<compile_context>
chip_gen: v5e
topology: v5e:2x2
jax: 0.10.0
libtpu: 0.0.40
codegen_flags: <defaults>
</compile_context>

<pallas_src>
import jax
import jax.numpy as jnp
from jax import lax
from jax.experimental import pallas as pl
from jax.experimental.pallas import tpu as pltpu

EMBEDDING_DIM = 100
LATENT_DIM = 100
N_CLASSES = 10
IMG_SHAPE = (1, 28, 28)
IMG_FLAT = 1 * 28 * 28            # 784
BN_EPS = 1e-5

PAD_IN = 128                      # 100 -> 128      lane-dense contraction
PAD_OUT = 896                     # 784 -> 7 * 128  lane-dense final store
PAD_CLASSES = 16                  # 10  -> 16       sublane-aligned embedding table
H1, H2, H3 = 256, 512, 1024

# Static lane offsets into the packed per-feature vector (all multiples of 128).
OFF_G1, OFF_BE1 = 0, H1                       # 0, 256
OFF_G2, OFF_BE2 = 2 * H1, 2 * H1 + H2         # 512, 1024
OFF_G3 = 2 * H1 + 2 * H2                      # 1536
OFF_BE3 = OFF_G3 + H3                         # 2560
OFF_B4 = OFF_BE3 + H3                         # 3584
PACK_LEN = OFF_B4 + PAD_OUT                   # 4480


def _generator_kernel(labels_ref, noise_ref, emb_ref,
                      w1_ref, w2_ref, w3_ref, w4_ref, pvec_ref,
                      out_ref, lemb_ref):
    B = noise_ref.shape[0]

    # ---- Embedding lookup: labels are scalars in SMEM; gather one row per sample
    # from the VMEM-resident (16, 128) table into a small scratch (dynamic row index).
    for i in range(B):
        idx = jnp.minimum(jnp.maximum(labels_ref[i], 0), N_CLASSES - 1)
        lemb_ref[pl.ds(i, 1), :] = emb_ref[pl.ds(idx, 1), :]
    x = noise_ref[...] * lemb_ref[...]                               # (B, 128) f32

    inv_b = jnp.float32(1.0 / B)

    def pvec(off, n):
        return pvec_ref[:, pl.ds(off, n)]                            # static (1, n)

    def linear_bn_lrelu(h_in, w_ref, g_off, be_off, n):
        # Linear (bias omitted: exactly cancelled by BN mean subtraction in training).
        h = jnp.dot(h_in.astype(jnp.bfloat16), w_ref[...],
                    preferred_element_type=jnp.float32)              # (B, n) f32
        # BatchNorm1d (training: biased batch stats), fused single pass, f32 math.
        s1 = jnp.sum(h, axis=0, keepdims=True)
        s2 = jnp.sum(h * h, axis=0, keepdims=True)
        mean = s1 * inv_b
        var = jnp.maximum(s2 * inv_b - mean * mean, 0.0)
        hn = (h - mean) * lax.rsqrt(var + BN_EPS)
        hn = hn * pvec(g_off, n) + pvec(be_off, n)
        # LeakyReLU(0.2)
        return jnp.maximum(hn, 0.2 * hn)

    x = linear_bn_lrelu(x, w1_ref, OFF_G1, OFF_BE1, H1)              # (B, 256)
    x = linear_bn_lrelu(x, w2_ref, OFF_G2, OFF_BE2, H2)              # (B, 512)
    x = linear_bn_lrelu(x, w3_ref, OFF_G3, OFF_BE3, H3)              # (B, 1024)

    # Final Linear + Tanh.  Padded output columns have zero weight/bias -> tanh(0)=0.
    y = jnp.dot(x.astype(jnp.bfloat16), w4_ref[...],
                preferred_element_type=jnp.float32) + pvec(OFF_B4, PAD_OUT)
    out_ref[...] = jnp.tanh(y)                                       # (B, 896) f32


def init_params(key):
    """Deterministic parameter init mirroring the PyTorch module's shapes (f32)."""
    ks = jax.random.split(key, 9)
    params = {}
    # nn.Embedding(10, 100): N(0, 1)
    params["emb"] = jax.random.normal(ks[0], (N_CLASSES, EMBEDDING_DIM), jnp.float32)

    def linear(kw, kb, fan_in, fan_out):
        bound = 1.0 / float(fan_in) ** 0.5
        w = jax.random.uniform(kw, (fan_in, fan_out), jnp.float32, -bound, bound)
        b = jax.random.uniform(kb, (1, fan_out), jnp.float32, -bound, bound)
        return w, b

    params["w1"], params["b1"] = linear(ks[1], ks[2], LATENT_DIM, H1)
    params["w2"], params["b2"] = linear(ks[3], ks[4], H1, H2)
    params["w3"], params["b3"] = linear(ks[5], ks[6], H2, H3)
    params["w4"], params["b4"] = linear(ks[7], ks[8], H3, IMG_FLAT)

    # BatchNorm1d affine params (PyTorch default init: gamma=1, beta=0).
    for name, dim in (("1", H1), ("2", H2), ("3", H3)):
        params["g" + name] = jnp.ones((1, dim), jnp.float32)
        params["be" + name] = jnp.zeros((1, dim), jnp.float32)
    return params


def prepare_params(params):
    """One-time prep: zero-pad to lane-aligned shapes, cast matmul weights to bf16,
    drop the BN-cancelled biases b1..b3, and pack all per-feature vectors into one
    lane-aligned f32 array."""
    p = {}
    emb = jnp.zeros((PAD_CLASSES, PAD_IN), jnp.float32)
    p["emb"] = emb.at[:N_CLASSES, :EMBEDDING_DIM].set(params["emb"])     # f32 (tiny)

    w1 = jnp.zeros((PAD_IN, H1), jnp.float32).at[:LATENT_DIM, :].set(params["w1"])
    p["w1"] = w1.astype(jnp.bfloat16)
    p["w2"] = params["w2"].astype(jnp.bfloat16)
    p["w3"] = params["w3"].astype(jnp.bfloat16)
    w4 = jnp.zeros((H3, PAD_OUT), jnp.float32).at[:, :IMG_FLAT].set(params["w4"])
    p["w4"] = w4.astype(jnp.bfloat16)

    b4 = jnp.zeros((1, PAD_OUT), jnp.float32).at[:, :IMG_FLAT].set(params["b4"])
    p["pvec"] = jnp.concatenate(
        [params["g1"], params["be1"], params["g2"], params["be2"],
         params["g3"], params["be3"], b4], axis=1)                       # (1, 4480)
    assert p["pvec"].shape == (1, PACK_LEN)
    return p


@jax.jit
def generator_forward(noise, labels, p):
    B = noise.shape[0]
    noise_pad = jnp.pad(noise.astype(jnp.float32),
                        ((0, 0), (0, PAD_IN - LATENT_DIM)))
    labels1d = labels.astype(jnp.int32).reshape(B)

    inputs = (labels1d, noise_pad, p["emb"],
              p["w1"], p["w2"], p["w3"], p["w4"], p["pvec"])

    flops = 2 * B * (PAD_IN * H1 + H1 * H2 + H2 * H3 + H3 * PAD_OUT)
    transcendentals = B * PAD_OUT + (H1 + H2 + H3)           # tanh + rsqrt
    bytes_accessed = (sum(int(x.size) * x.dtype.itemsize for x in inputs)
                      + B * PAD_OUT * 4)

    vmem_spec = pl.BlockSpec(memory_space=pltpu.MemorySpace.VMEM)
    smem_spec = pl.BlockSpec(memory_space=pltpu.MemorySpace.SMEM)

    img_flat = pl.pallas_call(
        _generator_kernel,
        out_shape=jax.ShapeDtypeStruct((B, PAD_OUT), jnp.float32),
        in_specs=[smem_spec] + [vmem_spec] * (len(inputs) - 1),
        out_specs=vmem_spec,
        scratch_shapes=[pltpu.VMEM((B, PAD_IN), jnp.float32)],
        compiler_params=pltpu.CompilerParams(vmem_limit_bytes=8 << 20),
        cost_estimate=pl.CostEstimate(flops=flops,
                                      transcendentals=transcendentals,
                                      bytes_accessed=bytes_accessed),
    )(*inputs)

    # Glue: drop lane padding and reshape to NCHW image layout (B, 1, 28, 28).
    return img_flat[:, :IMG_FLAT].reshape(B, *IMG_SHAPE)


def _reference_forward(noise, labels, raw):
    """Plain-JAX reference on the RAW (unpadded) parameters, including the b1..b3
    biases the kernel drops, using the same precision policy (bf16 MXU operands,
    f32 accumulation, f32 BN/elementwise)."""
    x = noise.astype(jnp.float32) * raw["emb"][labels]

    def block(h, w, b, g, be):
        h = jnp.dot(h.astype(jnp.bfloat16), w.astype(jnp.bfloat16),
                    preferred_element_type=jnp.float32) + b
        mean = jnp.mean(h, axis=0, keepdims=True)
        var = jnp.mean((h - mean) ** 2, axis=0, keepdims=True)
        h = (h - mean) / jnp.sqrt(var + BN_EPS) * g + be
        return jnp.where(h > 0, h, 0.2 * h)

    x = block(x, raw["w1"], raw["b1"], raw["g1"], raw["be1"])
    x = block(x, raw["w2"], raw["b2"], raw["g2"], raw["be2"])
    x = block(x, raw["w3"], raw["b3"], raw["g3"], raw["be3"])
    y = jnp.tanh(jnp.dot(x.astype(jnp.bfloat16), raw["w4"].astype(jnp.bfloat16),
                         preferred_element_type=jnp.float32) + raw["b4"])
    return y.reshape(noise.shape[0], *IMG_SHAPE)


if __name__ == "__main__":
    key = jax.random.PRNGKey(0)
    k_param, k_noise, k_label = jax.random.split(key, 3)

    B = 8
    raw_params = init_params(k_param)
    params = prepare_params(raw_params)
    noise = jax.random.normal(k_noise, (B, LATENT_DIM), jnp.float32)
    labels = jax.random.randint(k_label, (B,), 0, N_CLASSES, jnp.int32)

    img = jax.block_until_ready(generator_forward(noise, labels, params))
    assert img.shape == (B, *IMG_SHAPE), img.shape
    assert img.dtype == jnp.float32, img.dtype

    ref = jax.block_until_ready(_reference_forward(noise, labels, raw_params))
    max_err = float(jnp.max(jnp.abs(img - ref)))
    # bf16-weight mixed-precision tolerance (both paths use the same policy).
    assert jnp.allclose(img, ref, atol=5e-3, rtol=5e-3), f"mismatch, max_err={max_err}"

    print("KERNEL_OK")
</pallas_src>

<mosaic_0001>
module attributes {stable_mosaic.version = 11 : i64} {
  func.func @_generator_kernel(%arg0: memref<8xi32, #tpu.memory_space<smem>>, %arg1: memref<8x128xf32, #tpu.memory_space<vmem>>, %arg2: memref<16x128xf32, #tpu.memory_space<vmem>>, %arg3: memref<128x256xbf16, #tpu.memory_space<vmem>>, %arg4: memref<256x512xbf16, #tpu.memory_space<vmem>>, %arg5: memref<512x1024xbf16, #tpu.memory_space<vmem>>, %arg6: memref<1024x896xbf16, #tpu.memory_space<vmem>>, %arg7: memref<1x4480xf32, #tpu.memory_space<vmem>>, %arg8: memref<8x896xf32, #tpu.memory_space<vmem>>, %arg9: memref<8x128xf32, #tpu.memory_space<vmem>>) attributes {dimension_semantics = [], scalar_prefetch = 0 : i64, scratch_operands = 1 : i64, tpu.core_type = #tpu.core_type<tc>} {
    %c0 = arith.constant 0 : index
    %0 = memref.load %arg0[%c0] : memref<8xi32, #tpu.memory_space<smem>>
    %c0_i32 = arith.constant 0 : i32
    %1 = arith.maxsi %0, %c0_i32 : i32
    %c9_i32 = arith.constant 9 : i32
    %2 = arith.minsi %1, %c9_i32 : i32
    %3 = arith.index_cast %2 : i32 to index
    %c0_0 = arith.constant 0 : index
    %4 = vector.load %arg2[%3, %c0_0] : memref<16x128xf32, #tpu.memory_space<vmem>>, vector<1x128xf32>
    %c0_1 = arith.constant 0 : index
    %c0_2 = arith.constant 0 : index
    %5 = vector.load %arg9[%c0_1, %c0_2] : memref<8x128xf32, #tpu.memory_space<vmem>>, vector<1x128xf32>
    tpu.vector_store %arg9[%c0_1, %c0_2], %4 {strides = array<i32>} : memref<8x128xf32, #tpu.memory_space<vmem>>, vector<1x128xf32>,
    %c1 = arith.constant 1 : index
    %6 = memref.load %arg0[%c1] : memref<8xi32, #tpu.memory_space<smem>>
    %c0_i32_3 = arith.constant 0 : i32
    %7 = arith.maxsi %6, %c0_i32_3 : i32
    %c9_i32_4 = arith.constant 9 : i32
    %8 = arith.minsi %7, %c9_i32_4 : i32
    %9 = arith.index_cast %8 : i32 to index
    %c0_5 = arith.constant 0 : index
    %10 = vector.load %arg2[%9, %c0_5] : memref<16x128xf32, #tpu.memory_space<vmem>>, vector<1x128xf32>
    %c1_6 = arith.constant 1 : index
    %c0_7 = arith.constant 0 : index
    %11 = vector.load %arg9[%c1_6, %c0_7] : memref<8x128xf32, #tpu.memory_space<vmem>>, vector<1x128xf32>
    tpu.vector_store %arg9[%c1_6, %c0_7], %10 {strides = array<i32>} : memref<8x128xf32, #tpu.memory_space<vmem>>, vector<1x128xf32>,
    %c2 = arith.constant 2 : index
    %12 = memref.load %arg0[%c2] : memref<8xi32, #tpu.memory_space<smem>>
    %c0_i32_8 = arith.constant 0 : i32
    %13 = arith.maxsi %12, %c0_i32_8 : i32
    %c9_i32_9 = arith.constant 9 : i32
    %14 = arith.minsi %13, %c9_i32_9 : i32
    %15 = arith.index_cast %14 : i32 to index
    %c0_10 = arith.constant 0 : index
    %16 = vector.load %arg2[%15, %c0_10] : memref<16x128xf32, #tpu.memory_space<vmem>>, vector<1x128xf32>
    %c2_11 = arith.constant 2 : index
    %c0_12 = arith.constant 0 : index
    %17 = vector.load %arg9[%c2_11, %c0_12] : memref<8x128xf32, #tpu.memory_space<vmem>>, vector<1x128xf32>
    tpu.vector_store %arg9[%c2_11, %c0_12], %16 {strides = array<i32>} : memref<8x128xf32, #tpu.memory_space<vmem>>, vector<1x128xf32>,
    %c3 = arith.constant 3 : index
    %18 = memref.load %arg0[%c3] : memref<8xi32, #tpu.memory_space<smem>>
    %c0_i32_13 = arith.constant 0 : i32
    %19 = arith.maxsi %18, %c0_i32_13 : i32
    %c9_i32_14 = arith.constant 9 : i32
    %20 = arith.minsi %19, %c9_i32_14 : i32
    %21 = arith.index_cast %20 : i32 to index
    %c0_15 = arith.constant 0 : index
    %22 = vector.load %arg2[%21, %c0_15] : memref<16x128xf32, #tpu.memory_space<vmem>>, vector<1x128xf32>
    %c3_16 = arith.constant 3 : index
    %c0_17 = arith.constant 0 : index
    %23 = vector.load %arg9[%c3_16, %c0_17] : memref<8x128xf32, #tpu.memory_space<vmem>>, vector<1x128xf32>
    tpu.vector_store %arg9[%c3_16, %c0_17], %22 {strides = array<i32>} : memref<8x128xf32, #tpu.memory_space<vmem>>, vector<1x128xf32>,
    %c4 = arith.constant 4 : index
    %24 = memref.load %arg0[%c4] : memref<8xi32, #tpu.memory_space<smem>>
    %c0_i32_18 = arith.constant 0 : i32
    %25 = arith.maxsi %24, %c0_i32_18 : i32
    %c9_i32_19 = arith.constant 9 : i32
    %26 = arith.minsi %25, %c9_i32_19 : i32
    %27 = arith.index_cast %26 : i32 to index
    %c0_20 = arith.constant 0 : index
    %28 = vector.load %arg2[%27, %c0_20] : memref<16x128xf32, #tpu.memory_space<vmem>>, vector<1x128xf32>
    %c4_21 = arith.constant 4 : index
    %c0_22 = arith.constant 0 : index
    %29 = vector.load %arg9[%c4_21, %c0_22] : memref<8x128xf32, #tpu.memory_space<vmem>>, vector<1x128xf32>
    tpu.vector_store %arg9[%c4_21, %c0_22], %28 {strides = array<i32>} : memref<8x128xf32, #tpu.memory_space<vmem>>, vector<1x128xf32>,
    %c5 = arith.constant 5 : index
    %30 = memref.load %arg0[%c5] : memref<8xi32, #tpu.memory_space<smem>>
    %c0_i32_23 = arith.constant 0 : i32
    %31 = arith.maxsi %30, %c0_i32_23 : i32
    %c9_i32_24 = arith.constant 9 : i32
    %32 = arith.minsi %31, %c9_i32_24 : i32
    %33 = arith.index_cast %32 : i32 to index
    %c0_25 = arith.constant 0 : index
    %34 = vector.load %arg2[%33, %c0_25] : memref<16x128xf32, #tpu.memory_space<vmem>>, vector<1x128xf32>
    %c5_26 = arith.constant 5 : index
    %c0_27 = arith.constant 0 : index
    %35 = vector.load %arg9[%c5_26, %c0_27] : memref<8x128xf32, #tpu.memory_space<vmem>>, vector<1x128xf32>
    tpu.vector_store %arg9[%c5_26, %c0_27], %34 {strides = array<i32>} : memref<8x128xf32, #tpu.memory_space<vmem>>, vector<1x128xf32>,
    %c6 = arith.constant 6 : index
    %36 = memref.load %arg0[%c6] : memref<8xi32, #tpu.memory_space<smem>>
    %c0_i32_28 = arith.constant 0 : i32
    %37 = arith.maxsi %36, %c0_i32_28 : i32
    %c9_i32_29 = arith.constant 9 : i32
    %38 = arith.minsi %37, %c9_i32_29 : i32
    %39 = arith.index_cast %38 : i32 to index
    %c0_30 = arith.constant 0 : index
    %40 = vector.load %arg2[%39, %c0_30] : memref<16x128xf32, #tpu.memory_space<vmem>>, vector<1x128xf32>
    %c6_31 = arith.constant 6 : index
    %c0_32 = arith.constant 0 : index
    %41 = vector.load %arg9[%c6_31, %c0_32] : memref<8x128xf32, #tpu.memory_space<vmem>>, vector<1x128xf32>
    tpu.vector_store %arg9[%c6_31, %c0_32], %40 {strides = array<i32>} : memref<8x128xf32, #tpu.memory_space<vmem>>, vector<1x128xf32>,
    %c7 = arith.constant 7 : index
    %42 = memref.load %arg0[%c7] : memref<8xi32, #tpu.memory_space<smem>>
    %c0_i32_33 = arith.constant 0 : i32
    %43 = arith.maxsi %42, %c0_i32_33 : i32
    %c9_i32_34 = arith.constant 9 : i32
    %44 = arith.minsi %43, %c9_i32_34 : i32
    %45 = arith.index_cast %44 : i32 to index
    %c0_35 = arith.constant 0 : index
    %46 = vector.load %arg2[%45, %c0_35] : memref<16x128xf32, #tpu.memory_space<vmem>>, vector<1x128xf32>
    %c7_36 = arith.constant 7 : index
    %c0_37 = arith.constant 0 : index
    %47 = vector.load %arg9[%c7_36, %c0_37] : memref<8x128xf32, #tpu.memory_space<vmem>>, vector<1x128xf32>
    tpu.vector_store %arg9[%c7_36, %c0_37], %46 {strides = array<i32>} : memref<8x128xf32, #tpu.memory_space<vmem>>, vector<1x128xf32>,
    %c0_38 = arith.constant 0 : index
    %c0_39 = arith.constant 0 : index
    %48 = vector.load %arg1[%c0_38, %c0_39] : memref<8x128xf32, #tpu.memory_space<vmem>>, vector<8x128xf32>
    %c0_40 = arith.constant 0 : index
    %c0_41 = arith.constant 0 : index
    %49 = vector.load %arg9[%c0_40, %c0_41] : memref<8x128xf32, #tpu.memory_space<vmem>>, vector<8x128xf32>
    %50 = arith.mulf %48, %49 : vector<8x128xf32>
    %51 = arith.truncf %50 : vector<8x128xf32> to vector<8x128xbf16>
    %c0_42 = arith.constant 0 : index
    %c0_43 = arith.constant 0 : index
    %52 = vector.load %arg3[%c0_42, %c0_43] : memref<128x256xbf16, #tpu.memory_space<vmem>>, vector<128x256xbf16>
    %cst = arith.constant dense<0.000000e+00> : vector<8x256xf32>
    %53 = tpu.matmul %51, %52, %cst {dimension_numbers = #tpu.dot_dimension_numbers<[1], [0], [0], [1], [0, 0, 1, 1], [], []>} : vector<8x128xbf16>, vector<128x256xbf16>, vector<8x256xf32> -> vector<8x256xf32>
    %cst_44 = arith.constant dense<0.000000e+00> : vector<256xf32>
    %54 = vector.multi_reduction <add>, %53, %cst_44 [0] : vector<8x256xf32> to vector<256xf32>
    %55 = vector.shape_cast %54 : vector<256xf32> to vector<1x256xf32>
    %56 = arith.mulf %53, %53 : vector<8x256xf32>
    %cst_45 = arith.constant dense<0.000000e+00> : vector<256xf32>
    %57 = vector.multi_reduction <add>, %56, %cst_45 [0] : vector<8x256xf32> to vector<256xf32>
    %58 = vector.shape_cast %57 : vector<256xf32> to vector<1x256xf32>
    %cst_46 = arith.constant 1.250000e-01 : f32
    %59 = vector.broadcast %cst_46 : f32 to vector<1x256xf32>
    %60 = arith.mulf %55, %59 : vector<1x256xf32>
    %cst_47 = arith.constant 1.250000e-01 : f32
    %61 = vector.broadcast %cst_47 : f32 to vector<1x256xf32>
    %62 = arith.mulf %58, %61 : vector<1x256xf32>
    %63 = arith.mulf %60, %60 : vector<1x256xf32>
    %64 = arith.subf %62, %63 : vector<1x256xf32>
    %cst_48 = arith.constant 0.000000e+00 : f32
    %65 = vector.broadcast %cst_48 : f32 to vector<1x256xf32>
    %66 = arith.maximumf %64, %65 : vector<1x256xf32>
    %67 = vector.broadcast %60 : vector<1x256xf32> to vector<8x256xf32>
    %68 = arith.subf %53, %67 : vector<8x256xf32>
    %cst_49 = arith.constant 9.99999974E-6 : f32
    %69 = vector.broadcast %cst_49 : f32 to vector<1x256xf32>
    %70 = arith.addf %66, %69 : vector<1x256xf32>
    %71 = math.rsqrt %70 : vector<1x256xf32>
    %72 = vector.broadcast %71 : vector<1x256xf32> to vector<8x256xf32>
    %73 = arith.mulf %68, %72 : vector<8x256xf32>
    %c0_50 = arith.constant 0 : index
    %c0_51 = arith.constant 0 : index
    %74 = vector.load %arg7[%c0_50, %c0_51] : memref<1x4480xf32, #tpu.memory_space<vmem>>, vector<1x256xf32>
    %75 = vector.broadcast %74 : vector<1x256xf32> to vector<8x256xf32>
    %76 = arith.mulf %73, %75 : vector<8x256xf32>
    %c0_52 = arith.constant 0 : index
    %c256 = arith.constant 256 : index
    %77 = vector.load %arg7[%c0_52, %c256] : memref<1x4480xf32, #tpu.memory_space<vmem>>, vector<1x256xf32>
    %78 = vector.broadcast %77 : vector<1x256xf32> to vector<8x256xf32>
    %79 = arith.addf %76, %78 : vector<8x256xf32>
    %cst_53 = arith.constant 2.000000e-01 : f32
    %80 = vector.broadcast %cst_53 : f32 to vector<8x256xf32>
    %81 = arith.mulf %80, %79 : vector<8x256xf32>
    %82 = arith.maximumf %79, %81 : vector<8x256xf32>
    %83 = arith.truncf %82 : vector<8x256xf32> to vector<8x256xbf16>
    %c0_54 = arith.constant 0 : index
    %c0_55 = arith.constant 0 : index
    %84 = vector.load %arg4[%c0_54, %c0_55] : memref<256x512xbf16, #tpu.memory_space<vmem>>, vector<256x512xbf16>
    %cst_56 = arith.constant dense<0.000000e+00> : vector<8x512xf32>
    %85 = tpu.matmul %83, %84, %cst_56 {dimension_numbers = #tpu.dot_dimension_numbers<[1], [0], [0], [1], [0, 0, 1, 1], [], []>} : vector<8x256xbf16>, vector<256x512xbf16>, vector<8x512xf32> -> vector<8x512xf32>
    %cst_57 = arith.constant dense<0.000000e+00> : vector<512xf32>
    %86 = vector.multi_reduction <add>, %85, %cst_57 [0] : vector<8x512xf32> to vector<512xf32>
    %87 = vector.shape_cast %86 : vector<512xf32> to vector<1x512xf32>
    %88 = arith.mulf %85, %85 : vector<8x512xf32>
    %cst_58 = arith.constant dense<0.000000e+00> : vector<512xf32>
    %89 = vector.multi_reduction <add>, %88, %cst_58 [0] : vector<8x512xf32> to vector<512xf32>
    %90 = vector.shape_cast %89 : vector<512xf32> to vector<1x512xf32>
    %cst_59 = arith.constant 1.250000e-01 : f32
    %91 = vector.broadcast %cst_59 : f32 to vector<1x512xf32>
    %92 = arith.mulf %87, %91 : vector<1x512xf32>
    %cst_60 = arith.constant 1.250000e-01 : f32
    %93 = vector.broadcast %cst_60 : f32 to vector<1x512xf32>
    %94 = arith.mulf %90, %93 : vector<1x512xf32>
    %95 = arith.mulf %92, %92 : vector<1x512xf32>
    %96 = arith.subf %94, %95 : vector<1x512xf32>
    %cst_61 = arith.constant 0.000000e+00 : f32
    %97 = vector.broadcast %cst_61 : f32 to vector<1x512xf32>
    %98 = arith.maximumf %96, %97 : vector<1x512xf32>
    %99 = vector.broadcast %92 : vector<1x512xf32> to vector<8x512xf32>
    %100 = arith.subf %85, %99 : vector<8x512xf32>
    %cst_62 = arith.constant 9.99999974E-6 : f32
    %101 = vector.broadcast %cst_62 : f32 to vector<1x512xf32>
    %102 = arith.addf %98, %101 : vector<1x512xf32>
    %103 = math.rsqrt %102 : vector<1x512xf32>
    %104 = vector.broadcast %103 : vector<1x512xf32> to vector<8x512xf32>
    %105 = arith.mulf %100, %104 : vector<8x512xf32>
    %c0_63 = arith.constant 0 : index
    %c512 = arith.constant 512 : index
    %106 = vector.load %arg7[%c0_63, %c512] : memref<1x4480xf32, #tpu.memory_space<vmem>>, vector<1x512xf32>
    %107 = vector.broadcast %106 : vector<1x512xf32> to vector<8x512xf32>
    %108 = arith.mulf %105, %107 : vector<8x512xf32>
    %c0_64 = arith.constant 0 : index
    %c1024 = arith.constant 1024 : index
    %109 = vector.load %arg7[%c0_64, %c1024] : memref<1x4480xf32, #tpu.memory_space<vmem>>, vector<1x512xf32>
    %110 = vector.broadcast %109 : vector<1x512xf32> to vector<8x512xf32>
    %111 = arith.addf %108, %110 : vector<8x512xf32>
    %cst_65 = arith.constant 2.000000e-01 : f32
    %112 = vector.broadcast %cst_65 : f32 to vector<8x512xf32>
    %113 = arith.mulf %112, %111 : vector<8x512xf32>
    %114 = arith.maximumf %111, %113 : vector<8x512xf32>
    %115 = arith.truncf %114 : vector<8x512xf32> to vector<8x512xbf16>
    %c0_66 = arith.constant 0 : index
    %c0_67 = arith.constant 0 : index
    %116 = vector.load %arg5[%c0_66, %c0_67] : memref<512x1024xbf16, #tpu.memory_space<vmem>>, vector<512x1024xbf16>
    %cst_68 = arith.constant dense<0.000000e+00> : vector<8x1024xf32>
    %117 = tpu.matmul %115, %116, %cst_68 {dimension_numbers = #tpu.dot_dimension_numbers<[1], [0], [0], [1], [0, 0, 1, 1], [], []>} : vector<8x512xbf16>, vector<512x1024xbf16>, vector<8x1024xf32> -> vector<8x1024xf32>
    %cst_69 = arith.constant dense<0.000000e+00> : vector<1024xf32>
    %118 = vector.multi_reduction <add>, %117, %cst_69 [0] : vector<8x1024xf32> to vector<1024xf32>
    %119 = vector.shape_cast %118 : vector<1024xf32> to vector<1x1024xf32>
    %120 = arith.mulf %117, %117 : vector<8x1024xf32>
    %cst_70 = arith.constant dense<0.000000e+00> : vector<1024xf32>
    %121 = vector.multi_reduction <add>, %120, %cst_70 [0] : vector<8x1024xf32> to vector<1024xf32>
    %122 = vector.shape_cast %121 : vector<1024xf32> to vector<1x1024xf32>
    %cst_71 = arith.constant 1.250000e-01 : f32
    %123 = vector.broadcast %cst_71 : f32 to vector<1x1024xf32>
    %124 = arith.mulf %119, %123 : vector<1x1024xf32>
    %cst_72 = arith.constant 1.250000e-01 : f32
    %125 = vector.broadcast %cst_72 : f32 to vector<1x1024xf32>
    %126 = arith.mulf %122, %125 : vector<1x1024xf32>
    %127 = arith.mulf %124, %124 : vector<1x1024xf32>
    %128 = arith.subf %126, %127 : vector<1x1024xf32>
    %cst_73 = arith.constant 0.000000e+00 : f32
    %129 = vector.broadcast %cst_73 : f32 to vector<1x1024xf32>
    %130 = arith.maximumf %128, %129 : vector<1x1024xf32>
    %131 = vector.broadcast %124 : vector<1x1024xf32> to vector<8x1024xf32>
    %132 = arith.subf %117, %131 : vector<8x1024xf32>
    %cst_74 = arith.constant 9.99999974E-6 : f32
    %133 = vector.broadcast %cst_74 : f32 to vector<1x1024xf32>
    %134 = arith.addf %130, %133 : vector<1x1024xf32>
    %135 = math.rsqrt %134 : vector<1x1024xf32>
    %136 = vector.broadcast %135 : vector<1x1024xf32> to vector<8x1024xf32>
    %137 = arith.mulf %132, %136 : vector<8x1024xf32>
    %c0_75 = arith.constant 0 : index
    %c1536 = arith.constant 1536 : index
    %138 = vector.load %arg7[%c0_75, %c1536] : memref<1x4480xf32, #tpu.memory_space<vmem>>, vector<1x1024xf32>
    %139 = vector.broadcast %138 : vector<1x1024xf32> to vector<8x1024xf32>
    %140 = arith.mulf %137, %139 : vector<8x1024xf32>
    %c0_76 = arith.constant 0 : index
    %c2560 = arith.constant 2560 : index
    %141 = vector.load %arg7[%c0_76, %c2560] : memref<1x4480xf32, #tpu.memory_space<vmem>>, vector<1x1024xf32>
    %142 = vector.broadcast %141 : vector<1x1024xf32> to vector<8x1024xf32>
    %143 = arith.addf %140, %142 : vector<8x1024xf32>
    %cst_77 = arith.constant 2.000000e-01 : f32
    %144 = vector.broadcast %cst_77 : f32 to vector<8x1024xf32>
    %145 = arith.mulf %144, %143 : vector<8x1024xf32>
    %146 = arith.maximumf %143, %145 : vector<8x1024xf32>
    %147 = arith.truncf %146 : vector<8x1024xf32> to vector<8x1024xbf16>
    %c0_78 = arith.constant 0 : index
    %c0_79 = arith.constant 0 : index
    %148 = vector.load %arg6[%c0_78, %c0_79] : memref<1024x896xbf16, #tpu.memory_space<vmem>>, vector<1024x896xbf16>
    %cst_80 = arith.constant dense<0.000000e+00> : vector<8x896xf32>
    %149 = tpu.matmul %147, %148, %cst_80 {dimension_numbers = #tpu.dot_dimension_numbers<[1], [0], [0], [1], [0, 0, 1, 1], [], []>} : vector<8x1024xbf16>, vector<1024x896xbf16>, vector<8x896xf32> -> vector<8x896xf32>
    %c0_81 = arith.constant 0 : index
    %c3584 = arith.constant 3584 : index
    %150 = vector.load %arg7[%c0_81, %c3584] : memref<1x4480xf32, #tpu.memory_space<vmem>>, vector<1x896xf32>
    %151 = vector.broadcast %150 : vector<1x896xf32> to vector<8x896xf32>
    %152 = arith.addf %149, %151 : vector<8x896xf32>
    %153 = math.tanh %152 : vector<8x896xf32>
    %c0_82 = arith.constant 0 : index
    %c0_83 = arith.constant 0 : index
    %154 = vector.load %arg8[%c0_82, %c0_83] : memref<8x896xf32, #tpu.memory_space<vmem>>, vector<8x896xf32>
    tpu.vector_store %arg8[%c0_82, %c0_83], %153 {strides = array<i32>} : memref<8x896xf32, #tpu.memory_space<vmem>>, vector<8x896xf32>,
    return
  }
}

</mosaic_0001>

<bundles_post_ra>
// kernel: generator_forward.1
= control target key start
LH: loop header
LB: loop body
LE: loop exit
PB: predicated region body
PF: predicated region fallthrough
CT: control target
= control target key end

     0   :  { %13 = vsyncpa [#allocation5], 0  ;;  %s11837_s0 = inlined_call_operand.hbm [shape: s32[8], index: 0, kind: input, shape index: {}]   ;;  %s11838_s1 = inlined_call_operand.vmem [shape: f32[8,128], index: 1, kind: input, shape index: {}]   ;;  %s11839_s2 = inlined_call_operand.hbm [shape: f32[16,128], index: 2, kind: input, shape index: {}]   ;;  %s11840_s3 = inlined_call_operand.hbm [shape: bf16[128,256], index: 3, kind: input, shape index: {}]   ;;  %s11841_s4 = inlined_call_operand.hbm [shape: bf16[256,512], index: 4, kind: input, shape index: {}]   ;;  %s11842_s5 = inlined_call_operand.hbm [shape: bf16[512,1024], index: 5, kind: input, shape index: {}]   ;;  %s11843_s6 = inlined_call_operand.hbm [shape: bf16[1024,896], index: 6, kind: input, shape index: {}]   ;;  %s11844_s7 = inlined_call_operand.hbm [shape: f32[1,4480], index: 7, kind: input, shape index: {}]   ;;  %s11845_s8 = inlined_call_operand.vmem [shape: f32[8,896], index: 8, kind: output, shape index: {}]  }
   0x1   :  { %14 = vsyncpa [#allocation4], 0 }
   0x2   :  { %15 = vsyncpa [#allocation8], 0 }
   0x3   :  { %16 = vsyncpa [#allocation11], 0 }
   0x4   :  { %17 = vsyncpa [#allocation14], 0  ;;  %s46_s29 = sshll.u32 %s11840_s3, 4  ;;  %s11137_s30 = smov [#allocation7]   ;;  %s47_s29 = int_to_ptr.hbm [resolvable:$true] %s46_s29 }
   0x5   :  { %s48_s9 = sshll.u32 %s11137_s30, 4  ;;  %s72_s12 = sshll.u32 %s11842_s5, 4  ;;  %s49_s9 = int_to_ptr.vmem [resolvable:$true] %s48_s9  ;;  %s73_s12 = int_to_ptr.hbm [resolvable:$true] %s72_s12 }
   0x6   :  { %s11138_s13 = smov 128   ;;  %s11139_s14 = smov 8  }
   0x7   :  { %54 = dma.hbm_to_vmem [thread:$0]  %s47_s29, 2048, %s49_s9, [#allocation8], %s11138_s13, %s11138_s13, %s11139_s14  }
   0x8   :  { %s11140_s15 = smov [#allocation10]   ;;  %s11141_s17 = smov 512  }
   0x9   :  { %s74_s16 = sshll.u32 %s11140_s15, 4  ;;  %s11142_s18 = smov 32   ;;  %s75_s16 = int_to_ptr.vmem [resolvable:$true] %s74_s16 }
   0xa   :  { %80 = dma.hbm_to_vmem [thread:$0]  %s73_s12, 32768, %s75_s16, [#allocation11], %s11141_s17, %s11141_s17, %s11142_s18  }
   0xb   :  { %s23_s20 = sshll.u32 %s11837_s0, 4  ;;  %s33_s23 = sshll.u32 %s11839_s2, 4  ;;  %s24_s20 = int_to_ptr.hbm [resolvable:$true] %s23_s20  ;;  %s34_s23 = int_to_ptr.hbm [resolvable:$true] %s33_s23 }
   0xc   :  { %s11143_s5 = smov [#allocation3]   ;;  %s11144_s24 = smov [#allocation6]  }
   0xd   :  { %26 = dma.hbm_to_smem %s24_s20, 16, %s11143_s5, [#allocation5]  }
   0xe   :  { %s35_s25 = sshll.u32 %s11144_s24, 4  ;;  %s59_s28 = sshll.u32 %s11841_s4, 4  ;;  %s36_s25 = int_to_ptr.vmem [resolvable:$true] %s35_s25  ;;  %s60_s28 = int_to_ptr.hbm [resolvable:$true] %s59_s28 }
   0xf   :  { %41 = dma.hbm_to_vmem [thread:$0]  %s34_s23, 256, %s36_s25, [#allocation4], %s11138_s13, %s11138_s13, %s11139_s14  }
  0x10   :  { %s11145_s29 = smov [#allocation9]   ;;  %s85_s10 = sshll.u32 %s11843_s6, 4  ;;  %s86_s10 = int_to_ptr.hbm [resolvable:$true] %s85_s10 }
  0x11   :  { %s61_s30 = sshll.u32 %s11145_s29, 4  ;;  %s11146_s2 = smov 256   ;;  %s62_s30 = int_to_ptr.vmem [resolvable:$true] %s61_s30 }
  0x12   :  { %s11147_s11 = smov 16   ;;  %s11148_s12 = smov [#allocation12]  }
  0x13   :  { %67 = dma.hbm_to_vmem [thread:$0]  %s60_s28, 8192, %s62_s30, [#allocation8], %s11146_s2, %s11146_s2, %s11147_s11  }
  0x14   :  { %s87_s15 = sshll.u32 %s11148_s12, 4  ;;  %s11149_s16 = smov 448   ;;  %s88_s15 = int_to_ptr.vmem [resolvable:$true] %s87_s15 }
  0x15   :  { %s11150_s17 = smov 28   ;;  %s99_s13 = sshll.u32 %s11844_s7, 4  ;;  %s100_s13 = int_to_ptr.hbm [resolvable:$true] %s99_s13 }
  0x16   :  { %93 = dma.hbm_to_vmem [thread:$0]  %s86_s10, 57344, %s88_s15, [#allocation11], %s11149_s16, %s11149_s16, %s11150_s17  }
  0x17   :  { %s11151_s14 = smov [#allocation13]  }
  0x18   :  { %s101_s19 = sshll.u32 %s11151_s14, 4  ;;  %s102_s19 = int_to_ptr.vmem [resolvable:$true] %s101_s19 }
  0x19   :  { %104 = dma.hbm_to_vmem [thread:$0]  %s100_s13, 560, %s102_s19, [#allocation14]  }
  0x1a   :  { %11127 = dma.done.wait [#allocation5], 16  }
  0x1b   :  { %11128 = vsyncadd [#allocation5], 4294967280 }
  0x1c   :  { %11129 = dma.done.wait [#allocation4], 256  }
  0x1d   :  { %11130 = vsyncadd [#allocation4], 4294967040 }
  0x1e   :  { %11131 = dma.done.wait [#allocation8], 10240  }
  0x1f   :  { %11132 = vsyncadd [#allocation8], 4294957056 }
  0x20   :  { %11133 = dma.done.wait [#allocation11], 90112  }
  0x21   :  { %11134 = vsyncadd [#allocation11], 4294877184 }
  0x22   :  { %11135 = dma.done.wait [#allocation14], 560  }
  0x23   :  { %11136 = vsyncadd [#allocation14], 4294966736 }
  0x24   :  { %133 = sfence }
  0x25   :  { %v7032_v0 = vld [vmem:[#allocation7 + $0x70] sm:$0xf]  ;;  %v10141_v1 = vld [vmem:[#allocation7 + $0x74] sm:$0xf0]  ;;  %v10140_v2 = vld [vmem:[#allocation7 + $0x74] sm:$0xf] }
  0x26   :  { %v7033_v3 = vor.u32 %v10141_v1, %v7032_v0  ;;  %v7034_v4 = vld [vmem:[#allocation7 + $0x78] sm:$0xf0]  ;;  %v7024_v5 = vld [vmem:[#allocation7 + $0x60] sm:$0xf]  ;;  %v10139_v6 = vld [vmem:[#allocation7 + $0x64] sm:$0xf0] }
  0x27   :  { %v7037_v7 = vor.u32 %v10140_v2, %v7034_v4  ;;  %v10138_v8 = vld [vmem:[#allocation7 + $0x64] sm:$0xf]  ;;  %v7026_v9 = vld [vmem:[#allocation7 + $0x68] sm:$0xf0]  ;;  %v7025_v10 = vor.u32 %v10139_v6, %v7024_v5  ;;  %v7016_v12 = vld [vmem:[#allocation7 + $0x50] sm:$0xf] }
  0x28   :  { %298 = vmatpush.bf16.msra.mxu0 %v7033_v3  ;;  %v7029_v11 = vor.u32 %v10138_v8, %v7026_v9  ;;  %v10137_v13 = vld [vmem:[#allocation7 + $0x54] sm:$0xf0]  ;;  %v10136_v14 = vld [vmem:[#allocation7 + $0x54] sm:$0xf]  ;;  %v7018_v15 = vld [vmem:[#allocation7 + $0x58] sm:$0xf0] }
  0x29   :  { %311 = vmatpush.bf16.msra.mxu1 %v7037_v7  ;;  %v7017_v16 = vor.u32 %v10137_v13, %v7016_v12  ;;  %v7021_v17 = vor.u32 %v10136_v14, %v7018_v15  ;;  %v7008_v18 = vld [vmem:[#allocation7 + $0x40] sm:$0xf]  ;;  %v10135_v19 = vld [vmem:[#allocation7 + $0x44] sm:$0xf0]  ;;  %v10134_v20 = vld [vmem:[#allocation7 + $0x44] sm:$0xf] }
  0x2a   :  { %v7010_v21 = vld [vmem:[#allocation7 + $0x48] sm:$0xf0]  ;;  %s11218_s6 = sld [smem:[#allocation3]]  ;;  %v7009_v22 = vor.u32 %v10135_v19, %v7008_v18  ;;  %v7000_v24 = vld [vmem:[#allocation7 + $0x30] sm:$0xf] }
  0x2b   :  { %s11220_s7 = sld [smem:[#allocation3 + $0x1]]  ;;  %v7013_v23 = vor.u32 %v10134_v20, %v7010_v21  ;;  %v10133_v25 = vld [vmem:[#allocation7 + $0x34] sm:$0xf0]  ;;  %v10132_v26 = vld [vmem:[#allocation7 + $0x34] sm:$0xf]  ;;  %v198_v56 = vld [vmem:[%s11838_s1] sm:$0xff] }
  0x2c   :  { %299 = vmatpush.bf16.msra.mxu0 %v7025_v10  ;;  %s11222_s3 = sld [smem:[#allocation3 + $0x2]]  ;;  %v7002_v27 = vld [vmem:[#allocation7 + $0x38] sm:$0xf0]  ;;  %v7001_v28 = vor.u32 %v10133_v25, %v7000_v24  ;;  %v6992_v30 = vld [vmem:[#allocation7 + $0x20] sm:$0xf] }
  0x2d   :  { %312 = vmatpush.bf16.msra.mxu1 %v7029_v11  ;;  %s11224_s20 = sld [smem:[#allocation3 + $0x3]]  ;;  %v7005_v29 = vor.u32 %v10132_v26, %v7002_v27  ;;  %v10131_v31 = vld [vmem:[#allocation7 + $0x24] sm:$0xf0]  ;;  %v10130_v32 = vld [vmem:[#allocation7 + $0x24] sm:$0xf] }
  0x2e   :  { %s11226_s21 = sld [smem:[#allocation3 + $0x4]]  ;;  %v6994_v33 = vld [vmem:[#allocation7 + $0x28] sm:$0xf0]  ;;  %v6993_v34 = vor.u32 %v10131_v31, %v6992_v30  ;;  %v6984_v36 = vld [vmem:[#allocation7 + $0x10] sm:$0xf] }
  0x2f   :  { %s11228_s22 = sld [smem:[#allocation3 + $0x5]]  ;;  %v6997_v35 = vor.u32 %v10130_v32, %v6994_v33  ;;  %v10129_v37 = vld [vmem:[#allocation7 + $0x14] sm:$0xf0]  ;;  %v10128_v38 = vld [vmem:[#allocation7 + $0x14] sm:$0xf] }
  0x30   :  { %300 = vmatpush.bf16.msra.mxu0 %v7017_v16  ;;  %p135_p0 = scmp.gt.s32.totalorder %s11218_s6, 0  ;;  %p6927_p1 = scmp.lt.s32.totalorder %s11218_s6, 9  ;;  %v6986_v39 = vld [vmem:[#allocation7 + $0x18] sm:$0xf0]  ;;  %v6976_v40 = vld [vmem:[#allocation7] sm:$0xf]  ;;  %v6985_v42 = vor.u32 %v10129_v37, %v6984_v36 }
  0x31   :  { %313 = vmatpush.bf16.msra.mxu1 %v7021_v17  ;;  %p143_p2 = scmp.gt.s32.totalorder %s11220_s7, 0  ;;  %p6933_p3 = scmp.lt.s32.totalorder %s11220_s7, 9  ;;  %v10127_v41 = vld [vmem:[#allocation7 + $0x4] sm:$0xf0]  ;;  %v10126_v43 = vld [vmem:[#allocation7 + $0x4] sm:$0xf]  ;;  %v6989_v45 = vor.u32 %v10128_v38, %v6986_v39 }
  0x32   :  { %s11849_s6 = smov (!%p135_p0, %s11218_s6), 0  ;;  %p151_p4 = scmp.gt.s32.totalorder %s11222_s3, 0  ;;  %v6978_v47 = vld [vmem:[#allocation7 + $0x8] sm:$0xf0]  ;;  %v6977_v48 = vor.u32 %v10127_v41, %v6976_v40  ;;  %v7152_v60 = vld [vmem:[#allocation9 + $0xe0] sm:$0xf] }
  0x33   :  { %s11851_s7 = smov (!%p143_p2, %s11220_s7), 0  ;;  %s11853_s6 = smov (!%p6927_p1, %s11849_s6), 9  ;;  %v6981_v49 = vor.u32 %v10126_v43, %v6978_v47  ;;  %v10172_v61 = vld [vmem:[#allocation9 + $0xec] sm:$0xf0]  ;;  %v7280_v62 = vld [vmem:[#allocation9 + $0x1e0] sm:$0xf] }
  0x34   :  { %301 = vmatpush.bf16.msra.mxu0 %v7009_v22  ;;  %s11855_s7 = smov (!%p6933_p3, %s11851_s7), 9  ;;  %s139_s23 = scalar_lea.vmem [#allocation6], %s11853_s6  ;;  %v7153_v63 = vor.u32 %v10172_v61, %v7152_v60  ;;  %v10204_v0 = vld [vmem:[#allocation9 + $0x1ec] sm:$0xf0]  ;;  %v10170_v1 = vld [vmem:[#allocation9 + $0xe4] sm:$0xf] }
  0x35   :  { %314 = vmatpush.bf16.msra.mxu1 %v7013_v23  ;;  %v140_v44 = vld [vmem:[%s139_s23] sm:$0x1]  ;;  %p6939_p5 = scmp.lt.s32.totalorder %s11222_s3, 9  ;;  %s147_s5 = scalar_lea.vmem [#allocation6], %s11855_s7  ;;  %v7154_v2 = vld [vmem:[#allocation9 + $0xf0] sm:$0xf0]  ;;  %v7281_v3 = vor.u32 %v10204_v0, %v7280_v62 }
  0x36   :  { %141 = vst [vmem:[#allocation2] sm:$0x1] %v140_v44  ;;  %v148_v46 = vld [vmem:[%s147_s5] sm:$0x1]  ;;  %s11857_s3 = smov (!%p151_p4, %s11222_s3), 0  ;;  %p159_p6 = scmp.gt.s32.totalorder %s11224_s20, 0  ;;  %v7157_v4 = vor.u32 %v10170_v1, %v7154_v2  ;;  %792 = vmatpush.bf16.msra.mxu2 %v7153_v63 }
  0x37   :  { %149 = vst [vmem:[#allocation2 + $0x1] sm:$0x1] %v148_v46  ;;  %p6945_p7 = scmp.lt.s32.totalorder %s11224_s20, 9  ;;  %s11859_s3 = smov (!%p6939_p5, %s11857_s3), 9  ;;  %v10202_v5 = vld [vmem:[#allocation9 + $0x1e4] sm:$0xf]  ;;  %805 = vmatpush.bf16.msra.mxu3 %v7281_v3 }
  0x38   :  { %302 = vmatpush.bf16.msra.mxu0 %v7001_v28  ;;  %s11861_s20 = smov (!%p159_p6, %s11224_s20), 0  ;;  %p167_p8 = scmp.gt.s32.totalorder %s11226_s21, 0  ;;  %v7282_v6 = vld [vmem:[#allocation9 + $0x1f0] sm:$0xf0]  ;;  %v7136_v8 = vld [vmem:[#allocation9 + $0xc0] sm:$0xf] }
  0x39   :  { %315 = vmatpush.bf16.msra.mxu1 %v7005_v29  ;;  %s155_s24 = scalar_lea.vmem [#allocation6], %s11859_s3  ;;  %s11863_s20 = smov (!%p6945_p7, %s11861_s20), 9  ;;  %v7285_v7 = vor.u32 %v10202_v5, %v7282_v6  ;;  %v10168_v9 = vld [vmem:[#allocation9 + $0xcc] sm:$0xf0]  ;;  %v7264_v10 = vld [vmem:[#allocation9 + $0x1c0] sm:$0xf] }
  0x3a   :  { %v156_v50 = vld [vmem:[%s155_s24] sm:$0x1]  ;;  %s168_s25 = scalar_select %p167_p8, %s11226_s21, 0  ;;  %v7137_v11 = vor.u32 %v10168_v9, %v7136_v8  ;;  %v10200_v12 = vld [vmem:[#allocation9 + $0x1cc] sm:$0xf0] }
  0x3b   :  { %157 = vst [vmem:[#allocation2 + $0x2] sm:$0x1] %v156_v50  ;;  %p6951_p9 = scmp.lt.s32.totalorder %s11226_s21, 9  ;;  %s163_s26 = scalar_lea.vmem [#allocation6], %s11863_s20  ;;  %v10166_v13 = vld [vmem:[#allocation9 + $0xc4] sm:$0xf]  ;;  %v7265_v15 = vor.u32 %v10200_v12, %v7264_v10 }
  0x3c   :  { %303 = vmatpush.bf16.msra.mxu0 %v6993_v34  ;;  %v164_v51 = vld [vmem:[%s163_s26] sm:$0x1]  ;;  %p175_p10 = scmp.gt.s32.totalorder %s11228_s22, 0  ;;  %p6957_p11 = scmp.lt.s32.totalorder %s11228_s22, 9  ;;  %v7138_v14 = vld [vmem:[#allocation9 + $0xd0] sm:$0xf0]  ;;  %793 = vmatpush.bf16.msra.mxu2 %v7137_v11 }
  0x3d   :  { %316 = vmatpush.bf16.msra.mxu1 %v6997_v35  ;;  %165 = vst [vmem:[#allocation2 + $0x3] sm:$0x1] %v164_v51  ;;  %s11865_s25 = smov (!%p6951_p9, %s168_s25), 9  ;;  %s6962_s27 = sld [smem:[#allocation3 + $0x6]]  ;;  %v7141_v16 = vor.u32 %v10166_v13, %v7138_v14  ;;  %v10198_v17 = vld [vmem:[#allocation9 + $0x1c4] sm:$0xf]  ;;  %806 = vmatpush.bf16.msra.mxu3 %v7265_v15 }
  0x3e   :  { %s11867_s22 = smov (!%p175_p10, %s11228_s22), 0  ;;  %s171_s28 = scalar_lea.vmem [#allocation6], %s11865_s25  ;;  %v7266_v18 = vld [vmem:[#allocation9 + $0x1d0] sm:$0xf0]  ;;  %v7120_v20 = vld [vmem:[#allocation9 + $0xa0] sm:$0xf] }
  0x3f   :  { %v172_v52 = vld [vmem:[%s171_s28] sm:$0x1]  ;;  %s11869_s22 = smov (!%p6957_p11, %s11867_s22), 9  ;;  %s6968_s29 = sld [smem:[#allocation3 + $0x7]]  ;;  %v7269_v19 = vor.u32 %v10198_v17, %v7266_v18  ;;  %v10164_v21 = vld [vmem:[#allocation9 + $0xac] sm:$0xf0] }
  0x40   :  { %304 = vmatpush.bf16.msra.mxu0 %v6985_v42  ;;  %173 = vst [vmem:[#allocation2 + $0x4] sm:$0x1] %v172_v52  ;;  %s179_s30 = scalar_lea.vmem [#allocation6], %s11869_s22  ;;  %v7248_v22 = vld [vmem:[#allocation9 + $0x1a0] sm:$0xf]  ;;  %v7121_v23 = vor.u32 %v10164_v21, %v7120_v20 }
  0x41   :  { %317 = vmatpush.bf16.msra.mxu1 %v6989_v45  ;;  %v180_v53 = vld [vmem:[%s179_s30] sm:$0x1]  ;;  %v10196_v24 = vld [vmem:[#allocation9 + $0x1ac] sm:$0xf0]  ;;  %v10162_v25 = vld [vmem:[#allocation9 + $0xa4] sm:$0xf] }
  0x42   :  { %181 = vst [vmem:[#allocation2 + $0x5] sm:$0x1] %v180_v53  ;;  %v7122_v26 = vld [vmem:[#allocation9 + $0xb0] sm:$0xf0]  ;;  %v7249_v27 = vor.u32 %v10196_v24, %v7248_v22  ;;  %v10194_v29 = vld [vmem:[#allocation9 + $0x1a4] sm:$0xf]  ;;  %794 = vmatpush.bf16.msra.mxu2 %v7121_v23 }
  0x43   :  { %p183_p12 = scmp.gt.s32.totalorder %s6962_s27, 0  ;;  %p6963_p13 = scmp.lt.s32.totalorder %s6962_s27, 9  ;;  %v7125_v28 = vor.u32 %v10162_v25, %v7122_v26  ;;  %v7250_v30 = vld [vmem:[#allocation9 + $0x1b0] sm:$0xf0]  ;;  %v7104_v32 = vld [vmem:[#allocation9 + $0x80] sm:$0xf] }
  0x44   :  { %305 = vmatpush.bf16.msra.mxu0 %v6977_v48  ;;  %v7253_v31 = vor.u32 %v10194_v29, %v7250_v30  ;;  %807 = vmatpush.bf16.msra.mxu3 %v7249_v27  ;;  %v10160_v33 = vld [vmem:[#allocation9 + $0x8c] sm:$0xf0]  ;;  %v7232_v34 = vld [vmem:[#allocation9 + $0x180] sm:$0xf]  ;;  %v10158_v37 = vld [vmem:[#allocation9 + $0x84] sm:$0xf] }
  0x45   :  { %318 = vmatpush.bf16.msra.mxu1 %v6981_v49  ;;  %s11871_s27 = smov (!%p183_p12, %s6962_s27), 0  ;;  %p191_p0 = scmp.gt.s32.totalorder %s6968_s29, 0  ;;  %v7105_v35 = vor.u32 %v10160_v33, %v7104_v32  ;;  %v10192_v36 = vld [vmem:[#allocation9 + $0x18c] sm:$0xf0]  ;;  %v7106_v38 = vld [vmem:[#allocation9 + $0x90] sm:$0xf0] }
  0x46   :  { %p6969_p1 = scmp.lt.s32.totalorder %s6968_s29, 9  ;;  %s11873_s27 = smov (!%p6963_p13, %s11871_s27), 9  ;;  %v7233_v39 = vor.u32 %v10192_v36, %v7232_v34  ;;  %v7109_v40 = vor.u32 %v10158_v37, %v7106_v38  ;;  %v10190_v41 = vld [vmem:[#allocation9 + $0x184] sm:$0xf]  ;;  %v7234_v42 = vld [vmem:[#allocation9 + $0x190] sm:$0xf0] }
  0x47   :  { %s11875_s29 = smov (!%p191_p0, %s6968_s29), 0  ;;  %s187_s0 = scalar_lea.vmem [#allocation6], %s11873_s27  ;;  %795 = vmatpush.bf16.msra.mxu2 %v7105_v35  ;;  %v7237_v43 = vor.u32 %v10190_v41, %v7234_v42  ;;  %v7088_v44 = vld [vmem:[#allocation9 + $0x60] sm:$0xf]  ;;  %v10156_v45 = vld [vmem:[#allocation9 + $0x6c] sm:$0xf0] }
  0x48   :  { %v188_v54 = vld [vmem:[%s187_s0] sm:$0x1]  ;;  %s11877_s29 = smov (!%p6969_p1, %s11875_s29), 9  ;;  %818 = vmatpush.bf16.msrb.mxu0 %v7157_v4  ;;  %808 = vmatpush.bf16.msra.mxu3 %v7233_v39  ;;  %v7216_v46 = vld [vmem:[#allocation9 + $0x160] sm:$0xf]  ;;  %v7089_v47 = vor.u32 %v10156_v45, %v7088_v44 }
  0x49   :  { %189 = vst [vmem:[#allocation2 + $0x6] sm:$0x1] %v188_v54  ;;  %s195_s9 = scalar_lea.vmem [#allocation6], %s11877_s29  ;;  %831 = vmatpush.bf16.msrb.mxu1 %v7285_v7  ;;  %v10188_v48 = vld [vmem:[#allocation9 + $0x16c] sm:$0xf0] }
  0x4a   :  { %v196_v55 = vld [vmem:[%s195_s9] sm:$0x1]  ;;  %v10154_v49 = vld [vmem:[#allocation9 + $0x64] sm:$0xf]  ;;  %v7090_v50 = vld [vmem:[#allocation9 + $0x70] sm:$0xf0]  ;;  %v7217_v51 = vor.u32 %v10188_v48, %v7216_v46 }
  0x4b   :  { %197 = vst [vmem:[#allocation2 + $0x7] sm:$0x1] %v196_v55  ;;  %v7093_v52 = vor.u32 %v10154_v49, %v7090_v50  ;;  %v10186_v53 = vld [vmem:[#allocation9 + $0x164] sm:$0xf]  ;;  %v7218_v54 = vld [vmem:[#allocation9 + $0x170] sm:$0xf0]  ;;  %796 = vmatpush.bf16.msra.mxu2 %v7089_v47 }
  0x4c   :  { %819 = vmatpush.bf16.msrb.mxu0 %v7141_v16  ;;  %v7221_v55 = vor.u32 %v10186_v53, %v7218_v54  ;;  %809 = vmatpush.bf16.msra.mxu3 %v7217_v51  ;;  %v10184_v60 = vld [vmem:[#allocation9 + $0x14c] sm:$0xf0]  ;;  %v10150_v61 = vld [vmem:[#allocation9 + $0x44] sm:$0xf]  ;;  %v7074_v62 = vld [vmem:[#allocation9 + $0x50] sm:$0xf0] }
  0x4d   :  { %832 = vmatpush.bf16.msrb.mxu1 %v7269_v19  ;;  %v7077_v0 = vor.u32 %v10150_v61, %v7074_v62  ;;  %v10182_v1 = vld [vmem:[#allocation9 + $0x144] sm:$0xf]  ;;  %v7202_v2 = vld [vmem:[#allocation9 + $0x150] sm:$0xf0]  ;;  %v7056_v4 = vld [vmem:[#allocation9 + $0x20] sm:$0xf] }
  0x4e   :  { %v7205_v3 = vor.u32 %v10182_v1, %v7202_v2  ;;  %v10148_v5 = vld [vmem:[#allocation9 + $0x2c] sm:$0xf0]  ;;  %v7184_v6 = vld [vmem:[#allocation9 + $0x120] sm:$0xf]  ;;  %v10146_v11 = vld [vmem:[#allocation9 + $0x24] sm:$0xf] }
  0x4f   :  { %v7057_v9 = vor.u32 %v10148_v5, %v7056_v4  ;;  %v10180_v10 = vld [vmem:[#allocation9 + $0x12c] sm:$0xf0]  ;;  %v7058_v12 = vld [vmem:[#allocation9 + $0x30] sm:$0xf0]  ;;  %v10178_v17 = vld [vmem:[#allocation9 + $0x124] sm:$0xf] }
  0x50   :  { %820 = vmatpush.bf16.msrb.mxu0 %v7125_v28  ;;  %v7186_v18 = vld [vmem:[#allocation9 + $0x130] sm:$0xf0]  ;;  %v7185_v19 = vor.u32 %v10180_v10, %v7184_v6  ;;  %v7061_v20 = vor.u32 %v10146_v11, %v7058_v12  ;;  %v7040_v26 = vld [vmem:[#allocation9] sm:$0xf]  ;;  %v10144_v27 = vld [vmem:[#allocation9 + $0xc] sm:$0xf0] }
  0x51   :  { %833 = vmatpush.bf16.msrb.mxu1 %v7253_v31  ;;  %v7189_v21 = vor.u32 %v10178_v17, %v7186_v18  ;;  %v7041_v28 = vor.u32 %v10144_v27, %v7040_v26  ;;  %v7168_v29 = vld [vmem:[#allocation9 + $0x100] sm:$0xf]  ;;  %v10176_v30 = vld [vmem:[#allocation9 + $0x10c] sm:$0xf0]  ;;  %v10142_v31 = vld [vmem:[#allocation9 + $0x4] sm:$0xf] }
  0x52   :  { %v199_v57 = vld [vmem:[#allocation2] sm:$0xff]  ;;  %v7042_v36 = vld [vmem:[#allocation9 + $0x10] sm:$0xf0]  ;;  %v10174_v37 = vld [vmem:[#allocation9 + $0x104] sm:$0xf]  ;;  %v7169_v38 = vor.u32 %v10176_v30, %v7168_v29 }
  0x53   :  { %v200_v58 = vmul.f32 %v199_v57, %v198_v56  ;;  %v7072_v56 = vld [vmem:[#allocation9 + $0x40] sm:$0xf]  ;;  %v10152_v57 = vld [vmem:[#allocation9 + $0x4c] sm:$0xf0]  ;;  %v7045_v39 = vor.u32 %v10142_v31, %v7042_v36  ;;  %v7160_v41 = vld [vmem:[#allocation9 + $0xe8] sm:$0xf] }
  0x54   :  { %821 = vmatpush.bf16.msrb.mxu0 %v7109_v40  ;;  %v7170_v40 = vld [vmem:[#allocation9 + $0x110] sm:$0xf0]  ;;  %v10173_v42 = vld [vmem:[#allocation9 + $0xf4] sm:$0xf0]  ;;  %v7288_v47 = vld [vmem:[#allocation9 + $0x1e8] sm:$0xf] }
  0x55   :  { %v201_v59 = vpack.c.bf16 %v200_v58, %v200_v58  ;;  %834 = vmatpush.bf16.msrb.mxu1 %v7237_v43  ;;  %v7200_v58 = vld [vmem:[#allocation9 + $0x140] sm:$0xf]  ;;  %v10205_v48 = vld [vmem:[#allocation9 + $0x1f4] sm:$0xf0]  ;;  %v7173_v51 = vor.u32 %v10174_v37, %v7170_v40  ;;  %v10171_v54 = vld [vmem:[#allocation9 + $0xec] sm:$0xf] }
  0x56   :  { %v7201_v63 = vor.u32 %v10184_v60, %v7200_v58  ;;  %v7289_v53 = vor.u32 %v10205_v48, %v7288_v47  ;;  %v7290_v62 = vld [vmem:[#allocation9 + $0x1f8] sm:$0xf0]  ;;  %v10169_v4 = vld [vmem:[#allocation9 + $0xd4] sm:$0xf0]  ;;  %v7272_v5 = vld [vmem:[#allocation9 + $0x1c8] sm:$0xf] }
  0x57   :  { %306 = vmatmul.bf16.vlgmr.msra.gmra.mxu0 %v201_v59  ;;  %319 = vmatmul.bf16.vlgmr.msra.gmra.mxu1 %v201_v59  ;;  %v7073_v59 = vor.u32 %v10152_v57, %v7072_v56  ;;  %v10201_v10 = vld [vmem:[#allocation9 + $0x1d4] sm:$0xf0]  ;;  %v10167_v11 = vld [vmem:[#allocation9 + $0xcc] sm:$0xf]  ;;  %v7256_v26 = vld [vmem:[#allocation9 + $0x1a8] sm:$0xf] }
  0x58   :  { %822 = vmatpush.bf16.msrb.mxu0 %v7093_v52  ;;  %810 = vmatpush.bf16.msra.mxu3 %v7201_v63  ;;  %v7161_v52 = vor.u32 %v10173_v42, %v7160_v41  ;;  %v7144_v63 = vld [vmem:[#allocation9 + $0xc8] sm:$0xf]  ;;  %v10199_v17 = vld [vmem:[#allocation9 + $0x1cc] sm:$0xf]  ;;  %v10197_v27 = vld [vmem:[#allocation9 + $0x1b4] sm:$0xf0] }
  0x59   :  { %835 = vmatpush.bf16.msrb.mxu1 %v7221_v55  ;;  %797 = vmatpush.bf16.msra.mxu2 %v7073_v59  ;;  %v7162_v55 = vld [vmem:[#allocation9 + $0xf8] sm:$0xf0]  ;;  %v10203_v59 = vld [vmem:[#allocation9 + $0x1ec] sm:$0xf]  ;;  %v10161_v41 = vld [vmem:[#allocation9 + $0x94] sm:$0xf0] }
  0x5a   :  { %v7165_v61 = vor.u32 %v10171_v54, %v7162_v55  ;;  %v10163_v31 = vld [vmem:[#allocation9 + $0xac] sm:$0xf]  ;;  %v7258_v37 = vld [vmem:[#allocation9 + $0x1b8] sm:$0xf0]  ;;  %v7240_v42 = vld [vmem:[#allocation9 + $0x188] sm:$0xf] }
  0x5b   :  { %v10195_v36 = vld [vmem:[#allocation9 + $0x1ac] sm:$0xf]  ;;  %v7114_v48 = vld [vmem:[#allocation9 + $0x98] sm:$0xf0]  ;;  %v7096_v54 = vld [vmem:[#allocation9 + $0x68] sm:$0xf] }
  0x5c   :  { %823 = vmatpush.bf16.msrb.mxu0 %v7077_v0  ;;  %811 = vmatpush.bf16.msra.mxu3 %v7185_v19  ;;  %v7261_v40 = vor.u32 %v10195_v36, %v7258_v37  ;;  %v10159_v47 = vld [vmem:[#allocation9 + $0x8c] sm:$0xf] }
  0x5d   :  { %836 = vmatpush.bf16.msrb.mxu1 %v7205_v3  ;;  %798 = vmatpush.bf16.msra.mxu2 %v7057_v9  ;;  %v7293_v3 = vor.u32 %v10203_v59, %v7290_v62  ;;  %v7145_v9 = vor.u32 %v10169_v4, %v7144_v63  ;;  %v7224_v59 = vld [vmem:[#allocation9 + $0x168] sm:$0xf]  ;;  %v7098_v63 = vld [vmem:[#allocation9 + $0x78] sm:$0xf0]  ;;  %v10153_v4 = vld [vmem:[#allocation9 + $0x54] sm:$0xf0] }
  0x60   :  { %824 = vmatpush.bf16.msrb.mxu0 %v7061_v20  ;;  %812 = vmatpush.bf16.msra.mxu3 %v7169_v38  ;;  %v7274_v20 = vld [vmem:[#allocation9 + $0x1d8] sm:$0xf0]  ;;  %v7112_v38 = vld [vmem:[#allocation9 + $0x88] sm:$0xf] }
  0x61   :  { %837 = vmatpush.bf16.msrb.mxu1 %v7189_v21  ;;  %799 = vmatpush.bf16.msra.mxu2 %v7041_v28  ;;  %v7128_v21 = vld [vmem:[#allocation9 + $0xa8] sm:$0xf]  ;;  %v7277_v29 = vor.u32 %v10199_v17, %v7274_v20  ;;  %v7210_v17 = vld [vmem:[#allocation9 + $0x158] sm:$0xf0]  ;;  %v10149_v20 = vld [vmem:[#allocation9 + $0x34] sm:$0xf0] }
  0x64   :  { %825 = vmatpush.bf16.msrb.mxu0 %v7045_v39  ;;  %857 = vmatpush.bf16.msrb.mxu3 %v7289_v53 }
  0x65   :  { %838 = vmatpush.bf16.msrb.mxu1 %v7173_v51  ;;  %844 = vmatpush.bf16.msrb.mxu2 %v7161_v52  ;;  %v10191_v51 = vld [vmem:[#allocation9 + $0x18c] sm:$0xf]  ;;  %v7242_v52 = vld [vmem:[#allocation9 + $0x198] sm:$0xf0] }
  0x68   :  { %870 = vmatpush.bf16.msra.mxu0 %v7165_v61  ;;  %v10155_v61 = vld [vmem:[#allocation9 + $0x6c] sm:$0xf] }
  0x69   :  { %883 = vmatpush.bf16.msra.mxu1 %v7293_v3  ;;  %845 = vmatpush.bf16.msrb.mxu2 %v7145_v9  ;;  %v7080_v3 = vld [vmem:[#allocation9 + $0x48] sm:$0xf] }
  0x6a   :  { %v7081_v9 = vor.u32 %v10153_v4, %v7080_v3 }
  0x6d   :  { %884 = vmatpush.bf16.msra.mxu1 %v7277_v29 }
  0x71   :  { %885 = vmatpush.bf16.msra.mxu1 %v7261_v40 }
  0xd4   :  { %v11251_v7 = vpop.f32.mrf.mxu0  ;;  %v11253_v8 = vpop.f32.mrf.mxu1 }
  0xd5   :  { %v324_v13 = vrot.slane %v11251_v7, 4  ;;  %v336_v14 = vmul.f32 %v11251_v7, %v11251_v7  ;;  %v330_v15 = vrot.slane %v11253_v8, 4  ;;  %v337_v16 = vmul.f32 %v11253_v8, %v11253_v8 }
  0xd7   :  { %v325_v22 = vadd.f32 %v324_v13, %v11251_v7  ;;  %v338_v23 = vrot.slane %v336_v14, 4  ;;  %v331_v24 = vadd.f32 %v330_v15, %v11253_v8  ;;  %v344_v25 = vrot.slane %v337_v16, 4 }
  0xd8   :  { %v7273_v15 = vor.u32 %v10201_v10, %v7272_v5  ;;  %v7208_v5 = vld [vmem:[#allocation9 + $0x148] sm:$0xf]  ;;  %v10185_v10 = vld [vmem:[#allocation9 + $0x154] sm:$0xf0] }
  0xd9   :  { %v326_v32 = vrot.slane %v325_v22, 2  ;;  %v339_v33 = vadd.f32 %v338_v23, %v336_v14  ;;  %v332_v34 = vrot.slane %v331_v24, 2  ;;  %v345_v35 = vadd.f32 %v344_v25, %v337_v16  ;;  %v7146_v16 = vld [vmem:[#allocation9 + $0xd8] sm:$0xf0] }
  0xda   :  { %v7149_v19 = vor.u32 %v10167_v11, %v7146_v16  ;;  %858 = vmatpush.bf16.msrb.mxu3 %v7273_v15  ;;  %v10151_v11 = vld [vmem:[#allocation9 + $0x4c] sm:$0xf]  ;;  %v7209_v15 = vor.u32 %v10185_v10, %v7208_v5  ;;  %v7776_v10 = vld [vmem:[#allocation10 + $0x3c0] sm:$0xf] }
  0xdb   :  { %v327_v43 = vadd.f32 %v326_v32, %v325_v22  ;;  %v340_v44 = vrot.slane %v339_v33, 2  ;;  %v333_v45 = vadd.f32 %v332_v34, %v331_v24  ;;  %v346_v46 = vrot.slane %v345_v35, 2  ;;  %v10165_v22 = vld [vmem:[#allocation9 + $0xb4] sm:$0xf0]  ;;  %v7130_v32 = vld [vmem:[#allocation9 + $0xb8] sm:$0xf0] }
  0xdc   :  { %v309_v49 = vpop.f32.mrf.mxu0  ;;  %v322_v50 = vpop.f32.mrf.mxu1  ;;  %871 = vmatpush.bf16.msra.mxu0 %v7149_v19  ;;  %v7129_v30 = vor.u32 %v10165_v22, %v7128_v21  ;;  %v7257_v34 = vor.u32 %v10197_v27, %v7256_v26  ;;  %v10183_v16 = vld [vmem:[#allocation9 + $0x14c] sm:$0xf]  ;;  %v7192_v21 = vld [vmem:[#allocation9 + $0x128] sm:$0xf]  ;;  %v10181_v22 = vld [vmem:[#allocation9 + $0x134] sm:$0xf0] }
  0xdd   :  { %v328_v56 = vrot.slane %v327_v43, 1  ;;  %v341_v57 = vadd.f32 %v340_v44, %v339_v33  ;;  %v334_v58 = vrot.slane %v333_v45, 1  ;;  %v347_v60 = vadd.f32 %v346_v46, %v345_v35 }
  0xde   :  { %v7133_v35 = vor.u32 %v10163_v31, %v7130_v32  ;;  %846 = vmatpush.bf16.msrb.mxu2 %v7129_v30  ;;  %859 = vmatpush.bf16.msrb.mxu3 %v7257_v34  ;;  %v7117_v50 = vor.u32 %v10159_v47, %v7114_v48  ;;  %v10179_v30 = vld [vmem:[#allocation9 + $0x12c] sm:$0xf]  ;;  %v7193_v32 = vor.u32 %v10181_v22, %v7192_v21  ;;  %v7048_v34 = vld [vmem:[#allocation9 + $0x8] sm:$0xf]  ;;  %v10266_v21 = vld [vmem:[#allocation10 + $0x1dc] sm:$0xf0] }
  0xdf   :  { %v329_v0 = vadd.f32 %v328_v56, %v327_v43  ;;  %v342_v1 = vrot.slane %v341_v57, 1  ;;  %v335_v2 = vadd.f32 %v334_v58, %v333_v45  ;;  %v348_v6 = vrot.slane %v347_v60, 1  ;;  %v10193_v43 = vld [vmem:[#allocation9 + $0x194] sm:$0xf0]  ;;  %v10175_v48 = vld [vmem:[#allocation9 + $0x10c] sm:$0xf] }
  0xe0   :  { %v7113_v45 = vor.u32 %v10161_v41, %v7112_v38  ;;  %v7241_v46 = vor.u32 %v10193_v43, %v7240_v42  ;;  %872 = vmatpush.bf16.msra.mxu0 %v7133_v35  ;;  %v7245_v56 = vor.u32 %v10191_v51, %v7242_v52  ;;  %v10145_v35 = vld [vmem:[#allocation9 + $0x14] sm:$0xf0]  ;;  %v7176_v38 = vld [vmem:[#allocation9 + $0x108] sm:$0xf]  ;;  %v10143_v41 = vld [vmem:[#allocation9 + $0xc] sm:$0xf] }
  0xe1   :  { %v343_v12 = vadd.f32 %v342_v1, %v341_v57  ;;  %v11263_v13 = vmul.f32 0.125, %v329_v0  ;;  %v11265_v14 = vmul.f32 0.125, %v335_v2  ;;  %v349_v18 = vadd.f32 %v348_v6, %v347_v60  ;;  %v10157_v57 = vld [vmem:[#allocation9 + $0x74] sm:$0xf0]  ;;  %v10187_v0 = vld [vmem:[#allocation9 + $0x16c] sm:$0xf] }
  0xe2   :  { %847 = vmatpush.bf16.msrb.mxu2 %v7113_v45  ;;  %860 = vmatpush.bf16.msrb.mxu3 %v7241_v46  ;;  %v7097_v58 = vor.u32 %v10157_v57, %v7096_v54  ;;  %v10189_v60 = vld [vmem:[#allocation9 + $0x174] sm:$0xf0]  ;;  %v7226_v1 = vld [vmem:[#allocation9 + $0x178] sm:$0xf0]  ;;  %v7101_v2 = vor.u32 %v10155_v61, %v7098_v63  ;;  %v7049_v45 = vor.u32 %v10145_v35, %v7048_v34  ;;  %v386_v51 = vld [vmem:[#allocation13] sm:$0x3] }
  0xe3   :  { %v352_v23 = vmul.f32 0.125, %v343_v12  ;;  %v354_v24 = vmul.f32 %v11263_v13, %v11263_v13  ;;  %v355_v25 = vmul.f32 %v11265_v14, %v11265_v14  ;;  %v353_v28 = vmul.f32 0.125, %v349_v18  ;;  %886 = vmatpush.bf16.msra.mxu1 %v7245_v56  ;;  %v7082_v12 = vld [vmem:[#allocation9 + $0x58] sm:$0xf0]  ;;  %v7064_v18 = vld [vmem:[#allocation9 + $0x28] sm:$0xf] }
  0xe4   :  { %873 = vmatpush.bf16.msra.mxu0 %v7117_v50  ;;  %v7225_v62 = vor.u32 %v10189_v60, %v7224_v59  ;;  %v7229_v6 = vor.u32 %v10187_v0, %v7226_v1  ;;  %v7085_v19 = vor.u32 %v10151_v11, %v7082_v12  ;;  %v7065_v29 = vor.u32 %v10149_v20, %v7064_v18  ;;  %v7050_v42 = vld [vmem:[#allocation9 + $0x18] sm:$0xf0]  ;;  %v394_v57 = vld [vmem:[#allocation13 + $0x2] sm:$0x3] }
  0xe5   :  { %v356_v33 = vsub.f32 %v352_v23, %v354_v24  ;;  %v357_v39 = vsub.f32 %v353_v28, %v355_v25  ;;  %v10147_v24 = vld [vmem:[#allocation9 + $0x2c] sm:$0xf]  ;;  %v7066_v25 = vld [vmem:[#allocation9 + $0x38] sm:$0xf0]  ;;  %v7213_v28 = vor.u32 %v10183_v16, %v7210_v17  ;;  %v7053_v52 = vor.u32 %v10143_v41, %v7050_v42  ;;  %v10330_v11 = vld [vmem:[#allocation10 + $0x3dc] sm:$0xf0] }
  0xe6   :  { %848 = vmatpush.bf16.msrb.mxu2 %v7097_v58  ;;  %861 = vmatpush.bf16.msrb.mxu3 %v7225_v62  ;;  %v7069_v37 = vor.u32 %v10147_v24, %v7066_v25  ;;  %v360_v59 = vsub.f32 %v11251_v7, %v11263_v13  ;;  %v388_v60 = vperm.slane %v386_v51, 0  ;;  %v361_v63 = vsub.f32 %v11253_v8, %v11265_v14  ;;  %v7744_v17 = vld [vmem:[#allocation10 + $0x380] sm:$0xf] }
  0xe7   :  { %v358_v44 = vmax.f32 %v356_v33, 0.0  ;;  %v359_v49 = vmax.f32 %v357_v39, 0.0  ;;  %887 = vmatpush.bf16.msra.mxu1 %v7229_v6  ;;  %v7194_v33 = vld [vmem:[#allocation9 + $0x138] sm:$0xf0]  ;;  %v10177_v39 = vld [vmem:[#allocation9 + $0x114] sm:$0xf0] }
  0xe8   :  { %874 = vmatpush.bf16.msra.mxu0 %v7101_v2  ;;  %v7177_v47 = vor.u32 %v10177_v39, %v7176_v38  ;;  %v396_v2 = vperm.slane %v394_v57, 0  ;;  %v397_v4 = vperm.slane %v394_v57, 1  ;;  %v10322_v18 = vld [vmem:[#allocation10 + $0x39c] sm:$0xf0] }
  0xe9   :  { %v11271_v53 = vadd.f32 1e-05, %v358_v44  ;;  %v11273_v55 = vadd.f32 1e-05, %v359_v49  ;;  %v7197_v44 = vor.u32 %v10179_v30, %v7194_v33  ;;  %v7178_v49 = vld [vmem:[#allocation9 + $0x118] sm:$0xf0] }
  0xea   :  { %849 = vmatpush.bf16.msrb.mxu2 %v7081_v9  ;;  %862 = vmatpush.bf16.msrb.mxu3 %v7209_v15  ;;  %v7181_v58 = vor.u32 %v10175_v48, %v7178_v49  ;;  %v7777_v15 = vor.u32 %v10330_v11, %v7776_v10  ;;  %v7520_v20 = vld [vmem:[#allocation10 + $0x1c0] sm:$0xf]  ;;  %v7778_v10 = vld [vmem:[#allocation10 + $0x3e0] sm:$0xf0] }
  0xeb   :  { %10925 = vrsqrt.f32 %v11271_v53  ;;  %888 = vmatpush.bf16.msra.mxu1 %v7213_v28  ;;  %vm370_vm2 = vweird.f32 %v11271_v53  ;;  %vm380_vm4 = vweird.f32 %v11273_v55  ;;  %v7521_v22 = vor.u32 %v10266_v21, %v7520_v20  ;;  %v10314_v24 = vld [vmem:[#allocation10 + $0x35c] sm:$0xf0] }
  0xec   :  { %10927 = vrsqrt.f32 %v11273_v55  ;;  %875 = vmatpush.bf16.msra.mxu0 %v7085_v19  ;;  %v7745_v19 = vor.u32 %v10322_v18, %v7744_v17  ;;  %v10306_v30 = vld [vmem:[#allocation10 + $0x31c] sm:$0xf0] }
  0xed   :  { %v10250_v33 = vld [vmem:[#allocation10 + $0x15c] sm:$0xf0] }
  0xee   :  { %850 = vmatpush.bf16.msrb.mxu2 %v7065_v29  ;;  %863 = vmatpush.bf16.msrb.mxu3 %v7193_v32  ;;  %v7680_v29 = vld [vmem:[#allocation10 + $0x300] sm:$0xf] }
  0xef   :  { %889 = vmatpush.bf16.msra.mxu1 %v7197_v44  ;;  %v7456_v32 = vld [vmem:[#allocation10 + $0x140] sm:$0xf] }
  0xf0   :  { %876 = vmatpush.bf16.msra.mxu0 %v7069_v37  ;;  %v7457_v34 = vor.u32 %v10250_v33, %v7456_v32  ;;  %v7648_v35 = vld [vmem:[#allocation10 + $0x2c0] sm:$0xf]  ;;  %v7522_v32 = vld [vmem:[#allocation10 + $0x1e0] sm:$0xf0] }
  0xf1   :  { %v10926_v23 = vpop.eup %10925  ;;  %v8288_v37 = vld [vmem:[#allocation10 + $0x7c0] sm:$0xf] }
  0xf2   :  { %v10928_v26 = vpop.eup %10927  ;;  %v365_v27 = vmul.f32 %v10926_v23, %v11271_v53  ;;  %vm371_vm0 = vweird.f32 %v10926_v23  ;;  %851 = vmatpush.bf16.msrb.mxu2 %v7049_v45  ;;  %864 = vmatpush.bf16.msrb.mxu3 %v7177_v47  ;;  %v389_v53 = vperm.slane %v386_v51, 1  ;;  %v10458_v39 = vld [vmem:[#allocation10 + $0x7dc] sm:$0xf0] }
  0xf3   :  { %v375_v31 = vmul.f32 %v10928_v26, %v11273_v55  ;;  %vm381_vm1 = vweird.f32 %v10928_v26  ;;  %vm372_vm3 = vmor %vm370_vm2, %vm371_vm0  ;;  %890 = vmatpush.bf16.msra.mxu1 %v7181_v58  ;;  %v7424_v41 = vld [vmem:[#allocation10 + $0x100] sm:$0xf] }
  0xf4   :  { %v366_v36 = vmul.f32 %v10926_v23, %v365_v27  ;;  %vm382_vm5 = vmor %vm380_vm4, %vm381_vm1  ;;  %877 = vmatpush.bf16.msra.mxu0 %v7053_v52  ;;  %v10258_v27 = vld [vmem:[#allocation10 + $0x19c] sm:$0xf0] }
  0xf5   :  { %v376_v40 = vmul.f32 %v10928_v26, %v375_v31  ;;  %v7681_v31 = vor.u32 %v10306_v30, %v7680_v29  ;;  %v10242_v42 = vld [vmem:[#allocation10 + $0x11c] sm:$0xf0] }
  0xf6   :  { %v367_v43 = vmul.f32 0.5, %v366_v36  ;;  %v10298_v36 = vld [vmem:[#allocation10 + $0x2dc] sm:$0xf0] }
  0xf7   :  { %v377_v46 = vmul.f32 0.5, %v376_v40  ;;  %v7649_v38 = vor.u32 %v10298_v36, %v7648_v35  ;;  %v8289_v40 = vor.u32 %v10458_v39, %v8288_v37  ;;  %v7616_v44 = vld [vmem:[#allocation10 + $0x280] sm:$0xf] }
  0xf8   :  { %v368_v50 = vsub.f32 1.5, %v367_v43  ;;  %v7425_v43 = vor.u32 %v10242_v42, %v7424_v41  ;;  %v10290_v45 = vld [vmem:[#allocation10 + $0x29c] sm:$0xf0]  ;;  %v7714_v41 = vld [vmem:[#allocation10 + $0x360] sm:$0xf0] }
  0xf9   :  { %v378_v54 = vsub.f32 1.5, %v377_v46  ;;  %v8256_v46 = vld [vmem:[#allocation10 + $0x780] sm:$0xf]  ;;  %v7617_v47 = vor.u32 %v10290_v45, %v7616_v44 }
  0xfa   :  { %v369_v56 = vmul.f32 %v10926_v23, %v368_v50  ;;  %v10450_v48 = vld [vmem:[#allocation10 + $0x79c] sm:$0xf0] }
  0xfb   :  { %v379_v61 = vmul.f32 %v10928_v26, %v378_v54  ;;  %v8257_v49 = vor.u32 %v10450_v48, %v8256_v46  ;;  %v7392_v50 = vld [vmem:[#allocation10 + $0xc0] sm:$0xf]  ;;  %v10254_v48 = vld [vmem:[#allocation10 + $0x184] sm:$0xf] }
  0xfc   :  { %v373_v62 = vsel %vm372_vm3, %v10926_v23, %v369_v56  ;;  %v7712_v23 = vld [vmem:[#allocation10 + $0x340] sm:$0xf] }
  0xfd   :  { %v384_v0 = vmul.f32 %v373_v62, %v360_v59  ;;  %v383_v1 = vsel %vm382_vm5, %v10928_v26, %v379_v61  ;;  %v7713_v25 = vor.u32 %v10314_v24, %v7712_v23  ;;  %v7488_v26 = vld [vmem:[#allocation10 + $0x180] sm:$0xf]  ;;  %v7746_v23 = vld [vmem:[#allocation10 + $0x3a0] sm:$0xf0] }
  0xfe   :  { %v385_v3 = vmul.f32 %v383_v1, %v361_v63  ;;  %v7489_v28 = vor.u32 %v10258_v27, %v7488_v26  ;;  %v10234_v51 = vld [vmem:[#allocation10 + $0xdc] sm:$0xf0] }
  0xff   :  { %v392_v7 = vmul.f32 %v388_v60, %v384_v0  ;;  %v8032_v52 = vld [vmem:[#allocation10 + $0x5c0] sm:$0xf]  ;;  %v7393_v54 = vor.u32 %v10234_v51, %v7392_v50 }
 0x100   :  { %v393_v13 = vmul.f32 %v389_v53, %v385_v3  ;;  %v10394_v56 = vld [vmem:[#allocation10 + $0x5dc] sm:$0xf0] }
 0x101   :  { %v400_v5 = vadd.f32 %v396_v2, %v392_v7  ;;  %v8033_v57 = vor.u32 %v10394_v56, %v8032_v52  ;;  %v7584_v58 = vld [vmem:[#allocation10 + $0x240] sm:$0xf] }
 0x102   :  { %v401_v6 = vadd.f32 %v397_v4, %v393_v13  ;;  %v10282_v59 = vld [vmem:[#allocation10 + $0x25c] sm:$0xf0] }
 0x103   :  { %v402_v55 = vmul.f32 0.2, %v400_v5  ;;  %v8224_v60 = vld [vmem:[#allocation10 + $0x740] sm:$0xf]  ;;  %v7585_v61 = vor.u32 %v10282_v59, %v7584_v58  ;;  %v10302_v59 = vld [vmem:[#allocation10 + $0x304] sm:$0xf] }
 0x104   :  { %v403_v9 = vmul.f32 0.2, %v401_v6  ;;  %v10442_v62 = vld [vmem:[#allocation10 + $0x75c] sm:$0xf0] }
 0x105   :  { %v404_v12 = vmax.f32 %v400_v5, %v402_v55  ;;  %v8225_v63 = vor.u32 %v10442_v62, %v8224_v60  ;;  %v7360_v53 = vld [vmem:[#allocation10 + $0x80] sm:$0xf]  ;;  %v7682_v60 = vld [vmem:[#allocation10 + $0x320] sm:$0xf0] }
 0x106   :  { %v405_v8 = vmax.f32 %v401_v6, %v403_v9  ;;  %v10226_v0 = vld [vmem:[#allocation10 + $0x9c] sm:$0xf0]  ;;  %v10326_v9 = vld [vmem:[#allocation10 + $0x3c4] sm:$0xf]  ;;  %v7685_v62 = vor.u32 %v10302_v59, %v7682_v60 }
 0x107   :  { %v406_v14 = vpack.c.bf16 %v404_v12, %v404_v12  ;;  %v8000_v1 = vld [vmem:[#allocation10 + $0x580] sm:$0xf]  ;;  %v7361_v2 = vor.u32 %v10226_v0, %v7360_v53  ;;  %v7781_v12 = vor.u32 %v10326_v9, %v7778_v10  ;;  %v10390_v59 = vld [vmem:[#allocation10 + $0x5c4] sm:$0xf] }
 0x108   :  { %v407_v16 = vpack.c.bf16 %v405_v8, %v405_v8  ;;  %v10386_v3 = vld [vmem:[#allocation10 + $0x59c] sm:$0xf0] }
 0x109   :  { %800 = vmatmul.bf16.vlgmr.msra.gmra.mxu2 %v406_v14  ;;  %826 = vmatmul.bf16.vlgmr.msrb.gmra.mxu0 %v406_v14  ;;  %v8001_v4 = vor.u32 %v10386_v3, %v8000_v1  ;;  %v7552_v7 = vld [vmem:[#allocation10 + $0x200] sm:$0xf] }
 0x10a   :  { %813 = vmatmul.bf16.vlgmr.msra.gmra.mxu3 %v407_v16  ;;  %839 = vmatmul.bf16.vlgmr.msrb.gmra.mxu1 %v407_v16  ;;  %v10274_v13 = vld [vmem:[#allocation10 + $0x21c] sm:$0xf0] }
 0x10b   :  { %2609 = vmatpush.bf16.msra.mxu3 %v7777_v15  ;;  %2596 = vmatpush.bf16.msra.mxu2 %v7521_v22  ;;  %v8192_v5 = vld [vmem:[#allocation10 + $0x700] sm:$0xf]  ;;  %v7553_v6 = vor.u32 %v10274_v13, %v7552_v7  ;;  %v10318_v22 = vld [vmem:[#allocation10 + $0x384] sm:$0xf] }
 0x10c   :  { %2635 = vmatpush.bf16.msrb.mxu1 %v8289_v40  ;;  %2622 = vmatpush.bf16.msrb.mxu0 %v8033_v57  ;;  %v10434_v55 = vld [vmem:[#allocation10 + $0x71c] sm:$0xf0]  ;;  %v7749_v24 = vor.u32 %v10318_v22, %v7746_v23  ;;  %v10310_v40 = vld [vmem:[#allocation10 + $0x344] sm:$0xf] }
 0x10d   :  { %v8193_v11 = vor.u32 %v10434_v55, %v8192_v5  ;;  %v7328_v8 = vld [vmem:[#allocation10 + $0x40] sm:$0xf]  ;;  %v7717_v42 = vor.u32 %v10310_v40, %v7714_v41  ;;  %v10246_v7 = vld [vmem:[#allocation10 + $0x144] sm:$0xf] }
 0x10e   :  { %v7968_v15 = vld [vmem:[#allocation10 + $0x540] sm:$0xf]  ;;  %v7458_v13 = vld [vmem:[#allocation10 + $0x160] sm:$0xf0] }
 0x10f   :  { %2610 = vmatpush.bf16.msra.mxu3 %v7745_v19  ;;  %2597 = vmatpush.bf16.msra.mxu2 %v7489_v28  ;;  %v10378_v17 = vld [vmem:[#allocation10 + $0x55c] sm:$0xf0]  ;;  %v10446_v40 = vld [vmem:[#allocation10 + $0x784] sm:$0xf] }
 0x110   :  { %2636 = vmatpush.bf16.msrb.mxu1 %v8257_v49  ;;  %2623 = vmatpush.bf16.msrb.mxu0 %v8001_v4  ;;  %v7969_v18 = vor.u32 %v10378_v17, %v7968_v15  ;;  %v8160_v19 = vld [vmem:[#allocation10 + $0x6c0] sm:$0xf]  ;;  %v7490_v49 = vld [vmem:[#allocation10 + $0x1a0] sm:$0xf0] }
 0x111   :  { %v10426_v20 = vld [vmem:[#allocation10 + $0x6dc] sm:$0xf0]  ;;  %v7493_v50 = vor.u32 %v10254_v48, %v7490_v49  ;;  %v7650_v15 = vld [vmem:[#allocation10 + $0x2e0] sm:$0xf0] }
 0x112   :  { %v8161_v21 = vor.u32 %v10426_v20, %v8160_v19  ;;  %v10210_v26 = vld [vmem:[#allocation10 + $0x1c] sm:$0xf0]  ;;  %v8290_v19 = vld [vmem:[#allocation10 + $0x7e0] sm:$0xf0] }
 0x113   :  { %2611 = vmatpush.bf16.msra.mxu3 %v7713_v25  ;;  %2598 = vmatpush.bf16.msra.mxu2 %v7457_v34  ;;  %v7296_v25 = vld [vmem:[#allocation10] sm:$0xf] }
 0x114   :  { %2637 = vmatpush.bf16.msrb.mxu1 %v8225_v63  ;;  %2624 = vmatpush.bf16.msrb.mxu0 %v7969_v18  ;;  %v7936_v27 = vld [vmem:[#allocation10 + $0x500] sm:$0xf]  ;;  %v7297_v29 = vor.u32 %v10210_v26, %v7296_v25  ;;  %v10454_v18 = vld [vmem:[#allocation10 + $0x7c4] sm:$0xf] }
 0x115   :  { %v10370_v30 = vld [vmem:[#allocation10 + $0x51c] sm:$0xf0]  ;;  %v8293_v26 = vor.u32 %v10454_v18, %v8290_v19 }
 0x116   :  { %v7937_v34 = vor.u32 %v10370_v30, %v7936_v27  ;;  %v8128_v36 = vld [vmem:[#allocation10 + $0x680] sm:$0xf] }
 0x117   :  { %2612 = vmatpush.bf16.msra.mxu3 %v7681_v31  ;;  %2599 = vmatpush.bf16.msra.mxu2 %v7425_v43  ;;  %v10262_v31 = vld [vmem:[#allocation10 + $0x1c4] sm:$0xf]  ;;  %v10418_v37 = vld [vmem:[#allocation10 + $0x69c] sm:$0xf0] }
 0x118   :  { %2638 = vmatpush.bf16.msrb.mxu1 %v8193_v11  ;;  %v7525_v35 = vor.u32 %v10262_v31, %v7522_v32  ;;  %v8129_v39 = vor.u32 %v10418_v37, %v8128_v36  ;;  %2625 = vmatpush.bf16.msrb.mxu0 %v7937_v34  ;;  %v7904_v43 = vld [vmem:[#allocation10 + $0x4c0] sm:$0xf]  ;;  %v10286_v37 = vld [vmem:[#allocation10 + $0x284] sm:$0xf] }
 0x119   :  { %852 = vmatmul.bf16.vlgmr.msrb.gmra.mxu2 %v406_v14  ;;  %878 = vmatmul.bf16.vlgmr.msra.gmra.mxu0 %v406_v14  ;;  %v10218_v14 = vld [vmem:[#allocation10 + $0x5c] sm:$0xf0] }
 0x11a   :  { %865 = vmatmul.bf16.vlgmr.msrb.gmra.mxu3 %v407_v16  ;;  %891 = vmatmul.bf16.vlgmr.msra.gmra.mxu1 %v407_v16  ;;  %v7329_v16 = vor.u32 %v10218_v14, %v7328_v8  ;;  %v10362_v44 = vld [vmem:[#allocation10 + $0x4dc] sm:$0xf0]  ;;  %v10294_v14 = vld [vmem:[#allocation10 + $0x2c4] sm:$0xf] }
 0x11b   :  { %2613 = vmatpush.bf16.msra.mxu3 %v7649_v38  ;;  %2600 = vmatpush.bf16.msra.mxu2 %v7393_v54  ;;  %v8096_v51 = vld [vmem:[#allocation10 + $0x640] sm:$0xf]  ;;  %v7653_v17 = vor.u32 %v10294_v14, %v7650_v15 }
 0x11c   :  { %2639 = vmatpush.bf16.msrb.mxu1 %v8161_v21  ;;  %v10410_v52 = vld [vmem:[#allocation10 + $0x65c] sm:$0xf0] }
 0x11d   :  { %v8097_v58 = vor.u32 %v10410_v52, %v8096_v51  ;;  %v7872_v63 = vld [vmem:[#allocation10 + $0x480] sm:$0xf]  ;;  %v10230_v52 = vld [vmem:[#allocation10 + $0xc4] sm:$0xf] }
 0x11e   :  { %v10354_v53 = vld [vmem:[#allocation10 + $0x49c] sm:$0xf0] }
 0x11f   :  { %2614 = vmatpush.bf16.msra.mxu3 %v7617_v47  ;;  %2601 = vmatpush.bf16.msra.mxu2 %v7361_v2  ;;  %v7905_v47 = vor.u32 %v10362_v44, %v7904_v43  ;;  %v7873_v4 = vor.u32 %v10354_v53, %v7872_v63  ;;  %v8064_v55 = vld [vmem:[#allocation10 + $0x600] sm:$0xf]  ;;  %v8034_v63 = vld [vmem:[#allocation10 + $0x5e0] sm:$0xf0] }
 0x120   :  { %2640 = vmatpush.bf16.msrb.mxu1 %v8129_v39  ;;  %v10402_v9 = vld [vmem:[#allocation10 + $0x61c] sm:$0xf0]  ;;  %v7618_v39 = vld [vmem:[#allocation10 + $0x2a0] sm:$0xf0] }
 0x121   :  { %2626 = vmatpush.bf16.msrb.mxu0 %v7905_v47  ;;  %v7840_v23 = vld [vmem:[#allocation10 + $0x440] sm:$0xf]  ;;  %v10278_v53 = vld [vmem:[#allocation10 + $0x244] sm:$0xf] }
 0x122   :  { %v7808_v47 = vld [vmem:[#allocation10 + $0x400] sm:$0xf] }
 0x123   :  { %2615 = vmatpush.bf16.msra.mxu3 %v7585_v61  ;;  %2602 = vmatpush.bf16.msra.mxu2 %v7329_v16  ;;  %v8065_v16 = vor.u32 %v10402_v9, %v8064_v55  ;;  %v10338_v51 = vld [vmem:[#allocation10 + $0x41c] sm:$0xf0] }
 0x124   :  { %2641 = vmatpush.bf16.msrb.mxu1 %v8097_v58  ;;  %v7394_v58 = vld [vmem:[#allocation10 + $0xe0] sm:$0xf0] }
 0x125   :  { %2627 = vmatpush.bf16.msrb.mxu0 %v7873_v4  ;;  %v8037_v4 = vor.u32 %v10390_v59, %v8034_v63  ;;  %v8162_v59 = vld [vmem:[#allocation10 + $0x6e0] sm:$0xf0] }
 0x127   :  { %2616 = vmatpush.bf16.msra.mxu3 %v7553_v6  ;;  %2603 = vmatpush.bf16.msra.mxu2 %v7297_v29  ;;  %v7461_v6 = vor.u32 %v10246_v7, %v7458_v13  ;;  %v7586_v7 = vld [vmem:[#allocation10 + $0x260] sm:$0xf0] }
 0x128   :  { %2642 = vmatpush.bf16.msrb.mxu1 %v8065_v16  ;;  %v10438_v13 = vld [vmem:[#allocation10 + $0x744] sm:$0xf]  ;;  %v7589_v14 = vor.u32 %v10278_v53, %v7586_v7 }
 0x129   :  { %v7362_v16 = vld [vmem:[#allocation10 + $0xa0] sm:$0xf0] }
 0x12b   :  { %2661 = vmatpush.bf16.msrb.mxu3 %v7781_v12  ;;  %2648 = vmatpush.bf16.msrb.mxu2 %v7525_v35 }
 0x12c   :  { %2687 = vmatpush.bf16.msra.mxu1 %v8293_v26 }
 0x12f   :  { %2662 = vmatpush.bf16.msrb.mxu3 %v7749_v24  ;;  %2649 = vmatpush.bf16.msrb.mxu2 %v7493_v50  ;;  %v10346_v24 = vld [vmem:[#allocation10 + $0x45c] sm:$0xf0] }
 0x130   :  { %v7841_v27 = vor.u32 %v10346_v24, %v7840_v23  ;;  %v8002_v23 = vld [vmem:[#allocation10 + $0x5a0] sm:$0xf0] }
 0x132   :  { %2628 = vmatpush.bf16.msrb.mxu0 %v7841_v27 }
 0x133   :  { %2663 = vmatpush.bf16.msrb.mxu3 %v7717_v42  ;;  %2650 = vmatpush.bf16.msrb.mxu2 %v7461_v6 }
 0x137   :  { %2664 = vmatpush.bf16.msrb.mxu3 %v7685_v62  ;;  %v7809_v62 = vor.u32 %v10338_v51, %v7808_v47  ;;  %v10374_v47 = vld [vmem:[#allocation10 + $0x544] sm:$0xf] }
 0x138   :  { %v7970_v51 = vld [vmem:[#allocation10 + $0x560] sm:$0xf0] }
 0x139   :  { %2629 = vmatpush.bf16.msrb.mxu0 %v7809_v62  ;;  %v7973_v53 = vor.u32 %v10374_v47, %v7970_v51  ;;  %v11344_v51 = vld [vmem:[#allocation13 + $0x8] sm:$0xf] }
 0x13b   :  { %2665 = vmatpush.bf16.msrb.mxu3 %v7653_v17  ;;  %v10382_v17 = vld [vmem:[#allocation10 + $0x584] sm:$0xf] }
 0x13d   :  { %2674 = vmatpush.bf16.msra.mxu0 %v8037_v4 }
 0x186   :  { %v827_v28 = vpop.f32.mrf.mxu0 }
 0x187   :  { %v840_v33 = vpop.f32.mrf.mxu1 }
 0x188   :  { %v11286_v38 = vadd.f32 %v840_v33, %v827_v28  ;;  %v10238_v28 = vld [vmem:[#allocation10 + $0x104] sm:$0xf] }
 0x189   :  { %v7426_v33 = vld [vmem:[#allocation10 + $0x120] sm:$0xf0] }
 0x18a   :  { %v902_v45 = vrot.slane %v11286_v38, 4  ;;  %v921_v46 = vmul.f32 %v11286_v38, %v11286_v38  ;;  %v7429_v36 = vor.u32 %v10238_v28, %v7426_v33  ;;  %v10270_v28 = vld [vmem:[#allocation10 + $0x204] sm:$0xf] }
 0x18c   :  { %v903_v54 = vadd.f32 %v902_v45, %v11286_v38  ;;  %v930_v56 = vrot.slane %v921_v46, 4  ;;  %v801_v57 = vpop.f32.mrf.mxu2  ;;  %v7621_v45 = vor.u32 %v10286_v37, %v7618_v39  ;;  %2651 = vmatpush.bf16.msrb.mxu2 %v7429_v36  ;;  %v8194_v36 = vld [vmem:[#allocation10 + $0x720] sm:$0xf0] }
 0x18d   :  { %v814_v61 = vpop.f32.mrf.mxu3 }
 0x18e   :  { %v904_v0 = vrot.slane %v903_v54, 2  ;;  %v931_v1 = vadd.f32 %v930_v56, %v921_v46  ;;  %v11292_v2 = vadd.f32 %v814_v61, %v801_v57  ;;  %v829_v3 = vpop.f32.mrf.mxu0  ;;  %v8258_v46 = vld [vmem:[#allocation10 + $0x7a0] sm:$0xf0]  ;;  %2666 = vmatpush.bf16.msrb.mxu3 %v7621_v45 }
 0x18f   :  { %v842_v5 = vpop.f32.mrf.mxu1  ;;  %v8261_v50 = vor.u32 %v10446_v40, %v8258_v46  ;;  %v7397_v3 = vor.u32 %v10230_v52, %v7394_v58  ;;  %v10214_v40 = vld [vmem:[#allocation10 + $0x44] sm:$0xf] }
 0x190   :  { %v905_v10 = vadd.f32 %v904_v0, %v903_v54  ;;  %v932_v11 = vrot.slane %v931_v1, 2  ;;  %v896_v12 = vrot.slane %v11292_v2, 4  ;;  %v920_v8 = vmul.f32 %v11292_v2, %v11292_v2  ;;  %v8226_v5 = vld [vmem:[#allocation10 + $0x760] sm:$0xf0] }
 0x191   :  { %2688 = vmatpush.bf16.msra.mxu1 %v8261_v50  ;;  %2652 = vmatpush.bf16.msrb.mxu2 %v7397_v3  ;;  %v8229_v15 = vor.u32 %v10438_v13, %v8226_v5  ;;  %v7330_v46 = vld [vmem:[#allocation10 + $0x60] sm:$0xf0] }
 0x192   :  { %v906_v20 = vrot.slane %v905_v10, 1  ;;  %v933_v21 = vadd.f32 %v932_v11, %v931_v1  ;;  %v897_v22 = vadd.f32 %v896_v12, %v11292_v2  ;;  %v924_v25 = vrot.slane %v920_v8, 4  ;;  %2667 = vmatpush.bf16.msrb.mxu3 %v7589_v14  ;;  %v10422_v52 = vld [vmem:[#allocation10 + $0x6c4] sm:$0xf] }
 0x193   :  { %v7333_v58 = vor.u32 %v10214_v40, %v7330_v46  ;;  %v8165_v13 = vor.u32 %v10422_v52, %v8162_v59  ;;  %v7298_v5 = vld [vmem:[#allocation10 + $0x20] sm:$0xf0] }
 0x194   :  { %v907_v29 = vadd.f32 %v906_v20, %v905_v10  ;;  %v934_v30 = vrot.slane %v933_v21, 1  ;;  %v898_v31 = vrot.slane %v897_v22, 2  ;;  %v803_v32 = vpop.f32.mrf.mxu2  ;;  %v925_v34 = vadd.f32 %v924_v25, %v920_v8  ;;  %v10222_v10 = vld [vmem:[#allocation10 + $0x84] sm:$0xf] }
 0x195   :  { %v816_v35 = vpop.f32.mrf.mxu3  ;;  %2689 = vmatpush.bf16.msra.mxu1 %v8229_v15 }
 0x196   :  { %v935_v41 = vadd.f32 %v934_v30, %v933_v21  ;;  %v11298_v42 = vmul.f32 0.125, %v907_v29  ;;  %v899_v43 = vadd.f32 %v898_v31, %v897_v22  ;;  %v879_v44 = vpop.f32.mrf.mxu0  ;;  %v926_v48 = vrot.slane %v925_v34, 2  ;;  %v7554_v29 = vld [vmem:[#allocation10 + $0x220] sm:$0xf0] }
 0x197   :  { %v892_v49 = vpop.f32.mrf.mxu1  ;;  %v7365_v22 = vor.u32 %v10222_v10, %v7362_v16  ;;  %v10430_v35 = vld [vmem:[#allocation10 + $0x704] sm:$0xf]  ;;  %v7557_v45 = vor.u32 %v10270_v28, %v7554_v29 }
 0x198   :  { %v953_v54 = vmul.f32 0.125, %v935_v41  ;;  %v957_v56 = vmul.f32 %v11298_v42, %v11298_v42  ;;  %v900_v57 = vrot.slane %v899_v43, 1  ;;  %v927_v60 = vadd.f32 %v926_v48, %v925_v34  ;;  %v10366_v10 = vld [vmem:[#allocation10 + $0x504] sm:$0xf] }
 0x199   :  { %v11302_v61 = vadd.f32 %v892_v49, %v879_v44  ;;  %v8005_v34 = vor.u32 %v10382_v17, %v8002_v23  ;;  %2653 = vmatpush.bf16.msrb.mxu2 %v7365_v22  ;;  %v8197_v50 = vor.u32 %v10430_v35, %v8194_v36  ;;  %2668 = vmatpush.bf16.msrb.mxu3 %v7557_v45  ;;  %v10358_v28 = vld [vmem:[#allocation10 + $0x4c4] sm:$0xf] }
 0x19a   :  { %v961_v0 = vsub.f32 %v953_v54, %v957_v56  ;;  %v901_v1 = vadd.f32 %v900_v57, %v899_v43  ;;  %v928_v6 = vrot.slane %v927_v60, 1  ;;  %v7906_v29 = vld [vmem:[#allocation10 + $0x4e0] sm:$0xf0] }
 0x19b   :  { %v914_v55 = vrot.slane %v11302_v61, 4  ;;  %v923_v9 = vmul.f32 %v11302_v61, %v11302_v61  ;;  %2675 = vmatpush.bf16.msra.mxu0 %v8005_v34  ;;  %2690 = vmatpush.bf16.msra.mxu1 %v8197_v50  ;;  %v10406_v36 = vld [vmem:[#allocation10 + $0x644] sm:$0xf] }
 0x19c   :  { %v965_v11 = vmax.f32 %v961_v0, 0.0  ;;  %v11307_v12 = vmul.f32 0.125, %v901_v1  ;;  %v853_v8 = vpop.f32.mrf.mxu2  ;;  %v929_v18 = vadd.f32 %v928_v6, %v927_v60  ;;  %v10206_v0 = vld [vmem:[#allocation10 + $0x4] sm:$0xf] }
 0x19d   :  { %v915_v19 = vadd.f32 %v914_v55, %v11302_v61  ;;  %v942_v20 = vrot.slane %v923_v9, 4  ;;  %v866_v21 = vpop.f32.mrf.mxu3  ;;  %2654 = vmatpush.bf16.msrb.mxu2 %v7333_v58 }
 0x19e   :  { %v11310_v24 = vadd.f32 1e-05, %v965_v11  ;;  %v956_v25 = vmul.f32 %v11307_v12, %v11307_v12  ;;  %v11314_v26 = vadd.f32 %v866_v21, %v853_v8  ;;  %v881_v27 = vpop.f32.mrf.mxu0  ;;  %v952_v30 = vmul.f32 0.125, %v929_v18  ;;  %v7938_v11 = vld [vmem:[#allocation10 + $0x520] sm:$0xf0] }
 0x19f   :  { %v916_v31 = vrot.slane %v915_v19, 2  ;;  %v943_v32 = vadd.f32 %v942_v20, %v923_v9  ;;  %v894_v33 = vpop.f32.mrf.mxu1  ;;  %2676 = vmatpush.bf16.msra.mxu0 %v7973_v53  ;;  %2691 = vmatpush.bf16.msra.mxu1 %v8165_v13  ;;  %v10414_v18 = vld [vmem:[#allocation10 + $0x684] sm:$0xf]  ;;  %v7301_v21 = vor.u32 %v10206_v0, %v7298_v5  ;;  %v7941_v22 = vor.u32 %v10366_v10, %v7938_v11 }
 0x1a0   :  { %10929 = vrsqrt.f32 %v11310_v24  ;;  %v908_v37 = vrot.slane %v11314_v26, 4  ;;  %v922_v39 = vmul.f32 %v11314_v26, %v11314_v26  ;;  %v960_v41 = vsub.f32 %v952_v30, %v956_v25  ;;  %v10334_v11 = vld [vmem:[#allocation10 + $0x404] sm:$0xf] }
 0x1a1   :  { %v917_v43 = vadd.f32 %v916_v31, %v915_v19  ;;  %v944_v44 = vrot.slane %v943_v32, 2  ;;  %v8130_v19 = vld [vmem:[#allocation10 + $0x6a0] sm:$0xf0]  ;;  %2655 = vmatpush.bf16.msrb.mxu2 %v7301_v21  ;;  %vm992_vm7 = vweird.f32 %v11310_v24  ;;  %v7784_v21 = vld [vmem:[#allocation10 + $0x3c8] sm:$0xf] }
 0x1a2   :  { %v909_v48 = vadd.f32 %v908_v37, %v11314_v26  ;;  %v936_v49 = vrot.slane %v922_v39, 4  ;;  %v964_v54 = vmax.f32 %v960_v41, 0.0  ;;  %v11333_v31 = vld [vmem:[#allocation13 + $0x4] sm:$0xf]  ;;  %v8133_v33 = vor.u32 %v10414_v18, %v8130_v19 }
 0x1a3   :  { %v918_v56 = vrot.slane %v917_v43, 1  ;;  %v945_v57 = vadd.f32 %v944_v44, %v943_v32  ;;  %2677 = vmatpush.bf16.msra.mxu0 %v7941_v22  ;;  %v8098_v37 = vld [vmem:[#allocation10 + $0x660] sm:$0xf0]  ;;  %v1023_v45 = vperm.slane %v11333_v31, 1  ;;  %v10331_v22 = vld [vmem:[#allocation10 + $0x3e4] sm:$0xf0] }
 0x1a4   :  { %v910_v60 = vrot.slane %v909_v48, 2  ;;  %v937_v62 = vadd.f32 %v936_v49, %v922_v39  ;;  %v855_v63 = vpop.f32.mrf.mxu2  ;;  %v11321_v1 = vadd.f32 1e-05, %v964_v54  ;;  %2692 = vmatpush.bf16.msra.mxu1 %v8133_v33  ;;  %v10350_v44 = vld [vmem:[#allocation10 + $0x484] sm:$0xf]  ;;  %v8101_v54 = vor.u32 %v10406_v36, %v8098_v37 }
 0x1a5   :  { %v919_v3 = vadd.f32 %v918_v56, %v917_v43  ;;  %v946_v4 = vrot.slane %v945_v57, 1  ;;  %v868_v7 = vpop.f32.mrf.mxu3  ;;  %v7909_v43 = vor.u32 %v10358_v28, %v7906_v29  ;;  %v7874_v49 = vld [vmem:[#allocation10 + $0x4a0] sm:$0xf0] }
 0x1a6   :  { %v11323_v6 = vpop.eup %10929  ;;  %v911_v55 = vadd.f32 %v910_v60, %v909_v48  ;;  %v938_v9 = vrot.slane %v937_v62, 2  ;;  %10931 = vrsqrt.f32 %v11321_v1  ;;  %v10398_v56 = vld [vmem:[#allocation10 + $0x604] sm:$0xf]  ;;  %v7877_v60 = vor.u32 %v10350_v44, %v7874_v49  ;;  %v10267_v44 = vld [vmem:[#allocation10 + $0x1e4] sm:$0xf0] }
 0x1a7   :  { %v987_v8 = vmul.f32 %v11323_v6, %v11310_v24  ;;  %v947_v14 = vadd.f32 %v946_v4, %v945_v57  ;;  %v11328_v15 = vmul.f32 0.125, %v919_v3  ;;  %vm993_vm6 = vweird.f32 %v11323_v6  ;;  %2678 = vmatpush.bf16.msra.mxu0 %v7909_v43 }
 0x1a8   :  { %v912_v16 = vrot.slane %v911_v55, 1  ;;  %v939_v17 = vadd.f32 %v938_v9, %v937_v62  ;;  %v969_v57 = vsub.f32 %v11286_v38, %v11298_v42  ;;  %vm994_vm8 = vmor %vm992_vm7, %vm993_vm6  ;;  %v8066_v62 = vld [vmem:[#allocation10 + $0x620] sm:$0xf0]  ;;  %2693 = vmatpush.bf16.msra.mxu1 %v8101_v54  ;;  %v1037_v3 = vperm.slane %v11344_v51, 1 }
 0x1a9   :  { %v988_v20 = vmul.f32 %v11323_v6, %v987_v8  ;;  %v955_v23 = vmul.f32 0.125, %v947_v14  ;;  %v959_v25 = vmul.f32 %v11328_v15, %v11328_v15  ;;  %v8069_v53 = vor.u32 %v10398_v56, %v8066_v62  ;;  %v10342_v38 = vld [vmem:[#allocation10 + $0x444] sm:$0xf]  ;;  %v7496_v62 = vld [vmem:[#allocation10 + $0x188] sm:$0xf] }
 0x1aa   :  { %v913_v27 = vadd.f32 %v912_v16, %v911_v55  ;;  %v940_v32 = vrot.slane %v939_v17, 1  ;;  %v7842_v42 = vld [vmem:[#allocation10 + $0x460] sm:$0xf0]  ;;  %vm982_vm10 = vweird.f32 %v11321_v1  ;;  %v968_v14 = vsub.f32 %v11292_v2, %v11307_v12 }
 0x1ab   :  { %v989_v30 = vmul.f32 0.5, %v988_v20  ;;  %v963_v34 = vsub.f32 %v955_v23, %v959_v25  ;;  %2679 = vmatpush.bf16.msra.mxu0 %v7877_v60  ;;  %v7845_v13 = vor.u32 %v10342_v38, %v7842_v42  ;;  %v7810_v8 = vld [vmem:[#allocation10 + $0x420] sm:$0xf0]  ;;  %v1022_v16 = vperm.slane %v11333_v31, 0 }
 0x1ac   :  { %v11335_v35 = vmul.f32 0.125, %v913_v27  ;;  %v10932_v39 = vpop.eup %10931  ;;  %v941_v41 = vadd.f32 %v940_v32, %v939_v17  ;;  %2694 = vmatpush.bf16.msra.mxu1 %v8069_v53  ;;  %v7813_v17 = vor.u32 %v10334_v11, %v7810_v8  ;;  %v7785_v12 = vor.u32 %v10331_v22, %v7784_v21  ;;  %v10323_v32 = vld [vmem:[#allocation10 + $0x3a4] sm:$0xf0] }
 0x1ad   :  { %v990_v40 = vsub.f32 1.5, %v989_v30  ;;  %v977_v46 = vmul.f32 %v10932_v39, %v11321_v1  ;;  %v967_v47 = vmax.f32 %v963_v34, 0.0  ;;  %vm983_vm9 = vweird.f32 %v10932_v39  ;;  %v7752_v30 = vld [vmem:[#allocation10 + $0x388] sm:$0xf] }
 0x1ae   :  { %v958_v48 = vmul.f32 %v11335_v35, %v11335_v35  ;;  %v954_v52 = vmul.f32 0.125, %v941_v41  ;;  %vm984_vm11 = vmor %vm982_vm10, %vm983_vm9  ;;  %v1036_v1 = vperm.slane %v11344_v51, 0  ;;  %v7753_v43 = vor.u32 %v10323_v32, %v7752_v30  ;;  %v10299_v11 = vld [vmem:[#allocation10 + $0x2e4] sm:$0xf0] }
 0x1af   :  { %v991_v50 = vmul.f32 %v11323_v6, %v990_v40  ;;  %v978_v58 = vmul.f32 %v10932_v39, %v977_v46  ;;  %v11350_v59 = vadd.f32 1e-05, %v967_v47  ;;  %2680 = vmatpush.bf16.msra.mxu0 %v7845_v13  ;;  %v7720_v46 = vld [vmem:[#allocation10 + $0x348] sm:$0xf]  ;;  %v1039_v53 = vperm.slane %v11344_v51, 3 }
 0x1b0   :  { %v962_v24 = vsub.f32 %v954_v52, %v958_v48  ;;  %v10315_v47 = vld [vmem:[#allocation10 + $0x364] sm:$0xf0]  ;;  %v1025_v52 = vperm.slane %v11333_v31, 3  ;;  %v970_v38 = vsub.f32 %v11314_v26, %v11335_v35  ;;  %v1024_v42 = vperm.slane %v11333_v31, 2 }
 0x1b1   :  { %v995_v63 = vsel %vm994_vm8, %v11323_v6, %v991_v50  ;;  %v979_v4 = vmul.f32 0.5, %v978_v58  ;;  %10933 = vrsqrt.f32 %v11350_v59  ;;  %vm1012_vm13 = vweird.f32 %v11350_v59  ;;  %v7464_v13 = vld [vmem:[#allocation10 + $0x148] sm:$0xf] }
 0x1b2   :  { %v1017_v0 = vmul.f32 %v995_v63, %v969_v57  ;;  %v966_v7 = vmax.f32 %v962_v24, 0.0  ;;  %v971_v50 = vsub.f32 %v11302_v61, %v11328_v15  ;;  %v7721_v60 = vor.u32 %v10315_v47, %v7720_v46  ;;  %v10259_v63 = vld [vmem:[#allocation10 + $0x1a4] sm:$0xf0] }
 0x1b3   :  { %v980_v55 = vsub.f32 1.5, %v979_v4  ;;  %2681 = vmatpush.bf16.msra.mxu0 %v7813_v17  ;;  %v7497_v4 = vor.u32 %v10259_v63, %v7496_v62  ;;  %v8296_v17 = vld [vmem:[#allocation10 + $0x7c8] sm:$0xf]  ;;  %v7786_v62 = vld [vmem:[#allocation10 + $0x3e8] sm:$0xf0] }
 0x1b4   :  { %v1031_v5 = vmul.f32 %v1023_v45, %v1017_v0  ;;  %v11355_v9 = vadd.f32 1e-05, %v966_v7  ;;  %v7432_v31 = vld [vmem:[#allocation10 + $0x108] sm:$0xf] }
 0x1b5   :  { %v981_v10 = vmul.f32 %v10932_v39, %v980_v55  ;;  %v7624_v21 = vld [vmem:[#allocation10 + $0x288] sm:$0xf] }
 0x1b6   :  { %v1045_v6 = vadd.f32 %v1037_v3, %v1031_v5  ;;  %10935 = vrsqrt.f32 %v11355_v9  ;;  %v10307_v3 = vld [vmem:[#allocation10 + $0x324] sm:$0xf0]  ;;  %vm1002_vm0 = vweird.f32 %v11355_v9 }
 0x1b7   :  { %v10934_v18 = vpop.eup %10933  ;;  %v985_v20 = vsel %vm984_vm11, %v10932_v39, %v981_v10  ;;  %v7528_v39 = vld [vmem:[#allocation10 + $0x1c8] sm:$0xf] }
 0x1b8   :  { %v1049_v19 = vmul.f32 0.2, %v1045_v6  ;;  %v1016_v23 = vmul.f32 %v985_v20, %v968_v14  ;;  %v1007_v25 = vmul.f32 %v10934_v18, %v11350_v59  ;;  %vm1013_vm12 = vweird.f32 %v10934_v18  ;;  %v7688_v59 = vld [vmem:[#allocation10 + $0x308] sm:$0xf] }
 0x1b9   :  { %vm1014_vm14 = vmor %vm1012_vm13, %vm1013_vm12  ;;  %v7529_v56 = vor.u32 %v10267_v44, %v7528_v39  ;;  %v7689_v7 = vor.u32 %v10307_v3, %v7688_v59  ;;  %v10251_v5 = vld [vmem:[#allocation10 + $0x164] sm:$0xf0]  ;;  %v1038_v14 = vperm.slane %v11344_v51, 2 }
 0x1ba   :  { %v1053_v27 = vmax.f32 %v1045_v6, %v1049_v19  ;;  %v1030_v28 = vmul.f32 %v1022_v16, %v1016_v23  ;;  %v1008_v2 = vmul.f32 %v10934_v18, %v1007_v25  ;;  %v7656_v10 = vld [vmem:[#allocation10 + $0x2c8] sm:$0xf]  ;;  %v7465_v16 = vor.u32 %v10251_v5, %v7464_v13  ;;  %v7754_v13 = vld [vmem:[#allocation10 + $0x3a8] sm:$0xf0] }
 0x1bb   :  { %v7657_v35 = vor.u32 %v10299_v11, %v7656_v10  ;;  %v10243_v19 = vld [vmem:[#allocation10 + $0x124] sm:$0xf0] }
 0x1bc   :  { %v11364_v29 = vpack.c.bf16 %v1053_v27, %v1053_v27  ;;  %v10936_v33 = vpop.eup %10935  ;;  %v1044_v34 = vadd.f32 %v1036_v1, %v1030_v28  ;;  %v1009_v36 = vmul.f32 0.5, %v1008_v2  ;;  %v10291_v22 = vld [vmem:[#allocation10 + $0x2a4] sm:$0xf0]  ;;  %v7433_v51 = vor.u32 %v10243_v19, %v7432_v31  ;;  %v7722_v31 = vld [vmem:[#allocation10 + $0x368] sm:$0xf0] }
 0x1bd   :  { %v997_v37 = vmul.f32 %v10936_v33, %v11355_v9  ;;  %vm1003_vm15 = vweird.f32 %v10936_v33  ;;  %v8264_v27 = vld [vmem:[#allocation10 + $0x788] sm:$0xf]  ;;  %v7625_v30 = vor.u32 %v10291_v22, %v7624_v21 }
 0x1be   :  { %2617 = vmatmul.bf16.vlgmr.msra.gmra.mxu3 %v11364_v29  ;;  %v1048_v40 = vmul.f32 0.2, %v1044_v34  ;;  %v1010_v41 = vsub.f32 1.5, %v1009_v36  ;;  %vm1004_vm1 = vmor %vm1002_vm0, %vm1003_vm15  ;;  %v10451_v28 = vld [vmem:[#allocation10 + $0x7a4] sm:$0xf0] }
 0x1bf   :  { %2713 = vmatpush.bf16.msra.mxu3 %v7785_v12  ;;  %v998_v45 = vmul.f32 %v10936_v33, %v997_v37  ;;  %v7400_v2 = vld [vmem:[#allocation10 + $0xc8] sm:$0xf] }
 0x1c0   :  { %v1052_v48 = vmax.f32 %v1044_v34, %v1048_v40  ;;  %v1011_v49 = vmul.f32 %v10934_v18, %v1010_v41  ;;  %v8040_v32 = vld [vmem:[#allocation10 + $0x5c8] sm:$0xf]  ;;  %v8265_v40 = vor.u32 %v10451_v28, %v8264_v27  ;;  %v10255_v28 = vld [vmem:[#allocation10 + $0x18c] sm:$0xf] }
 0x1c1   :  { %v999_v54 = vmul.f32 0.5, %v998_v45  ;;  %v10235_v34 = vld [vmem:[#allocation10 + $0xe4] sm:$0xf0] }
 0x1c2   :  { %v11372_v57 = vpack.c.bf16 %v1052_v48, %v1052_v48  ;;  %v1015_v58 = vsel %vm1014_vm14, %v10934_v18, %v1011_v49  ;;  %v10459_v18 = vld [vmem:[#allocation10 + $0x7e4] sm:$0xf0]  ;;  %v7401_v46 = vor.u32 %v10235_v34, %v7400_v2 }
 0x1c3   :  { %2714 = vmatpush.bf16.msra.mxu3 %v7753_v43  ;;  %v1019_v24 = vmul.f32 %v1015_v58, %v971_v50  ;;  %v1000_v0 = vsub.f32 1.5, %v999_v54  ;;  %v8297_v1 = vor.u32 %v10459_v18, %v8296_v17  ;;  %v7592_v36 = vld [vmem:[#allocation10 + $0x248] sm:$0xf]  ;;  %v10263_v17 = vld [vmem:[#allocation10 + $0x1cc] sm:$0xf] }
 0x1c4   :  { %2604 = vmatmul.bf16.vlgmr.msra.gmra.mxu2 %v11372_v57  ;;  %v10283_v37 = vld [vmem:[#allocation10 + $0x264] sm:$0xf0] }
 0x1c5   :  { %v1033_v61 = vmul.f32 %v1025_v52, %v1019_v24  ;;  %v1001_v15 = vmul.f32 %v10936_v33, %v1000_v0  ;;  %2700 = vmatpush.bf16.msra.mxu2 %v7529_v56  ;;  %v8232_v43 = vld [vmem:[#allocation10 + $0x748] sm:$0xf]  ;;  %v7593_v47 = vor.u32 %v10283_v37, %v7592_v36 }
 0x1c6   :  { %v10443_v44 = vld [vmem:[#allocation10 + $0x764] sm:$0xf0] }
 0x1c7   :  { %2715 = vmatpush.bf16.msra.mxu3 %v7721_v60  ;;  %v1047_v55 = vadd.f32 %v1039_v53, %v1033_v61  ;;  %v1005_v6 = vsel %vm1004_vm1, %v10936_v33, %v1001_v15  ;;  %v10395_v33 = vld [vmem:[#allocation10 + $0x5e4] sm:$0xf0]  ;;  %v8233_v58 = vor.u32 %v10443_v44, %v8232_v43  ;;  %v10327_v60 = vld [vmem:[#allocation10 + $0x3cc] sm:$0xf] }
 0x1c8   :  { %v1018_v8 = vmul.f32 %v1005_v6, %v970_v38  ;;  %v8041_v41 = vor.u32 %v10395_v33, %v8040_v32  ;;  %v7368_v48 = vld [vmem:[#allocation10 + $0x88] sm:$0xf]  ;;  %v7789_v15 = vor.u32 %v10327_v60, %v7786_v62  ;;  %v7690_v32 = vld [vmem:[#allocation10 + $0x328] sm:$0xf0] }
 0x1c9   :  { %v1051_v9 = vmul.f32 0.2, %v1047_v55  ;;  %2701 = vmatpush.bf16.msra.mxu2 %v7497_v4  ;;  %v8008_v49 = vld [vmem:[#allocation10 + $0x588] sm:$0xf]  ;;  %v10247_v43 = vld [vmem:[#allocation10 + $0x14c] sm:$0xf] }
 0x1ca   :  { %v1032_v26 = vmul.f32 %v1024_v42, %v1018_v8  ;;  %v10387_v50 = vld [vmem:[#allocation10 + $0x5a4] sm:$0xf0] }
 0x1cb   :  { %2716 = vmatpush.bf16.msra.mxu3 %v7689_v7  ;;  %v1055_v20 = vmax.f32 %v1047_v55, %v1051_v9  ;;  %v10227_v52 = vld [vmem:[#allocation10 + $0xa4] sm:$0xf0]  ;;  %v8009_v63 = vor.u32 %v10387_v50, %v8008_v49  ;;  %v10319_v7 = vld [vmem:[#allocation10 + $0x38c] sm:$0xf] }
 0x1cc   :  { %v1046_v23 = vadd.f32 %v1038_v14, %v1032_v26  ;;  %v7560_v54 = vld [vmem:[#allocation10 + $0x208] sm:$0xf]  ;;  %v7369_v0 = vor.u32 %v10227_v52, %v7368_v48  ;;  %v7757_v14 = vor.u32 %v10319_v7, %v7754_v13  ;;  %v7530_v26 = vld [vmem:[#allocation10 + $0x1e8] sm:$0xf0] }
 0x1cd   :  { %v11381_v25 = vpack.c.bf16 %v1055_v20, %v1055_v20  ;;  %2702 = vmatpush.bf16.msra.mxu2 %v7465_v16  ;;  %v10275_v56 = vld [vmem:[#allocation10 + $0x224] sm:$0xf0]  ;;  %v7658_v48 = vld [vmem:[#allocation10 + $0x2e8] sm:$0xf0] }
 0x1ce   :  { %2669 = vmatmul.bf16.vlgmr.msrb.gmra.mxu3 %v11364_v29  ;;  %v1050_v12 = vmul.f32 0.2, %v1046_v23  ;;  %v8200_v24 = vld [vmem:[#allocation10 + $0x708] sm:$0xf]  ;;  %v7561_v59 = vor.u32 %v10275_v56, %v7560_v54  ;;  %v10455_v54 = vld [vmem:[#allocation10 + $0x7cc] sm:$0xf] }
 0x1cf   :  { %2717 = vmatpush.bf16.msra.mxu3 %v7657_v35  ;;  %2643 = vmatmul.bf16.vlgmr.msrb.gmra.mxu1 %v11381_v25  ;;  %v10435_v53 = vld [vmem:[#allocation10 + $0x724] sm:$0xf0]  ;;  %v10311_v35 = vld [vmem:[#allocation10 + $0x34c] sm:$0xf] }
 0x1d0   :  { %v1054_v39 = vmax.f32 %v1046_v23, %v1050_v12  ;;  %2739 = vmatpush.bf16.msrb.mxu1 %v8297_v1  ;;  %v7976_v3 = vld [vmem:[#allocation10 + $0x548] sm:$0xf]  ;;  %v8201_v42 = vor.u32 %v10435_v53, %v8200_v24  ;;  %v7725_v27 = vor.u32 %v10311_v35, %v7722_v31  ;;  %v7498_v12 = vld [vmem:[#allocation10 + $0x1a8] sm:$0xf0] }
 0x1d1   :  { %2703 = vmatpush.bf16.msra.mxu2 %v7433_v51  ;;  %v10379_v61 = vld [vmem:[#allocation10 + $0x564] sm:$0xf0]  ;;  %v7533_v51 = vor.u32 %v10263_v17, %v7530_v26  ;;  %v8298_v56 = vld [vmem:[#allocation10 + $0x7e8] sm:$0xf0] }
 0x1d2   :  { %v11385_v45 = vpack.c.bf16 %v1054_v39, %v1054_v39  ;;  %v7336_v4 = vld [vmem:[#allocation10 + $0x48] sm:$0xf]  ;;  %v7977_v5 = vor.u32 %v10379_v61, %v7976_v3  ;;  %v10239_v53 = vld [vmem:[#allocation10 + $0x10c] sm:$0xf] }
 0x1d3   :  { %2718 = vmatpush.bf16.msra.mxu3 %v7625_v30  ;;  %v10219_v38 = vld [vmem:[#allocation10 + $0x64] sm:$0xf0]  ;;  %v10303_v30 = vld [vmem:[#allocation10 + $0x30c] sm:$0xf] }
 0x1d4   :  { %2740 = vmatpush.bf16.msrb.mxu1 %v8265_v40  ;;  %2630 = vmatmul.bf16.vlgmr.msrb.gmra.mxu0 %v11385_v45  ;;  %v8168_v55 = vld [vmem:[#allocation10 + $0x6c8] sm:$0xf]  ;;  %v7337_v10 = vor.u32 %v10219_v38, %v7336_v4  ;;  %v7501_v40 = vor.u32 %v10255_v28, %v7498_v12  ;;  %v10287_v61 = vld [vmem:[#allocation10 + $0x28c] sm:$0xf]  ;;  %v7792_v12 = vld [vmem:[#allocation10 + $0x3d0] sm:$0xf] }
 0x1d5   :  { %2656 = vmatmul.bf16.vlgmr.msrb.gmra.mxu2 %v11372_v57  ;;  %2726 = vmatpush.bf16.msrb.mxu0 %v8041_v41  ;;  %v10427_v6 = vld [vmem:[#allocation10 + $0x6e4] sm:$0xf0]  ;;  %v7693_v41 = vor.u32 %v10303_v30, %v7690_v32  ;;  %v10447_v4 = vld [vmem:[#allocation10 + $0x78c] sm:$0xf]  ;;  %v10332_v30 = vld [vmem:[#allocation10 + $0x3ec] sm:$0xf0] }
 0x1d6   :  { %2704 = vmatpush.bf16.msra.mxu2 %v7401_v46  ;;  %v7944_v11 = vld [vmem:[#allocation10 + $0x508] sm:$0xf]  ;;  %v8169_v18 = vor.u32 %v10427_v6, %v8168_v55  ;;  %v7466_v46 = vld [vmem:[#allocation10 + $0x168] sm:$0xf0] }
 0x1d7   :  { %2719 = vmatpush.bf16.msra.mxu3 %v7593_v47  ;;  %v10371_v8 = vld [vmem:[#allocation10 + $0x524] sm:$0xf0]  ;;  %v10295_v47 = vld [vmem:[#allocation10 + $0x2cc] sm:$0xf]  ;;  %v7469_v62 = vor.u32 %v10247_v43, %v7466_v46 }
 0x1d8   :  { %2741 = vmatpush.bf16.msrb.mxu1 %v8233_v58  ;;  %v7304_v9 = vld [vmem:[#allocation10 + $0x8] sm:$0xf]  ;;  %v7945_v19 = vor.u32 %v10371_v8, %v7944_v11  ;;  %v8266_v38 = vld [vmem:[#allocation10 + $0x7a8] sm:$0xf0] }
 0x1d9   :  { %2727 = vmatpush.bf16.msrb.mxu0 %v8009_v63  ;;  %v10211_v16 = vld [vmem:[#allocation10 + $0x24] sm:$0xf0]  ;;  %v7661_v63 = vor.u32 %v10295_v47, %v7658_v48  ;;  %v8042_v55 = vld [vmem:[#allocation10 + $0x5e8] sm:$0xf0]  ;;  %v8269_v8 = vor.u32 %v10447_v4, %v8266_v38  ;;  %v7760_v47 = vld [vmem:[#allocation10 + $0x390] sm:$0xf] }
 0x1da   :  { %2705 = vmatpush.bf16.msra.mxu2 %v7369_v0  ;;  %v8136_v20 = vld [vmem:[#allocation10 + $0x688] sm:$0xf]  ;;  %v7305_v22 = vor.u32 %v10211_v16, %v7304_v9  ;;  %v7434_v0 = vld [vmem:[#allocation10 + $0x128] sm:$0xf0]  ;;  %v10324_v48 = vld [vmem:[#allocation10 + $0x3ac] sm:$0xf0] }
 0x1db   :  { %2720 = vmatpush.bf16.msra.mxu3 %v7561_v59  ;;  %v10419_v21 = vld [vmem:[#allocation10 + $0x6a4] sm:$0xf0]  ;;  %v8301_v59 = vor.u32 %v10455_v54, %v8298_v56  ;;  %v7437_v13 = vor.u32 %v10239_v53, %v7434_v0  ;;  %v7402_v11 = vld [vmem:[#allocation10 + $0xe8] sm:$0xf0] }
 0x1dc   :  { %2742 = vmatpush.bf16.msrb.mxu1 %v8201_v42  ;;  %v7912_v23 = vld [vmem:[#allocation10 + $0x4c8] sm:$0xf]  ;;  %v8137_v2 = vor.u32 %v10419_v21, %v8136_v20  ;;  %v10279_v9 = vld [vmem:[#allocation10 + $0x24c] sm:$0xf] }
 0x1dd   :  { %2728 = vmatpush.bf16.msrb.mxu0 %v7977_v5  ;;  %v10363_v1 = vld [vmem:[#allocation10 + $0x4e4] sm:$0xf0]  ;;  %v10391_v5 = vld [vmem:[#allocation10 + $0x5cc] sm:$0xf] }
 0x1de   :  { %2721 = vmatmul.bf16.vlgmr.msra.gmra.mxu3 %v11364_v29  ;;  %2706 = vmatpush.bf16.msra.mxu2 %v7337_v10  ;;  %v7913_v33 = vor.u32 %v10363_v1, %v7912_v23  ;;  %v8104_v34 = vld [vmem:[#allocation10 + $0x648] sm:$0xf]  ;;  %v10231_v10 = vld [vmem:[#allocation10 + $0xcc] sm:$0xf]  ;;  %v8045_v17 = vor.u32 %v10391_v5, %v8042_v55  ;;  %v10260_v5 = vld [vmem:[#allocation10 + $0x1ac] sm:$0xf0] }
 0x1df   :  { %2765 = vmatpush.bf16.msrb.mxu3 %v7789_v15  ;;  %2695 = vmatmul.bf16.vlgmr.msra.gmra.mxu1 %v11381_v25  ;;  %v10411_v36 = vld [vmem:[#allocation10 + $0x664] sm:$0xf0]  ;;  %v7626_v15 = vld [vmem:[#allocation10 + $0x2a8] sm:$0xf0]  ;;  %v7405_v35 = vor.u32 %v10231_v10, %v7402_v11  ;;  %v7696_v11 = vld [vmem:[#allocation10 + $0x310] sm:$0xf] }
 0x1e0   :  { %2743 = vmatpush.bf16.msrb.mxu1 %v8169_v18  ;;  %v7880_v37 = vld [vmem:[#allocation10 + $0x488] sm:$0xf]  ;;  %v8105_v44 = vor.u32 %v10411_v36, %v8104_v34  ;;  %v7629_v6 = vor.u32 %v10287_v61, %v7626_v15  ;;  %v7594_v16 = vld [vmem:[#allocation10 + $0x268] sm:$0xf0] }
 0x1e1   :  { %2729 = vmatpush.bf16.msrb.mxu0 %v7945_v19  ;;  %v10355_v39 = vld [vmem:[#allocation10 + $0x4a4] sm:$0xf0]  ;;  %v10439_v18 = vld [vmem:[#allocation10 + $0x74c] sm:$0xf]  ;;  %v7597_v20 = vor.u32 %v10279_v9, %v7594_v16 }
 0x1e2   :  { %2707 = vmatpush.bf16.msra.mxu2 %v7305_v22  ;;  %v7881_v49 = vor.u32 %v10355_v39, %v7880_v37  ;;  %v8072_v50 = vld [vmem:[#allocation10 + $0x608] sm:$0xf]  ;;  %v8234_v26 = vld [vmem:[#allocation10 + $0x768] sm:$0xf0] }
 0x1e3   :  { %2766 = vmatpush.bf16.msrb.mxu3 %v7757_v14  ;;  %v10403_v52 = vld [vmem:[#allocation10 + $0x624] sm:$0xf0]  ;;  %v10383_v31 = vld [vmem:[#allocation10 + $0x58c] sm:$0xf]  ;;  %v8237_v23 = vor.u32 %v10439_v18, %v8234_v26 }
 0x1e4   :  { %2744 = vmatpush.bf16.msrb.mxu1 %v8137_v2  ;;  %2682 = vmatmul.bf16.vlgmr.msra.gmra.mxu0 %v11385_v45  ;;  %v7848_v58 = vld [vmem:[#allocation10 + $0x448] sm:$0xf]  ;;  %v8073_v24 = vor.u32 %v10403_v52, %v8072_v50  ;;  %v8010_v19 = vld [vmem:[#allocation10 + $0x5a8] sm:$0xf0] }
 0x1e5   :  { %2708 = vmatmul.bf16.vlgmr.msra.gmra.mxu2 %v11372_v57  ;;  %2730 = vmatpush.bf16.msrb.mxu0 %v7913_v33  ;;  %v10347_v60 = vld [vmem:[#allocation10 + $0x464] sm:$0xf0]  ;;  %v10223_v21 = vld [vmem:[#allocation10 + $0x8c] sm:$0xf]  ;;  %v8013_v28 = vor.u32 %v10383_v31, %v8010_v19 }
 0x1e6   :  { %2752 = vmatpush.bf16.msrb.mxu2 %v7533_v51  ;;  %v7849_v3 = vor.u32 %v10347_v60, %v7848_v58  ;;  %v7816_v42 = vld [vmem:[#allocation10 + $0x408] sm:$0xf]  ;;  %v7370_v22 = vld [vmem:[#allocation10 + $0xa8] sm:$0xf0]  ;;  %v7761_v60 = vor.u32 %v10324_v48, %v7760_v47  ;;  %v10396_v47 = vld [vmem:[#allocation10 + $0x5ec] sm:$0xf0] }
 0x1e7   :  { %2767 = vmatpush.bf16.msrb.mxu3 %v7725_v27  ;;  %v10339_v7 = vld [vmem:[#allocation10 + $0x424] sm:$0xf0]  ;;  %v10271_v1 = vld [vmem:[#allocation10 + $0x20c] sm:$0xf]  ;;  %v7373_v32 = vor.u32 %v10223_v21, %v7370_v22  ;;  %v7664_v21 = vld [vmem:[#allocation10 + $0x2d0] sm:$0xf] }
 0x1e8   :  { %2745 = vmatpush.bf16.msrb.mxu1 %v8105_v44  ;;  %v7817_v14 = vor.u32 %v10339_v7, %v7816_v42  ;;  %v7562_v51 = vld [vmem:[#allocation10 + $0x228] sm:$0xf0]  ;;  %v10300_v22 = vld [vmem:[#allocation10 + $0x2ec] sm:$0xf0] }
 0x1e9   :  { %2731 = vmatpush.bf16.msrb.mxu0 %v7881_v49  ;;  %v10431_v27 = vld [vmem:[#allocation10 + $0x70c] sm:$0xf]  ;;  %v7565_v36 = vor.u32 %v10271_v1, %v7562_v51  ;;  %v10460_v1 = vld [vmem:[#allocation10 + $0x7ec] sm:$0xf0] }
 0x1ea   :  { %2753 = vmatpush.bf16.msrb.mxu2 %v7501_v40  ;;  %v8202_v2 = vld [vmem:[#allocation10 + $0x728] sm:$0xf0] }
 0x1eb   :  { %2768 = vmatpush.bf16.msrb.mxu3 %v7693_v41  ;;  %v10375_v33 = vld [vmem:[#allocation10 + $0x54c] sm:$0xf]  ;;  %v8205_v40 = vor.u32 %v10431_v27, %v8202_v2  ;;  %v7793_v41 = vor.u32 %v10332_v30, %v7792_v12  ;;  %v7665_v12 = vor.u32 %v10300_v22, %v7664_v21  ;;  %v7440_v30 = vld [vmem:[#allocation10 + $0x110] sm:$0xf] }
 0x1ec   :  { %2746 = vmatpush.bf16.msrb.mxu1 %v8073_v24  ;;  %v7978_v34 = vld [vmem:[#allocation10 + $0x568] sm:$0xf0]  ;;  %v7952_v21 = vld [vmem:[#allocation10 + $0x510] sm:$0xf] }
 0x1ed   :  { %2732 = vmatpush.bf16.msrb.mxu0 %v7849_v3  ;;  %v10215_v37 = vld [vmem:[#allocation10 + $0x4c] sm:$0xf]  ;;  %v7981_v44 = vor.u32 %v10375_v33, %v7978_v34  ;;  %v10316_v3 = vld [vmem:[#allocation10 + $0x36c] sm:$0xf0] }
 0x1ee   :  { %2754 = vmatpush.bf16.msrb.mxu2 %v7469_v62  ;;  %v7338_v39 = vld [vmem:[#allocation10 + $0x68] sm:$0xf0]  ;;  %v7536_v62 = vld [vmem:[#allocation10 + $0x1d0] sm:$0xf] }
 0x1ef   :  { %2769 = vmatpush.bf16.msrb.mxu3 %v7661_v63  ;;  %2747 = vmatmul.bf16.vlgmr.msrb.gmra.mxu1 %v11381_v25  ;;  %v10423_v43 = vld [vmem:[#allocation10 + $0x6cc] sm:$0xf]  ;;  %v7341_v49 = vor.u32 %v10215_v37, %v7338_v39  ;;  %v10268_v63 = vld [vmem:[#allocation10 + $0x1ec] sm:$0xf0] }
 0x1f0   :  { %2791 = vmatpush.bf16.msra.mxu1 %v8301_v59  ;;  %v8170_v46 = vld [vmem:[#allocation10 + $0x6e8] sm:$0xf0]  ;;  %v7728_v59 = vld [vmem:[#allocation10 + $0x350] sm:$0xf]  ;;  %v7537_v38 = vor.u32 %v10268_v63, %v7536_v62 }
 0x1f1   :  { %2733 = vmatpush.bf16.msrb.mxu0 %v7817_v14  ;;  %v10367_v50 = vld [vmem:[#allocation10 + $0x50c] sm:$0xf]  ;;  %v8173_v58 = vor.u32 %v10423_v43, %v8170_v46  ;;  %v7729_v7 = vor.u32 %v10316_v3, %v7728_v59  ;;  %v10292_v37 = vld [vmem:[#allocation10 + $0x2ac] sm:$0xf0] }
 0x1f2   :  { %2755 = vmatpush.bf16.msrb.mxu2 %v7437_v13  ;;  %v7946_v52 = vld [vmem:[#allocation10 + $0x528] sm:$0xf0]  ;;  %v7504_v13 = vld [vmem:[#allocation10 + $0x190] sm:$0xf] }
 0x1f3   :  { %2770 = vmatpush.bf16.msrb.mxu3 %v7629_v6  ;;  %v10207_v54 = vld [vmem:[#allocation10 + $0xc] sm:$0xf]  ;;  %v7949_v53 = vor.u32 %v10367_v50, %v7946_v52  ;;  %v7505_v16 = vor.u32 %v10260_v5, %v7504_v13  ;;  %v8272_v39 = vld [vmem:[#allocation10 + $0x790] sm:$0xf]  ;;  %v10328_v5 = vld [vmem:[#allocation10 + $0x3d4] sm:$0xf] }
 0x1f4   :  { %2792 = vmatpush.bf16.msra.mxu1 %v8269_v8  ;;  %2734 = vmatmul.bf16.vlgmr.msrb.gmra.mxu0 %v11385_v45  ;;  %v7306_v56 = vld [vmem:[#allocation10 + $0x28] sm:$0xf0]  ;;  %v10308_v8 = vld [vmem:[#allocation10 + $0x32c] sm:$0xf0] }
 0x1f5   :  { %2778 = vmatpush.bf16.msra.mxu0 %v8045_v17  ;;  %v10415_v24 = vld [vmem:[#allocation10 + $0x68c] sm:$0xf]  ;;  %v7309_v61 = vor.u32 %v10207_v54, %v7306_v56  ;;  %v7472_v17 = vld [vmem:[#allocation10 + $0x150] sm:$0xf]  ;;  %v7697_v26 = vor.u32 %v10308_v8, %v7696_v11 }
 0x1f6   :  { %2756 = vmatpush.bf16.msrb.mxu2 %v7405_v35  ;;  %v8138_v0 = vld [vmem:[#allocation10 + $0x6a8] sm:$0xf0]  ;;  %v10252_v35 = vld [vmem:[#allocation10 + $0x16c] sm:$0xf0] }
 0x1f7   :  { %2771 = vmatpush.bf16.msrb.mxu3 %v7597_v20  ;;  %v10359_v15 = vld [vmem:[#allocation10 + $0x4cc] sm:$0xf]  ;;  %v8141_v42 = vor.u32 %v10415_v24, %v8138_v0  ;;  %v8048_v46 = vld [vmem:[#allocation10 + $0x5d0] sm:$0xf] }
 0x1f8   :  { %2793 = vmatpush.bf16.msra.mxu1 %v8237_v23  ;;  %v7914_v4 = vld [vmem:[#allocation10 + $0x4e8] sm:$0xf0]  ;;  %v8304_v23 = vld [vmem:[#allocation10 + $0x7d0] sm:$0xf] }
 0x1f9   :  { %2779 = vmatpush.bf16.msra.mxu0 %v8013_v28  ;;  %v10407_v55 = vld [vmem:[#allocation10 + $0x64c] sm:$0xf]  ;;  %v7917_v6 = vor.u32 %v10359_v15, %v7914_v4  ;;  %v7473_v28 = vor.u32 %v10252_v35, %v7472_v17  ;;  %v8305_v33 = vor.u32 %v10460_v1, %v8304_v23  ;;  %v10236_v50 = vld [vmem:[#allocation10 + $0xec] sm:$0xf0] }
 0x1fa   :  { %2757 = vmatpush.bf16.msrb.mxu2 %v7373_v32  ;;  %v8106_v10 = vld [vmem:[#allocation10 + $0x668] sm:$0xf0]  ;;  %v10244_v32 = vld [vmem:[#allocation10 + $0x12c] sm:$0xf0] }
 0x1fb   :  { %2772 = vmatpush.bf16.msrb.mxu3 %v7565_v36  ;;  %v10351_v14 = vld [vmem:[#allocation10 + $0x48c] sm:$0xf]  ;;  %v8109_v18 = vor.u32 %v10407_v55, %v8106_v10  ;;  %v7632_v36 = vld [vmem:[#allocation10 + $0x290] sm:$0xf]  ;;  %v7794_v55 = vld [vmem:[#allocation10 + $0x3f0] sm:$0xf0] }
 0x1fc   :  { %2794 = vmatpush.bf16.msra.mxu1 %v8205_v40  ;;  %v7882_v9 = vld [vmem:[#allocation10 + $0x4a8] sm:$0xf0]  ;;  %v10452_v40 = vld [vmem:[#allocation10 + $0x7ac] sm:$0xf0]  ;;  %v7633_v48 = vor.u32 %v10292_v37, %v7632_v36  ;;  %v7797_v17 = vor.u32 %v10328_v5, %v7794_v55  ;;  %v10240_v55 = vld [vmem:[#allocation10 + $0x114] sm:$0xf] }
 0x1fd   :  { %2780 = vmatpush.bf16.msra.mxu0 %v7981_v44  ;;  %v10399_v31 = vld [vmem:[#allocation10 + $0x60c] sm:$0xf]  ;;  %v7885_v20 = vor.u32 %v10351_v14, %v7882_v9  ;;  %v7441_v44 = vor.u32 %v10244_v32, %v7440_v30  ;;  %v8273_v52 = vor.u32 %v10452_v40, %v8272_v39  ;;  %v7600_v56 = vld [vmem:[#allocation10 + $0x250] sm:$0xf] }
 0x1fe   :  { %2758 = vmatpush.bf16.msrb.mxu2 %v7341_v49  ;;  %2773 = vmatmul.bf16.vlgmr.msrb.gmra.mxu3 %v11364_v29  ;;  %v8074_v19 = vld [vmem:[#allocation10 + $0x628] sm:$0xf0]  ;;  %v7408_v49 = vld [vmem:[#allocation10 + $0xd0] sm:$0xf] }
 0x1ff   :  { %2817 = vmatpush.bf16.msra.mxu3 %v7793_v41  ;;  %v10343_v51 = vld [vmem:[#allocation10 + $0x44c] sm:$0xf]  ;;  %v8077_v2 = vor.u32 %v10399_v31, %v8074_v19  ;;  %v8240_v62 = vld [vmem:[#allocation10 + $0x750] sm:$0xf]  ;;  %v7409_v24 = vor.u32 %v10236_v50, %v7408_v49  ;;  %v10320_v31 = vld [vmem:[#allocation10 + $0x394] sm:$0xf] }
 0x200   :  { %2795 = vmatpush.bf16.msra.mxu1 %v8173_v58  ;;  %v7850_v27 = vld [vmem:[#allocation10 + $0x468] sm:$0xf0]  ;;  %v10284_v58 = vld [vmem:[#allocation10 + $0x26c] sm:$0xf0]  ;;  %v7762_v19 = vld [vmem:[#allocation10 + $0x3b0] sm:$0xf0] }
 0x201   :  { %2781 = vmatpush.bf16.msra.mxu0 %v7949_v53  ;;  %v7853_v34 = vor.u32 %v10343_v51, %v7850_v27  ;;  %v10335_v41 = vld [vmem:[#allocation10 + $0x40c] sm:$0xf]  ;;  %v10444_v63 = vld [vmem:[#allocation10 + $0x76c] sm:$0xf0]  ;;  %v7601_v59 = vor.u32 %v10284_v58, %v7600_v56  ;;  %v7765_v27 = vor.u32 %v10320_v31, %v7762_v19  ;;  %v10304_v50 = vld [vmem:[#allocation10 + $0x314] sm:$0xf] }
 0x202   :  { %2759 = vmatpush.bf16.msrb.mxu2 %v7309_v61  ;;  %v7818_v43 = vld [vmem:[#allocation10 + $0x428] sm:$0xf0]  ;;  %v8016_v53 = vld [vmem:[#allocation10 + $0x590] sm:$0xf]  ;;  %v8241_v15 = vor.u32 %v10444_v63, %v8240_v62  ;;  %v8050_v31 = vld [vmem:[#allocation10 + $0x5f0] sm:$0xf0] }
 0x203   :  { %2818 = vmatpush.bf16.msra.mxu3 %v7761_v60  ;;  %v7821_v54 = vor.u32 %v10335_v41, %v7818_v43  ;;  %v8049_v60 = vor.u32 %v10396_v47, %v8048_v46  ;;  %v10388_v0 = vld [vmem:[#allocation10 + $0x5ac] sm:$0xf0]  ;;  %v7506_v46 = vld [vmem:[#allocation10 + $0x1b0] sm:$0xf0] }
 0x204   :  { %2796 = vmatpush.bf16.msra.mxu1 %v8141_v42  ;;  %v7376_v3 = vld [vmem:[#allocation10 + $0x90] sm:$0xf] }
 0x205   :  { %2760 = vmatmul.bf16.vlgmr.msrb.gmra.mxu2 %v11372_v57  ;;  %2782 = vmatpush.bf16.msra.mxu0 %v7917_v6  ;;  %v10228_v61 = vld [vmem:[#allocation10 + $0xac] sm:$0xf0] }
 0x206   :  { %2804 = vmatpush.bf16.msra.mxu2 %v7537_v38  ;;  %v7568_v4 = vld [vmem:[#allocation10 + $0x210] sm:$0xf]  ;;  %v7377_v6 = vor.u32 %v10228_v61, %v7376_v3  ;;  %v10296_v3 = vld [vmem:[#allocation10 + $0x2d4] sm:$0xf] }
 0x207   :  { %2819 = vmatpush.bf16.msra.mxu3 %v7729_v7  ;;  %v10276_v38 = vld [vmem:[#allocation10 + $0x22c] sm:$0xf0]  ;;  %v8017_v7 = vor.u32 %v10388_v0, %v8016_v53  ;;  %v7666_v61 = vld [vmem:[#allocation10 + $0x2f0] sm:$0xf0] }
 0x208   :  { %2797 = vmatpush.bf16.msra.mxu1 %v8109_v18  ;;  %v8208_v42 = vld [vmem:[#allocation10 + $0x710] sm:$0xf]  ;;  %v7569_v8 = vor.u32 %v10276_v38, %v7568_v4  ;;  %v8306_v4 = vld [vmem:[#allocation10 + $0x7f0] sm:$0xf0]  ;;  %v7669_v5 = vor.u32 %v10296_v3, %v7666_v61 }
 0x209   :  { %2783 = vmatpush.bf16.msra.mxu0 %v7885_v20  ;;  %v10436_v13 = vld [vmem:[#allocation10 + $0x72c] sm:$0xf0]  ;;  %v10368_v3 = vld [vmem:[#allocation10 + $0x514] sm:$0xf] }
 0x20a   :  { %2805 = vmatpush.bf16.msra.mxu2 %v7505_v16  ;;  %v7984_v10 = vld [vmem:[#allocation10 + $0x550] sm:$0xf]  ;;  %v8209_v16 = vor.u32 %v10436_v13, %v8208_v42  ;;  %v7954_v61 = vld [vmem:[#allocation10 + $0x530] sm:$0xf0] }
 0x20b   :  { %2820 = vmatpush.bf16.msra.mxu3 %v7697_v26  ;;  %v10380_v11 = vld [vmem:[#allocation10 + $0x56c] sm:$0xf0] }
 0x20c   :  { %2798 = vmatpush.bf16.msra.mxu1 %v8077_v2  ;;  %v7344_v14 = vld [vmem:[#allocation10 + $0x50] sm:$0xf]  ;;  %v7985_v26 = vor.u32 %v10380_v11, %v7984_v10  ;;  %v7538_v2 = vld [vmem:[#allocation10 + $0x1f0] sm:$0xf0] }
 0x20d   :  { %2784 = vmatpush.bf16.msra.mxu0 %v7853_v34  ;;  %v10220_v9 = vld [vmem:[#allocation10 + $0x6c] sm:$0xf0]  ;;  %v7730_v34 = vld [vmem:[#allocation10 + $0x370] sm:$0xf0] }
 0x20e   :  { %2806 = vmatpush.bf16.msra.mxu2 %v7473_v28  ;;  %v8176_v18 = vld [vmem:[#allocation10 + $0x6d0] sm:$0xf]  ;;  %v7345_v20 = vor.u32 %v10220_v9, %v7344_v14  ;;  %v10264_v28 = vld [vmem:[#allocation10 + $0x1d4] sm:$0xf] }
 0x20f   :  { %2821 = vmatpush.bf16.msra.mxu3 %v7665_v12  ;;  %2799 = vmatmul.bf16.vlgmr.msra.gmra.mxu1 %v11381_v25  ;;  %v10428_v35 = vld [vmem:[#allocation10 + $0x6ec] sm:$0xf0]  ;;  %v7541_v40 = vor.u32 %v10264_v28, %v7538_v2  ;;  %v7634_v14 = vld [vmem:[#allocation10 + $0x2b0] sm:$0xf0] }
 0x210   :  { %2843 = vmatpush.bf16.msrb.mxu1 %v8305_v33  ;;  %v10372_v22 = vld [vmem:[#allocation10 + $0x52c] sm:$0xf0]  ;;  %v8177_v51 = vor.u32 %v10428_v35, %v8176_v18  ;;  %v10312_v33 = vld [vmem:[#allocation10 + $0x354] sm:$0xf] }
 0x211   :  { %2785 = vmatpush.bf16.msra.mxu0 %v7821_v54  ;;  %v7312_v23 = vld [vmem:[#allocation10 + $0x10] sm:$0xf]  ;;  %v7953_v30 = vor.u32 %v10372_v22, %v7952_v21  ;;  %v7733_v43 = vor.u32 %v10312_v33, %v7730_v34  ;;  %v10448_v9 = vld [vmem:[#allocation10 + $0x794] sm:$0xf] }
 0x212   :  { %2807 = vmatpush.bf16.msra.mxu2 %v7441_v44  ;;  %v10212_v1 = vld [vmem:[#allocation10 + $0x2c] sm:$0xf0]  ;;  %v10256_v44 = vld [vmem:[#allocation10 + $0x194] sm:$0xf] }
 0x213   :  { %2822 = vmatpush.bf16.msra.mxu3 %v7633_v48  ;;  %v8144_v12 = vld [vmem:[#allocation10 + $0x690] sm:$0xf]  ;;  %v7313_v36 = vor.u32 %v10212_v1, %v7312_v23  ;;  %v7509_v58 = vor.u32 %v10256_v44, %v7506_v46  ;;  %v10392_v35 = vld [vmem:[#allocation10 + $0x5d4] sm:$0xf]  ;;  %v7800_v46 = vld [vmem:[#allocation10 + $0x3d8] sm:$0xf] }
 0x214   :  { %2844 = vmatpush.bf16.msrb.mxu1 %v8273_v52  ;;  %2786 = vmatmul.bf16.vlgmr.msra.gmra.mxu0 %v11385_v45  ;;  %v10420_v32 = vld [vmem:[#allocation10 + $0x6ac] sm:$0xf0]  ;;  %v7698_v52 = vld [vmem:[#allocation10 + $0x330] sm:$0xf0] }
 0x215   :  { %2830 = vmatpush.bf16.msrb.mxu0 %v8049_v60  ;;  %v7920_v37 = vld [vmem:[#allocation10 + $0x4d0] sm:$0xf]  ;;  %v8145_v41 = vor.u32 %v10420_v32, %v8144_v12  ;;  %v10248_v60 = vld [vmem:[#allocation10 + $0x154] sm:$0xf]  ;;  %v7701_v63 = vor.u32 %v10304_v50, %v7698_v52 }
 0x216   :  { %2808 = vmatpush.bf16.msra.mxu2 %v7409_v24  ;;  %v10364_v39 = vld [vmem:[#allocation10 + $0x4ec] sm:$0xf0]  ;;  %v7474_v24 = vld [vmem:[#allocation10 + $0x170] sm:$0xf0] }
 0x217   :  { %2823 = vmatpush.bf16.msra.mxu3 %v7601_v59  ;;  %v8112_v47 = vld [vmem:[#allocation10 + $0x650] sm:$0xf]  ;;  %v7921_v48 = vor.u32 %v10364_v39, %v7920_v37  ;;  %v7410_v21 = vld [vmem:[#allocation10 + $0xf0] sm:$0xf0] }
 0x218   :  { %2845 = vmatpush.bf16.msrb.mxu1 %v8241_v15  ;;  %v10412_v49 = vld [vmem:[#allocation10 + $0x66c] sm:$0xf0]  ;;  %v10456_v15 = vld [vmem:[#allocation10 + $0x7d4] sm:$0xf] }
 0x219   :  { %2831 = vmatpush.bf16.msrb.mxu0 %v8017_v7  ;;  %v7888_v54 = vld [vmem:[#allocation10 + $0x490] sm:$0xf]  ;;  %v8113_v62 = vor.u32 %v10412_v49, %v8112_v47  ;;  %v7477_v7 = vor.u32 %v10248_v60, %v7474_v24  ;;  %v8309_v10 = vor.u32 %v10456_v15, %v8306_v4  ;;  %v10280_v1 = vld [vmem:[#allocation10 + $0x254] sm:$0xf]  ;;  %v10333_v47 = vld [vmem:[#allocation10 + $0x3f4] sm:$0xf0] }
 0x21a   :  { %2809 = vmatpush.bf16.msra.mxu2 %v7377_v6  ;;  %v10356_v56 = vld [vmem:[#allocation10 + $0x4ac] sm:$0xf0]  ;;  %v7442_v6 = vld [vmem:[#allocation10 + $0x130] sm:$0xf0]  ;;  %v7801_v60 = vor.u32 %v10333_v47, %v7800_v46  ;;  %v7448_v47 = vld [vmem:[#allocation10 + $0x118] sm:$0xf] }
 0x21b   :  { %2824 = vmatpush.bf16.msra.mxu3 %v7569_v8  ;;  %v8080_v53 = vld [vmem:[#allocation10 + $0x610] sm:$0xf]  ;;  %v7889_v59 = vor.u32 %v10356_v56, %v7888_v54  ;;  %v10288_v8 = vld [vmem:[#allocation10 + $0x294] sm:$0xf] }
 0x21c   :  { %2846 = vmatpush.bf16.msrb.mxu1 %v8209_v16  ;;  %v10404_v0 = vld [vmem:[#allocation10 + $0x62c] sm:$0xf0]  ;;  %v8274_v16 = vld [vmem:[#allocation10 + $0x7b0] sm:$0xf0]  ;;  %v7637_v19 = vor.u32 %v10288_v8, %v7634_v14 }
 0x21d   :  { %2832 = vmatpush.bf16.msrb.mxu0 %v7985_v26  ;;  %v7856_v38 = vld [vmem:[#allocation10 + $0x450] sm:$0xf]  ;;  %v8081_v13 = vor.u32 %v10404_v0, %v8080_v53  ;;  %v7445_v26 = vor.u32 %v10240_v55, %v7442_v6  ;;  %v8277_v22 = vor.u32 %v10448_v9, %v8274_v16  ;;  %v10440_v28 = vld [vmem:[#allocation10 + $0x754] sm:$0xf]  ;;  %v7768_v53 = vld [vmem:[#allocation10 + $0x398] sm:$0xf]  ;;  %v7957_v55 = vor.u32 %v10368_v3, %v7954_v61 }
 0x21e   :  { %2810 = vmatpush.bf16.msra.mxu2 %v7345_v20  ;;  %2825 = vmatmul.bf16.vlgmr.msra.gmra.mxu3 %v11364_v29  ;;  %v10348_v42 = vld [vmem:[#allocation10 + $0x46c] sm:$0xf0]  ;;  %v10232_v20 = vld [vmem:[#allocation10 + $0xd4] sm:$0xf]  ;;  %v10325_v0 = vld [vmem:[#allocation10 + $0x3b4] sm:$0xf0] }
 0x21f   :  { %2869 = vmatpush.bf16.msrb.mxu3 %v7797_v17  ;;  %v7857_v11 = vor.u32 %v10348_v42, %v7856_v38  ;;  %v7824_v17 = vld [vmem:[#allocation10 + $0x410] sm:$0xf]  ;;  %v8242_v2 = vld [vmem:[#allocation10 + $0x770] sm:$0xf0]  ;;  %v7413_v12 = vor.u32 %v10232_v20, %v7410_v21  ;;  %v7769_v42 = vor.u32 %v10325_v0, %v7768_v53  ;;  %v7704_v21 = vld [vmem:[#allocation10 + $0x318] sm:$0xf] }
 0x220   :  { %2847 = vmatpush.bf16.msrb.mxu1 %v8177_v51  ;;  %v10340_v18 = vld [vmem:[#allocation10 + $0x42c] sm:$0xf0]  ;;  %v7602_v51 = vld [vmem:[#allocation10 + $0x270] sm:$0xf0]  ;;  %v8245_v37 = vor.u32 %v10440_v28, %v8242_v2  ;;  %v8056_v53 = vld [vmem:[#allocation10 + $0x5d8] sm:$0xf] }
 0x221   :  { %2833 = vmatpush.bf16.msrb.mxu0 %v7953_v30  ;;  %v7825_v23 = vor.u32 %v10340_v18, %v7824_v17  ;;  %v10384_v30 = vld [vmem:[#allocation10 + $0x594] sm:$0xf]  ;;  %v7605_v33 = vor.u32 %v10280_v1, %v7602_v51  ;;  %v10397_v0 = vld [vmem:[#allocation10 + $0x5f4] sm:$0xf0] }
 0x222   :  { %2811 = vmatpush.bf16.msra.mxu2 %v7313_v36  ;;  %v8018_v32 = vld [vmem:[#allocation10 + $0x5b0] sm:$0xf0]  ;;  %v7416_v3 = vld [vmem:[#allocation10 + $0xd8] sm:$0xf] }
 0x223   :  { %2870 = vmatpush.bf16.msrb.mxu3 %v7765_v27  ;;  %v8053_v27 = vor.u32 %v10392_v35, %v8050_v31  ;;  %v10224_v34 = vld [vmem:[#allocation10 + $0x94] sm:$0xf]  ;;  %v10261_v35 = vld [vmem:[#allocation10 + $0x1b4] sm:$0xf0] }
 0x224   :  { %2848 = vmatpush.bf16.msrb.mxu1 %v8145_v41  ;;  %v7378_v36 = vld [vmem:[#allocation10 + $0xb0] sm:$0xf0]  ;;  %v10237_v61 = vld [vmem:[#allocation10 + $0xf4] sm:$0xf0] }
 0x225   :  { %2812 = vmatmul.bf16.vlgmr.msra.gmra.mxu2 %v11372_v57  ;;  %2834 = vmatpush.bf16.msrb.mxu0 %v7921_v48  ;;  %v10272_v39 = vld [vmem:[#allocation10 + $0x214] sm:$0xf]  ;;  %v7381_v48 = vor.u32 %v10224_v34, %v7378_v36  ;;  %v7672_v34 = vld [vmem:[#allocation10 + $0x2d8] sm:$0xf] }
 0x226   :  { %2856 = vmatpush.bf16.msrb.mxu2 %v7541_v40  ;;  %v7570_v40 = vld [vmem:[#allocation10 + $0x230] sm:$0xf0]  ;;  %v10301_v36 = vld [vmem:[#allocation10 + $0x2f4] sm:$0xf0] }
 0x227   :  { %2871 = vmatpush.bf16.msrb.mxu3 %v7733_v43  ;;  %v10432_v41 = vld [vmem:[#allocation10 + $0x714] sm:$0xf]  ;;  %v8021_v43 = vor.u32 %v10384_v30, %v8018_v32  ;;  %v7573_v52 = vor.u32 %v10272_v39, %v7570_v40  ;;  %v10461_v39 = vld [vmem:[#allocation10 + $0x7f4] sm:$0xf0]  ;;  %v7673_v46 = vor.u32 %v10301_v36, %v7672_v34  ;;  %v10321_v36 = vld [vmem:[#allocation10 + $0x39c] sm:$0xf] }
 0x228   :  { %2849 = vmatpush.bf16.msrb.mxu1 %v8113_v62  ;;  %v8210_v44 = vld [vmem:[#allocation10 + $0x730] sm:$0xf0]  ;;  %v10429_v34 = vld [vmem:[#allocation10 + $0x6f4] sm:$0xf0] }
 0x229   :  { %2835 = vmatpush.bf16.msrb.mxu0 %v7889_v59  ;;  %v10376_v49 = vld [vmem:[#allocation10 + $0x554] sm:$0xf] }
 0x22a   :  { %2857 = vmatpush.bf16.msrb.mxu2 %v7509_v58  ;;  %v7986_v50 = vld [vmem:[#allocation10 + $0x570] sm:$0xf0]  ;;  %v8213_v58 = vor.u32 %v10432_v41, %v8210_v44 }
 0x22b   :  { %2872 = vmatpush.bf16.msrb.mxu3 %v7701_v63  ;;  %v10216_v54 = vld [vmem:[#allocation10 + $0x54] sm:$0xf]  ;;  %v7989_v63 = vor.u32 %v10376_v49, %v7986_v50 }
 0x22c   :  { %2850 = vmatpush.bf16.msrb.mxu1 %v8081_v13  ;;  %v7346_v56 = vld [vmem:[#allocation10 + $0x70] sm:$0xf0]  ;;  %v10269_v13 = vld [vmem:[#allocation10 + $0x1f4] sm:$0xf0] }
 0x22d   :  { %2836 = vmatpush.bf16.msrb.mxu0 %v7857_v11  ;;  %v10424_v62 = vld [vmem:[#allocation10 + $0x6d4] sm:$0xf]  ;;  %v7349_v59 = vor.u32 %v10216_v54, %v7346_v56  ;;  %v10317_v11 = vld [vmem:[#allocation10 + $0x374] sm:$0xf0] }
 0x22e   :  { %2858 = vmatpush.bf16.msrb.mxu2 %v7477_v7  ;;  %v8178_v24 = vld [vmem:[#allocation10 + $0x6f0] sm:$0xf0]  ;;  %v7544_v7 = vld [vmem:[#allocation10 + $0x1d8] sm:$0xf] }
 0x22f   :  { %2873 = vmatpush.bf16.msrb.mxu3 %v7669_v5  ;;  %2851 = vmatmul.bf16.vlgmr.msrb.gmra.mxu1 %v11381_v25  ;;  %v10208_v15 = vld [vmem:[#allocation10 + $0x14] sm:$0xf]  ;;  %v8181_v38 = vor.u32 %v10424_v62, %v8178_v24  ;;  %v7545_v16 = vor.u32 %v10269_v13, %v7544_v7  ;;  %v7640_v54 = vld [vmem:[#allocation10 + $0x298] sm:$0xf]  ;;  %v8057_v7 = vor.u32 %v10397_v0, %v8056_v53  ;;  %v7738_v53 = vld [vmem:[#allocation10 + $0x378] sm:$0xf0] }
 0x230   :  { %2895 = vmatpush.bf16.msra.mxu1 %v8309_v10  ;;  %v7314_v4 = vld [vmem:[#allocation10 + $0x30] sm:$0xf0]  ;;  %v7736_v10 = vld [vmem:[#allocation10 + $0x358] sm:$0xf] }
 0x231   :  { %2837 = vmatpush.bf16.msrb.mxu0 %v7825_v23  ;;  %v10416_v5 = vld [vmem:[#allocation10 + $0x694] sm:$0xf]  ;;  %v7317_v8 = vor.u32 %v10208_v15, %v7314_v4  ;;  %v7737_v18 = vor.u32 %v10317_v11, %v7736_v10  ;;  %v10293_v56 = vld [vmem:[#allocation10 + $0x2b4] sm:$0xf0] }
 0x232   :  { %2859 = vmatpush.bf16.msrb.mxu2 %v7445_v26  ;;  %v8146_v6 = vld [vmem:[#allocation10 + $0x6b0] sm:$0xf0]  ;;  %v7512_v26 = vld [vmem:[#allocation10 + $0x198] sm:$0xf] }
 0x233   :  { %2874 = vmatpush.bf16.msrb.mxu3 %v7637_v19  ;;  %v10360_v14 = vld [vmem:[#allocation10 + $0x4d4] sm:$0xf]  ;;  %v8149_v17 = vor.u32 %v10416_v5, %v8146_v6  ;;  %v7513_v51 = vor.u32 %v10261_v35, %v7512_v26  ;;  %v8248_v13 = vld [vmem:[#allocation10 + $0x758] sm:$0xf] }
 0x234   :  { %2896 = vmatpush.bf16.msra.mxu1 %v8277_v22  ;;  %2838 = vmatmul.bf16.vlgmr.msrb.gmra.mxu0 %v11385_v45  ;;  %v7922_v9 = vld [vmem:[#allocation10 + $0x4f0] sm:$0xf0]  ;;  %v10309_v22 = vld [vmem:[#allocation10 + $0x334] sm:$0xf0] }
 0x235   :  { %2882 = vmatpush.bf16.msra.mxu0 %v8053_v27  ;;  %v10408_v31 = vld [vmem:[#allocation10 + $0x654] sm:$0xf]  ;;  %v7925_v19 = vor.u32 %v10360_v14, %v7922_v9  ;;  %v7480_v27 = vld [vmem:[#allocation10 + $0x158] sm:$0xf]  ;;  %v7705_v2 = vor.u32 %v10309_v22, %v7704_v21  ;;  %v7802_v21 = vld [vmem:[#allocation10 + $0x3f8] sm:$0xf0] }
 0x236   :  { %2860 = vmatpush.bf16.msrb.mxu2 %v7413_v12  ;;  %v8114_v20 = vld [vmem:[#allocation10 + $0x670] sm:$0xf0]  ;;  %v10253_v12 = vld [vmem:[#allocation10 + $0x174] sm:$0xf0] }
 0x237   :  { %2875 = vmatpush.bf16.msrb.mxu3 %v7605_v33  ;;  %v10352_v23 = vld [vmem:[#allocation10 + $0x494] sm:$0xf]  ;;  %v8117_v28 = vor.u32 %v10408_v31, %v8114_v20  ;;  %v10445_v5 = vld [vmem:[#allocation10 + $0x774] sm:$0xf0]  ;;  %v10329_v20 = vld [vmem:[#allocation10 + $0x3dc] sm:$0xf] }
 0x238   :  { %2897 = vmatpush.bf16.msra.mxu1 %v8245_v37  ;;  %v7890_v1 = vld [vmem:[#allocation10 + $0x4b0] sm:$0xf0]  ;;  %v8312_v37 = vld [vmem:[#allocation10 + $0x7d8] sm:$0xf] }
 0x239   :  { %2883 = vmatpush.bf16.msra.mxu0 %v8021_v43  ;;  %v10400_v30 = vld [vmem:[#allocation10 + $0x614] sm:$0xf]  ;;  %v7893_v33 = vor.u32 %v10352_v23, %v7890_v1  ;;  %v7481_v43 = vor.u32 %v10253_v12, %v7480_v27  ;;  %v8313_v50 = vor.u32 %v10461_v39, %v8312_v37  ;;  %v8024_v6 = vld [vmem:[#allocation10 + $0x598] sm:$0xf]  ;;  %v7770_v37 = vld [vmem:[#allocation10 + $0x3b8] sm:$0xf0] }
 0x23a   :  { %2861 = vmatpush.bf16.msrb.mxu2 %v7381_v48  ;;  %v8082_v32 = vld [vmem:[#allocation10 + $0x630] sm:$0xf0]  ;;  %v10245_v48 = vld [vmem:[#allocation10 + $0x134] sm:$0xf0] }
 0x23b   :  { %2876 = vmatpush.bf16.msrb.mxu3 %v7573_v52  ;;  %v10344_v40 = vld [vmem:[#allocation10 + $0x454] sm:$0xf]  ;;  %v8085_v44 = vor.u32 %v10400_v30, %v8082_v32  ;;  %v7449_v24 = vor.u32 %v10245_v48, %v7448_v47  ;;  %v10389_v10 = vld [vmem:[#allocation10 + $0x5b4] sm:$0xf0]  ;;  %v7805_v30 = vor.u32 %v10329_v20, %v7802_v21 }
 0x23c   :  { %2898 = vmatpush.bf16.msra.mxu1 %v8213_v58  ;;  %v7858_v41 = vld [vmem:[#allocation10 + $0x470] sm:$0xf0]  ;;  %v8280_v58 = vld [vmem:[#allocation10 + $0x798] sm:$0xf]  ;;  %v8025_v31 = vor.u32 %v10389_v10, %v8024_v6  ;;  %v10305_v10 = vld [vmem:[#allocation10 + $0x31c] sm:$0xf] }
 0x23d   :  { %2884 = vmatpush.bf16.msra.mxu0 %v7989_v63  ;;  %v7861_v52 = vor.u32 %v10344_v40, %v7858_v41  ;;  %v10336_v62 = vld [vmem:[#allocation10 + $0x414] sm:$0xf]  ;;  %v7384_v14 = vld [vmem:[#allocation10 + $0x98] sm:$0xf] }
 0x23e   :  { %2862 = vmatpush.bf16.msrb.mxu2 %v7349_v59  ;;  %2877 = vmatmul.bf16.vlgmr.msrb.gmra.mxu3 %v11364_v29  ;;  %v7826_v63 = vld [vmem:[#allocation10 + $0x430] sm:$0xf0]  ;;  %v7641_v59 = vor.u32 %v10293_v56, %v7640_v54  ;;  %v10229_v9 = vld [vmem:[#allocation10 + $0xb4] sm:$0xf0]  ;;  %v10265_v54 = vld [vmem:[#allocation10 + $0x1dc] sm:$0xf] }
 0x23f   :  { %2921 = vmatpush.bf16.msra.mxu3 %v7801_v60  ;;  %v10453_v60 = vld [vmem:[#allocation10 + $0x7b4] sm:$0xf0]  ;;  %v7829_v4 = vor.u32 %v10336_v62, %v7826_v63  ;;  %v7385_v22 = vor.u32 %v10229_v9, %v7384_v14  ;;  %v7546_v56 = vld [vmem:[#allocation10 + $0x1f8] sm:$0xf0] }
 0x240   :  { %2899 = vmatpush.bf16.msra.mxu1 %v8181_v38  ;;  %v8281_v15 = vor.u32 %v10453_v60, %v8280_v58  ;;  %v7608_v38 = vld [vmem:[#allocation10 + $0x258] sm:$0xf] }
 0x241   :  { %2885 = vmatpush.bf16.msra.mxu0 %v7957_v55  ;;  %v11405_v49 = vpop.f32.mrf.mxu3  ;;  %v7417_v55 = vor.u32 %v10237_v61, %v7416_v3  ;;  %v10277_v26 = vld [vmem:[#allocation10 + $0x234] sm:$0xf0]  ;;  %v7549_v61 = vor.u32 %v10265_v54, %v7546_v56  ;;  %v7642_v56 = vld [vmem:[#allocation10 + $0x2b8] sm:$0xf0] }
 0x242   :  { %2863 = vmatpush.bf16.msrb.mxu2 %v7317_v8  ;;  %v8216_v35 = vld [vmem:[#allocation10 + $0x718] sm:$0xf] }
 0x243   :  { %2922 = vmatpush.bf16.msra.mxu3 %v7769_v42  ;;  %v10285_v42 = vld [vmem:[#allocation10 + $0x274] sm:$0xf0] }
 0x244   :  { %2900 = vmatpush.bf16.msra.mxu1 %v8149_v17  ;;  %v7609_v8 = vor.u32 %v10285_v42, %v7608_v38  ;;  %v8249_v17 = vor.u32 %v10445_v5, %v8248_v13  ;;  %v7992_v23 = vld [vmem:[#allocation10 + $0x558] sm:$0xf]  ;;  %v7514_v13 = vld [vmem:[#allocation10 + $0x1b8] sm:$0xf0] }
 0x245   :  { %2864 = vmatmul.bf16.vlgmr.msrb.gmra.mxu2 %v11372_v57  ;;  %2886 = vmatpush.bf16.msra.mxu0 %v7925_v19  ;;  %v10437_v19 = vld [vmem:[#allocation10 + $0x734] sm:$0xf0] }
 0x246   :  { %2908 = vmatpush.bf16.msra.mxu2 %v7545_v16  ;;  %v10381_v1 = vld [vmem:[#allocation10 + $0x574] sm:$0xf0]  ;;  %v8217_v12 = vor.u32 %v10437_v19, %v8216_v35 }
 0x247   :  { %2923 = vmatpush.bf16.msra.mxu3 %v7737_v18  ;;  %v2605_v11 = vpop.f32.mrf.mxu2  ;;  %v7576_v18 = vld [vmem:[#allocation10 + $0x218] sm:$0xf] }
 0x248   :  { %2901 = vmatpush.bf16.msra.mxu1 %v8117_v28  ;;  %v7352_v27 = vld [vmem:[#allocation10 + $0x58] sm:$0xf]  ;;  %v2619_v47 = vadd.f32 %v11405_v49, %v2605_v11  ;;  %v7706_v11 = vld [vmem:[#allocation10 + $0x338] sm:$0xf0] }
 0x249   :  { %2887 = vmatpush.bf16.msra.mxu0 %v7893_v33  ;;  %v2620_v16 = vpop.f32.mrf.mxu3  ;;  %v10221_v28 = vld [vmem:[#allocation10 + $0x74] sm:$0xf0]  ;;  %v7993_v33 = vor.u32 %v10381_v1, %v7992_v23  ;;  %v7709_v23 = vor.u32 %v10305_v10, %v7706_v11  ;;  %v10281_v11 = vld [vmem:[#allocation10 + $0x25c] sm:$0xf] }
 0x24a   :  { %2909 = vmatpush.bf16.msra.mxu2 %v7513_v51  ;;  %v7577_v51 = vor.u32 %v10277_v26, %v7576_v18  ;;  %v8184_v32 = vld [vmem:[#allocation10 + $0x6d8] sm:$0xf]  ;;  %v7353_v39 = vor.u32 %v10221_v28, %v7352_v27  ;;  %v10249_v18 = vld [vmem:[#allocation10 + $0x15c] sm:$0xf] }
 0x24b   :  { %2924 = vmatpush.bf16.msra.mxu3 %v7705_v2  ;;  %v7960_v40 = vld [vmem:[#allocation10 + $0x518] sm:$0xf]  ;;  %v7482_v26 = vld [vmem:[#allocation10 + $0x178] sm:$0xf0] }
 0x24c   :  { %2902 = vmatpush.bf16.msra.mxu1 %v8085_v44  ;;  %v2644_v2 = vpop.f32.mrf.mxu1  ;;  %v10373_v41 = vld [vmem:[#allocation10 + $0x534] sm:$0xf0] }
 0x24d   :  { %2888 = vmatpush.bf16.msra.mxu0 %v7861_v52  ;;  %v7320_v44 = vld [vmem:[#allocation10 + $0x18] sm:$0xf]  ;;  %v7773_v52 = vor.u32 %v10321_v36, %v7770_v37  ;;  %v7961_v62 = vor.u32 %v10373_v41, %v7960_v40  ;;  %v7485_v37 = vor.u32 %v10249_v18, %v7482_v26  ;;  %v8250_v18 = vld [vmem:[#allocation10 + $0x778] sm:$0xf0] }
 0x24e   :  { %2910 = vmatpush.bf16.msra.mxu2 %v7481_v43  ;;  %v8152_v58 = vld [vmem:[#allocation10 + $0x698] sm:$0xf] }
 0x24f   :  { %2925 = vmatpush.bf16.msra.mxu3 %v7673_v46  ;;  %2903 = vmatmul.bf16.vlgmr.msra.gmra.mxu1 %v11381_v25  ;;  %v2607_v43 = vpop.f32.mrf.mxu2  ;;  %v10213_v46 = vld [vmem:[#allocation10 + $0x34] sm:$0xf0] }
 0x250   :  { %2947 = vmatpush.bf16.msrb.mxu1 %v8313_v50  ;;  %v8185_v50 = vor.u32 %v10429_v34, %v8184_v32  ;;  %v10421_v63 = vld [vmem:[#allocation10 + $0x6b4] sm:$0xf0]  ;;  %v7321_v49 = vor.u32 %v10213_v46, %v7320_v44 }
 0x251   :  { %2889 = vmatpush.bf16.msra.mxu0 %v7829_v4  ;;  %v11410_v48 = vpop.f32.mrf.mxu3  ;;  %v2631_v60 = vpop.f32.mrf.mxu0  ;;  %v10365_v3 = vld [vmem:[#allocation10 + $0x4f4] sm:$0xf0]  ;;  %v8153_v38 = vor.u32 %v10421_v63, %v8152_v58  ;;  %v10449_v58 = vld [vmem:[#allocation10 + $0x79c] sm:$0xf] }
 0x252   :  { %2911 = vmatpush.bf16.msra.mxu2 %v7449_v24  ;;  %v10313_v24 = vld [vmem:[#allocation10 + $0x35c] sm:$0xf]  ;;  %v2632_v0 = vadd.f32 %v2631_v60, %v2619_v47  ;;  %v8120_v5 = vld [vmem:[#allocation10 + $0x658] sm:$0xf] }
 0x253   :  { %2926 = vmatpush.bf16.msra.mxu3 %v7641_v59  ;;  %v7928_v59 = vld [vmem:[#allocation10 + $0x4d8] sm:$0xf]  ;;  %v7741_v42 = vor.u32 %v10313_v24, %v7738_v53  ;;  %v7450_v47 = vld [vmem:[#allocation10 + $0x138] sm:$0xf0] }
 0x254   :  { %2948 = vmatpush.bf16.msrb.mxu1 %v8281_v15  ;;  %2890 = vmatmul.bf16.vlgmr.msra.gmra.mxu0 %v11385_v45  ;;  %v11413_v15 = vadd.f32 %v2644_v2, %v2632_v0  ;;  %v2646_v4 = vpop.f32.mrf.mxu1  ;;  %v10413_v6 = vld [vmem:[#allocation10 + $0x674] sm:$0xf0]  ;;  %v7674_v2 = vld [vmem:[#allocation10 + $0x2f8] sm:$0xf0] }
 0x255   :  { %2934 = vmatpush.bf16.msrb.mxu0 %v8057_v7  ;;  %v10257_v7 = vld [vmem:[#allocation10 + $0x19c] sm:$0xf]  ;;  %v7896_v9 = vld [vmem:[#allocation10 + $0x498] sm:$0xf] }
 0x256   :  { %2912 = vmatpush.bf16.msra.mxu2 %v7417_v55  ;;  %v7929_v55 = vor.u32 %v10365_v3, %v7928_v59  ;;  %v3060_v14 = vmul.f32 %v11413_v15, %v11413_v15  ;;  %v10357_v16 = vld [vmem:[#allocation10 + $0x4b4] sm:$0xf0]  ;;  %v8282_v60 = vld [vmem:[#allocation10 + $0x7b8] sm:$0xf0] }
 0x257   :  { %2927 = vmatpush.bf16.msra.mxu3 %v7609_v8  ;;  %v3012_v8 = vrot.slane %v11413_v15, 4  ;;  %v8088_v35 = vld [vmem:[#allocation10 + $0x618] sm:$0xf]  ;;  %v7897_v28 = vor.u32 %v10357_v16, %v7896_v9  ;;  %v8058_v59 = vld [vmem:[#allocation10 + $0x5f8] sm:$0xf0] }
 0x258   :  { %2949 = vmatpush.bf16.msrb.mxu1 %v8249_v17  ;;  %v7517_v17 = vor.u32 %v10257_v7, %v7514_v13  ;;  %v3068_v19 = vrot.slane %v3060_v14, 4  ;;  %v2657_v20 = vpop.f32.mrf.mxu2  ;;  %v10405_v1 = vld [vmem:[#allocation10 + $0x634] sm:$0xf0]  ;;  %v10233_v13 = vld [vmem:[#allocation10 + $0xdc] sm:$0xf] }
 0x259   :  { %2935 = vmatpush.bf16.msrb.mxu0 %v8025_v31  ;;  %v3013_v31 = vadd.f32 %v3012_v8, %v11413_v15  ;;  %v2672_v21 = vpop.f32.mrf.mxu3  ;;  %v2633_v27 = vpop.f32.mrf.mxu0  ;;  %v7864_v34 = vld [vmem:[#allocation10 + $0x458] sm:$0xf]  ;;  %v8089_v44 = vor.u32 %v10405_v1, %v8088_v35  ;;  %v2671_v4 = vadd.f32 %v11410_v48, %v2657_v20  ;;  %v7610_v8 = vld [vmem:[#allocation10 + $0x278] sm:$0xf0] }
 0x25a   :  { %2913 = vmatpush.bf16.msra.mxu2 %v7385_v22  ;;  %v8121_v22 = vor.u32 %v10413_v6, %v8120_v5  ;;  %v10349_v36 = vld [vmem:[#allocation10 + $0x474] sm:$0xf0]  ;;  %v7418_v5 = vld [vmem:[#allocation10 + $0xf8] sm:$0xf0]  ;;  %v8285_v6 = vor.u32 %v10449_v58, %v8282_v60  ;;  %v7613_v1 = vor.u32 %v10281_v11, %v7610_v8  ;;  %v8516_v8 = vld [vmem:[#allocation12 + $0x188] sm:$0xf] }
 0x25b   :  { %2928 = vmatpush.bf16.msra.mxu3 %v7577_v51  ;;  %v10297_v51 = vld [vmem:[#allocation10 + $0x2dc] sm:$0xf]  ;;  %v3014_v32 = vrot.slane %v3013_v31, 2  ;;  %v7865_v54 = vor.u32 %v10349_v36, %v7864_v34  ;;  %v7832_v24 = vld [vmem:[#allocation10 + $0x418] sm:$0xf]  ;;  %v7421_v26 = vor.u32 %v10233_v13, %v7418_v5 }
 0x25c   :  { %2950 = vmatpush.bf16.msrb.mxu1 %v8217_v12  ;;  %v10457_v12 = vld [vmem:[#allocation10 + $0x7dc] sm:$0xf]  ;;  %v2696_v43 = vpop.f32.mrf.mxu1  ;;  %v7677_v46 = vor.u32 %v10297_v51, %v7674_v2  ;;  %v10341_v53 = vld [vmem:[#allocation10 + $0x434] sm:$0xf0] }
 0x25d   :  { %2936 = vmatpush.bf16.msrb.mxu0 %v7993_v33  ;;  %v3069_v33 = vadd.f32 %v3068_v19, %v3060_v14  ;;  %v3015_v40 = vadd.f32 %v3014_v32, %v3013_v31  ;;  %v7833_v10 = vor.u32 %v10341_v53, %v7832_v24  ;;  %v10225_v35 = vld [vmem:[#allocation10 + $0x9c] sm:$0xf] }
 0x25e   :  { %2914 = vmatpush.bf16.msra.mxu2 %v7353_v39  ;;  %2929 = vmatmul.bf16.vlgmr.msra.gmra.mxu3 %v11364_v29  ;;  %v10241_v39 = vld [vmem:[#allocation10 + $0x11c] sm:$0xf] }
 0x25f   :  { %2973 = vmatpush.bf16.msrb.mxu3 %v7805_v30  ;;  %v8314_v30 = vld [vmem:[#allocation10 + $0x7f8] sm:$0xf0]  ;;  %v3070_v41 = vrot.slane %v3069_v33, 2  ;;  %v7453_v0 = vor.u32 %v10241_v39, %v7450_v47  ;;  %v10570_v39 = vld [vmem:[#allocation12 + $0x360] sm:$0xf0] }
 0x260   :  { %2951 = vmatpush.bf16.msrb.mxu1 %v8185_v50  ;;  %v10289_v50 = vld [vmem:[#allocation10 + $0x29c] sm:$0xf] }
 0x261   :  { %2937 = vmatpush.bf16.msrb.mxu0 %v7961_v62  ;;  %v3016_v62 = vrot.slane %v3015_v40, 1  ;;  %v3071_v63 = vadd.f32 %v3070_v41, %v3069_v33  ;;  %v7645_v7 = vor.u32 %v10289_v50, %v7642_v56  ;;  %v10385_v31 = vld [vmem:[#allocation10 + $0x59c] sm:$0xf] }
 0x262   :  { %2915 = vmatpush.bf16.msra.mxu2 %v7321_v49  ;;  %v10393_v49 = vld [vmem:[#allocation10 + $0x5dc] sm:$0xf] }
 0x263   :  { %2974 = vmatpush.bf16.msrb.mxu3 %v7773_v52  ;;  %v8317_v52 = vor.u32 %v10457_v12, %v8314_v30  ;;  %v3017_v3 = vadd.f32 %v3016_v62, %v3015_v40  ;;  %v8061_v48 = vor.u32 %v10393_v49, %v8058_v59  ;;  %v8026_v19 = vld [vmem:[#allocation10 + $0x5b8] sm:$0xf0] }
 0x264   :  { %2952 = vmatpush.bf16.msrb.mxu1 %v8153_v38  ;;  %v2659_v38 = vpop.f32.mrf.mxu2  ;;  %v7386_v51 = vld [vmem:[#allocation10 + $0xb8] sm:$0xf0]  ;;  %v8029_v36 = vor.u32 %v10385_v31, %v8026_v19  ;;  %v8684_v19 = vld [vmem:[#allocation12 + $0x2d8] sm:$0xf] }
 0x265   :  { %2916 = vmatmul.bf16.vlgmr.msra.gmra.mxu2 %v11372_v57  ;;  %2938 = vmatpush.bf16.msrb.mxu0 %v7929_v55  ;;  %v2683_v55 = vpop.f32.mrf.mxu0  ;;  %v11423_v9 = vmul.f32 0.125, %v3017_v3  ;;  %v10273_v27 = vld [vmem:[#allocation10 + $0x21c] sm:$0xf]  ;;  %v7389_v40 = vor.u32 %v10225_v35, %v7386_v51 }
 0x266   :  { %2960 = vmatpush.bf16.msrb.mxu2 %v7549_v61  ;;  %v3072_v61 = vrot.slane %v3071_v63, 1  ;;  %v2684_v16 = vadd.f32 %v2683_v55, %v2671_v4  ;;  %v7578_v2 = vld [vmem:[#allocation10 + $0x238] sm:$0xf0]  ;;  %v10563_v4 = vld [vmem:[#allocation12 + $0x328] sm:$0xf0] }
 0x267   :  { %2975 = vmatpush.bf16.msrb.mxu3 %v7741_v42  ;;  %v11421_v42 = vpop.f32.mrf.mxu3  ;;  %v3132_v21 = vmul.f32 %v11423_v9, %v11423_v9  ;;  %v10433_v12 = vld [vmem:[#allocation10 + $0x71c] sm:$0xf] }
 0x268   :  { %2953 = vmatpush.bf16.msrb.mxu1 %v8121_v22  ;;  %v3073_v14 = vadd.f32 %v3072_v61, %v3071_v63  ;;  %v11428_v22 = vadd.f32 %v2696_v43, %v2684_v16  ;;  %v8218_v30 = vld [vmem:[#allocation10 + $0x738] sm:$0xf0]  ;;  %v10514_v16 = vld [vmem:[#allocation12 + $0x1a0] sm:$0xf0] }
 0x269   :  { %2939 = vmatpush.bf16.msrb.mxu0 %v7897_v28  ;;  %v10377_v41 = vld [vmem:[#allocation10 + $0x55c] sm:$0xf]  ;;  %v8221_v62 = vor.u32 %v10433_v12, %v8218_v30  ;;  %v8517_v12 = vor.u32 %v10514_v16, %v8516_v8  ;;  %v8488_v30 = vld [vmem:[#allocation12 + $0x150] sm:$0xf]  ;;  %v8432_v8 = vld [vmem:[#allocation12 + $0xe0] sm:$0xf] }
 0x26a   :  { %2961 = vmatpush.bf16.msrb.mxu2 %v7517_v17  ;;  %v10441_v17 = vld [vmem:[#allocation10 + $0x75c] sm:$0xf]  ;;  %v3124_v20 = vmul.f32 0.125, %v3073_v14  ;;  %v3018_v33 = vrot.slane %v11428_v22, 4  ;;  %v3061_v34 = vmul.f32 %v11428_v22, %v11428_v22 }
 0x26b   :  { %2976 = vmatpush.bf16.msrb.mxu3 %v7709_v23  ;;  %v2698_v23 = vpop.f32.mrf.mxu1  ;;  %v8253_v28 = vor.u32 %v10441_v17, %v8250_v18  ;;  %v7994_v43 = vld [vmem:[#allocation10 + $0x578] sm:$0xf0] }
 0x26c   :  { %2954 = vmatpush.bf16.msrb.mxu1 %v8089_v44  ;;  %v3140_v32 = vsub.f32 %v3124_v20, %v3132_v21  ;;  %v3074_v47 = vrot.slane %v3061_v34, 4  ;;  %v2709_v50 = vpop.f32.mrf.mxu2  ;;  %v10217_v56 = vld [vmem:[#allocation10 + $0x5c] sm:$0xf]  ;;  %v7997_v61 = vor.u32 %v10377_v41, %v7994_v43  ;;  %v10556_v20 = vld [vmem:[#allocation12 + $0x2f0] sm:$0xf0] }
 0x26d   :  { %2940 = vmatpush.bf16.msrb.mxu0 %v7865_v54  ;;  %v7581_v54 = vor.u32 %v10273_v27, %v7578_v2  ;;  %v7354_v58 = vld [vmem:[#allocation10 + $0x78] sm:$0xf0]  ;;  %v2685_v60 = vpop.f32.mrf.mxu0 }
 0x26e   :  { %2962 = vmatpush.bf16.msrb.mxu2 %v7485_v37  ;;  %v8740_v37 = vld [vmem:[#allocation12 + $0x348] sm:$0xf]  ;;  %v3148_v44 = vmax.f32 %v3140_v32, 0.0  ;;  %v10425_v63 = vld [vmem:[#allocation10 + $0x6dc] sm:$0xf]  ;;  %v3075_v3 = vadd.f32 %v3074_v47, %v3061_v34  ;;  %v7357_v38 = vor.u32 %v10217_v56, %v7354_v58 }
 0x26f   :  { %2977 = vmatpush.bf16.msrb.mxu3 %v7677_v46  ;;  %2955 = vmatmul.bf16.vlgmr.msrb.gmra.mxu1 %v11381_v25  ;;  %v3019_v46 = vadd.f32 %v3018_v33, %v11428_v22  ;;  %v8186_v24 = vld [vmem:[#allocation10 + $0x6f8] sm:$0xf0]  ;;  %v8741_v53 = vor.u32 %v10570_v39, %v8740_v37  ;;  %v10507_v34 = vld [vmem:[#allocation12 + $0x168] sm:$0xf0]  ;;  %v8685_v39 = vor.u32 %v10556_v20, %v8684_v19  ;;  %v8600_v20 = vld [vmem:[#allocation12 + $0x230] sm:$0xf] }
 0x270   :  { %2999 = vmatpush.bf16.msra.mxu1 %v8317_v52  ;;  %v2724_v52 = vpop.f32.mrf.mxu3  ;;  %v11435_v49 = vadd.f32 1e-05, %v3148_v44  ;;  %v10369_v13 = vld [vmem:[#allocation10 + $0x51c] sm:$0xf]  ;;  %v8189_v14 = vor.u32 %v10425_v63, %v8186_v24  ;;  %v8460_v63 = vld [vmem:[#allocation12 + $0x118] sm:$0xf] }
 0x271   :  { %2941 = vmatpush.bf16.msrb.mxu0 %v7833_v10  ;;  %v3020_v59 = vrot.slane %v3019_v46, 2  ;;  %v7962_v5 = vld [vmem:[#allocation10 + $0x538] sm:$0xf0]  ;;  %v10500_v24 = vld [vmem:[#allocation12 + $0x130] sm:$0xf0] }
 0x272   :  { %2963 = vmatpush.bf16.msrb.mxu2 %v7453_v0  ;;  %v8712_v0 = vld [vmem:[#allocation12 + $0x310] sm:$0xf]  ;;  %10937 = vrsqrt.f32 %v11435_v49  ;;  %v7322_v11 = vld [vmem:[#allocation10 + $0x38] sm:$0xf0]  ;;  %v7965_v31 = vor.u32 %v10369_v13, %v7962_v5  ;;  %vm3178_vm3 = vweird.f32 %v11435_v49 }
 0x273   :  { %2978 = vmatpush.bf16.msrb.mxu3 %v7645_v7  ;;  %v10209_v7 = vld [vmem:[#allocation10 + $0x1c] sm:$0xf]  ;;  %v3021_v55 = vadd.f32 %v3020_v59, %v3019_v46  ;;  %v2748_v10 = vpop.f32.mrf.mxu1  ;;  %v8713_v18 = vor.u32 %v10563_v4, %v8712_v0 }
 0x274   :  { %3000 = vmatpush.bf16.msra.mxu1 %v8285_v6  ;;  %2942 = vmatmul.bf16.vlgmr.msrb.gmra.mxu0 %v11385_v45  ;;  %v3076_v6 = vrot.slane %v3075_v3, 2  ;;  %v8154_v17 = vld [vmem:[#allocation10 + $0x6b8] sm:$0xf0]  ;;  %v7325_v21 = vor.u32 %v10209_v7, %v7322_v11  ;;  %v2711_v2 = vpop.f32.mrf.mxu2 }
 0x275   :  { %2986 = vmatpush.bf16.msra.mxu0 %v8061_v48  ;;  %v10417_v48 = vld [vmem:[#allocation10 + $0x69c] sm:$0xf]  ;;  %v2735_v32 = vpop.f32.mrf.mxu0 }
 0x276   :  { %2964 = vmatpush.bf16.msrb.mxu2 %v7421_v26  ;;  %v3022_v26 = vrot.slane %v3021_v55, 1  ;;  %v3077_v35 = vadd.f32 %v3076_v6, %v3075_v3  ;;  %v10361_v23 = vld [vmem:[#allocation10 + $0x4dc] sm:$0xf]  ;;  %v8157_v33 = vor.u32 %v10417_v48, %v8154_v17  ;;  %v10542_v6 = vld [vmem:[#allocation12 + $0x280] sm:$0xf0] }
 0x277   :  { %2979 = vmatpush.bf16.msrb.mxu3 %v7613_v1  ;;  %v7930_v1 = vld [vmem:[#allocation10 + $0x4f8] sm:$0xf0] }
 0x278   :  { %3001 = vmatpush.bf16.msra.mxu1 %v8253_v28  ;;  %v3023_v51 = vadd.f32 %v3022_v26, %v3021_v55  ;;  %v3078_v27 = vrot.slane %v3077_v35, 1  ;;  %v2723_v28 = vadd.f32 %v11421_v42, %v2709_v50  ;;  %v8122_v37 = vld [vmem:[#allocation10 + $0x678] sm:$0xf0]  ;;  %v7933_v44 = vor.u32 %v10361_v23, %v7930_v1  ;;  %v8656_v42 = vld [vmem:[#allocation12 + $0x2a0] sm:$0xf] }
 0x279   :  { %2987 = vmatpush.bf16.msra.mxu0 %v8029_v36  ;;  %v10409_v36 = vld [vmem:[#allocation10 + $0x65c] sm:$0xf]  ;;  %v8628_v55 = vld [vmem:[#allocation12 + $0x268] sm:$0xf] }
 0x27a   :  { %2965 = vmatpush.bf16.msrb.mxu2 %v7389_v40  ;;  %v11440_v40 = vpop.eup %10937  ;;  %v11442_v41 = vmul.f32 0.125, %v3023_v51  ;;  %v2736_v43 = vadd.f32 %v2735_v32, %v2723_v28  ;;  %v10549_v46 = vld [vmem:[#allocation12 + $0x2b8] sm:$0xf0]  ;;  %v8125_v0 = vor.u32 %v10409_v36, %v8122_v37  ;;  %v8629_v19 = vor.u32 %v10542_v6, %v8628_v55 }
 0x27b   :  { %2980 = vmatpush.bf16.msrb.mxu3 %v7581_v54  ;;  %v3173_v47 = vmul.f32 %v11440_v40, %v11435_v49  ;;  %v10353_v50 = vld [vmem:[#allocation10 + $0x49c] sm:$0xf]  ;;  %v2750_v60 = vpop.f32.mrf.mxu1  ;;  %v8657_v4 = vor.u32 %v10549_v46, %v8656_v42  ;;  %vm3179_vm2 = vweird.f32 %v11440_v40  ;;  %v10626_v49 = vld [vmem:[#allocation12 + $0x520] sm:$0xf0] }
 0x27c   :  { %3002 = vmatpush.bf16.msra.mxu1 %v8221_v62  ;;  %v7898_v52 = vld [vmem:[#allocation10 + $0x4b8] sm:$0xf0]  ;;  %v3133_v56 = vmul.f32 %v11442_v41, %v11442_v41  ;;  %v11448_v58 = vadd.f32 %v2748_v10, %v2736_v43  ;;  %v8489_v62 = vor.u32 %v10507_v34, %v8488_v30  ;;  %v3156_v34 = vsub.f32 %v11413_v15, %v11423_v9  ;;  %vm3180_vm4 = vmor %vm3178_vm3, %vm3179_vm2  ;;  %v8404_v43 = vld [vmem:[#allocation12 + $0xa8] sm:$0xf] }
 0x27d   :  { %2988 = vmatpush.bf16.msra.mxu0 %v7997_v61  ;;  %v10401_v59 = vld [vmem:[#allocation10 + $0x61c] sm:$0xf]  ;;  %v7901_v5 = vor.u32 %v10353_v50, %v7898_v52  ;;  %v8572_v52 = vld [vmem:[#allocation12 + $0x1f8] sm:$0xf] }
 0x27e   :  { %2966 = vmatpush.bf16.msrb.mxu2 %v7357_v38  ;;  %2981 = vmatmul.bf16.vlgmr.msrb.gmra.mxu3 %v11364_v29  ;;  %v3079_v29 = vadd.f32 %v3078_v27, %v3077_v35  ;;  %v8090_v3 = vld [vmem:[#allocation10 + $0x638] sm:$0xf0]  ;;  %v3024_v7 = vrot.slane %v11448_v58, 4  ;;  %v3062_v13 = vmul.f32 %v11448_v58, %v11448_v58  ;;  %v10535_v27 = vld [vmem:[#allocation12 + $0x248] sm:$0xf0] }
 0x27f   :  { %6181 = vmatpush.bf16.msra.mxu3 %v8741_v53  ;;  %v3174_v53 = vmul.f32 %v11440_v40, %v3173_v47  ;;  %v10345_v61 = vld [vmem:[#allocation10 + $0x45c] sm:$0xf]  ;;  %v8601_v42 = vor.u32 %v10535_v27, %v8600_v20  ;;  %v9188_v20 = vld [vmem:[#allocation12 + $0x6c8] sm:$0xf] }
 0x280   :  { %3003 = vmatpush.bf16.msra.mxu1 %v8189_v14  ;;  %v3125_v54 = vmul.f32 0.125, %v3079_v29  ;;  %v7866_v11 = vld [vmem:[#allocation10 + $0x478] sm:$0xf0]  ;;  %v11455_v14 = vld [vmem:[#allocation13 + $0xc] sm:$0xff]  ;;  %v3025_v48 = vadd.f32 %v3024_v7, %v11448_v58  ;;  %v3080_v17 = vrot.slane %v3062_v13, 4 }
 0x281   :  { %2989 = vmatpush.bf16.msra.mxu0 %v7965_v31  ;;  %v3175_v10 = vmul.f32 0.5, %v3174_v53  ;;  %v10493_v26 = vld [vmem:[#allocation12 + $0xf8] sm:$0xf0]  ;;  %v8093_v31 = vor.u32 %v10401_v59, %v8090_v3  ;;  %v7869_v51 = vor.u32 %v10345_v61, %v7866_v11  ;;  %v3262_v2 = vperm.slane %v11455_v14, 0  ;;  %v11472_v9 = vpop.f32.mrf.mxu3  ;;  %v8936_v53 = vld [vmem:[#allocation12 + $0x4d0] sm:$0xf] }
 0x282   :  { %2967 = vmatpush.bf16.msrb.mxu2 %v7325_v21  ;;  %v3141_v38 = vsub.f32 %v3125_v54, %v3133_v56  ;;  %v3026_v23 = vrot.slane %v3025_v48, 2  ;;  %v3081_v1 = vadd.f32 %v3080_v17, %v3062_v13  ;;  %v8433_v30 = vor.u32 %v10493_v26, %v8432_v8  ;;  %v10337_v32 = vld [vmem:[#allocation10 + $0x41c] sm:$0xf]  ;;  %v10528_v54 = vld [vmem:[#allocation12 + $0x210] sm:$0xf0] }
 0x283   :  { %6182 = vmatpush.bf16.msra.mxu3 %v8713_v18  ;;  %v8461_v18 = vor.u32 %v10500_v24, %v8460_v63  ;;  %v3176_v35 = vsub.f32 1.5, %v3175_v10  ;;  %v8376_v59 = vld [vmem:[#allocation12 + $0x70] sm:$0xf]  ;;  %v10479_v3 = vld [vmem:[#allocation12 + $0x88] sm:$0xf0]  ;;  %v8573_v61 = vor.u32 %v10528_v54, %v8572_v52 }
 0x284   :  { %3004 = vmatpush.bf16.msra.mxu1 %v8157_v33  ;;  %v3149_v16 = vmax.f32 %v3141_v38, 0.0  ;;  %v7834_v33 = vld [vmem:[#allocation10 + $0x438] sm:$0xf0]  ;;  %v3027_v36 = vadd.f32 %v3026_v23, %v3025_v48  ;;  %v3082_v37 = vrot.slane %v3081_v1, 2  ;;  %v8544_v13 = vld [vmem:[#allocation12 + $0x1c0] sm:$0xf]  ;;  %v8377_v8 = vor.u32 %v10479_v3, %v8376_v59 }
 0x285   :  { %2968 = vmatmul.bf16.vlgmr.msrb.gmra.mxu2 %v11372_v57  ;;  %2990 = vmatpush.bf16.msra.mxu0 %v7933_v44  ;;  %v2737_v57 = vpop.f32.mrf.mxu0  ;;  %v3177_v28 = vmul.f32 %v11440_v40, %v3176_v35  ;;  %v10486_v44 = vld [vmem:[#allocation12 + $0xc0] sm:$0xf0]  ;;  %v7837_v50 = vor.u32 %v10337_v32, %v7834_v33  ;;  %v10612_v48 = vld [vmem:[#allocation12 + $0x4b0] sm:$0xf0]  ;;  %v8348_v26 = vld [vmem:[#allocation12 + $0x38] sm:$0xf] }
 0x286   :  { %6168 = vmatpush.bf16.msra.mxu2 %v8517_v12  ;;  %v11459_v21 = vadd.f32 1e-05, %v3149_v16  ;;  %v11464_v12 = vld [vmem:[#allocation13 + $0x14] sm:$0xff]  ;;  %v3028_v47 = vrot.slane %v3027_v36, 1  ;;  %v3083_v15 = vadd.f32 %v3082_v37, %v3081_v1  ;;  %v8405_v24 = vor.u32 %v10486_v44, %v8404_v43  ;;  %v8320_v1 = vld [vmem:[#allocation12] sm:$0xf] }
 0x287   :  { %6183 = vmatpush.bf16.msra.mxu3 %v8685_v39  ;;  %v8964_v39 = vld [vmem:[#allocation12 + $0x508] sm:$0xf]  ;;  %v3181_v29 = vsel %vm3180_vm4, %v11440_v40, %v3177_v28  ;;  %v3288_v56 = vperm.slane %v11464_v12, 0  ;;  %v8908_v16 = vld [vmem:[#allocation12 + $0x498] sm:$0xf]  ;;  %v3263_v37 = vperm.slane %v11455_v14, 1 }
 0x288   :  { %3005 = vmatpush.bf16.msra.mxu1 %v8125_v0  ;;  %10939 = vrsqrt.f32 %v11459_v21  ;;  %v3252_v46 = vmul.f32 %v3181_v29, %v3156_v34  ;;  %v8965_v60 = vor.u32 %v10626_v49, %v8964_v39  ;;  %v3029_v63 = vadd.f32 %v3028_v47, %v3027_v36  ;;  %v10619_v0 = vld [vmem:[#allocation12 + $0x4e8] sm:$0xf0]  ;;  %v10472_v35 = vld [vmem:[#allocation12 + $0x50] sm:$0xf0]  ;;  %v8880_v28 = vld [vmem:[#allocation12 + $0x460] sm:$0xf] }
 0x289   :  { %2991 = vmatpush.bf16.msra.mxu0 %v7901_v5  ;;  %v3084_v40 = vrot.slane %v3083_v15, 1  ;;  %v10521_v5 = vld [vmem:[#allocation12 + $0x1d8] sm:$0xf0]  ;;  %v8909_v27 = vor.u32 %v10612_v48, %v8908_v16  ;;  %v8349_v33 = vor.u32 %v10472_v35, %v8348_v26  ;;  %v9412_v49 = vld [vmem:[#allocation12 + $0x888] sm:$0xf]  ;;  %vm3188_vm6 = vweird.f32 %v11459_v21 }
 0x28a   :  { %6169 = vmatpush.bf16.msra.mxu2 %v8489_v62  ;;  %v3278_v62 = vmul.f32 %v3262_v2, %v3252_v46  ;;  %v11478_v7 = vmul.f32 0.125, %v3029_v63  ;;  %v8545_v57 = vor.u32 %v10521_v5, %v8544_v13  ;;  %v10682_v2 = vld [vmem:[#allocation12 + $0x6e0] sm:$0xf0]  ;;  %v10605_v34 = vld [vmem:[#allocation12 + $0x478] sm:$0xf0]  ;;  %v3289_v52 = vperm.slane %v11464_v12, 1 }
 0x28b   :  { %6184 = vmatpush.bf16.msra.mxu3 %v8657_v4  ;;  %v3085_v38 = vadd.f32 %v3084_v40, %v3083_v15  ;;  %v10738_v29 = vld [vmem:[#allocation12 + $0x8a0] sm:$0xf0]  ;;  %v9160_v44 = vld [vmem:[#allocation12 + $0x690] sm:$0xf]  ;;  %v8881_v47 = vor.u32 %v10605_v34, %v8880_v28  ;;  %v9132_v59 = vld [vmem:[#allocation12 + $0x658] sm:$0xf] }
 0x28c   :  { %3006 = vmatpush.bf16.msra.mxu1 %v8093_v31  ;;  %v3304_v6 = vadd.f32 %v3288_v56, %v3278_v62  ;;  %v3134_v11 = vmul.f32 %v11478_v7, %v11478_v7  ;;  %v2800_v39 = vpop.f32.mrf.mxu1  ;;  %v8852_v56 = vld [vmem:[#allocation12 + $0x428] sm:$0xf]  ;;  %v10668_v3 = vld [vmem:[#allocation12 + $0x670] sm:$0xf0] }
 0x28d   :  { %2992 = vmatpush.bf16.msra.mxu0 %v7869_v51  ;;  %v3126_v10 = vmul.f32 0.125, %v3085_v38  ;;  %v10465_v51 = vld [vmem:[#allocation12 + $0x18] sm:$0xf0]  ;;  %v9133_v13 = vor.u32 %v10668_v3, %v9132_v59  ;;  %v10724_v48 = vld [vmem:[#allocation12 + $0x830] sm:$0xf0]  ;;  %v3290_v59 = vperm.slane %v11464_v12, 2 }
 0x28e   :  { %6170 = vmatpush.bf16.msra.mxu2 %v8461_v18  ;;  %v11476_v4 = vpop.eup %10939  ;;  %v2761_v18 = vpop.f32.mrf.mxu2  ;;  %v8321_v54 = vor.u32 %v10465_v51, %v8320_v1 }
 0x28f   :  { %6185 = vmatpush.bf16.msra.mxu3 %v8629_v19  ;;  %3007 = vmatmul.bf16.vlgmr.msra.gmra.mxu1 %v11381_v25  ;;  %v3183_v55 = vmul.f32 %v11476_v4, %v11459_v21  ;;  %v8937_v25 = vor.u32 %v10619_v0, %v8936_v53  ;;  %v3142_v31 = vsub.f32 %v3126_v10, %v3134_v11  ;;  %v2776_v19 = vpop.f32.mrf.mxu3  ;;  %vm3189_vm5 = vweird.f32 %v11476_v4  ;;  %v9384_v53 = vld [vmem:[#allocation12 + $0x850] sm:$0xf]  ;;  %v10731_v0 = vld [vmem:[#allocation12 + $0x868] sm:$0xf0]  ;;  %v9356_v11 = vld [vmem:[#allocation12 + $0x818] sm:$0xf] }
 0x290   :  { %vm3190_vm7 = vmor %vm3188_vm6, %vm3189_vm5  ;;  %v2775_v63 = vadd.f32 %v11472_v9, %v2761_v18  ;;  %v9385_v10 = vor.u32 %v10731_v0, %v9384_v53  ;;  %v10661_v18 = vld [vmem:[#allocation12 + $0x638] sm:$0xf0]  ;;  %v8796_v19 = vld [vmem:[#allocation12 + $0x3b8] sm:$0xf]  ;;  %v3264_v0 = vperm.slane %v11455_v14, 2 }
 0x291   :  { %2993 = vmatpush.bf16.msra.mxu0 %v7837_v50  ;;  %v3184_v17 = vmul.f32 %v11476_v4, %v3183_v55  ;;  %v3150_v32 = vmax.f32 %v3142_v31, 0.0  ;;  %v3157_v50 = vsub.f32 %v11428_v22, %v11442_v41  ;;  %v2787_v41 = vpop.f32.mrf.mxu0  ;;  %v8824_v55 = vld [vmem:[#allocation12 + $0x3f0] sm:$0xf] }
 0x292   :  { %6171 = vmatpush.bf16.msra.mxu2 %v8433_v30  ;;  %v3312_v30 = vmul.f32 0.2, %v3304_v6 }
 0x293   :  { %6186 = vmatpush.bf16.msra.mxu3 %v8601_v42  ;;  %v3185_v23 = vmul.f32 0.5, %v3184_v17  ;;  %v11488_v43 = vadd.f32 1e-05, %v3150_v32  ;;  %v10675_v42 = vld [vmem:[#allocation12 + $0x6a8] sm:$0xf0] }
 0x294   :  { %2994 = vmatmul.bf16.vlgmr.msra.gmra.mxu0 %v11385_v45  ;;  %v9189_v45 = vor.u32 %v10682_v2, %v9188_v20  ;;  %v9161_v15 = vor.u32 %v10675_v42, %v9160_v44  ;;  %v3320_v62 = vmax.f32 %v3304_v6, %v3312_v30  ;;  %v2802_v6 = vpop.f32.mrf.mxu1  ;;  %v9104_v17 = vld [vmem:[#allocation12 + $0x620] sm:$0xf]  ;;  %v10584_v20 = vld [vmem:[#allocation12 + $0x3d0] sm:$0xf0]  ;;  %v9357_v2 = vor.u32 %v10724_v48, %v9356_v11  ;;  %v10577_v42 = vld [vmem:[#allocation12 + $0x398] sm:$0xf0] }
 0x295   :  { %6194 = vmatpush.bf16.msrb.mxu0 %v8965_v60  ;;  %v3186_v36 = vsub.f32 1.5, %v3185_v23  ;;  %10941 = vrsqrt.f32 %v11488_v43  ;;  %v10598_v60 = vld [vmem:[#allocation12 + $0x440] sm:$0xf0]  ;;  %v9105_v1 = vor.u32 %v10661_v18, %v9104_v17  ;;  %v9328_v30 = vld [vmem:[#allocation12 + $0x7e0] sm:$0xf]  ;;  %v8797_v34 = vor.u32 %v10584_v20, %v8796_v19 }
 0x296   :  { %6172 = vmatpush.bf16.msra.mxu2 %v8405_v24  ;;  %6207 = vmatpush.bf16.msrb.mxu1 %v9189_v45  ;;  %v2763_v40 = vpop.f32.mrf.mxu2  ;;  %v9413_v24 = vor.u32 %v10738_v29, %v9412_v49  ;;  %v8853_v38 = vor.u32 %v10598_v60, %v8852_v56  ;;  %v10717_v45 = vld [vmem:[#allocation12 + $0x7f8] sm:$0xf0]  ;;  %v8768_v44 = vld [vmem:[#allocation12 + $0x380] sm:$0xf]  ;;  %v9300_v56 = vld [vmem:[#allocation12 + $0x7a8] sm:$0xf]  ;;  %vm3198_vm9 = vweird.f32 %v11488_v43 }
 0x297   :  { %6187 = vmatpush.bf16.msra.mxu3 %v8573_v61  ;;  %v3187_v46 = vmul.f32 %v11476_v4, %v3186_v36  ;;  %v2788_v61 = vadd.f32 %v2787_v41, %v2775_v63  ;;  %v9076_v36 = vld [vmem:[#allocation12 + $0x5e8] sm:$0xf]  ;;  %v8769_v60 = vor.u32 %v10577_v42, %v8768_v44  ;;  %v10647_v63 = vld [vmem:[#allocation12 + $0x5c8] sm:$0xf0]  ;;  %v3158_v41 = vsub.f32 %v11448_v58, %v11478_v7  ;;  %v9020_v6 = vld [vmem:[#allocation12 + $0x578] sm:$0xf] }
 0x298   :  { %v10640_v58 = vld [vmem:[#allocation12 + $0x590] sm:$0xf0]  ;;  %v9244_v18 = vld [vmem:[#allocation12 + $0x738] sm:$0xf]  ;;  %v10633_v19 = vld [vmem:[#allocation12 + $0x558] sm:$0xf0] }
 0x299   :  { %6195 = vmatpush.bf16.msrb.mxu0 %v8937_v25  ;;  %v3191_v21 = vsel %vm3190_vm7, %v11476_v4, %v3187_v46  ;;  %v10591_v25 = vld [vmem:[#allocation12 + $0x408] sm:$0xf0]  ;;  %v11500_v4 = vpack.c.bf16 %v3320_v62, %v3320_v62  ;;  %v11502_v9 = vadd.f32 %v2800_v39, %v2788_v61  ;;  %v10710_v62 = vld [vmem:[#allocation12 + $0x7c0] sm:$0xf0]  ;;  %v9021_v11 = vor.u32 %v10640_v58, %v9020_v6  ;;  %v9608_v42 = vld [vmem:[#allocation12 + $0xa10] sm:$0xf] }
 0x29a   :  { %6173 = vmatpush.bf16.msra.mxu2 %v8377_v8  ;;  %v3253_v22 = vmul.f32 %v3191_v21, %v3157_v50  ;;  %6208 = vmatpush.bf16.msrb.mxu1 %v9161_v15  ;;  %v8825_v31 = vor.u32 %v10591_v25, %v8824_v55  ;;  %v9048_v21 = vld [vmem:[#allocation12 + $0x5b0] sm:$0xf]  ;;  %v10703_v25 = vld [vmem:[#allocation12 + $0x788] sm:$0xf0] }
 0x29b   :  { %6188 = vmatpush.bf16.msra.mxu3 %v8545_v57  ;;  %v11504_v8 = vpop.eup %10941  ;;  %v3030_v35 = vrot.slane %v11502_v9, 4  ;;  %v3063_v57 = vmul.f32 %v11502_v9, %v11502_v9  ;;  %v9049_v3 = vor.u32 %v10647_v63, %v9048_v21  ;;  %v9580_v63 = vld [vmem:[#allocation12 + $0x9d8] sm:$0xf] }
 0x29c   :  { %v3279_v5 = vmul.f32 %v3263_v37, %v3253_v22  ;;  %v3193_v26 = vmul.f32 %v11504_v8, %v11488_v43  ;;  %v10654_v37 = vld [vmem:[#allocation12 + $0x600] sm:$0xf0]  ;;  %vm3199_vm8 = vweird.f32 %v11504_v8  ;;  %v9301_v43 = vor.u32 %v10710_v62, %v9300_v56  ;;  %v8490_v62 = vld [vmem:[#allocation12 + $0x16c] sm:$0xf0] }
 0x29d   :  { %6196 = vmatpush.bf16.msrb.mxu0 %v8909_v27  ;;  %v3031_v27 = vadd.f32 %v3030_v35, %v11502_v9  ;;  %v3086_v28 = vrot.slane %v3063_v57, 4  ;;  %v9077_v46 = vor.u32 %v10654_v37, %v9076_v36  ;;  %vm3200_vm10 = vmor %vm3198_vm9, %vm3199_vm8 }
 0x29e   :  { %6174 = vmatpush.bf16.msra.mxu2 %v8349_v33  ;;  %v3305_v16 = vadd.f32 %v3289_v52, %v3279_v5  ;;  %6209 = vmatpush.bf16.msrb.mxu1 %v9133_v13  ;;  %v3194_v51 = vmul.f32 %v11504_v8, %v3193_v26  ;;  %v2789_v33 = vpop.f32.mrf.mxu0  ;;  %v9272_v5 = vld [vmem:[#allocation12 + $0x770] sm:$0xf] }
 0x29f   :  { %v3032_v49 = vrot.slane %v3031_v27, 2  ;;  %v3087_v29 = vadd.f32 %v3086_v28, %v3063_v57  ;;  %v9273_v17 = vor.u32 %v10703_v25, %v9272_v5  ;;  %v10696_v57 = vld [vmem:[#allocation12 + $0x750] sm:$0xf0]  ;;  %v9552_v5 = vld [vmem:[#allocation12 + $0x9a0] sm:$0xf] }
 0x2a0   :  { %v3313_v23 = vmul.f32 0.2, %v3305_v16  ;;  %v3195_v39 = vmul.f32 0.5, %v3194_v51  ;;  %v9245_v28 = vor.u32 %v10696_v57, %v9244_v18  ;;  %v10766_v57 = vld [vmem:[#allocation12 + $0x980] sm:$0xf0] }
 0x2a1   :  { %6197 = vmatpush.bf16.msrb.mxu0 %v8881_v47  ;;  %v3033_v50 = vadd.f32 %v3032_v49, %v3031_v27  ;;  %v3088_v52 = vrot.slane %v3087_v29, 2  ;;  %v2826_v22 = vpop.f32.mrf.mxu3  ;;  %v8518_v49 = vld [vmem:[#allocation12 + $0x1a4] sm:$0xf0] }
 0x2a2   :  { %6175 = vmatpush.bf16.msra.mxu2 %v8321_v54  ;;  %v3321_v32 = vmax.f32 %v3305_v16, %v3313_v23  ;;  %6210 = vmatpush.bf16.msrb.mxu1 %v9105_v1  ;;  %v3196_v15 = vsub.f32 1.5, %v3195_v39  ;;  %v9329_v54 = vor.u32 %v10717_v45, %v9328_v30  ;;  %v10794_v30 = vld [vmem:[#allocation12 + $0xa60] sm:$0xf0]  ;;  %v10689_v45 = vld [vmem:[#allocation12 + $0x718] sm:$0xf0] }
 0x2a3   :  { %v3089_v53 = vadd.f32 %v3088_v52, %v3087_v29  ;;  %v10511_v39 = vld [vmem:[#allocation12 + $0x18c] sm:$0xf] }
 0x2a4   :  { %v11514_v47 = vpack.c.bf16 %v3321_v32, %v3321_v32  ;;  %v3197_v40 = vmul.f32 %v11504_v8, %v3196_v15  ;;  %v8521_v52 = vor.u32 %v10511_v39, %v8518_v49 }
 0x2a5   :  { %6176 = vmatmul.bf16.vlgmr.msra.gmra.mxu2 %v11500_v4  ;;  %6198 = vmatpush.bf16.msrb.mxu0 %v8853_v38  ;;  %v3090_v13 = vrot.slane %v3089_v53, 1 }
 0x2a6   :  { %6220 = vmatpush.bf16.msrb.mxu2 %v9413_v24  ;;  %6189 = vmatmul.bf16.vlgmr.msra.gmra.mxu3 %v11514_v47  ;;  %v3034_v24 = vrot.slane %v3033_v50, 1  ;;  %v3201_v61 = vsel %vm3200_vm10, %v11504_v8, %v3197_v40  ;;  %v10780_v40 = vld [vmem:[#allocation12 + $0x9f0] sm:$0xf0] }
 0x2a7   :  { %6211 = vmatpush.bf16.msrb.mxu1 %v9077_v46  ;;  %v3254_v55 = vmul.f32 %v3201_v61, %v3158_v41  ;;  %v3091_v7 = vadd.f32 %v3090_v13, %v3089_v53  ;;  %v10787_v46 = vld [vmem:[#allocation12 + $0xa28] sm:$0xf0] }
 0x2a8   :  { %v3035_v38 = vadd.f32 %v3034_v24, %v3033_v50  ;;  %v2813_v35 = vpop.f32.mrf.mxu2 }
 0x2a9   :  { %6199 = vmatpush.bf16.msrb.mxu0 %v8825_v31  ;;  %v3280_v16 = vmul.f32 %v3264_v0, %v3254_v55  ;;  %v3127_v48 = vmul.f32 0.125, %v3091_v7  ;;  %v8992_v31 = vld [vmem:[#allocation12 + $0x540] sm:$0xf]  ;;  %v2828_v23 = vpop.f32.mrf.mxu3  ;;  %v2827_v15 = vadd.f32 %v2826_v22, %v2813_v35  ;;  %v9581_v0 = vor.u32 %v10780_v40, %v9580_v63  ;;  %v10497_v22 = vld [vmem:[#allocation12 + $0x11c] sm:$0xf] }
 0x2aa   :  { %6221 = vmatpush.bf16.msrb.mxu2 %v9385_v10  ;;  %v11527_v10 = vmul.f32 0.125, %v3035_v38  ;;  %v8993_v1 = vor.u32 %v10633_v19, %v8992_v31  ;;  %v10773_v55 = vld [vmem:[#allocation12 + $0x9b8] sm:$0xf0]  ;;  %v9524_v35 = vld [vmem:[#allocation12 + $0x968] sm:$0xf] }
 0x2ab   :  { %6212 = vmatpush.bf16.msrb.mxu1 %v9049_v3  ;;  %v3306_v26 = vadd.f32 %v3290_v59, %v3280_v16  ;;  %v8462_v59 = vld [vmem:[#allocation12 + $0x134] sm:$0xf0]  ;;  %v9553_v7 = vor.u32 %v10773_v55, %v9552_v5  ;;  %v8434_v16 = vld [vmem:[#allocation12 + $0xfc] sm:$0xf0]  ;;  %v9525_v23 = vor.u32 %v10766_v57, %v9524_v35  ;;  %v10462_v55 = vld [vmem:[#allocation12 + $0x4] sm:$0xf] }
 0x2ac   :  { %v3135_v8 = vmul.f32 %v11527_v10, %v11527_v10  ;;  %v2852_v33 = vpop.f32.mrf.mxu1  ;;  %v9832_v57 = vld [vmem:[#allocation12 + $0xbd0] sm:$0xf] }
 0x2ad   :  { %6200 = vmatpush.bf16.msrb.mxu0 %v8797_v34  ;;  %v3314_v51 = vmul.f32 0.2, %v3306_v26  ;;  %v9216_v34 = vld [vmem:[#allocation12 + $0x700] sm:$0xf] }
 0x2ae   :  { %6222 = vmatpush.bf16.msrb.mxu2 %v9357_v2  ;;  %v3143_v20 = vsub.f32 %v3127_v48, %v3135_v8  ;;  %v9636_v2 = vld [vmem:[#allocation12 + $0xa48] sm:$0xf]  ;;  %v9217_v44 = vor.u32 %v10689_v45, %v9216_v34  ;;  %v9496_v34 = vld [vmem:[#allocation12 + $0x930] sm:$0xf]  ;;  %v10759_v45 = vld [vmem:[#allocation12 + $0x948] sm:$0xf0] }
 0x2af   :  { %6213 = vmatpush.bf16.msrb.mxu1 %v9021_v11  ;;  %v3322_v32 = vmax.f32 %v3306_v26, %v3314_v51  ;;  %v9637_v36 = vor.u32 %v10794_v30, %v9636_v2  ;;  %v10490_v11 = vld [vmem:[#allocation12 + $0xe4] sm:$0xf]  ;;  %v8406_v51 = vld [vmem:[#allocation12 + $0xc4] sm:$0xf0] }
 0x2b0   :  { %v3151_v27 = vmax.f32 %v3143_v20, 0.0  ;;  %v2815_v50 = vpop.f32.mrf.mxu2  ;;  %v8437_v26 = vor.u32 %v10490_v11, %v8434_v16  ;;  %v10850_v11 = vld [vmem:[#allocation12 + $0xc20] sm:$0xf0]  ;;  %v10567_v16 = vld [vmem:[#allocation12 + $0x34c] sm:$0xf] }
 0x2b1   :  { %6201 = vmatpush.bf16.msrb.mxu0 %v8769_v60  ;;  %v11533_v29 = vpack.c.bf16 %v3322_v32, %v3322_v32  ;;  %6233 = vmatpush.bf16.msrb.mxu3 %v9637_v36  ;;  %v2839_v56 = vpop.f32.mrf.mxu0  ;;  %v10504_v60 = vld [vmem:[#allocation12 + $0x154] sm:$0xf]  ;;  %v3159_v32 = vsub.f32 %v11502_v9, %v11527_v10  ;;  %v8378_v50 = vld [vmem:[#allocation12 + $0x8c] sm:$0xf0]  ;;  %v9468_v10 = vld [vmem:[#allocation12 + $0x8f8] sm:$0xf] }
 0x2b2   :  { %6223 = vmatpush.bf16.msrb.mxu2 %v9329_v54  ;;  %v11531_v37 = vadd.f32 1e-05, %v3151_v27  ;;  %v9609_v54 = vor.u32 %v10787_v46, %v9608_v42  ;;  %v2840_v21 = vadd.f32 %v2839_v56, %v2827_v15  ;;  %v8493_v41 = vor.u32 %v10504_v60, %v8490_v62  ;;  %v10476_v15 = vld [vmem:[#allocation12 + $0x74] sm:$0xf] }
 0x2b3   :  { %6214 = vmatpush.bf16.msrb.mxu1 %v8993_v1  ;;  %v10483_v1 = vld [vmem:[#allocation12 + $0xac] sm:$0xf]  ;;  %v9497_v46 = vor.u32 %v10759_v45, %v9496_v34  ;;  %v10752_v56 = vld [vmem:[#allocation12 + $0x910] sm:$0xf0]  ;;  %v10553_v34 = vld [vmem:[#allocation12 + $0x2dc] sm:$0xf] }
 0x2b4   :  { %10943 = vrsqrt.f32 %v11531_v37  ;;  %6202 = vmatmul.bf16.vlgmr.msrb.gmra.mxu0 %v11533_v29  ;;  %v11537_v24 = vadd.f32 %v2852_v33, %v2840_v21  ;;  %v2854_v53 = vpop.f32.mrf.mxu1  ;;  %vm3208_vm12 = vweird.f32 %v11531_v37  ;;  %v3265_v33 = vperm.slane %v11455_v14, 3 }
 0x2b5   :  { %6234 = vmatpush.bf16.msrb.mxu3 %v9609_v54  ;;  %v8381_v21 = vor.u32 %v10476_v15, %v8378_v50  ;;  %v9469_v63 = vor.u32 %v10752_v56, %v9468_v10  ;;  %v9776_v15 = vld [vmem:[#allocation12 + $0xb60] sm:$0xf]  ;;  %v10829_v50 = vld [vmem:[#allocation12 + $0xb78] sm:$0xf0] }
 0x2b6   :  { %6224 = vmatpush.bf16.msrb.mxu2 %v9301_v43  ;;  %v3036_v38 = vrot.slane %v11537_v24, 4  ;;  %v3064_v13 = vmul.f32 %v11537_v24, %v11537_v24  ;;  %v8465_v43 = vor.u32 %v10497_v22, %v8462_v59  ;;  %v9777_v56 = vor.u32 %v10829_v50, %v9776_v15 }
 0x2b8   :  { %v3037_v6 = vadd.f32 %v3036_v38, %v11537_v24  ;;  %v3092_v58 = vrot.slane %v3064_v13, 4  ;;  %v10745_v38 = vld [vmem:[#allocation12 + $0x8d8] sm:$0xf0] }
 0x2b9   :  { %6235 = vmatpush.bf16.msrb.mxu3 %v9581_v0  ;;  %v2841_v48 = vpop.f32.mrf.mxu0  ;;  %v8350_v0 = vld [vmem:[#allocation12 + $0x54] sm:$0xf0] }
 0x2ba   :  { %6225 = vmatpush.bf16.msrb.mxu2 %v9273_v17  ;;  %v10944_v3 = vpop.eup %10943  ;;  %v3038_v17 = vrot.slane %v3037_v6, 2  ;;  %v3093_v18 = vadd.f32 %v3092_v58, %v3064_v13 }
 0x2bb   :  { %v3203_v61 = vmul.f32 %v10944_v3, %v11531_v37  ;;  %vm3209_vm11 = vweird.f32 %v10944_v3  ;;  %v3291_v37 = vperm.slane %v11464_v12, 3 }
 0x2bc   :  { %v3039_v19 = vadd.f32 %v3038_v17, %v3037_v6  ;;  %v3094_v20 = vrot.slane %v3093_v18, 2  ;;  %vm3210_vm13 = vmor %vm3208_vm12, %vm3209_vm11  ;;  %v8742_v17 = vld [vmem:[#allocation12 + $0x364] sm:$0xf0] }
 0x2bd   :  { %v3204_v25 = vmul.f32 %v10944_v3, %v3203_v61  ;;  %6236 = vmatpush.bf16.msrb.mxu3 %v9553_v7  ;;  %v9440_v61 = vld [vmem:[#allocation12 + $0x8c0] sm:$0xf]  ;;  %v9860_v7 = vld [vmem:[#allocation12 + $0xc08] sm:$0xf] }
 0x2be   :  { %6226 = vmatpush.bf16.msrb.mxu2 %v9245_v28  ;;  %v3040_v28 = vrot.slane %v3039_v19, 1  ;;  %v3095_v2 = vadd.f32 %v3094_v20, %v3093_v18  ;;  %v9441_v5 = vor.u32 %v10745_v38, %v9440_v61 }
 0x2bf   :  { %v3205_v8 = vmul.f32 0.5, %v3204_v25  ;;  %v8322_v25 = vld [vmem:[#allocation12 + $0x1c] sm:$0xf0] }
 0x2c0   :  { %v3041_v39 = vadd.f32 %v3040_v28, %v3039_v19  ;;  %v3096_v49 = vrot.slane %v3095_v2, 1  ;;  %v8325_v35 = vor.u32 %v10462_v55, %v8322_v25  ;;  %v10560_v19 = vld [vmem:[#allocation12 + $0x314] sm:$0xf]  ;;  %v3266_v25 = vperm.slane %v11455_v14, 4 }
 0x2c1   :  { %v3206_v31 = vsub.f32 1.5, %v3205_v8  ;;  %v2878_v30 = vpop.f32.mrf.mxu3  ;;  %6237 = vmatpush.bf16.msrb.mxu3 %v9525_v23  ;;  %v9861_v8 = vor.u32 %v10850_v11, %v9860_v7 }
 0x2c2   :  { %6227 = vmatpush.bf16.msrb.mxu2 %v9217_v44  ;;  %v8409_v44 = vor.u32 %v10483_v1, %v8406_v51  ;;  %v11550_v54 = vmul.f32 0.125, %v3041_v39  ;;  %v8714_v51 = vld [vmem:[#allocation12 + $0x32c] sm:$0xf0] }
 0x2c3   :  { %v3207_v27 = vmul.f32 %v10944_v3, %v3206_v31  ;;  %6246 = vmatpush.bf16.msra.mxu0 %v9861_v8  ;;  %v10843_v31 = vld [vmem:[#allocation12 + $0xbe8] sm:$0xf0]  ;;  %v8717_v28 = vor.u32 %v10560_v19, %v8714_v51  ;;  %v3292_v19 = vperm.slane %v11464_v12, 4 }
 0x2c4   :  { %v3136_v62 = vmul.f32 %v11550_v54, %v11550_v54  ;;  %v9833_v1 = vor.u32 %v10843_v31, %v9832_v57  ;;  %v3160_v11 = vsub.f32 %v11537_v24, %v11550_v54  ;;  %v10815_v8 = vld [vmem:[#allocation12 + $0xb08] sm:$0xf0]  ;;  %v9692_v24 = vld [vmem:[#allocation12 + $0xab8] sm:$0xf]  ;;  %v10808_v54 = vld [vmem:[#allocation12 + $0xad0] sm:$0xf0] }
 0x2c5   :  { %v3211_v36 = vsel %vm3210_vm13, %v10944_v3, %v3207_v27  ;;  %6238 = vmatpush.bf16.msrb.mxu3 %v9497_v46 }
 0x2c6   :  { %6272 = vmatpush.bf16.msra.mxu2 %v8521_v52  ;;  %v3255_v42 = vmul.f32 %v3211_v36, %v3159_v32  ;;  %v3097_v52 = vadd.f32 %v3096_v49, %v3095_v2  ;;  %v9804_v32 = vld [vmem:[#allocation12 + $0xb98] sm:$0xf] }
 0x2c7   :  { %6247 = vmatpush.bf16.msra.mxu0 %v9833_v1 }
 0x2c8   :  { %v3281_v9 = vmul.f32 %v3265_v33, %v3255_v42  ;;  %v3128_v60 = vmul.f32 0.125, %v3097_v52  ;;  %v2865_v53 = vpop.f32.mrf.mxu2  ;;  %v10836_v33 = vld [vmem:[#allocation12 + $0xbb0] sm:$0xf0] }
 0x2c9   :  { %v2880_v59 = vpop.f32.mrf.mxu3  ;;  %6239 = vmatpush.bf16.msrb.mxu3 %v9469_v63  ;;  %v2879_v20 = vadd.f32 %v2878_v30, %v2865_v53  ;;  %v9805_v39 = vor.u32 %v10836_v33, %v9804_v32  ;;  %v8686_v30 = vld [vmem:[#allocation12 + $0x2f4] sm:$0xf0]  ;;  %v9693_v32 = vor.u32 %v10808_v54, %v9692_v24 }
 0x2ca   :  { %6273 = vmatpush.bf16.msra.mxu2 %v8493_v41  ;;  %v3307_v40 = vadd.f32 %v3291_v37, %v3281_v9  ;;  %v10469_v41 = vld [vmem:[#allocation12 + $0x3c] sm:$0xf]  ;;  %v3144_v22 = vsub.f32 %v3128_v60, %v3136_v62  ;;  %v10546_v60 = vld [vmem:[#allocation12 + $0x2a4] sm:$0xf]  ;;  %v8658_v62 = vld [vmem:[#allocation12 + $0x2bc] sm:$0xf0] }
 0x2cb   :  { %6248 = vmatpush.bf16.msra.mxu0 %v9805_v39  ;;  %v8661_v63 = vor.u32 %v10546_v60, %v8658_v62  ;;  %v10539_v59 = vld [vmem:[#allocation12 + $0x26c] sm:$0xf]  ;;  %v8574_v33 = vld [vmem:[#allocation12 + $0x214] sm:$0xf0]  ;;  %v10084_v62 = vld [vmem:[#allocation12 + $0xdc8] sm:$0xf] }
 0x2cc   :  { %v3315_v3 = vmul.f32 0.2, %v3307_v40  ;;  %v3152_v13 = vmax.f32 %v3144_v22, 0.0  ;;  %v2904_v58 = vpop.f32.mrf.mxu1  ;;  %v10822_v22 = vld [vmem:[#allocation12 + $0xb40] sm:$0xf0] }
 0x2cd   :  { %6240 = vmatpush.bf16.msrb.mxu3 %v9441_v5 }
 0x2ce   :  { %6274 = vmatpush.bf16.msra.mxu2 %v8465_v43  ;;  %v8353_v43 = vor.u32 %v10469_v41, %v8350_v0  ;;  %v3323_v6 = vmax.f32 %v3307_v40, %v3315_v3  ;;  %v11554_v48 = vadd.f32 1e-05, %v3152_v13  ;;  %v9748_v0 = vld [vmem:[#allocation12 + $0xb28] sm:$0xf] }
 0x2cf   :  { %6249 = vmatpush.bf16.msra.mxu0 %v9777_v56  ;;  %v9749_v13 = vor.u32 %v10822_v22, %v9748_v0  ;;  %v10728_v0 = vld [vmem:[#allocation12 + $0x854] sm:$0xf]  ;;  %v9386_v22 = vld [vmem:[#allocation12 + $0x86c] sm:$0xf0] }
 0x2d0   :  { %v11556_v18 = vpack.c.bf16 %v3323_v6, %v3323_v6  ;;  %10945 = vrsqrt.f32 %v11554_v48  ;;  %v2867_v23 = vpop.f32.mrf.mxu2  ;;  %vm3218_vm15 = vweird.f32 %v11554_v48 }
 0x2d1   :  { %v2891_v27 = vpop.f32.mrf.mxu0 }
 0x2d2   :  { %6275 = vmatpush.bf16.msra.mxu2 %v8437_v26  ;;  %v8745_v26 = vor.u32 %v10567_v16, %v8742_v17  ;;  %6215 = vmatmul.bf16.vlgmr.msrb.gmra.mxu1 %v11556_v18  ;;  %v2892_v2 = vadd.f32 %v2891_v27, %v2879_v20  ;;  %v9720_v16 = vld [vmem:[#allocation12 + $0xaf0] sm:$0xf]  ;;  %v10532_v17 = vld [vmem:[#allocation12 + $0x234] sm:$0xf]  ;;  %v10525_v27 = vld [vmem:[#allocation12 + $0x1fc] sm:$0xf] }
 0x2d3   :  { %6250 = vmatpush.bf16.msra.mxu0 %v9749_v13  ;;  %v9721_v20 = vor.u32 %v10815_v8, %v9720_v16  ;;  %v8577_v12 = vor.u32 %v10525_v27, %v8574_v33  ;;  %v10885_v33 = vld [vmem:[#allocation12 + $0xd38] sm:$0xf0] }
 0x2d4   :  { %6285 = vmatpush.bf16.msra.mxu3 %v8745_v26  ;;  %v11560_v45 = vadd.f32 %v2904_v58, %v2892_v2  ;;  %v2906_v36 = vpop.f32.mrf.mxu1 }
 0x2d6   :  { %6276 = vmatpush.bf16.msra.mxu2 %v8409_v44  ;;  %v10946_v49 = vpop.eup %10945  ;;  %v8689_v44 = vor.u32 %v10553_v34, %v8686_v30  ;;  %v3042_v37 = vrot.slane %v11560_v45, 4  ;;  %v3065_v46 = vmul.f32 %v11560_v45, %v11560_v45 }
 0x2d7   :  { %v3213_v42 = vmul.f32 %v10946_v49, %v11554_v48  ;;  %vm3219_vm14 = vweird.f32 %v10946_v49  ;;  %v8602_v48 = vld [vmem:[#allocation12 + $0x24c] sm:$0xf0]  ;;  %6251 = vmatpush.bf16.msra.mxu0 %v9721_v20  ;;  %v8910_v20 = vld [vmem:[#allocation12 + $0x4b4] sm:$0xf0] }
 0x2d8   :  { %6286 = vmatpush.bf16.msra.mxu3 %v8717_v28  ;;  %v3043_v9 = vadd.f32 %v3042_v37, %v11560_v45  ;;  %v3098_v10 = vrot.slane %v3065_v46, 4  ;;  %vm3220_vm0 = vmor %vm3218_vm15, %vm3219_vm14  ;;  %v8605_v14 = vor.u32 %v10532_v17, %v8602_v48  ;;  %v9664_v37 = vld [vmem:[#allocation12 + $0xa80] sm:$0xf]  ;;  %v10721_v17 = vld [vmem:[#allocation12 + $0x81c] sm:$0xf] }
 0x2d9   :  { %v3214_v52 = vmul.f32 %v10946_v49, %v3213_v42  ;;  %v10609_v48 = vld [vmem:[#allocation12 + $0x49c] sm:$0xf] }
 0x2da   :  { %6277 = vmatpush.bf16.msra.mxu2 %v8381_v21  ;;  %v2893_v21 = vpop.f32.mrf.mxu0  ;;  %v3044_v53 = vrot.slane %v3043_v9, 2  ;;  %v3099_v41 = vadd.f32 %v3098_v10, %v3065_v46  ;;  %v10801_v46 = vld [vmem:[#allocation12 + $0xa98] sm:$0xf0] }
 0x2db   :  { %v3215_v40 = vmul.f32 0.5, %v3214_v52  ;;  %6252 = vmatpush.bf16.msra.mxu0 %v9693_v32  ;;  %v9665_v50 = vor.u32 %v10801_v46, %v9664_v37  ;;  %v10518_v52 = vld [vmem:[#allocation12 + $0x1c4] sm:$0xf]  ;;  %v10000_v32 = vld [vmem:[#allocation12 + $0xd20] sm:$0xf] }
 0x2dc   :  { %6287 = vmatpush.bf16.msra.mxu3 %v8689_v44  ;;  %v3045_v61 = vadd.f32 %v3044_v53, %v3043_v9  ;;  %v3100_v38 = vrot.slane %v3099_v41, 2  ;;  %v9414_v44 = vld [vmem:[#allocation12 + $0x8a4] sm:$0xf0]  ;;  %v8546_v9 = vld [vmem:[#allocation12 + $0x1dc] sm:$0xf0] }
 0x2dd   :  { %v3216_v3 = vsub.f32 1.5, %v3215_v40  ;;  %v8549_v60 = vor.u32 %v10518_v52, %v8546_v9  ;;  %v10906_v40 = vld [vmem:[#allocation12 + $0xde0] sm:$0xf0]  ;;  %v10623_v53 = vld [vmem:[#allocation12 + $0x50c] sm:$0xf] }
 0x2de   :  { %6278 = vmatpush.bf16.msra.mxu2 %v8353_v43  ;;  %v8630_v43 = vld [vmem:[#allocation12 + $0x284] sm:$0xf0]  ;;  %v3046_v6 = vrot.slane %v3045_v61, 1  ;;  %v3101_v58 = vadd.f32 %v3100_v38, %v3099_v41  ;;  %v10056_v38 = vld [vmem:[#allocation12 + $0xd90] sm:$0xf] }
 0x2df   :  { %v8633_v5 = vor.u32 %v10539_v59, %v8630_v43  ;;  %v3217_v55 = vmul.f32 %v10946_v49, %v3216_v3  ;;  %6253 = vmatpush.bf16.msra.mxu0 %v9665_v50  ;;  %v10085_v59 = vor.u32 %v10906_v40, %v10084_v62  ;;  %v8966_v3 = vld [vmem:[#allocation12 + $0x524] sm:$0xf0]  ;;  %v10707_v52 = vld [vmem:[#allocation12 + $0x7ac] sm:$0xf] }
 0x2e0   :  { %6288 = vmatpush.bf16.msra.mxu3 %v8661_v63  ;;  %v3102_v57 = vrot.slane %v3101_v58, 1  ;;  %v9302_v9 = vld [vmem:[#allocation12 + $0x7c4] sm:$0xf0] }
 0x2e1   :  { %v2930_v7 = vpop.f32.mrf.mxu3  ;;  %v3221_v26 = vsel %vm3220_vm0, %v10946_v49, %v3217_v55  ;;  %v10735_v49 = vld [vmem:[#allocation12 + $0x88c] sm:$0xf]  ;;  %6259 = vmatpush.bf16.msra.mxu1 %v10085_v59  ;;  %v10616_v55 = vld [vmem:[#allocation12 + $0x4d4] sm:$0xf] }
 0x2e2   :  { %6279 = vmatpush.bf16.msra.mxu2 %v8325_v35  ;;  %v3047_v35 = vadd.f32 %v3046_v6, %v3045_v61  ;;  %v3256_v31 = vmul.f32 %v3221_v26, %v3160_v11  ;;  %v3103_v23 = vadd.f32 %v3102_v57, %v3101_v58  ;;  %v9417_v63 = vor.u32 %v10735_v49, %v9414_v44  ;;  %v9358_v26 = vld [vmem:[#allocation12 + $0x834] sm:$0xf0]  ;;  %v10892_v57 = vld [vmem:[#allocation12 + $0xd70] sm:$0xf0]  ;;  %v8882_v49 = vld [vmem:[#allocation12 + $0x47c] sm:$0xf0] }
 0x2e3   :  { %v8969_v61 = vor.u32 %v10623_v53, %v8966_v3  ;;  %v9389_v58 = vor.u32 %v10728_v0, %v9386_v22  ;;  %v8854_v0 = vld [vmem:[#allocation12 + $0x444] sm:$0xf0]  ;;  %v9305_v22 = vor.u32 %v10707_v52, %v9302_v9  ;;  %v10700_v59 = vld [vmem:[#allocation12 + $0x774] sm:$0xf]  ;;  %v9274_v3 = vld [vmem:[#allocation12 + $0x78c] sm:$0xf0] }
 0x2e4   :  { %6289 = vmatpush.bf16.msra.mxu3 %v8633_v5  ;;  %v11572_v1 = vmul.f32 0.125, %v3047_v35  ;;  %v3282_v51 = vmul.f32 %v3266_v25, %v3256_v31  ;;  %v3129_v28 = vmul.f32 0.125, %v3103_v23  ;;  %v10899_v5 = vld [vmem:[#allocation12 + $0xda8] sm:$0xf0]  ;;  %v8938_v25 = vld [vmem:[#allocation12 + $0x4ec] sm:$0xf0]  ;;  %v9361_v23 = vor.u32 %v10721_v17, %v9358_v26 }
 0x2e5   :  { %6298 = vmatpush.bf16.msrb.mxu0 %v8969_v61  ;;  %v10057_v11 = vor.u32 %v10899_v5, %v10056_v38  ;;  %v8941_v16 = vor.u32 %v10616_v55, %v8938_v25  ;;  %v10028_v35 = vld [vmem:[#allocation12 + $0xd58] sm:$0xf]  ;;  %v10515_v52 = vld [vmem:[#allocation12 + $0x1a8] sm:$0xf0] }
 0x2e6   :  { %v3137_v2 = vmul.f32 %v11572_v1, %v11572_v1  ;;  %v3308_v34 = vadd.f32 %v3292_v19, %v3282_v51  ;;  %v10029_v19 = vor.u32 %v10892_v57, %v10028_v35  ;;  %v8913_v51 = vor.u32 %v10609_v48, %v8910_v20  ;;  %v8826_v57 = vld [vmem:[#allocation12 + $0x40c] sm:$0xf0] }
 0x2e7   :  { %6260 = vmatpush.bf16.msra.mxu1 %v10057_v11  ;;  %v10871_v11 = vld [vmem:[#allocation12 + $0xcc8] sm:$0xf0]  ;;  %v9277_v35 = vor.u32 %v10700_v59, %v9274_v3  ;;  %v10784_v59 = vld [vmem:[#allocation12 + $0xa14] sm:$0xf] }
 0x2e8   :  { %6290 = vmatpush.bf16.msra.mxu3 %v8605_v14  ;;  %v2917_v36 = vpop.f32.mrf.mxu2  ;;  %v3145_v39 = vsub.f32 %v3129_v28, %v3137_v2  ;;  %v3316_v42 = vmul.f32 0.2, %v3308_v34  ;;  %v10714_v28 = vld [vmem:[#allocation12 + $0x7e4] sm:$0xf]  ;;  %v9330_v2 = vld [vmem:[#allocation12 + $0x7fc] sm:$0xf0] }
 0x2e9   :  { %v2932_v30 = vpop.f32.mrf.mxu3  ;;  %v2931_v13 = vadd.f32 %v2930_v7, %v2917_v36  ;;  %6299 = vmatpush.bf16.msrb.mxu0 %v8941_v16  ;;  %v10588_v16 = vld [vmem:[#allocation12 + $0x3f4] sm:$0xf] }
 0x2ea   :  { %v3153_v15 = vmax.f32 %v3145_v39, 0.0  ;;  %v3324_v10 = vmax.f32 %v3308_v34, %v3316_v42  ;;  %v10001_v39 = vor.u32 %v10885_v33, %v10000_v32  ;;  %v10602_v30 = vld [vmem:[#allocation12 + $0x464] sm:$0xf]  ;;  %v9333_v42 = vor.u32 %v10714_v28, %v9330_v2  ;;  %v10581_v28 = vld [vmem:[#allocation12 + $0x3bc] sm:$0xf] }
 0x2eb   :  { %6261 = vmatpush.bf16.msra.mxu1 %v10029_v19  ;;  %v8885_v37 = vor.u32 %v10602_v30, %v8882_v49  ;;  %v10686_v30 = vld [vmem:[#allocation12 + $0x704] sm:$0xf]  ;;  %v9218_v49 = vld [vmem:[#allocation12 + $0x71c] sm:$0xf0] }
 0x2ec   :  { %6291 = vmatpush.bf16.msra.mxu3 %v8577_v12  ;;  %v2956_v56 = vpop.f32.mrf.mxu1  ;;  %v11576_v21 = vadd.f32 1e-05, %v3153_v15  ;;  %v11578_v41 = vpack.c.bf16 %v3324_v10, %v3324_v10  ;;  %v9972_v10 = vld [vmem:[#allocation12 + $0xce8] sm:$0xf] }
 0x2ed   :  { %6300 = vmatpush.bf16.msrb.mxu0 %v8913_v51  ;;  %v9246_v51 = vld [vmem:[#allocation12 + $0x754] sm:$0xf0] }
 0x2ee   :  { %10947 = vrsqrt.f32 %v11576_v21  ;;  %6228 = vmatmul.bf16.vlgmr.msrb.gmra.mxu2 %v11578_v41  ;;  %vm3228_vm2 = vweird.f32 %v11576_v21 }
 0x2ef   :  { %6324 = vmatpush.bf16.msrb.mxu2 %v9417_v63  ;;  %6262 = vmatpush.bf16.msra.mxu1 %v10001_v39 }
 0x2f0   :  { %6292 = vmatpush.bf16.msra.mxu3 %v8549_v60  ;;  %v2919_v43 = vpop.f32.mrf.mxu2  ;;  %v10595_v60 = vld [vmem:[#allocation12 + $0x42c] sm:$0xf] }
 0x2f1   :  { %v2943_v6 = vpop.f32.mrf.mxu0  ;;  %6301 = vmatpush.bf16.msrb.mxu0 %v8885_v37  ;;  %v8857_v61 = vor.u32 %v10595_v60, %v8854_v0  ;;  %v11602_v43 = vld [vmem:[#allocation13 + $0xc] sm:$0xff] }
 0x2f2   :  { %v2944_v8 = vadd.f32 %v2943_v6, %v2931_v13  ;;  %v3267_v5 = vperm.slane %v11602_v43, 5  ;;  %v3161_v6 = vsub.f32 %v11560_v45, %v11572_v1  ;;  %v8829_v1 = vor.u32 %v10588_v16, %v8826_v57  ;;  %v9610_v13 = vld [vmem:[#allocation12 + $0xa2c] sm:$0xf0] }
 0x2f3   :  { %6325 = vmatpush.bf16.msrb.mxu2 %v9389_v58  ;;  %v9944_v58 = vld [vmem:[#allocation12 + $0xcb0] sm:$0xf] }
 0x2f4   :  { %v11582_v7 = vadd.f32 %v2956_v56, %v2944_v8  ;;  %v2958_v31 = vpop.f32.mrf.mxu1  ;;  %v11584_v14 = vpop.eup %10947  ;;  %v10878_v56 = vld [vmem:[#allocation12 + $0xd00] sm:$0xf0]  ;;  %v9945_v45 = vor.u32 %v10871_v11, %v9944_v58  ;;  %v9190_v11 = vld [vmem:[#allocation12 + $0x6e4] sm:$0xf0] }
 0x2f5   :  { %v3223_v24 = vmul.f32 %v11584_v14, %v11576_v21  ;;  %vm3229_vm1 = vweird.f32 %v11584_v14  ;;  %v9973_v53 = vor.u32 %v10878_v56, %v9972_v10  ;;  %v11613_v31 = vld [vmem:[#allocation13 + $0x14] sm:$0xff]  ;;  %6302 = vmatpush.bf16.msrb.mxu0 %v8857_v61  ;;  %v9888_v10 = vld [vmem:[#allocation12 + $0xc40] sm:$0xf]  ;;  %v10857_v56 = vld [vmem:[#allocation12 + $0xc58] sm:$0xf0] }
 0x2f6   :  { %v3048_v54 = vrot.slane %v11582_v7, 4  ;;  %v3066_v27 = vmul.f32 %v11582_v7, %v11582_v7  ;;  %vm11598_vm3 = vmor %vm3228_vm2, %vm3229_vm1  ;;  %v3293_v19 = vperm.slane %v11613_v31, 5 }
 0x2f7   :  { %v3224_v34 = vmul.f32 %v11584_v14, %v3223_v24  ;;  %6326 = vmatpush.bf16.msrb.mxu2 %v9361_v23  ;;  %6263 = vmatpush.bf16.msra.mxu1 %v9973_v53 }
 0x2f8   :  { %v3049_v36 = vadd.f32 %v3048_v54, %v11582_v7  ;;  %v3104_v12 = vrot.slane %v3066_v27, 4  ;;  %v9916_v54 = vld [vmem:[#allocation12 + $0xc78] sm:$0xf] }
 0x2f9   :  { %v2945_v44 = vpop.f32.mrf.mxu0  ;;  %v3225_v46 = vmul.f32 0.5, %v3224_v34  ;;  %v8798_v34 = vld [vmem:[#allocation12 + $0x3d4] sm:$0xf0]  ;;  %6303 = vmatpush.bf16.msrb.mxu0 %v8829_v1 }
 0x2fa   :  { %v3050_v15 = vrot.slane %v3049_v36, 2  ;;  %v3105_v50 = vadd.f32 %v3104_v12, %v3066_v27  ;;  %v10864_v27 = vld [vmem:[#allocation12 + $0xc90] sm:$0xf0]  ;;  %v10791_v44 = vld [vmem:[#allocation12 + $0xa4c] sm:$0xf] }
 0x2fb   :  { %v3226_v62 = vsub.f32 1.5, %v3225_v46  ;;  %6327 = vmatpush.bf16.msrb.mxu2 %v9333_v42  ;;  %6264 = vmatpush.bf16.msra.mxu1 %v9945_v45  ;;  %v9917_v33 = vor.u32 %v10864_v27, %v9916_v54  ;;  %v8801_v42 = vor.u32 %v10581_v28, %v8798_v34  ;;  %v10777_v45 = vld [vmem:[#allocation12 + $0x9dc] sm:$0xf]  ;;  %v9134_v28 = vld [vmem:[#allocation12 + $0x674] sm:$0xf0] }
 0x2fc   :  { %v3051_v63 = vadd.f32 %v3050_v15, %v3049_v36  ;;  %v3106_v40 = vrot.slane %v3105_v50, 2  ;;  %v9638_v15 = vld [vmem:[#allocation12 + $0xa64] sm:$0xf0]  ;;  %v10665_v27 = vld [vmem:[#allocation12 + $0x65c] sm:$0xf] }
 0x2fd   :  { %v3227_v38 = vmul.f32 %v11584_v14, %v3226_v62  ;;  %v9889_v62 = vor.u32 %v10857_v56, %v9888_v10  ;;  %6304 = vmatpush.bf16.msrb.mxu0 %v8801_v42  ;;  %v9641_v61 = vor.u32 %v10791_v44, %v9638_v15  ;;  %v10770_v34 = vld [vmem:[#allocation12 + $0x9a4] sm:$0xf]  ;;  %v9137_v42 = vor.u32 %v10665_v27, %v9134_v28 }
 0x2fe   :  { %v3052_v55 = vrot.slane %v3051_v63, 1  ;;  %v3107_v21 = vadd.f32 %v3106_v40, %v3105_v50  ;;  %6280 = vmatmul.bf16.vlgmr.msra.gmra.mxu2 %v11500_v4  ;;  %v8524_v50 = vld [vmem:[#allocation12 + $0x190] sm:$0xf]  ;;  %v8770_v40 = vld [vmem:[#allocation12 + $0x39c] sm:$0xf0]  ;;  %v3294_v27 = vperm.slane %v11613_v31, 6 }
 0x2ff   :  { %v3231_v8 = vsel %vm11598_vm3, %v11584_v14, %v3227_v38  ;;  %6328 = vmatpush.bf16.msrb.mxu2 %v9305_v22  ;;  %v10693_v14 = vld [vmem:[#allocation12 + $0x73c] sm:$0xf]  ;;  %6265 = vmatpush.bf16.msra.mxu1 %v9917_v33  ;;  %v9221_v22 = vor.u32 %v10686_v30, %v9218_v49  ;;  %v8525_v38 = vor.u32 %v10515_v52, %v8524_v50  ;;  %v8440_v49 = vld [vmem:[#allocation12 + $0xe8] sm:$0xf]  ;;  %v10494_v44 = vld [vmem:[#allocation12 + $0x100] sm:$0xf0] }
 0x300   :  { %v3053_v17 = vadd.f32 %v3052_v55, %v3051_v63  ;;  %v3108_v26 = vrot.slane %v3107_v21, 1  ;;  %v3257_v48 = vmul.f32 %v3231_v8, %v3161_v6  ;;  %v9249_v39 = vor.u32 %v10693_v14, %v9246_v51  ;;  %v10574_v63 = vld [vmem:[#allocation12 + $0x384] sm:$0xf]  ;;  %v10508_v6 = vld [vmem:[#allocation12 + $0x170] sm:$0xf0] }
 0x301   :  { %v11605_v25 = vpop.f32.mrf.mxu3  ;;  %v8773_v58 = vor.u32 %v10574_v63, %v8770_v40  ;;  %v8468_v14 = vld [vmem:[#allocation12 + $0x120] sm:$0xf]  ;;  %v10501_v51 = vld [vmem:[#allocation12 + $0x138] sm:$0xf0]  ;;  %v10658_v50 = vld [vmem:[#allocation12 + $0x624] sm:$0xf]  ;;  %v8441_v56 = vor.u32 %v10494_v44, %v8440_v49 }
 0x302   :  { %v3109_v20 = vadd.f32 %v3108_v26, %v3107_v21  ;;  %v11616_v23 = vmul.f32 0.125, %v3053_v17  ;;  %v3283_v24 = vmul.f32 %v3267_v5, %v3257_v48  ;;  %v10679_v5 = vld [vmem:[#allocation12 + $0x6cc] sm:$0xf]  ;;  %v8496_v21 = vld [vmem:[#allocation12 + $0x158] sm:$0xf]  ;;  %v9613_v48 = vor.u32 %v10784_v59, %v9610_v13 }
 0x303   :  { %6329 = vmatpush.bf16.msrb.mxu2 %v9277_v35  ;;  %6266 = vmatpush.bf16.msra.mxu1 %v9889_v62  ;;  %v9193_v16 = vor.u32 %v10679_v5, %v9190_v11  ;;  %v10672_v26 = vld [vmem:[#allocation12 + $0x694] sm:$0xf]  ;;  %v9162_v35 = vld [vmem:[#allocation12 + $0x6ac] sm:$0xf0]  ;;  %v8469_v33 = vor.u32 %v10501_v51, %v8468_v14  ;;  %v9106_v52 = vld [vmem:[#allocation12 + $0x63c] sm:$0xf0] }
 0x304   :  { %v3130_v2 = vmul.f32 0.125, %v3109_v20  ;;  %v3138_v32 = vmul.f32 %v11616_v23, %v11616_v23  ;;  %v3309_v36 = vadd.f32 %v3293_v19, %v3283_v24  ;;  %v8497_v19 = vor.u32 %v10508_v6, %v8496_v21  ;;  %v9582_v20 = vld [vmem:[#allocation12 + $0x9f4] sm:$0xf0]  ;;  %6305 = vmatpush.bf16.msrb.mxu0 %v8773_v58  ;;  %v9526_v62 = vld [vmem:[#allocation12 + $0x984] sm:$0xf0] }
 0x305   :  { %v9165_v24 = vor.u32 %v10672_v26, %v9162_v35  ;;  %v9109_v59 = vor.u32 %v10658_v50, %v9106_v52  ;;  %v10651_v5 = vld [vmem:[#allocation12 + $0x5ec] sm:$0xf]  ;;  %v9078_v21 = vld [vmem:[#allocation12 + $0x604] sm:$0xf0]  ;;  %v10756_v11 = vld [vmem:[#allocation12 + $0x934] sm:$0xf] }
 0x306   :  { %v3146_v37 = vsub.f32 %v3130_v2, %v3138_v32  ;;  %v3317_v9 = vmul.f32 0.2, %v3309_v36  ;;  %v9585_v32 = vor.u32 %v10777_v45, %v9582_v20  ;;  %v8384_v35 = vld [vmem:[#allocation12 + $0x78] sm:$0xf]  ;;  %v3268_v45 = vperm.slane %v11602_v43, 6 }
 0x307   :  { %6330 = vmatpush.bf16.msrb.mxu2 %v9249_v39  ;;  %6311 = vmatpush.bf16.msrb.mxu1 %v9193_v16  ;;  %v9498_v16 = vld [vmem:[#allocation12 + $0x94c] sm:$0xf0]  ;;  %v10644_v51 = vld [vmem:[#allocation12 + $0x5b4] sm:$0xf] }
 0x308   :  { %v2969_v12 = vpop.f32.mrf.mxu2  ;;  %v3154_v60 = vmax.f32 %v3146_v37, 0.0  ;;  %v3325_v53 = vmax.f32 %v3309_v36, %v3317_v9  ;;  %v9554_v36 = vld [vmem:[#allocation12 + $0x9bc] sm:$0xf0] }
 0x309   :  { %v2984_v46 = vpop.f32.mrf.mxu3  ;;  %v2983_v8 = vadd.f32 %v11605_v25, %v2969_v12  ;;  %v9557_v10 = vor.u32 %v10770_v34, %v9554_v36  ;;  %v10473_v36 = vld [vmem:[#allocation12 + $0x58] sm:$0xf0] }
 0x30a   :  { %v11620_v3 = vadd.f32 1e-05, %v3154_v60  ;;  %v11622_v55 = vpack.c.bf16 %v3325_v53, %v3325_v53  ;;  %v10763_v60 = vld [vmem:[#allocation12 + $0x96c] sm:$0xf] }
 0x30b   :  { %6331 = vmatpush.bf16.msrb.mxu2 %v9221_v22  ;;  %6312 = vmatpush.bf16.msrb.mxu1 %v9165_v24  ;;  %v10487_v22 = vld [vmem:[#allocation12 + $0xc8] sm:$0xf0]  ;;  %v9529_v6 = vor.u32 %v10763_v60, %v9526_v62  ;;  %v9050_v24 = vld [vmem:[#allocation12 + $0x5cc] sm:$0xf0]  ;;  %v10466_v62 = vld [vmem:[#allocation12 + $0x20] sm:$0xf0] }
 0x30c   :  { %v3008_v0 = vpop.f32.mrf.mxu1  ;;  %10949 = vrsqrt.f32 %v11620_v3  ;;  %6241 = vmatmul.bf16.vlgmr.msrb.gmra.mxu3 %v11622_v55  ;;  %vm3238_vm5 = vweird.f32 %v11620_v3 }
 0x30d   :  { %6337 = vmatpush.bf16.msrb.mxu3 %v9641_v61 }
 0x30e   :  { %6332 = vmatmul.bf16.vlgmr.msrb.gmra.mxu2 %v11578_v41 }
 0x30f   :  { %6376 = vmatpush.bf16.msra.mxu2 %v8525_v38  ;;  %6313 = vmatpush.bf16.msrb.mxu1 %v9137_v42  ;;  %v10637_v42 = vld [vmem:[#allocation12 + $0x57c] sm:$0xf] }
 0x310   :  { %v2971_v17 = vpop.f32.mrf.mxu2 }
 0x311   :  { %v2995_v57 = vpop.f32.mrf.mxu0  ;;  %6338 = vmatpush.bf16.msrb.mxu3 %v9613_v48  ;;  %v9081_v48 = vor.u32 %v10651_v5, %v9078_v21 }
 0x312   :  { %v2996_v1 = vadd.f32 %v2995_v57, %v2983_v8  ;;  %v11630_v2 = vpop.eup %10949  ;;  %v10480_v57 = vld [vmem:[#allocation12 + $0x90] sm:$0xf0] }
 0x313   :  { %6377 = vmatpush.bf16.msra.mxu2 %v8497_v19  ;;  %v3233_v12 = vmul.f32 %v11630_v2, %v11620_v3  ;;  %vm3239_vm4 = vweird.f32 %v11630_v2  ;;  %6314 = vmatpush.bf16.msrb.mxu1 %v9109_v59  ;;  %v3162_v19 = vsub.f32 %v11582_v7, %v11616_v23  ;;  %v3848_v7 = vld [vmem:[#allocation13 + $0x1c] sm:$0xff]  ;;  %v9501_v23 = vor.u32 %v10756_v11, %v9498_v16  ;;  %v10571_v59 = vld [vmem:[#allocation12 + $0x368] sm:$0xf0]  ;;  %v10630_v16 = vld [vmem:[#allocation12 + $0x544] sm:$0xf] }
 0x314   :  { %v11628_v25 = vadd.f32 %v3008_v0, %v2996_v1  ;;  %v3010_v54 = vpop.f32.mrf.mxu1  ;;  %v8412_v0 = vld [vmem:[#allocation12 + $0xb0] sm:$0xf]  ;;  %vm3240_vm6 = vmor %vm3238_vm5, %vm3239_vm4  ;;  %v8385_v28 = vor.u32 %v10480_v57, %v8384_v35  ;;  %v10749_v3 = vld [vmem:[#allocation12 + $0x8fc] sm:$0xf]  ;;  %v3850_v44 = vperm.slane %v3848_v7, 0 }
 0x315   :  { %v3234_v37 = vmul.f32 %v11630_v2, %v3233_v12  ;;  %6339 = vmatpush.bf16.msrb.mxu3 %v9585_v32  ;;  %v8413_v58 = vor.u32 %v10487_v22, %v8412_v0  ;;  %v9470_v32 = vld [vmem:[#allocation12 + $0x914] sm:$0xf0]  ;;  %v9053_v12 = vor.u32 %v10644_v51, %v9050_v24  ;;  %v8748_v22 = vld [vmem:[#allocation12 + $0x350] sm:$0xf]  ;;  %v10732_v51 = vld [vmem:[#allocation12 + $0x870] sm:$0xf0] }
 0x316   :  { %v3054_v39 = vrot.slane %v11628_v25, 4  ;;  %v3067_v30 = vmul.f32 %v11628_v25, %v11628_v25  ;;  %v9473_v50 = vor.u32 %v10749_v3, %v9470_v32  ;;  %v8749_v11 = vor.u32 %v10571_v59, %v8748_v22  ;;  %v10833_v3 = vld [vmem:[#allocation12 + $0xb9c] sm:$0xf]  ;;  %v8692_v32 = vld [vmem:[#allocation12 + $0x2e0] sm:$0xf] }
 0x317   :  { %6378 = vmatpush.bf16.msra.mxu2 %v8469_v33  ;;  %v3235_v63 = vmul.f32 0.5, %v3234_v37  ;;  %6315 = vmatpush.bf16.msrb.mxu1 %v9081_v48  ;;  %v9022_v37 = vld [vmem:[#allocation12 + $0x594] sm:$0xf0]  ;;  %v10840_v48 = vld [vmem:[#allocation12 + $0xbd4] sm:$0xf] }
 0x318   :  { %v3055_v46 = vadd.f32 %v3054_v39, %v11628_v25  ;;  %v3110_v15 = vrot.slane %v3067_v30, 4  ;;  %v8636_v59 = vld [vmem:[#allocation12 + $0x270] sm:$0xf] }
 0x319   :  { %v2997_v9 = vpop.f32.mrf.mxu0  ;;  %v3236_v61 = vsub.f32 1.5, %v3235_v63  ;;  %6340 = vmatpush.bf16.msrb.mxu3 %v9557_v10  ;;  %v9442_v10 = vld [vmem:[#allocation12 + $0x8dc] sm:$0xf0]  ;;  %v10847_v63 = vld [vmem:[#allocation12 + $0xc0c] sm:$0xf] }
 0x31a   :  { %v3056_v40 = vrot.slane %v3055_v46, 2  ;;  %v3111_v53 = vadd.f32 %v3110_v15, %v3067_v30  ;;  %v10742_v9 = vld [vmem:[#allocation12 + $0x8c4] sm:$0xf] }
 0x31b   :  { %6379 = vmatpush.bf16.msra.mxu2 %v8441_v56  ;;  %v3237_v8 = vmul.f32 %v11630_v2, %v3236_v61  ;;  %v8328_v56 = vld [vmem:[#allocation12 + $0x8] sm:$0xf]  ;;  %6316 = vmatpush.bf16.msrb.mxu1 %v9053_v12  ;;  %v9445_v21 = vor.u32 %v10742_v9, %v9442_v10  ;;  %v10725_v12 = vld [vmem:[#allocation12 + $0x838] sm:$0xf0]  ;;  %v10718_v10 = vld [vmem:[#allocation12 + $0x800] sm:$0xf0] }
 0x31c   :  { %v3057_v38 = vadd.f32 %v3056_v40, %v3055_v46  ;;  %v3112_v13 = vrot.slane %v3111_v53, 2  ;;  %6293 = vmatmul.bf16.vlgmr.msra.gmra.mxu3 %v11514_v47  ;;  %v9862_v40 = vld [vmem:[#allocation12 + $0xc24] sm:$0xf0] }
 0x31d   :  { %v3241_v1 = vsel %vm3240_vm6, %v11630_v2, %v3237_v8  ;;  %6341 = vmatpush.bf16.msrb.mxu3 %v9529_v6  ;;  %v8356_v2 = vld [vmem:[#allocation12 + $0x40] sm:$0xf]  ;;  %v8329_v6 = vor.u32 %v10466_v62, %v8328_v56  ;;  %v9865_v35 = vor.u32 %v10847_v63, %v9862_v40  ;;  %v9336_v9 = vld [vmem:[#allocation12 + $0x7e8] sm:$0xf]  ;;  %v10819_v63 = vld [vmem:[#allocation12 + $0xb2c] sm:$0xf] }
 0x31e   :  { %v3058_v17 = vrot.slane %v3057_v38, 1  ;;  %v3113_v26 = vadd.f32 %v3112_v13, %v3111_v53  ;;  %v3258_v54 = vmul.f32 %v3241_v1, %v3162_v19  ;;  %v8357_v52 = vor.u32 %v10473_v36, %v8356_v2  ;;  %v10739_v13 = vld [vmem:[#allocation12 + $0x8a8] sm:$0xf0]  ;;  %v8994_v8 = vld [vmem:[#allocation12 + $0x55c] sm:$0xf0] }
 0x31f   :  { %6380 = vmatpush.bf16.msra.mxu2 %v8413_v58  ;;  %v9025_v53 = vor.u32 %v10637_v42, %v9022_v37  ;;  %v8720_v19 = vld [vmem:[#allocation12 + $0x318] sm:$0xf]  ;;  %v9364_v36 = vld [vmem:[#allocation12 + $0x820] sm:$0xf]  ;;  %v10826_v37 = vld [vmem:[#allocation12 + $0xb64] sm:$0xf]  ;;  %v9337_v22 = vor.u32 %v10718_v10, %v9336_v9 }
 0x320   :  { %v3059_v20 = vadd.f32 %v3058_v17, %v3057_v38  ;;  %v3114_v14 = vrot.slane %v3113_v26, 1  ;;  %v3284_v39 = vmul.f32 %v3268_v45, %v3258_v54  ;;  %v9420_v38 = vld [vmem:[#allocation12 + $0x890] sm:$0xf]  ;;  %v10564_v45 = vld [vmem:[#allocation12 + $0x330] sm:$0xf0]  ;;  %v9365_v42 = vor.u32 %v10725_v12, %v9364_v36 }
 0x321   :  { %6342 = vmatpush.bf16.msrb.mxu3 %v9501_v23  ;;  %6317 = vmatpush.bf16.msrb.mxu1 %v9025_v53  ;;  %v9421_v57 = vor.u32 %v10739_v13, %v9420_v38  ;;  %v8721_v7 = vor.u32 %v10564_v45, %v8720_v19  ;;  %v9806_v2 = vld [vmem:[#allocation12 + $0xbb4] sm:$0xf0]  ;;  %v9750_v38 = vld [vmem:[#allocation12 + $0xb44] sm:$0xf0]  ;;  %v9308_v13 = vld [vmem:[#allocation12 + $0x7b0] sm:$0xf] }
 0x322   :  { %v3115_v33 = vadd.f32 %v3114_v14, %v3113_v26  ;;  %v11652_v34 = vmul.f32 0.125, %v3059_v20  ;;  %v3310_v46 = vadd.f32 %v3294_v27, %v3284_v39  ;;  %v9834_v20 = vld [vmem:[#allocation12 + $0xbec] sm:$0xf0]  ;;  %v9392_v14 = vld [vmem:[#allocation12 + $0x858] sm:$0xf]  ;;  %v8997_v27 = vor.u32 %v10630_v16, %v8994_v8 }
 0x323   :  { %6381 = vmatpush.bf16.msra.mxu2 %v8385_v28  ;;  %v9837_v23 = vor.u32 %v10840_v48, %v9834_v20  ;;  %v9393_v28 = vor.u32 %v10732_v51, %v9392_v14  ;;  %v9753_v8 = vor.u32 %v10819_v63, %v9750_v38  ;;  %v10536_v48 = vld [vmem:[#allocation12 + $0x250] sm:$0xf0]  ;;  %v3269_v45 = vperm.slane %v11602_v43, 7  ;;  %v9694_v43 = vld [vmem:[#allocation12 + $0xad4] sm:$0xf0] }
 0x324   :  { %v3131_v30 = vmul.f32 0.125, %v3115_v33  ;;  %v3139_v49 = vmul.f32 %v11652_v34, %v11652_v34  ;;  %v3318_v0 = vmul.f32 0.2, %v3310_v46  ;;  %v10557_v33 = vld [vmem:[#allocation12 + $0x2f8] sm:$0xf0]  ;;  %v3163_v19 = vsub.f32 %v11628_v25, %v11652_v34 }
 0x325   :  { %6343 = vmatpush.bf16.msrb.mxu3 %v9473_v50  ;;  %6318 = vmatpush.bf16.msrb.mxu1 %v8997_v27  ;;  %v10704_v20 = vld [vmem:[#allocation12 + $0x790] sm:$0xf0]  ;;  %v8580_v25 = vld [vmem:[#allocation12 + $0x200] sm:$0xf]  ;;  %v10529_v34 = vld [vmem:[#allocation12 + $0x218] sm:$0xf0] }
 0x326   :  { %v3147_v60 = vsub.f32 %v3131_v30, %v3139_v49  ;;  %v3326_v5 = vmax.f32 %v3310_v46, %v3318_v0  ;;  %v8693_v30 = vor.u32 %v10557_v33, %v8692_v32  ;;  %v8664_v46 = vld [vmem:[#allocation12 + $0x2a8] sm:$0xf]  ;;  %v10697_v32 = vld [vmem:[#allocation12 + $0x758] sm:$0xf0]  ;;  %v9666_v36 = vld [vmem:[#allocation12 + $0xa9c] sm:$0xf0] }
 0x327   :  { %6382 = vmatpush.bf16.msra.mxu2 %v8357_v52  ;;  %v9778_v52 = vld [vmem:[#allocation12 + $0xb7c] sm:$0xf0]  ;;  %v8552_v12 = vld [vmem:[#allocation12 + $0x1c8] sm:$0xf]  ;;  %v9644_v9 = vld [vmem:[#allocation12 + $0xa50] sm:$0xf] }
 0x328   :  { %v6177_v15 = vpop.f32.mrf.mxu2  ;;  %v3155_v61 = vmax.f32 %v3147_v60, 0.0  ;;  %v11658_v17 = vpack.c.bf16 %v3326_v5, %v3326_v5  ;;  %v9781_v0 = vor.u32 %v10826_v37, %v9778_v52  ;;  %v10711_v5 = vld [vmem:[#allocation12 + $0x7c8] sm:$0xf0]  ;;  %v8526_v63 = vld [vmem:[#allocation12 + $0x1ac] sm:$0xf0] }
 0x329   :  { %v6178_v26 = vadd.f32 %v6177_v15, %v3850_v44  ;;  %v6190_v1 = vpop.f32.mrf.mxu3  ;;  %6344 = vmatpush.bf16.msrb.mxu3 %v9445_v21  ;;  %v9809_v44 = vor.u32 %v10833_v3, %v9806_v2  ;;  %v10550_v15 = vld [vmem:[#allocation12 + $0x2c0] sm:$0xf0]  ;;  %v9252_v3 = vld [vmem:[#allocation12 + $0x740] sm:$0xf]  ;;  %v8581_v2 = vor.u32 %v10529_v34, %v8580_v25  ;;  %v10627_v52 = vld [vmem:[#allocation12 + $0x528] sm:$0xf0] }
 0x32a   :  { %v11656_v58 = vadd.f32 1e-05, %v3155_v61  ;;  %6254 = vmatmul.bf16.vlgmr.msra.gmra.mxu0 %v11658_v17  ;;  %v8665_v62 = vor.u32 %v10550_v15, %v8664_v46  ;;  %v10543_v61 = vld [vmem:[#allocation12 + $0x288] sm:$0xf0]  ;;  %v10086_v15 = vld [vmem:[#allocation12 + $0xde4] sm:$0xf0] }
 0x32b   :  { %6383 = vmatpush.bf16.msra.mxu2 %v8329_v6  ;;  %v6191_v54 = vadd.f32 %v6190_v1, %v6178_v26  ;;  %6350 = vmatpush.bf16.msra.mxu0 %v9865_v35  ;;  %v8637_v6 = vor.u32 %v10543_v61, %v8636_v59  ;;  %v9309_v26 = vor.u32 %v10711_v5, %v9308_v13  ;;  %v9722_v35 = vld [vmem:[#allocation12 + $0xb0c] sm:$0xf0]  ;;  %v9280_v1 = vld [vmem:[#allocation12 + $0x778] sm:$0xf]  ;;  %v10903_v46 = vld [vmem:[#allocation12 + $0xdcc] sm:$0xf] }
 0x32c   :  { %10951 = vrsqrt.f32 %v11656_v58  ;;  %6345 = vmatmul.bf16.vlgmr.msrb.gmra.mxu3 %v11622_v55  ;;  %vm3248_vm8 = vweird.f32 %v11656_v58  ;;  %v10089_v59 = vor.u32 %v10903_v46, %v10086_v15  ;;  %v10896_v38 = vld [vmem:[#allocation12 + $0xd94] sm:$0xf]  ;;  %v10058_v13 = vld [vmem:[#allocation12 + $0xdac] sm:$0xf0]  ;;  %v10882_v25 = vld [vmem:[#allocation12 + $0xd24] sm:$0xf] }
 0x32d   :  { %6389 = vmatpush.bf16.msra.mxu3 %v8749_v11  ;;  %v10812_v11 = vld [vmem:[#allocation12 + $0xaf4] sm:$0xf]  ;;  %v10002_v34 = vld [vmem:[#allocation12 + $0xd3c] sm:$0xf0]  ;;  %v8860_v15 = vld [vmem:[#allocation12 + $0x430] sm:$0xf] }
 0x32e   :  { %6384 = vmatmul.bf16.vlgmr.msra.gmra.mxu2 %v11500_v4  ;;  %v9725_v27 = vor.u32 %v10812_v11, %v9722_v35  ;;  %v10620_v11 = vld [vmem:[#allocation12 + $0x4f0] sm:$0xf0]  ;;  %v8498_v35 = vld [vmem:[#allocation12 + $0x174] sm:$0xf0] }
 0x32f   :  { %6428 = vmatpush.bf16.msrb.mxu2 %v9421_v57  ;;  %6351 = vmatpush.bf16.msra.mxu0 %v9837_v23  ;;  %v8608_v57 = vld [vmem:[#allocation12 + $0x238] sm:$0xf]  ;;  %v10805_v23 = vld [vmem:[#allocation12 + $0xabc] sm:$0xf] }
 0x330   :  { %v6179_v24 = vpop.f32.mrf.mxu2 }
 0x331   :  { %6390 = vmatpush.bf16.msra.mxu3 %v8721_v7  ;;  %v6192_v50 = vpop.f32.mrf.mxu3  ;;  %v6203_v60 = vpop.f32.mrf.mxu0  ;;  %v3295_v24 = vperm.slane %v11613_v31, 7  ;;  %v9281_v7 = vor.u32 %v10704_v20, %v9280_v1  ;;  %v10798_v31 = vld [vmem:[#allocation12 + $0xa84] sm:$0xf] }
 0x332   :  { %v10952_v39 = vpop.eup %10951  ;;  %v11665_v53 = vadd.f32 %v6203_v60, %v6191_v54  ;;  %v8609_v54 = vor.u32 %v10536_v48, %v8608_v57  ;;  %v8972_v50 = vld [vmem:[#allocation12 + $0x510] sm:$0xf]  ;;  %v10795_v60 = vld [vmem:[#allocation12 + $0xa68] sm:$0xf0]  ;;  %v10061_v57 = vor.u32 %v10896_v38, %v10058_v13  ;;  %v9504_v38 = vld [vmem:[#allocation12 + $0x938] sm:$0xf] }
 0x333   :  { %v3243_v49 = vmul.f32 %v10952_v39, %v11656_v58  ;;  %6429 = vmatpush.bf16.msrb.mxu2 %v9393_v28  ;;  %6352 = vmatpush.bf16.msra.mxu0 %v9809_v44  ;;  %vm3249_vm7 = vweird.f32 %v10952_v39  ;;  %v9224_v44 = vld [vmem:[#allocation12 + $0x708] sm:$0xf]  ;;  %v8973_v61 = vor.u32 %v10627_v52, %v8972_v50  ;;  %v9645_v5 = vor.u32 %v10795_v60, %v9644_v9  ;;  %v10599_v50 = vld [vmem:[#allocation12 + $0x448] sm:$0xf0]  ;;  %v9532_v52 = vld [vmem:[#allocation12 + $0x970] sm:$0xf] }
 0x334   :  { %vm3250_vm9 = vmor %vm3248_vm8, %vm3249_vm7  ;;  %v10767_v9 = vld [vmem:[#allocation12 + $0x988] sm:$0xf0]  ;;  %v10760_v13 = vld [vmem:[#allocation12 + $0x950] sm:$0xf0] }
 0x335   :  { %v3244_v56 = vmul.f32 %v10952_v39, %v3243_v49  ;;  %6391 = vmatpush.bf16.msra.mxu3 %v8693_v30  ;;  %v9253_v30 = vor.u32 %v10697_v32, %v9252_v3  ;;  %v10522_v49 = vld [vmem:[#allocation12 + $0x1e0] sm:$0xf0]  ;;  %v8888_v3 = vld [vmem:[#allocation12 + $0x468] sm:$0xf] }
 0x336   :  { %v10606_v32 = vld [vmem:[#allocation12 + $0x480] sm:$0xf0] }
 0x337   :  { %v3245_v40 = vmul.f32 0.5, %v3244_v56  ;;  %6430 = vmatpush.bf16.msrb.mxu2 %v9365_v42  ;;  %6353 = vmatpush.bf16.msra.mxu0 %v9781_v0  ;;  %v10690_v42 = vld [vmem:[#allocation12 + $0x720] sm:$0xf0]  ;;  %v8553_v56 = vor.u32 %v10522_v49, %v8552_v12  ;;  %v8889_v49 = vor.u32 %v10606_v32, %v8888_v3  ;;  %v8330_v3 = vld [vmem:[#allocation12 + $0x24] sm:$0xf0] }
 0x338   :  { %v9225_v0 = vor.u32 %v10690_v42, %v9224_v44  ;;  %v10875_v44 = vld [vmem:[#allocation12 + $0xcec] sm:$0xf]  ;;  %v9974_v42 = vld [vmem:[#allocation12 + $0xd04] sm:$0xf0]  ;;  %v9196_v32 = vld [vmem:[#allocation12 + $0x6d0] sm:$0xf] }
 0x339   :  { %v3246_v21 = vsub.f32 1.5, %v3245_v40  ;;  %6392 = vmatpush.bf16.msra.mxu3 %v8665_v62  ;;  %v6205_v58 = vpop.f32.mrf.mxu0  ;;  %v10512_v62 = vld [vmem:[#allocation12 + $0x194] sm:$0xf]  ;;  %v9669_v40 = vor.u32 %v10798_v31, %v9666_v36  ;;  %v10491_v31 = vld [vmem:[#allocation12 + $0xec] sm:$0xf]  ;;  %v9977_v60 = vor.u32 %v10875_v44, %v9974_v42 }
 0x33a   :  { %6306 = vmatmul.bf16.vlgmr.msrb.gmra.mxu0 %v11533_v29  ;;  %v10781_v58 = vld [vmem:[#allocation12 + $0x9f8] sm:$0xf0]  ;;  %v8442_v36 = vld [vmem:[#allocation12 + $0x104] sm:$0xf0]  ;;  %v10736_v44 = vld [vmem:[#allocation12 + $0x894] sm:$0xf] }
 0x33b   :  { %v3247_v16 = vmul.f32 %v10952_v39, %v3246_v21  ;;  %6431 = vmatpush.bf16.msrb.mxu2 %v9337_v22  ;;  %6354 = vmatpush.bf16.msra.mxu0 %v9753_v8  ;;  %v8529_v21 = vor.u32 %v10512_v62, %v8526_v63  ;;  %v10788_v8 = vld [vmem:[#allocation12 + $0xa30] sm:$0xf0]  ;;  %v8445_v46 = vor.u32 %v10491_v31, %v8442_v36  ;;  %v9946_v63 = vld [vmem:[#allocation12 + $0xccc] sm:$0xf0]  ;;  %v10851_v31 = vld [vmem:[#allocation12 + $0xc28] sm:$0xf0] }
 0x33c   :  { %v8861_v62 = vor.u32 %v10599_v50, %v8860_v15  ;;  %v10568_v36 = vld [vmem:[#allocation12 + $0x354] sm:$0xf]  ;;  %v9422_v42 = vld [vmem:[#allocation12 + $0x8ac] sm:$0xf0] }
 0x33d   :  { %v3251_v14 = vsel %vm3250_vm9, %v10952_v39, %v3247_v16  ;;  %6393 = vmatpush.bf16.msra.mxu3 %v8637_v6  ;;  %v9697_v39 = vor.u32 %v10805_v23, %v9694_v43  ;;  %v8944_v6 = vld [vmem:[#allocation12 + $0x4d8] sm:$0xf] }
 0x33e   :  { %v3259_v51 = vmul.f32 %v3251_v14, %v3163_v19  ;;  %v9616_v16 = vld [vmem:[#allocation12 + $0xa18] sm:$0xf]  ;;  %v8945_v48 = vor.u32 %v10620_v11, %v8944_v6  ;;  %v10889_v19 = vld [vmem:[#allocation12 + $0xd5c] sm:$0xf]  ;;  %v8916_v14 = vld [vmem:[#allocation12 + $0x4a0] sm:$0xf] }
 0x33f   :  { %6432 = vmatpush.bf16.msrb.mxu2 %v9309_v26  ;;  %6355 = vmatpush.bf16.msra.mxu0 %v9725_v27  ;;  %v10505_v26 = vld [vmem:[#allocation12 + $0x15c] sm:$0xf]  ;;  %v9617_v1 = vor.u32 %v10788_v8, %v9616_v16  ;;  %v8470_v27 = vld [vmem:[#allocation12 + $0x13c] sm:$0xf0] }
 0x340   :  { %v3285_v28 = vmul.f32 %v3269_v45, %v3259_v51  ;;  %v10030_v45 = vld [vmem:[#allocation12 + $0xd74] sm:$0xf0]  ;;  %v8501_v20 = vor.u32 %v10505_v26, %v8498_v35  ;;  %v10613_v51 = vld [vmem:[#allocation12 + $0x4b8] sm:$0xf0]  ;;  %v9505_v35 = vor.u32 %v10760_v13, %v9504_v38  ;;  %v9140_v38 = vld [vmem:[#allocation12 + $0x660] sm:$0xf] }
 0x341   :  { %6394 = vmatpush.bf16.msra.mxu3 %v8609_v54  ;;  %v10498_v54 = vld [vmem:[#allocation12 + $0x124] sm:$0xf]  ;;  %v8917_v23 = vor.u32 %v10613_v51, %v8916_v14  ;;  %v10861_v8 = vld [vmem:[#allocation12 + $0xc7c] sm:$0xf]  ;;  %v9918_v26 = vld [vmem:[#allocation12 + $0xc94] sm:$0xf0] }
 0x342   :  { %v3311_v33 = vadd.f32 %v3295_v24, %v3285_v28  ;;  %v9588_v24 = vld [vmem:[#allocation12 + $0x9e0] sm:$0xf]  ;;  %v8473_v43 = vor.u32 %v10498_v54, %v8470_v27  ;;  %v10854_v51 = vld [vmem:[#allocation12 + $0xc44] sm:$0xf]  ;;  %v8776_v27 = vld [vmem:[#allocation12 + $0x388] sm:$0xf] }
 0x343   :  { %6433 = vmatpush.bf16.msrb.mxu2 %v9281_v7  ;;  %6356 = vmatpush.bf16.msra.mxu0 %v9697_v39  ;;  %v10033_v7 = vor.u32 %v10889_v19, %v10030_v45  ;;  %v9589_v28 = vor.u32 %v10781_v58, %v9588_v24  ;;  %v10585_v19 = vld [vmem:[#allocation12 + $0x3d8] sm:$0xf0]  ;;  %v9476_v45 = vld [vmem:[#allocation12 + $0x900] sm:$0xf]  ;;  %v9921_v24 = vor.u32 %v10861_v8, %v9918_v26  ;;  %v10722_v26 = vld [vmem:[#allocation12 + $0x824] sm:$0xf] }
 0x344   :  { %v3319_v37 = vmul.f32 0.2, %v3311_v33  ;;  %v8358_v14 = vld [vmem:[#allocation12 + $0x5c] sm:$0xf0]  ;;  %v10669_v13 = vld [vmem:[#allocation12 + $0x678] sm:$0xf0] }
 0x345   :  { %6395 = vmatpush.bf16.msra.mxu3 %v8581_v2  ;;  %v10774_v2 = vld [vmem:[#allocation12 + $0x9c0] sm:$0xf0]  ;;  %v9890_v54 = vld [vmem:[#allocation12 + $0xc5c] sm:$0xf0] }
 0x346   :  { %v3327_v10 = vmax.f32 %v3311_v33, %v3319_v37  ;;  %v9560_v33 = vld [vmem:[#allocation12 + $0x9a8] sm:$0xf]  ;;  %v8694_v8 = vld [vmem:[#allocation12 + $0x2fc] sm:$0xf0] }
 0x347   :  { %6434 = vmatpush.bf16.msrb.mxu2 %v9253_v30  ;;  %6357 = vmatpush.bf16.msra.mxu0 %v9669_v40  ;;  %v10005_v30 = vor.u32 %v10882_v25, %v10002_v34  ;;  %v9561_v37 = vor.u32 %v10774_v2, %v9560_v33  ;;  %v9533_v40 = vor.u32 %v10767_v9, %v9532_v52  ;;  %v9448_v34 = vld [vmem:[#allocation12 + $0x8c8] sm:$0xf]  ;;  %v10683_v33 = vld [vmem:[#allocation12 + $0x6e8] sm:$0xf0]  ;;  %v9868_v2 = vld [vmem:[#allocation12 + $0xc10] sm:$0xf] }
 0x348   :  { %v11673_v22 = vpack.c.bf16 %v3327_v10, %v3327_v10  ;;  %v10484_v10 = vld [vmem:[#allocation12 + $0xb4] sm:$0xf]  ;;  %v9197_v15 = vor.u32 %v10683_v33, %v9196_v32  ;;  %v9869_v50 = vor.u32 %v10851_v31, %v9868_v2  ;;  %v9168_v52 = vld [vmem:[#allocation12 + $0x698] sm:$0xf]  ;;  %v10823_v32 = vld [vmem:[#allocation12 + $0xb48] sm:$0xf0] }
 0x349   :  { %6396 = vmatpush.bf16.msra.mxu3 %v8553_v56  ;;  %v8414_v56 = vld [vmem:[#allocation12 + $0xcc] sm:$0xf0]  ;;  %v10676_v9 = vld [vmem:[#allocation12 + $0x6b0] sm:$0xf0] }
 0x34a   :  { %6267 = vmatmul.bf16.vlgmr.msra.gmra.mxu1 %v11673_v22  ;;  %6358 = vmatmul.bf16.vlgmr.msra.gmra.mxu0 %v11658_v17  ;;  %v10540_v33 = vld [vmem:[#allocation12 + $0x274] sm:$0xf]  ;;  %v8638_v2 = vld [vmem:[#allocation12 + $0x28c] sm:$0xf0] }
 0x34b   :  { %6435 = vmatpush.bf16.msrb.mxu2 %v9225_v0  ;;  %6363 = vmatpush.bf16.msra.mxu1 %v10089_v59  ;;  %v8417_v0 = vor.u32 %v10484_v10, %v8414_v56  ;;  %v8832_v59 = vld [vmem:[#allocation12 + $0x3f8] sm:$0xf]  ;;  %v9425_v56 = vor.u32 %v10736_v44, %v9422_v42  ;;  %v10708_v31 = vld [vmem:[#allocation12 + $0x7b4] sm:$0xf] }
 0x34c   :  { %6402 = vmatpush.bf16.msrb.mxu0 %v8973_v61  ;;  %6397 = vmatmul.bf16.vlgmr.msra.gmra.mxu3 %v11514_v47  ;;  %v10592_v61 = vld [vmem:[#allocation12 + $0x410] sm:$0xf0]  ;;  %v9056_v44 = vld [vmem:[#allocation12 + $0x5b8] sm:$0xf] }
 0x34d   :  { %6441 = vmatpush.bf16.msrb.mxu3 %v9645_v5  ;;  %v10477_v5 = vld [vmem:[#allocation12 + $0x7c] sm:$0xf]  ;;  %v8833_v16 = vor.u32 %v10592_v61, %v8832_v59  ;;  %v9169_v59 = vor.u32 %v10676_v9, %v9168_v52  ;;  %v10648_v42 = vld [vmem:[#allocation12 + $0x5d0] sm:$0xf0] }
 0x34e   :  { %6436 = vmatmul.bf16.vlgmr.msrb.gmra.mxu2 %v11578_v41  ;;  %v10816_v52 = vld [vmem:[#allocation12 + $0xb10] sm:$0xf0]  ;;  %v10533_v9 = vld [vmem:[#allocation12 + $0x23c] sm:$0xf] }
 0x34f   :  { %6480 = vmatpush.bf16.msra.mxu2 %v8529_v21  ;;  %6364 = vmatpush.bf16.msra.mxu1 %v10061_v57  ;;  %v6216_v12 = vpop.f32.mrf.mxu1  ;;  %v8386_v21 = vld [vmem:[#allocation12 + $0x94] sm:$0xf0] }
 0x350   :  { %6403 = vmatpush.bf16.msrb.mxu0 %v8945_v48  ;;  %v11680_v39 = vadd.f32 %v6216_v12, %v11665_v53  ;;  %v10868_v53 = vld [vmem:[#allocation12 + $0xcb4] sm:$0xf]  ;;  %v8389_v57 = vor.u32 %v10477_v5, %v8386_v21  ;;  %v8804_v48 = vld [vmem:[#allocation12 + $0x3c0] sm:$0xf]  ;;  %v9893_v12 = vor.u32 %v10854_v51, %v9890_v54  ;;  %v10830_v51 = vld [vmem:[#allocation12 + $0xb80] sm:$0xf0] }
 0x351   :  { %6442 = vmatpush.bf16.msrb.mxu3 %v9617_v1  ;;  %v9949_v11 = vor.u32 %v10868_v53, %v9946_v63  ;;  %v10753_v1 = vld [vmem:[#allocation12 + $0x918] sm:$0xf0]  ;;  %v8805_v58 = vor.u32 %v10585_v19, %v8804_v48  ;;  %v8722_v63 = vld [vmem:[#allocation12 + $0x334] sm:$0xf0]  ;;  %v9112_v19 = vld [vmem:[#allocation12 + $0x628] sm:$0xf] }
 0x352   :  { %v10561_v53 = vld [vmem:[#allocation12 + $0x31c] sm:$0xf]  ;;  %v10715_v54 = vld [vmem:[#allocation12 + $0x7ec] sm:$0xf] }
 0x353   :  { %6481 = vmatpush.bf16.msra.mxu2 %v8501_v20  ;;  %6365 = vmatpush.bf16.msra.mxu1 %v10033_v7  ;;  %v10470_v20 = vld [vmem:[#allocation12 + $0x44] sm:$0xf]  ;;  %v8725_v5 = vor.u32 %v10561_v53, %v8722_v63  ;;  %v9028_v63 = vld [vmem:[#allocation12 + $0x580] sm:$0xf] }
 0x354   :  { %6404 = vmatpush.bf16.msrb.mxu0 %v8917_v23  ;;  %v10578_v7 = vld [vmem:[#allocation12 + $0x3a0] sm:$0xf0]  ;;  %v9477_v23 = vor.u32 %v10753_v1, %v9476_v45  ;;  %v8361_v25 = vor.u32 %v10470_v20, %v8358_v14  ;;  %v9784_v14 = vld [vmem:[#allocation12 + $0xb68] sm:$0xf] }
 0x355   :  { %6443 = vmatpush.bf16.msrb.mxu3 %v9589_v28  ;;  %v10746_v28 = vld [vmem:[#allocation12 + $0x8e0] sm:$0xf0] }
 0x356   :  { %v10662_v45 = vld [vmem:[#allocation12 + $0x640] sm:$0xf0] }
 0x357   :  { %6482 = vmatpush.bf16.msra.mxu2 %v8473_v43  ;;  %6366 = vmatpush.bf16.msra.mxu1 %v10005_v30  ;;  %v6218_v6 = vpop.f32.mrf.mxu1  ;;  %v10463_v43 = vld [vmem:[#allocation12 + $0xc] sm:$0xf]  ;;  %v8777_v30 = vor.u32 %v10578_v7, %v8776_v27  ;;  %v9338_v27 = vld [vmem:[#allocation12 + $0x804] sm:$0xf0]  ;;  %v9113_v7 = vor.u32 %v10662_v45, %v9112_v19 }
 0x358   :  { %6405 = vmatpush.bf16.msrb.mxu0 %v8889_v49  ;;  %v8750_v49 = vld [vmem:[#allocation12 + $0x36c] sm:$0xf0]  ;;  %v9812_v6 = vld [vmem:[#allocation12 + $0xba0] sm:$0xf]  ;;  %v10519_v45 = vld [vmem:[#allocation12 + $0x1cc] sm:$0xf] }
 0x359   :  { %6444 = vmatpush.bf16.msrb.mxu3 %v9561_v37  ;;  %v9449_v37 = vor.u32 %v10746_v28, %v9448_v34  ;;  %v8753_v10 = vor.u32 %v10568_v36, %v8750_v49  ;;  %v10655_v34 = vld [vmem:[#allocation12 + $0x608] sm:$0xf0]  ;;  %v9310_v36 = vld [vmem:[#allocation12 + $0x7cc] sm:$0xf0] }
 0x35a   :  { %6319 = vmatmul.bf16.vlgmr.msrb.gmra.mxu1 %v11556_v18 }
 0x35b   :  { %6483 = vmatpush.bf16.msra.mxu2 %v8445_v46  ;;  %6367 = vmatpush.bf16.msra.mxu1 %v9977_v60  ;;  %v8333_v46 = vor.u32 %v10463_v43, %v8330_v3  ;;  %v9840_v60 = vld [vmem:[#allocation12 + $0xbd8] sm:$0xf]  ;;  %v9341_v43 = vor.u32 %v10715_v54, %v9338_v27  ;;  %v9756_v3 = vld [vmem:[#allocation12 + $0xb30] sm:$0xf]  ;;  %v10792_v27 = vld [vmem:[#allocation12 + $0xa54] sm:$0xf] }
 0x35c   :  { %6406 = vmatpush.bf16.msrb.mxu0 %v8861_v62  ;;  %v10844_v62 = vld [vmem:[#allocation12 + $0xbf0] sm:$0xf0]  ;;  %v9757_v49 = vor.u32 %v10823_v32, %v9756_v3  ;;  %v8974_v54 = vld [vmem:[#allocation12 + $0x52c] sm:$0xf0] }
 0x35d   :  { %6445 = vmatpush.bf16.msrb.mxu3 %v9533_v40  ;;  %v10729_v40 = vld [vmem:[#allocation12 + $0x85c] sm:$0xf]  ;;  %v9841_v61 = vor.u32 %v10844_v62, %v9840_v60  ;;  %v9282_v60 = vld [vmem:[#allocation12 + $0x794] sm:$0xf0]  ;;  %v9057_v62 = vor.u32 %v10648_v42, %v9056_v44 }
 0x35e   :  { %v10785_v44 = vld [vmem:[#allocation12 + $0xa1c] sm:$0xf] }
 0x35f   :  { %6484 = vmatpush.bf16.msra.mxu2 %v8417_v0  ;;  %6368 = vmatpush.bf16.msra.mxu1 %v9949_v11  ;;  %v9394_v0 = vld [vmem:[#allocation12 + $0x874] sm:$0xf0]  ;;  %v10837_v11 = vld [vmem:[#allocation12 + $0xbb8] sm:$0xf0] }
 0x360   :  { %6407 = vmatpush.bf16.msrb.mxu0 %v8833_v16  ;;  %v9397_v21 = vor.u32 %v10729_v40, %v9394_v0  ;;  %v10554_v16 = vld [vmem:[#allocation12 + $0x2e4] sm:$0xf]  ;;  %v9813_v48 = vor.u32 %v10837_v11, %v9812_v6  ;;  %v10641_v40 = vld [vmem:[#allocation12 + $0x598] sm:$0xf0]  ;;  %v9000_v6 = vld [vmem:[#allocation12 + $0x548] sm:$0xf] }
 0x361   :  { %6446 = vmatpush.bf16.msrb.mxu3 %v9505_v35  ;;  %v9366_v35 = vld [vmem:[#allocation12 + $0x83c] sm:$0xf0]  ;;  %v8697_v1 = vor.u32 %v10554_v16, %v8694_v8  ;;  %v9029_v16 = vor.u32 %v10641_v40, %v9028_v63  ;;  %v10778_v40 = vld [vmem:[#allocation12 + $0x9e4] sm:$0xf] }
 0x362   :  { %v9369_v20 = vor.u32 %v10722_v26, %v9366_v35  ;;  %v10634_v26 = vld [vmem:[#allocation12 + $0x560] sm:$0xf0]  ;;  %v9672_v35 = vld [vmem:[#allocation12 + $0xa88] sm:$0xf]  ;;  %v8918_v63 = vld [vmem:[#allocation12 + $0x4bc] sm:$0xf0] }
 0x363   :  { %6485 = vmatpush.bf16.msra.mxu2 %v8389_v57  ;;  %6369 = vmatpush.bf16.msra.mxu1 %v9921_v24  ;;  %v9141_v57 = vor.u32 %v10669_v13, %v9140_v38  ;;  %v10547_v24 = vld [vmem:[#allocation12 + $0x2ac] sm:$0xf]  ;;  %v10526_v38 = vld [vmem:[#allocation12 + $0x204] sm:$0xf]  ;;  %v8582_v13 = vld [vmem:[#allocation12 + $0x21c] sm:$0xf0] }
 0x364   :  { %6408 = vmatpush.bf16.msrb.mxu0 %v8805_v58  ;;  %v8666_v58 = vld [vmem:[#allocation12 + $0x2c4] sm:$0xf0] }
 0x365   :  { %6447 = vmatpush.bf16.msrb.mxu3 %v9477_v23  ;;  %v9785_v23 = vor.u32 %v10830_v51, %v9784_v14  ;;  %v8669_v28 = vor.u32 %v10547_v24, %v8666_v58  ;;  %v9226_v14 = vld [vmem:[#allocation12 + $0x724] sm:$0xf0]  ;;  %v10092_v51 = vld [vmem:[#allocation12 + $0xdd0] sm:$0xf]  ;;  %v10907_v24 = vld [vmem:[#allocation12 + $0xde8] sm:$0xf0] }
 0x366   :  { %v10624_v58 = vld [vmem:[#allocation12 + $0x514] sm:$0xf]  ;;  %v10093_v32 = vor.u32 %v10907_v24, %v10092_v51 }
 0x367   :  { %6486 = vmatpush.bf16.msra.mxu2 %v8361_v25  ;;  %6370 = vmatpush.bf16.msra.mxu1 %v9893_v12  ;;  %v9084_v25 = vld [vmem:[#allocation12 + $0x5f0] sm:$0xf]  ;;  %v10596_v24 = vld [vmem:[#allocation12 + $0x434] sm:$0xf] }
 0x368   :  { %6409 = vmatpush.bf16.msrb.mxu0 %v8777_v30  ;;  %v9085_v30 = vor.u32 %v10655_v34, %v9084_v25  ;;  %v9646_v25 = vld [vmem:[#allocation12 + $0xa6c] sm:$0xf0]  ;;  %v8532_v34 = vld [vmem:[#allocation12 + $0x198] sm:$0xf] }
 0x369   :  { %6448 = vmatpush.bf16.msrb.mxu3 %v9449_v37 }
 0x36a   :  { %6371 = vmatmul.bf16.vlgmr.msra.gmra.mxu1 %v11673_v22 }
 0x36b   :  { %6487 = vmatpush.bf16.msra.mxu2 %v8333_v46  ;;  %6415 = vmatpush.bf16.msrb.mxu1 %v9197_v15  ;;  %v8641_v46 = vor.u32 %v10540_v33, %v8638_v2  ;;  %v9313_v15 = vor.u32 %v10708_v31, %v9310_v36  ;;  %v8977_v33 = vor.u32 %v10624_v58, %v8974_v54  ;;  %v10064_v2 = vld [vmem:[#allocation12 + $0xd98] sm:$0xf]  ;;  %v10900_v31 = vld [vmem:[#allocation12 + $0xdb0] sm:$0xf0]  ;;  %v8862_v58 = vld [vmem:[#allocation12 + $0x44c] sm:$0xf0] }
 0x36c   :  { %6454 = vmatpush.bf16.msra.mxu0 %v9869_v50  ;;  %6449 = vmatmul.bf16.vlgmr.msrb.gmra.mxu3 %v11622_v55  ;;  %v9728_v50 = vld [vmem:[#allocation12 + $0xaf8] sm:$0xf]  ;;  %v9649_v36 = vor.u32 %v10792_v27, %v9646_v25  ;;  %v10764_v54 = vld [vmem:[#allocation12 + $0x974] sm:$0xf]  ;;  %v9534_v27 = vld [vmem:[#allocation12 + $0x98c] sm:$0xf0] }
 0x36d   :  { %6493 = vmatpush.bf16.msra.mxu3 %v8753_v10  ;;  %6410 = vmatmul.bf16.vlgmr.msrb.gmra.mxu0 %v11533_v29  ;;  %v8610_v10 = vld [vmem:[#allocation12 + $0x254] sm:$0xf0]  ;;  %v9729_v53 = vor.u32 %v10816_v52, %v9728_v50  ;;  %v10509_v50 = vld [vmem:[#allocation12 + $0x178] sm:$0xf0]  ;;  %v10065_v52 = vor.u32 %v10900_v31, %v10064_v2 }
 0x36e   :  { %6488 = vmatmul.bf16.vlgmr.msra.gmra.mxu2 %v11500_v4  ;;  %v8613_v0 = vor.u32 %v10533_v9, %v8610_v10  ;;  %v10036_v10 = vld [vmem:[#allocation12 + $0xd60] sm:$0xf]  ;;  %v10589_v2 = vld [vmem:[#allocation12 + $0x3fc] sm:$0xf]  ;;  %v8834_v31 = vld [vmem:[#allocation12 + $0x414] sm:$0xf0] }
 0x36f   :  { %6532 = vmatpush.bf16.msrb.mxu2 %v9425_v56  ;;  %6416 = vmatpush.bf16.msrb.mxu1 %v9169_v59  ;;  %v10701_v56 = vld [vmem:[#allocation12 + $0x77c] sm:$0xf] }
 0x370   :  { %6455 = vmatpush.bf16.msra.mxu0 %v9841_v61  ;;  %v9285_v59 = vor.u32 %v10701_v56, %v9282_v60  ;;  %v10809_v61 = vld [vmem:[#allocation12 + $0xad8] sm:$0xf0] }
 0x371   :  { %6494 = vmatpush.bf16.msra.mxu3 %v8725_v5  ;;  %v6229_v12 = vpop.f32.mrf.mxu2  ;;  %v10694_v5 = vld [vmem:[#allocation12 + $0x744] sm:$0xf]  ;;  %v10893_v56 = vld [vmem:[#allocation12 + $0xd78] sm:$0xf0] }
 0x372   :  { %v11688_v37 = vadd.f32 %v6229_v12, %v11680_v39  ;;  %v9700_v39 = vld [vmem:[#allocation12 + $0xac0] sm:$0xf] }
 0x373   :  { %6533 = vmatpush.bf16.msrb.mxu2 %v9397_v21  ;;  %6417 = vmatpush.bf16.msrb.mxu1 %v9141_v57  ;;  %v9254_v21 = vld [vmem:[#allocation12 + $0x75c] sm:$0xf0]  ;;  %v9701_v8 = vor.u32 %v10809_v61, %v9700_v39  ;;  %v10802_v57 = vld [vmem:[#allocation12 + $0xaa0] sm:$0xf0]  ;;  %v10037_v61 = vor.u32 %v10893_v56, %v10036_v10 }
 0x374   :  { %6456 = vmatpush.bf16.msra.mxu0 %v9813_v48  ;;  %v8585_v48 = vor.u32 %v10526_v38, %v8582_v13  ;;  %v9257_v19 = vor.u32 %v10694_v5, %v9254_v21  ;;  %v10502_v39 = vld [vmem:[#allocation12 + $0x140] sm:$0xf0]  ;;  %v10008_v13 = vld [vmem:[#allocation12 + $0xd28] sm:$0xf] }
 0x375   :  { %6495 = vmatpush.bf16.msra.mxu3 %v8697_v1  ;;  %v8554_v1 = vld [vmem:[#allocation12 + $0x1e4] sm:$0xf0]  ;;  %v10886_v5 = vld [vmem:[#allocation12 + $0xd40] sm:$0xf0] }
 0x376   :  { %v10582_v56 = vld [vmem:[#allocation12 + $0x3c4] sm:$0xf] }
 0x377   :  { %6534 = vmatpush.bf16.msrb.mxu2 %v9369_v20  ;;  %6418 = vmatpush.bf16.msrb.mxu1 %v9113_v7  ;;  %v10687_v20 = vld [vmem:[#allocation12 + $0x70c] sm:$0xf]  ;;  %v9001_v7 = vor.u32 %v10634_v26, %v9000_v6 }
 0x378   :  { %6457 = vmatpush.bf16.msra.mxu0 %v9785_v23  ;;  %v9673_v23 = vor.u32 %v10802_v57, %v9672_v35  ;;  %v9229_v3 = vor.u32 %v10687_v20, %v9226_v14  ;;  %v9562_v35 = vld [vmem:[#allocation12 + $0x9c4] sm:$0xf0]  ;;  %v8448_v57 = vld [vmem:[#allocation12 + $0xf0] sm:$0xf]  ;;  %v10879_v20 = vld [vmem:[#allocation12 + $0xd08] sm:$0xf0] }
 0x379   :  { %6496 = vmatpush.bf16.msra.mxu3 %v8669_v28  ;;  %v6231_v11 = vpop.f32.mrf.mxu2  ;;  %v10516_v28 = vld [vmem:[#allocation12 + $0x1b0] sm:$0xf0] }
 0x37a   :  { %v8533_v12 = vor.u32 %v10516_v28, %v8532_v34  ;;  %v10603_v11 = vld [vmem:[#allocation12 + $0x46c] sm:$0xf]  ;;  %v8865_v28 = vor.u32 %v10596_v24, %v8862_v58  ;;  %v9428_v24 = vld [vmem:[#allocation12 + $0x898] sm:$0xf]  ;;  %v10740_v58 = vld [vmem:[#allocation12 + $0x8b0] sm:$0xf0] }
 0x37b   :  { %6535 = vmatpush.bf16.msrb.mxu2 %v9341_v43  ;;  %6419 = vmatpush.bf16.msrb.mxu1 %v9085_v30  ;;  %v8557_v43 = vor.u32 %v10519_v45, %v8554_v1  ;;  %v10617_v30 = vld [vmem:[#allocation12 + $0x4dc] sm:$0xf]  ;;  %v9980_v1 = vld [vmem:[#allocation12 + $0xcf0] sm:$0xf] }
 0x37c   :  { %6458 = vmatpush.bf16.msra.mxu0 %v9757_v49  ;;  %v8946_v49 = vld [vmem:[#allocation12 + $0x4f4] sm:$0xf0]  ;;  %v9981_v34 = vor.u32 %v10879_v20, %v9980_v1 }
 0x37d   :  { %6497 = vmatpush.bf16.msra.mxu3 %v8641_v46  ;;  %v9618_v46 = vld [vmem:[#allocation12 + $0xa34] sm:$0xf0]  ;;  %v8949_v9 = vor.u32 %v10617_v30, %v8946_v49  ;;  %v8392_v49 = vld [vmem:[#allocation12 + $0x80] sm:$0xf] }
 0x37e   :  { %v9621_v60 = vor.u32 %v10785_v44, %v9618_v46  ;;  %v9506_v30 = vld [vmem:[#allocation12 + $0x954] sm:$0xf0]  ;;  %v10481_v44 = vld [vmem:[#allocation12 + $0x98] sm:$0xf0] }
 0x37f   :  { %6536 = vmatpush.bf16.msrb.mxu2 %v9313_v15  ;;  %6420 = vmatpush.bf16.msrb.mxu1 %v9057_v62  ;;  %v8504_v15 = vld [vmem:[#allocation12 + $0x160] sm:$0xf]  ;;  %v8393_v10 = vor.u32 %v10481_v44, %v8392_v49  ;;  %v8756_v1 = vld [vmem:[#allocation12 + $0x358] sm:$0xf]  ;;  %v10733_v49 = vld [vmem:[#allocation12 + $0x878] sm:$0xf0] }
 0x380   :  { %6459 = vmatpush.bf16.msra.mxu0 %v9729_v53  ;;  %v8505_v62 = vor.u32 %v10509_v50, %v8504_v15  ;;  %v10610_v53 = vld [vmem:[#allocation12 + $0x4a4] sm:$0xf]  ;;  %v8837_v15 = vor.u32 %v10589_v2, %v8834_v31  ;;  %v9924_v50 = vld [vmem:[#allocation12 + $0xc80] sm:$0xf]  ;;  %v9842_v2 = vld [vmem:[#allocation12 + $0xbf4] sm:$0xf0] }
 0x381   :  { %6498 = vmatpush.bf16.msra.mxu3 %v8613_v0  ;;  %v11690_v42 = vpop.f32.mrf.mxu2  ;;  %v9590_v0 = vld [vmem:[#allocation12 + $0x9fc] sm:$0xf0]  ;;  %v8921_v38 = vor.u32 %v10610_v53, %v8918_v63  ;;  %v8364_v63 = vld [vmem:[#allocation12 + $0x48] sm:$0xf] }
 0x382   :  { %v9593_v21 = vor.u32 %v10778_v40, %v9590_v0  ;;  %v9478_v53 = vld [vmem:[#allocation12 + $0x91c] sm:$0xf0]  ;;  %v10474_v40 = vld [vmem:[#allocation12 + $0x60] sm:$0xf0] }
 0x383   :  { %6537 = vmatpush.bf16.msrb.mxu2 %v9285_v59  ;;  %6421 = vmatpush.bf16.msrb.mxu1 %v9029_v16  ;;  %v8476_v59 = vld [vmem:[#allocation12 + $0x128] sm:$0xf]  ;;  %v8728_v31 = vld [vmem:[#allocation12 + $0x320] sm:$0xf] }
 0x384   :  { %6460 = vmatpush.bf16.msra.mxu0 %v9701_v8  ;;  %v8477_v6 = vor.u32 %v10502_v39, %v8476_v59  ;;  %v8890_v16 = vld [vmem:[#allocation12 + $0x484] sm:$0xf0]  ;;  %v10771_v8 = vld [vmem:[#allocation12 + $0x9ac] sm:$0xf] }
 0x385   :  { %6499 = vmatpush.bf16.msra.mxu3 %v8585_v48  ;;  %v10495_v48 = vld [vmem:[#allocation12 + $0x108] sm:$0xf0]  ;;  %v8893_v45 = vor.u32 %v10603_v11, %v8890_v16  ;;  %v9565_v14 = vor.u32 %v10771_v8, %v9562_v35  ;;  %v9896_v59 = vld [vmem:[#allocation12 + $0xc48] sm:$0xf]  ;;  %v8336_v8 = vld [vmem:[#allocation12 + $0x10] sm:$0xf] }
 0x386   :  { %v8449_v51 = vor.u32 %v10495_v48, %v8448_v57  ;;  %v10743_v11 = vld [vmem:[#allocation12 + $0x8cc] sm:$0xf]  ;;  %v9450_v16 = vld [vmem:[#allocation12 + $0x8e4] sm:$0xf0]  ;;  %v10680_v57 = vld [vmem:[#allocation12 + $0x6d4] sm:$0xf] }
 0x387   :  { %6538 = vmatpush.bf16.msrb.mxu2 %v9257_v19  ;;  %6422 = vmatpush.bf16.msrb.mxu1 %v9001_v7  ;;  %v10009_v19 = vor.u32 %v10886_v5, %v10008_v13  ;;  %v8420_v7 = vld [vmem:[#allocation12 + $0xb8] sm:$0xf]  ;;  %v10575_v13 = vld [vmem:[#allocation12 + $0x38c] sm:$0xf]  ;;  %v8778_v5 = vld [vmem:[#allocation12 + $0x3a4] sm:$0xf0] }
 0x388   :  { %6461 = vmatpush.bf16.msra.mxu0 %v9673_v23  ;;  %v10488_v23 = vld [vmem:[#allocation12 + $0xd0] sm:$0xf0]  ;;  %v10467_v35 = vld [vmem:[#allocation12 + $0x28] sm:$0xf0]  ;;  %v9198_v48 = vld [vmem:[#allocation12 + $0x6ec] sm:$0xf0] }
 0x389   :  { %6500 = vmatpush.bf16.msra.mxu3 %v8557_v43  ;;  %v6283_v26 = vpop.f32.mrf.mxu2  ;;  %v9952_v43 = vld [vmem:[#allocation12 + $0xcb8] sm:$0xf] }
 0x38a   :  { %6423 = vmatmul.bf16.vlgmr.msrb.gmra.mxu1 %v11556_v18 }
 0x38b   :  { %6539 = vmatpush.bf16.msrb.mxu2 %v9229_v3  ;;  %6467 = vmatpush.bf16.msra.mxu1 %v10093_v32  ;;  %v10872_v3 = vld [vmem:[#allocation12 + $0xcd0] sm:$0xf0]  ;;  %v9537_v32 = vor.u32 %v10764_v54, %v9534_v27  ;;  %v9453_v54 = vor.u32 %v10743_v11, %v9450_v16  ;;  %v8337_v27 = vor.u32 %v10467_v35, %v8336_v8  ;;  %v8672_v11 = vld [vmem:[#allocation12 + $0x2b0] sm:$0xf]  ;;  %v10551_v16 = vld [vmem:[#allocation12 + $0x2c8] sm:$0xf0] }
 0x38c   :  { %6506 = vmatpush.bf16.msrb.mxu0 %v8977_v33  ;;  %6501 = vmatmul.bf16.vlgmr.msra.gmra.mxu3 %v11514_v47  ;;  %v8421_v33 = vor.u32 %v10488_v23, %v8420_v7  ;;  %v9953_v46 = vor.u32 %v10872_v3, %v9952_v43  ;;  %v9201_v7 = vor.u32 %v10680_v57, %v9198_v48  ;;  %v9344_v8 = vld [vmem:[#allocation12 + $0x7f0] sm:$0xf]  ;;  %v10652_v48 = vld [vmem:[#allocation12 + $0x5f4] sm:$0xf] }
 0x38d   :  { %6545 = vmatpush.bf16.msrb.mxu3 %v9649_v36  ;;  %6462 = vmatmul.bf16.vlgmr.msra.gmra.mxu0 %v11658_v17  ;;  %v10757_v36 = vld [vmem:[#allocation12 + $0x93c] sm:$0xf]  ;;  %v9429_v3 = vor.u32 %v10740_v58, %v9428_v24  ;;  %v10544_v24 = vld [vmem:[#allocation12 + $0x290] sm:$0xf0]  ;;  %v9316_v58 = vld [vmem:[#allocation12 + $0x7b8] sm:$0xf] }
 0x38e   :  { %6540 = vmatmul.bf16.vlgmr.msrb.gmra.mxu2 %v11578_v41 }
 0x38f   :  { %6584 = vmatpush.bf16.msra.mxu2 %v8533_v12  ;;  %6468 = vmatpush.bf16.msra.mxu1 %v10065_v52  ;;  %v11696_v25 = vpop.f32.mrf.mxu3  ;;  %v10865_v52 = vld [vmem:[#allocation12 + $0xc98] sm:$0xf0] }
 0x390   :  { %6507 = vmatpush.bf16.msrb.mxu0 %v8949_v9  ;;  %v9509_v9 = vor.u32 %v10757_v36, %v9506_v30  ;;  %v9925_v39 = vor.u32 %v10865_v52, %v9924_v50  ;;  %v10565_v36 = vld [vmem:[#allocation12 + $0x338] sm:$0xf0]  ;;  %v9400_v30 = vld [vmem:[#allocation12 + $0x860] sm:$0xf] }
 0x391   :  { %6546 = vmatpush.bf16.msrb.mxu3 %v9621_v60  ;;  %v11698_v12 = vpop.f32.mrf.mxu2  ;;  %v8806_v60 = vld [vmem:[#allocation12 + $0x3dc] sm:$0xf0]  ;;  %v8729_v52 = vor.u32 %v10565_v36, %v8728_v31  ;;  %v9730_v31 = vld [vmem:[#allocation12 + $0xb14] sm:$0xf0] }
 0x392   :  { %v9142_v50 = vld [vmem:[#allocation12 + $0x67c] sm:$0xf0] }
 0x393   :  { %6585 = vmatpush.bf16.msra.mxu2 %v8505_v62  ;;  %6469 = vmatpush.bf16.msra.mxu1 %v10037_v61  ;;  %v10750_v62 = vld [vmem:[#allocation12 + $0x904] sm:$0xf]  ;;  %v8809_v61 = vor.u32 %v10582_v56, %v8806_v60  ;;  %v9814_v56 = vld [vmem:[#allocation12 + $0xbbc] sm:$0xf0]  ;;  %v8700_v60 = vld [vmem:[#allocation12 + $0x2e8] sm:$0xf] }
 0x394   :  { %6508 = vmatpush.bf16.msrb.mxu0 %v8921_v38  ;;  %v10858_v38 = vld [vmem:[#allocation12 + $0xc60] sm:$0xf0]  ;;  %v8616_v36 = vld [vmem:[#allocation12 + $0x240] sm:$0xf] }
 0x395   :  { %6547 = vmatpush.bf16.msrb.mxu3 %v9593_v21  ;;  %v9481_v21 = vor.u32 %v10750_v62, %v9478_v53  ;;  %v9897_v20 = vor.u32 %v10858_v38, %v9896_v59  ;;  %v10558_v62 = vld [vmem:[#allocation12 + $0x300] sm:$0xf0]  ;;  %v9372_v53 = vld [vmem:[#allocation12 + $0x828] sm:$0xf]  ;;  %v10659_v59 = vld [vmem:[#allocation12 + $0x62c] sm:$0xf] }
 0x397   :  { %6586 = vmatpush.bf16.msra.mxu2 %v8477_v6  ;;  %6470 = vmatpush.bf16.msra.mxu1 %v10009_v19  ;;  %v6244_v0 = vpop.f32.mrf.mxu3  ;;  %v8365_v6 = vor.u32 %v10474_v40, %v8364_v63  ;;  %v10848_v19 = vld [vmem:[#allocation12 + $0xc14] sm:$0xf]  ;;  %v10726_v63 = vld [vmem:[#allocation12 + $0x840] sm:$0xf0] }
 0x398   :  { %6509 = vmatpush.bf16.msrb.mxu0 %v8893_v45  ;;  %v9870_v45 = vld [vmem:[#allocation12 + $0xc2c] sm:$0xf0]  ;;  %v9373_v38 = vor.u32 %v10726_v63, %v9372_v53  ;;  %v8588_v53 = vld [vmem:[#allocation12 + $0x208] sm:$0xf]  ;;  %v10530_v63 = vld [vmem:[#allocation12 + $0x220] sm:$0xf0] }
 0x399   :  { %6548 = vmatpush.bf16.msrb.mxu3 %v9565_v14  ;;  %v6335_v26 = vpop.f32.mrf.mxu2  ;;  %v8781_v14 = vor.u32 %v10575_v13, %v8778_v5  ;;  %v9873_v23 = vor.u32 %v10848_v19, %v9870_v45  ;;  %v9086_v19 = vld [vmem:[#allocation12 + $0x60c] sm:$0xf0]  ;;  %v8673_v45 = vor.u32 %v10551_v16, %v8672_v11 }
 0x39a   :  { %v10719_v26 = vld [vmem:[#allocation12 + $0x808] sm:$0xf0] }
 0x39b   :  { %6587 = vmatpush.bf16.msra.mxu2 %v8449_v51  ;;  %6471 = vmatpush.bf16.msra.mxu1 %v9981_v34  ;;  %v10572_v51 = vld [vmem:[#allocation12 + $0x370] sm:$0xf0]  ;;  %v10673_v34 = vld [vmem:[#allocation12 + $0x69c] sm:$0xf] }
 0x39c   :  { %6510 = vmatpush.bf16.msrb.mxu0 %v8865_v28  ;;  %v9170_v28 = vld [vmem:[#allocation12 + $0x6b4] sm:$0xf0]  ;;  %v8757_v43 = vor.u32 %v10572_v51, %v8756_v1  ;;  %v9345_v1 = vor.u32 %v10719_v26, %v9344_v8  ;;  %v8560_v26 = vld [vmem:[#allocation12 + $0x1d0] sm:$0xf] }
 0x39d   :  { %6549 = vmatpush.bf16.msrb.mxu3 %v9537_v32  ;;  %v9173_v44 = vor.u32 %v10673_v34, %v9170_v28  ;;  %v8644_v51 = vld [vmem:[#allocation12 + $0x278] sm:$0xf] }
 0x39e   :  { %v9058_v34 = vld [vmem:[#allocation12 + $0x5d4] sm:$0xf0]  ;;  %v8645_v28 = vor.u32 %v10544_v24, %v8644_v51 }
 0x39f   :  { %6588 = vmatpush.bf16.msra.mxu2 %v8421_v33  ;;  %6472 = vmatpush.bf16.msra.mxu1 %v9953_v46  ;;  %v11700_v32 = vpop.f32.mrf.mxu3  ;;  %v10841_v33 = vld [vmem:[#allocation12 + $0xbdc] sm:$0xf]  ;;  %v9652_v51 = vld [vmem:[#allocation12 + $0xa58] sm:$0xf] }
 0x3a0   :  { %6511 = vmatpush.bf16.msrb.mxu0 %v8837_v15  ;;  %v9845_v46 = vor.u32 %v10841_v33, %v9842_v2  ;;  %v10666_v15 = vld [vmem:[#allocation12 + $0x664] sm:$0xf]  ;;  %v10813_v2 = vld [vmem:[#allocation12 + $0xafc] sm:$0xf] }
 0x3a1   :  { %6550 = vmatpush.bf16.msrb.mxu3 %v9509_v9  ;;  %v9401_v9 = vor.u32 %v10733_v49, %v9400_v30  ;;  %v9145_v40 = vor.u32 %v10666_v15, %v9142_v50  ;;  %v10537_v49 = vld [vmem:[#allocation12 + $0x258] sm:$0xf0]  ;;  %v9733_v50 = vor.u32 %v10813_v2, %v9730_v31  ;;  %v10066_v2 = vld [vmem:[#allocation12 + $0xdb4] sm:$0xf0] }
 0x3a3   :  { %6589 = vmatpush.bf16.msra.mxu2 %v8393_v10  ;;  %6473 = vmatpush.bf16.msra.mxu1 %v9925_v39  ;;  %v10834_v10 = vld [vmem:[#allocation12 + $0xba4] sm:$0xf]  ;;  %v9114_v39 = vld [vmem:[#allocation12 + $0x644] sm:$0xf0] }
 0x3a4   :  { %6512 = vmatpush.bf16.msrb.mxu0 %v8809_v61  ;;  %v9817_v0 = vor.u32 %v10834_v10, %v9814_v56  ;;  %v8701_v61 = vor.u32 %v10558_v62, %v8700_v60  ;;  %v9117_v35 = vor.u32 %v10659_v59, %v9114_v39  ;;  %v8617_v10 = vor.u32 %v10537_v49, %v8616_v36  ;;  %v10806_v60 = vld [vmem:[#allocation12 + $0xac4] sm:$0xf]  ;;  %v9702_v62 = vld [vmem:[#allocation12 + $0xadc] sm:$0xf0]  ;;  %v10631_v59 = vld [vmem:[#allocation12 + $0x54c] sm:$0xf] }
 0x3a5   :  { %6551 = vmatpush.bf16.msrb.mxu3 %v9481_v21  ;;  %v10827_v21 = vld [vmem:[#allocation12 + $0xb6c] sm:$0xf]  ;;  %v8952_v49 = vld [vmem:[#allocation12 + $0x4e0] sm:$0xf] }
 0x3a7   :  { %6590 = vmatpush.bf16.msra.mxu2 %v8365_v6  ;;  %6474 = vmatpush.bf16.msra.mxu1 %v9897_v20  ;;  %v11706_v13 = vpop.f32.mrf.mxu0  ;;  %v6296_v5 = vpop.f32.mrf.mxu3  ;;  %v9786_v6 = vld [vmem:[#allocation12 + $0xb84] sm:$0xf0]  ;;  %v10820_v20 = vld [vmem:[#allocation12 + $0xb34] sm:$0xf] }
 0x3a8   :  { %6513 = vmatpush.bf16.msrb.mxu0 %v8781_v14  ;;  %v9789_v57 = vor.u32 %v10827_v21, %v9786_v6  ;;  %v9758_v14 = vld [vmem:[#allocation12 + $0xb4c] sm:$0xf0]  ;;  %v10799_v5 = vld [vmem:[#allocation12 + $0xa8c] sm:$0xf]  ;;  %v9674_v21 = vld [vmem:[#allocation12 + $0xaa4] sm:$0xf0]  ;;  %v8589_v6 = vor.u32 %v10530_v63, %v8588_v53 }
 0x3a9   :  { %6552 = vmatpush.bf16.msrb.mxu3 %v9453_v54  ;;  %v10712_v54 = vld [vmem:[#allocation12 + $0x7d0] sm:$0xf0]  ;;  %v10038_v53 = vld [vmem:[#allocation12 + $0xd7c] sm:$0xf0] }
 0x3aa   :  { %6475 = vmatmul.bf16.vlgmr.msra.gmra.mxu1 %v11673_v22 }
 0x3ab   :  { %6591 = vmatpush.bf16.msra.mxu2 %v8337_v27  ;;  %6519 = vmatpush.bf16.msrb.mxu1 %v9201_v7  ;;  %v9089_v27 = vor.u32 %v10652_v48, %v9086_v19  ;;  %v9761_v7 = vor.u32 %v10820_v20, %v9758_v14  ;;  %v10691_v19 = vld [vmem:[#allocation12 + $0x728] sm:$0xf0]  ;;  %v8980_v20 = vld [vmem:[#allocation12 + $0x518] sm:$0xf]  ;;  %v10628_v14 = vld [vmem:[#allocation12 + $0x530] sm:$0xf0] }
 0x3ac   :  { %6558 = vmatpush.bf16.msra.mxu0 %v9873_v23  ;;  %6553 = vmatmul.bf16.vlgmr.msrb.gmra.mxu3 %v11622_v55  ;;  %v10645_v23 = vld [vmem:[#allocation12 + $0x5bc] sm:$0xf] }
 0x3ad   :  { %6597 = vmatpush.bf16.msra.mxu3 %v8757_v43  ;;  %6514 = vmatmul.bf16.vlgmr.msrb.gmra.mxu0 %v11533_v29  ;;  %v9317_v43 = vor.u32 %v10712_v54, %v9316_v58  ;;  %v9061_v15 = vor.u32 %v10645_v23, %v9058_v34  ;;  %v9677_v58 = vor.u32 %v10799_v5, %v9674_v21  ;;  %v10796_v54 = vld [vmem:[#allocation12 + $0xa70] sm:$0xf0] }
 0x3ae   :  { %6592 = vmatmul.bf16.vlgmr.msra.gmra.mxu2 %v11500_v4  ;;  %v9653_v31 = vor.u32 %v10796_v54, %v9652_v51 }
 0x3af   :  { %6636 = vmatpush.bf16.msrb.mxu2 %v9429_v3  ;;  %6520 = vmatpush.bf16.msrb.mxu1 %v9173_v44  ;;  %v6257_v3 = vpop.f32.mrf.mxu0  ;;  %v11710_v30 = vpop.f32.mrf.mxu3  ;;  %v9288_v44 = vld [vmem:[#allocation12 + $0x780] sm:$0xf] }
 0x3b0   :  { %6559 = vmatpush.bf16.msra.mxu0 %v9845_v46  ;;  %v10705_v46 = vld [vmem:[#allocation12 + $0x798] sm:$0xf0] }
 0x3b1   :  { %6598 = vmatpush.bf16.msra.mxu3 %v8729_v52  ;;  %v11708_v33 = vpop.f32.mrf.mxu2  ;;  %v10638_v52 = vld [vmem:[#allocation12 + $0x584] sm:$0xf]  ;;  %v9289_v56 = vor.u32 %v10705_v46, %v9288_v44  ;;  %v10897_v3 = vld [vmem:[#allocation12 + $0xd9c] sm:$0xf]  ;;  %v9624_v46 = vld [vmem:[#allocation12 + $0xa20] sm:$0xf] }
 0x3b2   :  { %v10621_v44 = vld [vmem:[#allocation12 + $0x4f8] sm:$0xf0] }
 0x3b3   :  { %6637 = vmatpush.bf16.msrb.mxu2 %v9401_v9  ;;  %6521 = vmatpush.bf16.msrb.mxu1 %v9145_v40  ;;  %v9030_v9 = vld [vmem:[#allocation12 + $0x59c] sm:$0xf0]  ;;  %v9260_v40 = vld [vmem:[#allocation12 + $0x748] sm:$0xf] }
 0x3b4   :  { %6560 = vmatpush.bf16.msra.mxu0 %v9817_v0  ;;  %v10698_v0 = vld [vmem:[#allocation12 + $0x760] sm:$0xf0]  ;;  %v9033_v39 = vor.u32 %v10638_v52, %v9030_v9  ;;  %v8506_v52 = vld [vmem:[#allocation12 + $0x17c] sm:$0xf0] }
 0x3b5   :  { %6599 = vmatpush.bf16.msra.mxu3 %v8701_v61  ;;  %v9705_v61 = vor.u32 %v10806_v60, %v9702_v62  ;;  %v9261_v11 = vor.u32 %v10698_v0, %v9260_v40  ;;  %v8953_v60 = vor.u32 %v10621_v44, %v8952_v49  ;;  %v10890_v62 = vld [vmem:[#allocation12 + $0xd64] sm:$0xf]  ;;  %v8924_v0 = vld [vmem:[#allocation12 + $0x4a8] sm:$0xf]  ;;  %v8422_v49 = vld [vmem:[#allocation12 + $0xd4] sm:$0xf0] }
 0x3b6   :  { %v10041_v21 = vor.u32 %v10890_v62, %v10038_v53 }
 0x3b7   :  { %6638 = vmatpush.bf16.msrb.mxu2 %v9373_v38  ;;  %6522 = vmatpush.bf16.msrb.mxu1 %v9117_v35  ;;  %v9002_v38 = vld [vmem:[#allocation12 + $0x564] sm:$0xf0]  ;;  %v11712_v16 = vpop.f32.mrf.mxu0  ;;  %v10523_v35 = vld [vmem:[#allocation12 + $0x1e8] sm:$0xf0]  ;;  %v6348_v48 = vpop.f32.mrf.mxu3 }
 0x3b8   :  { %6561 = vmatpush.bf16.msra.mxu0 %v9789_v57  ;;  %v9232_v57 = vld [vmem:[#allocation12 + $0x710] sm:$0xf]  ;;  %v9005_v24 = vor.u32 %v10631_v59, %v9002_v38  ;;  %v8561_v23 = vor.u32 %v10523_v35, %v8560_v26  ;;  %v10614_v59 = vld [vmem:[#allocation12 + $0x4c0] sm:$0xf0]  ;;  %v8478_v38 = vld [vmem:[#allocation12 + $0x144] sm:$0xf0] }
 0x3b9   :  { %6600 = vmatpush.bf16.msra.mxu3 %v8673_v45  ;;  %v6387_v8 = vpop.f32.mrf.mxu2  ;;  %v10904_v45 = vld [vmem:[#allocation12 + $0xdd4] sm:$0xf]  ;;  %v9233_v34 = vor.u32 %v10691_v19, %v9232_v57  ;;  %v10010_v26 = vld [vmem:[#allocation12 + $0xd44] sm:$0xf0]  ;;  %v8896_v57 = vld [vmem:[#allocation12 + $0x470] sm:$0xf] }
 0x3ba   :  { %v10883_v8 = vld [vmem:[#allocation12 + $0xd2c] sm:$0xf]  ;;  %v9568_v19 = vld [vmem:[#allocation12 + $0x9b0] sm:$0xf] }
 0x3bb   :  { %6639 = vmatpush.bf16.msrb.mxu2 %v9345_v1  ;;  %6523 = vmatpush.bf16.msrb.mxu1 %v9089_v27  ;;  %v10094_v1 = vld [vmem:[#allocation12 + $0xdec] sm:$0xf0]  ;;  %v10513_v27 = vld [vmem:[#allocation12 + $0x19c] sm:$0xf]  ;;  %v10607_v48 = vld [vmem:[#allocation12 + $0x488] sm:$0xf0]  ;;  %v10013_v54 = vor.u32 %v10883_v8, %v10010_v26 }
 0x3bc   :  { %6562 = vmatpush.bf16.msra.mxu0 %v9761_v7  ;;  %v8534_v7 = vld [vmem:[#allocation12 + $0x1b4] sm:$0xf0] }
 0x3bd   :  { %6601 = vmatpush.bf16.msra.mxu3 %v8645_v28  ;;  %v10097_v28 = vor.u32 %v10904_v45, %v10094_v1  ;;  %v8537_v36 = vor.u32 %v10513_v27, %v8534_v7  ;;  %v10775_v45 = vld [vmem:[#allocation12 + $0x9c8] sm:$0xf0]  ;;  %v10492_v1 = vld [vmem:[#allocation12 + $0xf4] sm:$0xf]  ;;  %v8897_v27 = vor.u32 %v10607_v48, %v8896_v57  ;;  %v10754_v48 = vld [vmem:[#allocation12 + $0x920] sm:$0xf0] }
 0x3be   :  { %v10876_v7 = vld [vmem:[#allocation12 + $0xcf4] sm:$0xf] }
 0x3bf   :  { %6640 = vmatpush.bf16.msrb.mxu2 %v9317_v43  ;;  %6524 = vmatpush.bf16.msrb.mxu1 %v9061_v15  ;;  %v8981_v43 = vor.u32 %v10628_v14, %v8980_v20  ;;  %v10789_v15 = vld [vmem:[#allocation12 + $0xa38] sm:$0xf0]  ;;  %v6309_v9 = vpop.f32.mrf.mxu0  ;;  %v8450_v20 = vld [vmem:[#allocation12 + $0x10c] sm:$0xf0] }
 0x3c0   :  { %6563 = vmatpush.bf16.msra.mxu0 %v9733_v50  ;;  %v10506_v50 = vld [vmem:[#allocation12 + $0x164] sm:$0xf]  ;;  %v9625_v63 = vor.u32 %v10789_v15, %v9624_v46  ;;  %v11721_v14 = vld [vmem:[#allocation13 + $0x1c] sm:$0xff] }
 0x3c1   :  { %6602 = vmatpush.bf16.msra.mxu3 %v8617_v10  ;;  %v6243_v10 = vadd.f32 %v11696_v25, %v11688_v37  ;;  %v8509_v40 = vor.u32 %v10506_v50, %v8506_v52  ;;  %v10782_v37 = vld [vmem:[#allocation12 + $0xa00] sm:$0xf0]  ;;  %v10499_v25 = vld [vmem:[#allocation12 + $0x12c] sm:$0xf]  ;;  %v3851_v51 = vperm.slane %v11721_v14, 1 }
 0x3c2   :  { %v8481_v35 = vor.u32 %v10499_v25, %v8478_v38  ;;  %v10869_v9 = vld [vmem:[#allocation12 + $0xcbc] sm:$0xf] }
 0x3c3   :  { %6641 = vmatpush.bf16.msrb.mxu2 %v9289_v56  ;;  %6525 = vmatpush.bf16.msrb.mxu1 %v9033_v39  ;;  %v10069_v56 = vor.u32 %v10897_v3, %v10066_v2  ;;  %v9596_v39 = vld [vmem:[#allocation12 + $0x9e8] sm:$0xf]  ;;  %v10600_v3 = vld [vmem:[#allocation12 + $0x450] sm:$0xf0]  ;;  %v9540_v2 = vld [vmem:[#allocation12 + $0x978] sm:$0xf] }
 0x3c4   :  { %6564 = vmatpush.bf16.msra.mxu0 %v9705_v61  ;;  %v6256_v61 = vadd.f32 %v11706_v13, %v6243_v10  ;;  %v9597_v13 = vor.u32 %v10782_v37, %v9596_v39  ;;  %v9954_v10 = vld [vmem:[#allocation12 + $0xcd4] sm:$0xf0]  ;;  %v10761_v39 = vld [vmem:[#allocation12 + $0x958] sm:$0xf0]  ;;  %v8394_v37 = vld [vmem:[#allocation12 + $0x9c] sm:$0xf0] }
 0x3c5   :  { %6603 = vmatpush.bf16.msra.mxu3 %v8589_v6  ;;  %v8925_v6 = vor.u32 %v10614_v59, %v8924_v0  ;;  %v6282_v0 = vadd.f32 %v11690_v42, %v3851_v51  ;;  %v10586_v42 = vld [vmem:[#allocation12 + $0x3e0] sm:$0xf0] }
 0x3c7   :  { %6642 = vmatpush.bf16.msrb.mxu2 %v9261_v11  ;;  %6526 = vmatpush.bf16.msrb.mxu1 %v9005_v24  ;;  %v6268_v5 = vpop.f32.mrf.mxu1  ;;  %v3852_v24 = vperm.slane %v11721_v14, 2  ;;  %v6295_v25 = vadd.f32 %v11700_v32, %v6282_v0  ;;  %v10677_v0 = vld [vmem:[#allocation12 + $0x6b8] sm:$0xf0] }
 0x3c8   :  { %6565 = vmatpush.bf16.msra.mxu0 %v9677_v58  ;;  %v6269_v11 = vadd.f32 %v6268_v5, %v6256_v61  ;;  %v11725_v58 = vpop.f32.mrf.mxu0  ;;  %v10478_v61 = vld [vmem:[#allocation12 + $0x84] sm:$0xf]  ;;  %v9957_v5 = vor.u32 %v10869_v9, %v9954_v10  ;;  %v8758_v10 = vld [vmem:[#allocation12 + $0x374] sm:$0xf0] }
 0x3c9   :  { %6604 = vmatpush.bf16.msra.mxu3 %v8561_v23  ;;  %v9982_v23 = vld [vmem:[#allocation12 + $0xd0c] sm:$0xf0]  ;;  %v6386_v15 = vadd.f32 %v11708_v33, %v3852_v24  ;;  %v9512_v33 = vld [vmem:[#allocation12 + $0x940] sm:$0xf]  ;;  %v8397_v26 = vor.u32 %v10478_v61, %v8394_v37  ;;  %v6308_v57 = vadd.f32 %v11712_v16, %v6295_v25 }
 0x3ca   :  { %6527 = vmatmul.bf16.vlgmr.msrb.gmra.mxu1 %v11556_v18  ;;  %10953 = vtanh.f32 %v6269_v11  ;;  %v9985_v50 = vor.u32 %v10876_v7, %v9982_v23  ;;  %v9926_v11 = vld [vmem:[#allocation12 + $0xc9c] sm:$0xf0]  ;;  %v9513_v8 = vor.u32 %v10761_v39, %v9512_v33  ;;  %v10579_v7 = vld [vmem:[#allocation12 + $0x3a8] sm:$0xf0]  ;;  %v9456_v16 = vld [vmem:[#allocation12 + $0x8d0] sm:$0xf] }
 0x3cb   :  { %6643 = vmatpush.bf16.msrb.mxu2 %v9233_v34  ;;  %6571 = vmatpush.bf16.msra.mxu1 %v10097_v28  ;;  %v9569_v34 = vor.u32 %v10775_v45, %v9568_v19  ;;  %v8453_v28 = vor.u32 %v10492_v1, %v8450_v20  ;;  %v10471_v19 = vld [vmem:[#allocation12 + $0x4c] sm:$0xf]  ;;  %v8366_v45 = vld [vmem:[#allocation12 + $0x64] sm:$0xf0]  ;;  %v9848_v25 = vld [vmem:[#allocation12 + $0xbe0] sm:$0xf] }
 0x3cc   :  { %6610 = vmatpush.bf16.msrb.mxu0 %v8981_v43  ;;  %6605 = vmatmul.bf16.vlgmr.msra.gmra.mxu3 %v11514_v47  ;;  %v8868_v43 = vld [vmem:[#allocation12 + $0x438] sm:$0xf]  ;;  %v10855_v1 = vld [vmem:[#allocation12 + $0xc4c] sm:$0xf] }
 0x3cd   :  { %6649 = vmatpush.bf16.msrb.mxu3 %v9653_v31  ;;  %6566 = vmatmul.bf16.vlgmr.msra.gmra.mxu0 %v11658_v17  ;;  %v10768_v31 = vld [vmem:[#allocation12 + $0x990] sm:$0xf0]  ;;  %v8869_v52 = vor.u32 %v10600_v3, %v8868_v43  ;;  %v10747_v3 = vld [vmem:[#allocation12 + $0x8e8] sm:$0xf0] }
 0x3ce   :  { %6644 = vmatmul.bf16.vlgmr.msrb.gmra.mxu2 %v11578_v41 }
 0x3cf   :  { %6688 = vmatpush.bf16.msra.mxu2 %v8537_v36  ;;  %6572 = vmatpush.bf16.msra.mxu1 %v10069_v56  ;;  %v10485_v36 = vld [vmem:[#allocation12 + $0xbc] sm:$0xf]  ;;  %v6270_v44 = vpop.f32.mrf.mxu1  ;;  %v9541_v56 = vor.u32 %v10768_v31, %v9540_v2  ;;  %v6398_v62 = vpop.f32.mrf.mxu3  ;;  %v10464_v2 = vld [vmem:[#allocation12 + $0x14] sm:$0xf] }
 0x3d0   :  { %6611 = vmatpush.bf16.msrb.mxu0 %v8953_v60  ;;  %v10954_v46 = vpop.eup %10953  ;;  %v8425_v60 = vor.u32 %v10485_v36, %v8422_v49  ;;  %v11734_v59 = vadd.f32 %v6398_v62, %v6386_v15  ;;  %v6361_v38 = vpop.f32.mrf.mxu0  ;;  %v8338_v36 = vld [vmem:[#allocation12 + $0x2c] sm:$0xf0]  ;;  %v9204_v49 = vld [vmem:[#allocation12 + $0x6d8] sm:$0xf]  ;;  %v10684_v44 = vld [vmem:[#allocation12 + $0x6f0] sm:$0xf0]  ;;  %v9457_v62 = vor.u32 %v10747_v3, %v9456_v16 }
 0x3d1   :  { %6650 = vmatpush.bf16.msrb.mxu3 %v9625_v63  ;;  %6903 = vst [vmem:[%s11845_s8] sm:$0xff] %v10954_v46  ;;  %v11731_v53 = vpop.f32.mrf.mxu2  ;;  %v8840_v63 = vld [vmem:[#allocation12 + $0x400] sm:$0xf]  ;;  %v9876_v46 = vld [vmem:[#allocation12 + $0xc18] sm:$0xf]  ;;  %v10852_v15 = vld [vmem:[#allocation12 + $0xc30] sm:$0xf0] }
 0x3d2   :  { %v9877_v33 = vor.u32 %v10852_v15, %v9876_v46  ;;  %v10845_v38 = vld [vmem:[#allocation12 + $0xbf8] sm:$0xf0]  ;;  %v10548_v16 = vld [vmem:[#allocation12 + $0x2b4] sm:$0xf]  ;;  %v8674_v3 = vld [vmem:[#allocation12 + $0x2cc] sm:$0xf0] }
 0x3d3   :  { %6689 = vmatpush.bf16.msra.mxu2 %v8509_v40  ;;  %6573 = vmatpush.bf16.msra.mxu1 %v10041_v21  ;;  %v10593_v40 = vld [vmem:[#allocation12 + $0x418] sm:$0xf0]  ;;  %v9092_v15 = vld [vmem:[#allocation12 + $0x5f8] sm:$0xf] }
 0x3d4   :  { %6612 = vmatpush.bf16.msrb.mxu0 %v8925_v6  ;;  %v8841_v21 = vor.u32 %v10593_v40, %v8840_v63  ;;  %v10862_v6 = vld [vmem:[#allocation12 + $0xc84] sm:$0xf]  ;;  %v8341_v63 = vor.u32 %v10464_v2, %v8338_v36  ;;  %v9205_v40 = vor.u32 %v10684_v44, %v9204_v49  ;;  %v10716_v2 = vld [vmem:[#allocation12 + $0x7f4] sm:$0xf]  ;;  %v9346_v36 = vld [vmem:[#allocation12 + $0x80c] sm:$0xf0] }
 0x3d5   :  { %6651 = vmatpush.bf16.msrb.mxu3 %v9597_v13  ;;  %v8812_v13 = vld [vmem:[#allocation12 + $0x3c8] sm:$0xf]  ;;  %v9929_v20 = vor.u32 %v10862_v6, %v9926_v11  ;;  %v10730_v6 = vld [vmem:[#allocation12 + $0x864] sm:$0xf]  ;;  %v9402_v11 = vld [vmem:[#allocation12 + $0x87c] sm:$0xf0] }
 0x3d6   :  { %v8813_v51 = vor.u32 %v10586_v42, %v8812_v13  ;;  %v9148_v13 = vld [vmem:[#allocation12 + $0x668] sm:$0xf]  ;;  %v10670_v42 = vld [vmem:[#allocation12 + $0x680] sm:$0xf0] }
 0x3d7   :  { %6690 = vmatpush.bf16.msra.mxu2 %v8481_v35  ;;  %6574 = vmatpush.bf16.msra.mxu1 %v10013_v54  ;;  %v9484_v35 = vld [vmem:[#allocation12 + $0x908] sm:$0xf]  ;;  %v6320_v32 = vpop.f32.mrf.mxu1 }
 0x3d8   :  { %6613 = vmatpush.bf16.msrb.mxu0 %v8897_v27  ;;  %v6321_v24 = vadd.f32 %v6320_v32, %v6308_v57  ;;  %v9898_v54 = vld [vmem:[#allocation12 + $0xc64] sm:$0xf0]  ;;  %v8784_v27 = vld [vmem:[#allocation12 + $0x390] sm:$0xf]  ;;  %v9485_v23 = vor.u32 %v10754_v48, %v9484_v35  ;;  %v9405_v57 = vor.u32 %v10730_v6, %v9402_v11  ;;  %v8618_v11 = vld [vmem:[#allocation12 + $0x25c] sm:$0xf0] }
 0x3d9   :  { %6652 = vmatpush.bf16.msrb.mxu3 %v9569_v34  ;;  %v8369_v34 = vor.u32 %v10471_v19, %v8366_v45  ;;  %v6439_v43 = vpop.f32.mrf.mxu2  ;;  %v8785_v9 = vor.u32 %v10579_v7, %v8784_v27  ;;  %v9820_v48 = vld [vmem:[#allocation12 + $0xba8] sm:$0xf]  ;;  %v10838_v19 = vld [vmem:[#allocation12 + $0xbc0] sm:$0xf0]  ;;  %v10555_v45 = vld [vmem:[#allocation12 + $0x2ec] sm:$0xf] }
 0x3da   :  { %v6334_v31 = vadd.f32 %v11698_v12, %v6321_v24  ;;  %v9176_v12 = vld [vmem:[#allocation12 + $0x6a0] sm:$0xf]  ;;  %v8702_v32 = vld [vmem:[#allocation12 + $0x304] sm:$0xf0]  ;;  %v9149_v24 = vor.u32 %v10670_v42, %v9148_v13  ;;  %v9120_v27 = vld [vmem:[#allocation12 + $0x630] sm:$0xf] }
 0x3db   :  { %6691 = vmatpush.bf16.msra.mxu2 %v8453_v28  ;;  %6575 = vmatpush.bf16.msra.mxu1 %v9985_v50  ;;  %v6400_v28 = vpop.f32.mrf.mxu3  ;;  %v10569_v50 = vld [vmem:[#allocation12 + $0x35c] sm:$0xf]  ;;  %v10663_v7 = vld [vmem:[#allocation12 + $0x648] sm:$0xf0] }
 0x3dc   :  { %6614 = vmatpush.bf16.msrb.mxu0 %v8869_v52  ;;  %v9901_v52 = vor.u32 %v10855_v1, %v9898_v54  ;;  %v8761_v39 = vor.u32 %v10569_v50, %v8758_v10  ;;  %v10723_v1 = vld [vmem:[#allocation12 + $0x82c] sm:$0xf]  ;;  %v9821_v54 = vor.u32 %v10838_v19, %v9820_v48  ;;  %v9792_v28 = vld [vmem:[#allocation12 + $0xb70] sm:$0xf]  ;;  %v9121_v44 = vor.u32 %v10663_v7, %v9120_v27  ;;  %v10656_v50 = vld [vmem:[#allocation12 + $0x610] sm:$0xf0] }
 0x3dd   :  { %6653 = vmatpush.bf16.msrb.mxu3 %v9541_v56  ;;  %v10737_v56 = vld [vmem:[#allocation12 + $0x89c] sm:$0xf]  ;;  %v10831_v43 = vld [vmem:[#allocation12 + $0xb88] sm:$0xf0]  ;;  %v9349_v10 = vor.u32 %v10716_v2, %v9346_v36  ;;  %v9036_v48 = vld [vmem:[#allocation12 + $0x588] sm:$0xf] }
 0x3de   :  { %v9793_v46 = vor.u32 %v10831_v43, %v9792_v28  ;;  %v10642_v19 = vld [vmem:[#allocation12 + $0x5a0] sm:$0xf0]  ;;  %v10695_v27 = vld [vmem:[#allocation12 + $0x74c] sm:$0xf]  ;;  %v9262_v7 = vld [vmem:[#allocation12 + $0x764] sm:$0xf0] }
 0x3df   :  { %6692 = vmatpush.bf16.msra.mxu2 %v8425_v60  ;;  %6576 = vmatpush.bf16.msra.mxu1 %v9957_v5  ;;  %v9430_v60 = vld [vmem:[#allocation12 + $0x8b4] sm:$0xf0]  ;;  %v6322_v37 = vpop.f32.mrf.mxu1  ;;  %v10562_v5 = vld [vmem:[#allocation12 + $0x324] sm:$0xf]  ;;  %v10635_v43 = vld [vmem:[#allocation12 + $0x568] sm:$0xf0]  ;;  %v9265_v36 = vor.u32 %v10695_v27, %v9262_v7 }
 0x3e0   :  { %6615 = vmatpush.bf16.msrb.mxu0 %v8841_v21  ;;  %v9433_v61 = vor.u32 %v10737_v56, %v9430_v60  ;;  %v8730_v21 = vld [vmem:[#allocation12 + $0x33c] sm:$0xf0]  ;;  %v9764_v56 = vld [vmem:[#allocation12 + $0xb38] sm:$0xf]  ;;  %v10824_v60 = vld [vmem:[#allocation12 + $0xb50] sm:$0xf0] }
 0x3e1   :  { %6654 = vmatpush.bf16.msrb.mxu3 %v9513_v8  ;;  %v9177_v8 = vor.u32 %v10677_v0, %v9176_v12  ;;  %v8733_v35 = vor.u32 %v10562_v5, %v8730_v21  ;;  %v9765_v12 = vor.u32 %v10824_v60, %v9764_v56  ;;  %v9064_v0 = vld [vmem:[#allocation12 + $0x5c0] sm:$0xf]  ;;  %v10817_v5 = vld [vmem:[#allocation12 + $0xb18] sm:$0xf0]  ;;  %v10534_v21 = vld [vmem:[#allocation12 + $0x244] sm:$0xf] }
 0x3e2   :  { %v8982_v56 = vld [vmem:[#allocation12 + $0x534] sm:$0xf0]  ;;  %v10793_v60 = vld [vmem:[#allocation12 + $0xa5c] sm:$0xf]  ;;  %v8484_v27 = vld [vmem:[#allocation12 + $0x130] sm:$0xf] }
 0x3e3   :  { %6693 = vmatpush.bf16.msra.mxu2 %v8397_v26  ;;  %6577 = vmatpush.bf16.msra.mxu1 %v9929_v20  ;;  %v9849_v26 = vor.u32 %v10845_v38, %v9848_v25  ;;  %v9374_v20 = vld [vmem:[#allocation12 + $0x844] sm:$0xf0]  ;;  %v9736_v38 = vld [vmem:[#allocation12 + $0xb00] sm:$0xf]  ;;  %v10503_v7 = vld [vmem:[#allocation12 + $0x148] sm:$0xf0] }
 0x3e4   :  { %6616 = vmatpush.bf16.msrb.mxu0 %v8813_v51  ;;  %v6347_v51 = vadd.f32 %v11710_v30, %v6334_v31 }
 0x3e5   :  { %6655 = vmatpush.bf16.msrb.mxu3 %v9485_v23  ;;  %v8705_v23 = vor.u32 %v10555_v45, %v8702_v32  ;;  %v9708_v45 = vld [vmem:[#allocation12 + $0xac8] sm:$0xf] }
 0x3e6   :  { %v6360_v30 = vadd.f32 %v11725_v58, %v6347_v51  ;;  %v9093_v58 = vor.u32 %v10656_v50, %v9092_v15  ;;  %v10810_v51 = vld [vmem:[#allocation12 + $0xae0] sm:$0xf0]  ;;  %v9234_v50 = vld [vmem:[#allocation12 + $0x72c] sm:$0xf0] }
 0x3e7   :  { %6694 = vmatpush.bf16.msra.mxu2 %v8369_v34  ;;  %6578 = vmatpush.bf16.msra.mxu1 %v9901_v52  ;;  %v9377_v34 = vor.u32 %v10723_v1, %v9374_v20  ;;  %v6372_v31 = vpop.f32.mrf.mxu1  ;;  %v8621_v1 = vor.u32 %v10534_v21, %v8618_v11  ;;  %v9709_v28 = vor.u32 %v10810_v51, %v9708_v45  ;;  %v10618_v11 = vld [vmem:[#allocation12 + $0x4e4] sm:$0xf]  ;;  %v8926_v51 = vld [vmem:[#allocation12 + $0x4c4] sm:$0xf0] }
 0x3e8   :  { %6617 = vmatpush.bf16.msrb.mxu0 %v8785_v9  ;;  %v6373_v52 = vadd.f32 %v6372_v31, %v6360_v30  ;;  %v8677_v9 = vor.u32 %v10548_v16, %v8674_v3  ;;  %v9680_v16 = vld [vmem:[#allocation12 + $0xa90] sm:$0xf]  ;;  %v10803_v3 = vld [vmem:[#allocation12 + $0xaa8] sm:$0xf0]  ;;  %v10520_v31 = vld [vmem:[#allocation12 + $0x1d4] sm:$0xf] }
 0x3e9   :  { %6656 = vmatpush.bf16.msrb.mxu3 %v9457_v62  ;;  %v10541_v62 = vld [vmem:[#allocation12 + $0x27c] sm:$0xf]  ;;  %v10894_v45 = vld [vmem:[#allocation12 + $0xd80] sm:$0xf0] }
 0x3ea   :  { %6579 = vmatmul.bf16.vlgmr.msra.gmra.mxu1 %v11673_v22  ;;  %v11744_v49 = vpop.f32.mrf.mxu0  ;;  %10955 = vtanh.f32 %v6373_v52  ;;  %v10100_v52 = vld [vmem:[#allocation12 + $0xdd8] sm:$0xf] }
 0x3eb   :  { %6695 = vmatpush.bf16.msra.mxu2 %v8341_v63  ;;  %6623 = vmatpush.bf16.msrb.mxu1 %v9205_v40  ;;  %v8646_v63 = vld [vmem:[#allocation12 + $0x294] sm:$0xf0]  ;;  %v10709_v40 = vld [vmem:[#allocation12 + $0x7bc] sm:$0xf] }
 0x3ec   :  { %6662 = vmatpush.bf16.msra.mxu0 %v9877_v33  ;;  %6657 = vmatmul.bf16.vlgmr.msrb.gmra.mxu3 %v11622_v55  ;;  %v9318_v33 = vld [vmem:[#allocation12 + $0x7d4] sm:$0xf0] }
 0x3ed   :  { %6701 = vmatpush.bf16.msra.mxu3 %v8761_v39  ;;  %6618 = vmatmul.bf16.vlgmr.msrb.gmra.mxu0 %v11533_v29  ;;  %v10649_v39 = vld [vmem:[#allocation12 + $0x5d8] sm:$0xf0]  ;;  %v9321_v37 = vor.u32 %v10709_v40, %v9318_v33  ;;  %v9654_v40 = vld [vmem:[#allocation12 + $0xa74] sm:$0xf0]  ;;  %v8540_v33 = vld [vmem:[#allocation12 + $0x1a0] sm:$0xf] }
 0x3ee   :  { %6696 = vmatmul.bf16.vlgmr.msra.gmra.mxu2 %v11500_v4 }
 0x3ef   :  { %6740 = vmatpush.bf16.msrb.mxu2 %v9433_v61  ;;  %6624 = vmatpush.bf16.msrb.mxu1 %v9177_v8  ;;  %v8649_v61 = vor.u32 %v10541_v62, %v8646_v63  ;;  %v11747_v25 = vpop.f32.mrf.mxu3  ;;  %v10702_v8 = vld [vmem:[#allocation12 + $0x784] sm:$0xf]  ;;  %v6374_v42 = vpop.f32.mrf.mxu1  ;;  %v9681_v63 = vor.u32 %v10803_v3, %v9680_v16  ;;  %v8485_v3 = vor.u32 %v10503_v7, %v8484_v27  ;;  %v10583_v7 = vld [vmem:[#allocation12 + $0x3cc] sm:$0xf] }
 0x3f0   :  { %6663 = vmatpush.bf16.msra.mxu0 %v9849_v26  ;;  %v9290_v26 = vld [vmem:[#allocation12 + $0x79c] sm:$0xf0]  ;;  %v10956_v32 = vpop.eup %10955  ;;  %v8512_v42 = vld [vmem:[#allocation12 + $0x168] sm:$0xf] }
 0x3f1   :  { %6702 = vmatpush.bf16.msra.mxu3 %v8733_v35  ;;  %v11749_v6 = vpop.f32.mrf.mxu2  ;;  %v9065_v35 = vor.u32 %v10649_v39, %v9064_v0  ;;  %v9293_v20 = vor.u32 %v10702_v8, %v9290_v26  ;;  %6904 = vst [vmem:[%s11845_s8 + $0x8] sm:$0xff] %v10956_v32  ;;  %v8954_v8 = vld [vmem:[#allocation12 + $0x4fc] sm:$0xf0]  ;;  %v10786_v26 = vld [vmem:[#allocation12 + $0xa24] sm:$0xf] }
 0x3f2   :  { %v6413_v13 = vpop.f32.mrf.mxu0 }
 0x3f3   :  { %6741 = vmatpush.bf16.msrb.mxu2 %v9405_v57  ;;  %6625 = vmatpush.bf16.msrb.mxu1 %v9149_v24  ;;  %v9737_v57 = vor.u32 %v10817_v5, %v9736_v38  ;;  %v10527_v24 = vld [vmem:[#allocation12 + $0x20c] sm:$0xf]  ;;  %v10901_v38 = vld [vmem:[#allocation12 + $0xdb8] sm:$0xf0]  ;;  %v9657_v5 = vor.u32 %v10793_v60, %v9654_v40  ;;  %v9626_v13 = vld [vmem:[#allocation12 + $0xa3c] sm:$0xf0] }
 0x3f4   :  { %6664 = vmatpush.bf16.msra.mxu0 %v9821_v54  ;;  %v8590_v54 = vld [vmem:[#allocation12 + $0x224] sm:$0xf0]  ;;  %v9629_v32 = vor.u32 %v10786_v26, %v9626_v13  ;;  %v10590_v26 = vld [vmem:[#allocation12 + $0x404] sm:$0xf]  ;;  %v8842_v13 = vld [vmem:[#allocation12 + $0x41c] sm:$0xf0] }
 0x3f5   :  { %6703 = vmatpush.bf16.msra.mxu3 %v8705_v23  ;;  %v9008_v23 = vld [vmem:[#allocation12 + $0x550] sm:$0xf]  ;;  %v8593_v2 = vor.u32 %v10527_v24, %v8590_v54  ;;  %v10779_v24 = vld [vmem:[#allocation12 + $0x9ec] sm:$0xf]  ;;  %v9598_v54 = vld [vmem:[#allocation12 + $0xa04] sm:$0xf0] }
 0x3f6   :  { %v9009_v62 = vor.u32 %v10635_v43, %v9008_v23  ;;  %v10887_v43 = vld [vmem:[#allocation12 + $0xd48] sm:$0xf0]  ;;  %v9601_v16 = vor.u32 %v10779_v24, %v9598_v54  ;;  %v10866_v24 = vld [vmem:[#allocation12 + $0xca0] sm:$0xf0] }
 0x3f7   :  { %6742 = vmatpush.bf16.msrb.mxu2 %v9377_v34  ;;  %6626 = vmatpush.bf16.msrb.mxu1 %v9121_v44  ;;  %v9037_v34 = vor.u32 %v10642_v19, %v9036_v48  ;;  %v6452_v30 = vpop.f32.mrf.mxu3  ;;  %v8562_v44 = vld [vmem:[#allocation12 + $0x1ec] sm:$0xf0]  ;;  %v8957_v48 = vor.u32 %v10618_v11, %v8954_v8  ;;  %v10044_v19 = vld [vmem:[#allocation12 + $0xd68] sm:$0xf] }
 0x3f8   :  { %6665 = vmatpush.bf16.msra.mxu0 %v9793_v46  ;;  %v10688_v46 = vld [vmem:[#allocation12 + $0x714] sm:$0xf]  ;;  %v10045_v23 = vor.u32 %v10894_v45, %v10044_v19  ;;  %v10482_v19 = vld [vmem:[#allocation12 + $0xa0] sm:$0xf0] }
 0x3f9   :  { %6704 = vmatpush.bf16.msra.mxu3 %v8677_v9  ;;  %v6491_v15 = vpop.f32.mrf.mxu2  ;;  %v10908_v9 = vld [vmem:[#allocation12 + $0xdf0] sm:$0xf0]  ;;  %v9237_v0 = vor.u32 %v10688_v46, %v9234_v50  ;;  %v8456_v46 = vld [vmem:[#allocation12 + $0xf8] sm:$0xf] }
 0x3fa   :  { %v10101_v39 = vor.u32 %v10908_v9, %v10100_v52  ;;  %v10772_v30 = vld [vmem:[#allocation12 + $0x9b4] sm:$0xf]  ;;  %v3853_v9 = vperm.slane %v11721_v14, 3  ;;  %v10489_v14 = vld [vmem:[#allocation12 + $0xd8] sm:$0xf0] }
 0x3fb   :  { %6743 = vmatpush.bf16.msrb.mxu2 %v9349_v10  ;;  %6627 = vmatpush.bf16.msrb.mxu1 %v9093_v58  ;;  %v10625_v10 = vld [vmem:[#allocation12 + $0x51c] sm:$0xf]  ;;  %v10496_v15 = vld [vmem:[#allocation12 + $0x110] sm:$0xf0] }
 0x3fc   :  { %6666 = vmatpush.bf16.msra.mxu0 %v9765_v12  ;;  %v10517_v58 = vld [vmem:[#allocation12 + $0x1b8] sm:$0xf0]  ;;  %v8565_v12 = vor.u32 %v10520_v31, %v8562_v44  ;;  %v6412_v31 = vadd.f32 %v11744_v49, %v11734_v59  ;;  %v9570_v44 = vld [vmem:[#allocation12 + $0x9cc] sm:$0xf0]  ;;  %v8870_v49 = vld [vmem:[#allocation12 + $0x454] sm:$0xf0] }
 0x3fd   :  { %6705 = vmatpush.bf16.msra.mxu3 %v8649_v61  ;;  %v8985_v61 = vor.u32 %v10625_v10, %v8982_v56  ;;  %v8541_v21 = vor.u32 %v10517_v58, %v8540_v33  ;;  %v9573_v40 = vor.u32 %v10772_v30, %v9570_v44  ;;  %v8457_v33 = vor.u32 %v10496_v15, %v8456_v46  ;;  %v10597_v59 = vld [vmem:[#allocation12 + $0x43c] sm:$0xf]  ;;  %v10859_v30 = vld [vmem:[#allocation12 + $0xc68] sm:$0xf0]  ;;  %v8786_v44 = vld [vmem:[#allocation12 + $0x3ac] sm:$0xf0] }
 0x3fe   :  { %v10765_v58 = vld [vmem:[#allocation12 + $0x97c] sm:$0xf] }
 0x3ff   :  { %6744 = vmatpush.bf16.msrb.mxu2 %v9321_v37  ;;  %6628 = vmatpush.bf16.msrb.mxu1 %v9065_v35  ;;  %v10072_v37 = vld [vmem:[#allocation12 + $0xda0] sm:$0xf]  ;;  %v10510_v35 = vld [vmem:[#allocation12 + $0x180] sm:$0xf0] }
 0x400   :  { %6667 = vmatpush.bf16.msra.mxu0 %v9737_v57  ;;  %v10073_v57 = vor.u32 %v10901_v38, %v10072_v37  ;;  %v8873_v37 = vor.u32 %v10597_v59, %v8870_v49  ;;  %v9960_v38 = vld [vmem:[#allocation12 + $0xcc0] sm:$0xf]  ;;  %v9878_v59 = vld [vmem:[#allocation12 + $0xc34] sm:$0xf0] }
 0x401   :  { %6706 = vmatpush.bf16.msra.mxu3 %v8621_v1  ;;  %v8513_v1 = vor.u32 %v10510_v35, %v8512_v42  ;;  %v10758_v42 = vld [vmem:[#allocation12 + $0x944] sm:$0xf]  ;;  %v8764_v49 = vld [vmem:[#allocation12 + $0x360] sm:$0xf] }
 0x403   :  { %6745 = vmatpush.bf16.msrb.mxu2 %v9293_v20  ;;  %6629 = vmatpush.bf16.msrb.mxu1 %v9037_v34  ;;  %v10611_v20 = vld [vmem:[#allocation12 + $0x4ac] sm:$0xf] }
 0x404   :  { %6668 = vmatpush.bf16.msra.mxu0 %v9709_v28  ;;  %v8929_v34 = vor.u32 %v10611_v20, %v8926_v51  ;;  %v10016_v28 = vld [vmem:[#allocation12 + $0xd30] sm:$0xf]  ;;  %v8845_v20 = vor.u32 %v10590_v26, %v8842_v13  ;;  %v9932_v51 = vld [vmem:[#allocation12 + $0xc88] sm:$0xf] }
 0x405   :  { %6707 = vmatpush.bf16.msra.mxu3 %v8593_v2  ;;  %v10604_v2 = vld [vmem:[#allocation12 + $0x474] sm:$0xf]  ;;  %v10017_v56 = vor.u32 %v10887_v43, %v10016_v28  ;;  %v9486_v28 = vld [vmem:[#allocation12 + $0x924] sm:$0xf0]  ;;  %v8372_v43 = vld [vmem:[#allocation12 + $0x50] sm:$0xf] }
 0x407   :  { %6746 = vmatpush.bf16.msrb.mxu2 %v9265_v36  ;;  %6630 = vmatpush.bf16.msrb.mxu1 %v9009_v62  ;;  %v8898_v36 = vld [vmem:[#allocation12 + $0x48c] sm:$0xf0]  ;;  %v6424_v50 = vpop.f32.mrf.mxu1  ;;  %v9988_v62 = vld [vmem:[#allocation12 + $0xcf8] sm:$0xf] }
 0x408   :  { %6669 = vmatpush.bf16.msra.mxu0 %v9681_v63  ;;  %v6425_v10 = vadd.f32 %v6424_v50, %v6412_v31  ;;  %v8901_v60 = vor.u32 %v10604_v2, %v8898_v36  ;;  %v10880_v63 = vld [vmem:[#allocation12 + $0xd10] sm:$0xf0]  ;;  %v9933_v2 = vor.u32 %v10866_v24, %v9932_v51  ;;  %v9150_v51 = vld [vmem:[#allocation12 + $0x684] sm:$0xf0] }
 0x409   :  { %6708 = vmatpush.bf16.msra.mxu3 %v8565_v12  ;;  %v10576_v31 = vld [vmem:[#allocation12 + $0x394] sm:$0xf] }
 0x40a   :  { %6631 = vmatmul.bf16.vlgmr.msrb.gmra.mxu1 %v11556_v18  ;;  %v11760_v52 = vpop.f32.mrf.mxu0  ;;  %v11764_v12 = vadd.f32 %v11731_v53, %v6425_v10  ;;  %v10744_v50 = vld [vmem:[#allocation12 + $0x8d4] sm:$0xf]  ;;  %v8344_v10 = vld [vmem:[#allocation12 + $0x18] sm:$0xf] }
 0x40b   :  { %6747 = vmatpush.bf16.msrb.mxu2 %v9237_v0  ;;  %6675 = vmatpush.bf16.msra.mxu1 %v10101_v39  ;;  %v9542_v0 = vld [vmem:[#allocation12 + $0x994] sm:$0xf0]  ;;  %v8428_v39 = vld [vmem:[#allocation12 + $0xc0] sm:$0xf] }
 0x40c   :  { %6714 = vmatpush.bf16.msrb.mxu0 %v8985_v61  ;;  %6709 = vmatmul.bf16.vlgmr.msra.gmra.mxu3 %v11514_v47  ;;  %v9989_v61 = vor.u32 %v10880_v63, %v9988_v62  ;;  %v9545_v11 = vor.u32 %v10765_v58, %v9542_v0  ;;  %v8429_v8 = vor.u32 %v10489_v14, %v8428_v39  ;;  %v10468_v62 = vld [vmem:[#allocation12 + $0x30] sm:$0xf0]  ;;  %v10681_v63 = vld [vmem:[#allocation12 + $0x6dc] sm:$0xf]  ;;  %v9436_v14 = vld [vmem:[#allocation12 + $0x8a0] sm:$0xf] }
 0x40d   :  { %6753 = vmatpush.bf16.msrb.mxu3 %v9657_v5  ;;  %6670 = vmatmul.bf16.vlgmr.msra.gmra.mxu0 %v11658_v17  ;;  %v10873_v5 = vld [vmem:[#allocation12 + $0xcd8] sm:$0xf0]  ;;  %v8789_v0 = vor.u32 %v10576_v31, %v8786_v44  ;;  %v10828_v31 = vld [vmem:[#allocation12 + $0xb74] sm:$0xf]  ;;  %v9794_v44 = vld [vmem:[#allocation12 + $0xb8c] sm:$0xf0] }
 0x40e   :  { %6748 = vmatmul.bf16.vlgmr.msrb.gmra.mxu2 %v11578_v41  ;;  %v10573_v39 = vld [vmem:[#allocation12 + $0x378] sm:$0xf0] }
 0x40f   :  { %6792 = vmatpush.bf16.msra.mxu2 %v8541_v21  ;;  %6676 = vmatpush.bf16.msra.mxu1 %v10073_v57  ;;  %v6490_v21 = vadd.f32 %v11749_v6, %v3853_v9  ;;  %v6502_v53 = vpop.f32.mrf.mxu3  ;;  %v9514_v57 = vld [vmem:[#allocation12 + $0x95c] sm:$0xf0]  ;;  %v9961_v6 = vor.u32 %v10873_v5, %v9960_v38  ;;  %v9458_v9 = vld [vmem:[#allocation12 + $0x8ec] sm:$0xf0]  ;;  %v8345_v38 = vor.u32 %v10468_v62, %v8344_v10  ;;  %v10720_v10 = vld [vmem:[#allocation12 + $0x810] sm:$0xf0] }
 0x410   :  { %6715 = vmatpush.bf16.msrb.mxu0 %v8957_v48  ;;  %v8400_v48 = vld [vmem:[#allocation12 + $0x88] sm:$0xf]  ;;  %v9517_v54 = vor.u32 %v10758_v42, %v9514_v57  ;;  %v8765_v26 = vor.u32 %v10573_v39, %v8764_v49  ;;  %v10842_v42 = vld [vmem:[#allocation12 + $0xbe4] sm:$0xf]  ;;  %v10545_v39 = vld [vmem:[#allocation12 + $0x298] sm:$0xf0] }
 0x411   :  { %6754 = vmatpush.bf16.msrb.mxu3 %v9629_v32  ;;  %v11767_v35 = vpop.f32.mrf.mxu2  ;;  %v11769_v45 = vadd.f32 %v6502_v53, %v6490_v21  ;;  %v6426_v32 = vpop.f32.mrf.mxu1  ;;  %v8401_v27 = vor.u32 %v10482_v19, %v8400_v48  ;;  %v9850_v53 = vld [vmem:[#allocation12 + $0xbfc] sm:$0xf0]  ;;  %v8736_v57 = vld [vmem:[#allocation12 + $0x328] sm:$0xf]  ;;  %v10566_v48 = vld [vmem:[#allocation12 + $0x340] sm:$0xf0] }
 0x412   :  { %v9408_v19 = vld [vmem:[#allocation12 + $0x868] sm:$0xf]  ;;  %v10734_v32 = vld [vmem:[#allocation12 + $0x880] sm:$0xf0]  ;;  %v8737_v24 = vor.u32 %v10566_v48, %v8736_v57 }
 0x413   :  { %6793 = vmatpush.bf16.msra.mxu2 %v8513_v1  ;;  %6677 = vmatpush.bf16.msra.mxu1 %v10045_v23  ;;  %v6465_v1 = vpop.f32.mrf.mxu0  ;;  %v8814_v23 = vld [vmem:[#allocation12 + $0x3e4] sm:$0xf0]  ;;  %v10538_v48 = vld [vmem:[#allocation12 + $0x260] sm:$0xf0] }
 0x414   :  { %6716 = vmatpush.bf16.msrb.mxu0 %v8929_v34  ;;  %v10751_v34 = vld [vmem:[#allocation12 + $0x90c] sm:$0xf]  ;;  %v8817_v36 = vor.u32 %v10583_v7, %v8814_v23  ;;  %v9822_v7 = vld [vmem:[#allocation12 + $0xbc4] sm:$0xf0]  ;;  %v8708_v23 = vld [vmem:[#allocation12 + $0x2f0] sm:$0xf] }
 0x415   :  { %6755 = vmatpush.bf16.msrb.mxu3 %v9601_v16  ;;  %v10475_v16 = vld [vmem:[#allocation12 + $0x68] sm:$0xf0]  ;;  %v9489_v46 = vor.u32 %v10751_v34, %v9486_v28  ;;  %v6451_v34 = vadd.f32 %v11747_v25, %v11764_v12 }
 0x416   :  { %v8373_v15 = vor.u32 %v10475_v16, %v8372_v43  ;;  %v10559_v28 = vld [vmem:[#allocation12 + $0x308] sm:$0xf0]  ;;  %v9380_v43 = vld [vmem:[#allocation12 + $0x830] sm:$0xf] }
 0x417   :  { %6794 = vmatpush.bf16.msra.mxu2 %v8485_v3  ;;  %6678 = vmatpush.bf16.msra.mxu1 %v10017_v56  ;;  %v9904_v3 = vld [vmem:[#allocation12 + $0xc50] sm:$0xf]  ;;  %v6504_v56 = vpop.f32.mrf.mxu3  ;;  %v10727_v16 = vld [vmem:[#allocation12 + $0x848] sm:$0xf0]  ;;  %v8709_v25 = vor.u32 %v10559_v28, %v8708_v23  ;;  %v9710_v28 = vld [vmem:[#allocation12 + $0xae4] sm:$0xf0] }
 0x418   :  { %6717 = vmatpush.bf16.msrb.mxu0 %v8901_v60  ;;  %v9905_v58 = vor.u32 %v10859_v30, %v9904_v3  ;;  %v9122_v30 = vld [vmem:[#allocation12 + $0x64c] sm:$0xf0]  ;;  %v9381_v12 = vor.u32 %v10727_v16, %v9380_v43  ;;  %v10531_v16 = vld [vmem:[#allocation12 + $0x228] sm:$0xf0] }
 0x419   :  { %6756 = vmatpush.bf16.msrb.mxu3 %v9573_v40  ;;  %v6543_v60 = vpop.f32.mrf.mxu2  ;;  %v9206_v40 = vld [vmem:[#allocation12 + $0x6f4] sm:$0xf0]  ;;  %v8596_v43 = vld [vmem:[#allocation12 + $0x210] sm:$0xf] }
 0x41a   :  { %v9209_v5 = vor.u32 %v10681_v63, %v9206_v40  ;;  %v9797_v63 = vor.u32 %v10828_v31, %v9794_v44  ;;  %v10653_v40 = vld [vmem:[#allocation12 + $0x5fc] sm:$0xf]  ;;  %v10800_v31 = vld [vmem:[#allocation12 + $0xa94] sm:$0xf]  ;;  %v8597_v44 = vor.u32 %v10531_v16, %v8596_v43 }
 0x41b   :  { %6795 = vmatpush.bf16.msra.mxu2 %v8457_v33  ;;  %6679 = vmatpush.bf16.msra.mxu1 %v9989_v61  ;;  %v10849_v33 = vld [vmem:[#allocation12 + $0xc1c] sm:$0xf]  ;;  %v10608_v43 = vld [vmem:[#allocation12 + $0x490] sm:$0xf0] }
 0x41c   :  { %6718 = vmatpush.bf16.msrb.mxu0 %v8873_v37  ;;  %v10741_v61 = vld [vmem:[#allocation12 + $0x8b8] sm:$0xf0]  ;;  %v9461_v37 = vor.u32 %v10744_v50, %v9458_v9  ;;  %v9881_v21 = vor.u32 %v10849_v33, %v9878_v59  ;;  %v10552_v50 = vld [vmem:[#allocation12 + $0x2d0] sm:$0xf0]  ;;  %v9352_v9 = vld [vmem:[#allocation12 + $0x7f8] sm:$0xf] }
 0x41d   :  { %6757 = vmatpush.bf16.msrb.mxu3 %v9545_v11  ;;  %v10674_v11 = vld [vmem:[#allocation12 + $0x6a4] sm:$0xf]  ;;  %v9437_v13 = vor.u32 %v10741_v61, %v9436_v14  ;;  %v9094_v33 = vld [vmem:[#allocation12 + $0x614] sm:$0xf0]  ;;  %v9353_v49 = vor.u32 %v10720_v10, %v9352_v9  ;;  %v9324_v14 = vld [vmem:[#allocation12 + $0x7c0] sm:$0xf] }
 0x41e   :  { %v10713_v61 = vld [vmem:[#allocation12 + $0x7d8] sm:$0xf0]  ;;  %v10524_v9 = vld [vmem:[#allocation12 + $0x1f0] sm:$0xf0] }
 0x41f   :  { %6796 = vmatpush.bf16.msra.mxu2 %v8429_v8  ;;  %6680 = vmatpush.bf16.msra.mxu1 %v9961_v6  ;;  %v9178_v8 = vld [vmem:[#allocation12 + $0x6bc] sm:$0xf0]  ;;  %v9853_v6 = vor.u32 %v10842_v42, %v9850_v53  ;;  %v8624_v42 = vld [vmem:[#allocation12 + $0x248] sm:$0xf] }
 0x420   :  { %6719 = vmatpush.bf16.msrb.mxu0 %v8845_v20  ;;  %v9181_v1 = vor.u32 %v10674_v11, %v9178_v8  ;;  %v10667_v20 = vld [vmem:[#allocation12 + $0x66c] sm:$0xf]  ;;  %v9325_v8 = vor.u32 %v10713_v61, %v9324_v14  ;;  %v8625_v23 = vor.u32 %v10538_v48, %v8624_v42 }
 0x421   :  { %6758 = vmatpush.bf16.msrb.mxu3 %v9517_v54  ;;  %v9409_v54 = vor.u32 %v10734_v32, %v9408_v19  ;;  %v9153_v3 = vor.u32 %v10667_v20, %v9150_v51  ;;  %v9296_v19 = vld [vmem:[#allocation12 + $0x788] sm:$0xf]  ;;  %v10706_v32 = vld [vmem:[#allocation12 + $0x7a0] sm:$0xf0] }
 0x423   :  { %6797 = vmatpush.bf16.msra.mxu2 %v8401_v27  ;;  %6681 = vmatpush.bf16.msra.mxu1 %v9933_v2  ;;  %v10835_v27 = vld [vmem:[#allocation12 + $0xbac] sm:$0xf] }
 0x424   :  { %6720 = vmatpush.bf16.msrb.mxu0 %v8817_v36  ;;  %v9825_v2 = vor.u32 %v10835_v27, %v9822_v7  ;;  %v10660_v36 = vld [vmem:[#allocation12 + $0x634] sm:$0xf]  ;;  %v9038_v27 = vld [vmem:[#allocation12 + $0x5a4] sm:$0xf0]  ;;  %v10807_v7 = vld [vmem:[#allocation12 + $0xacc] sm:$0xf] }
 0x425   :  { %6759 = vmatpush.bf16.msrb.mxu3 %v9489_v46  ;;  %v8680_v46 = vld [vmem:[#allocation12 + $0x2b8] sm:$0xf]  ;;  %v9125_v62 = vor.u32 %v10660_v36, %v9122_v30  ;;  %v9713_v30 = vor.u32 %v10807_v7, %v9710_v28  ;;  %v10884_v7 = vld [vmem:[#allocation12 + $0xd34] sm:$0xf] }
 0x426   :  { %v8681_v59 = vor.u32 %v10552_v50, %v8680_v46  ;;  %v8568_v50 = vld [vmem:[#allocation12 + $0x1d8] sm:$0xf] }
 0x427   :  { %6798 = vmatpush.bf16.msra.mxu2 %v8373_v15  ;;  %6682 = vmatpush.bf16.msra.mxu1 %v9905_v58  ;;  %v6464_v15 = vadd.f32 %v11760_v52, %v6451_v34  ;;  %v6476_v56 = vpop.f32.mrf.mxu1  ;;  %v10821_v58 = vld [vmem:[#allocation12 + $0xb3c] sm:$0xf]  ;;  %v8652_v52 = vld [vmem:[#allocation12 + $0x280] sm:$0xf]  ;;  %v9297_v34 = vor.u32 %v10706_v32, %v9296_v19  ;;  %v10891_v19 = vld [vmem:[#allocation12 + $0xd6c] sm:$0xf] }
 0x428   :  { %6721 = vmatpush.bf16.msrb.mxu0 %v8789_v0  ;;  %v9766_v0 = vld [vmem:[#allocation12 + $0xb54] sm:$0xf0]  ;;  %v8653_v11 = vor.u32 %v10545_v39, %v8652_v52  ;;  %v10797_v52 = vld [vmem:[#allocation12 + $0xa78] sm:$0xf0]  ;;  %v8569_v39 = vor.u32 %v10524_v9, %v8568_v50  ;;  %v8876_v50 = vld [vmem:[#allocation12 + $0x440] sm:$0xf] }
 0x429   :  { %6760 = vmatpush.bf16.msrb.mxu3 %v9461_v37  ;;  %v6477_v60 = vadd.f32 %v6476_v56, %v6464_v15  ;;  %v9097_v37 = vor.u32 %v10653_v40, %v9094_v33  ;;  %v9682_v15 = vld [vmem:[#allocation12 + $0xaac] sm:$0xf0]  ;;  %v10102_v40 = vld [vmem:[#allocation12 + $0xdf4] sm:$0xf0]  ;;  %v8988_v33 = vld [vmem:[#allocation12 + $0x520] sm:$0xf] }
 0x42a   :  { %6683 = vmatmul.bf16.vlgmr.msra.gmra.mxu1 %v11673_v22  ;;  %v8904_v28 = vld [vmem:[#allocation12 + $0x478] sm:$0xf]  ;;  %v9548_v9 = vld [vmem:[#allocation12 + $0x980] sm:$0xf] }
 0x42b   :  { %6799 = vmatpush.bf16.msra.mxu2 %v8345_v38  ;;  %6727 = vmatpush.bf16.msrb.mxu1 %v9209_v5  ;;  %10957 = vtanh.f32 %v6477_v60  ;;  %v9769_v38 = vor.u32 %v10821_v58, %v9766_v0  ;;  %v10646_v5 = vld [vmem:[#allocation12 + $0x5c4] sm:$0xf]  ;;  %v9240_v60 = vld [vmem:[#allocation12 + $0x718] sm:$0xf]  ;;  %v9685_v58 = vor.u32 %v10800_v31, %v9682_v15  ;;  %v9660_v0 = vld [vmem:[#allocation12 + $0xa60] sm:$0xf]  ;;  %v8905_v31 = vor.u32 %v10608_v43, %v8904_v28 }
 0x42c   :  { %6766 = vmatpush.bf16.msra.mxu0 %v9881_v21  ;;  %6761 = vmatmul.bf16.vlgmr.msrb.gmra.mxu3 %v11622_v55  ;;  %v9066_v21 = vld [vmem:[#allocation12 + $0x5dc] sm:$0xf0]  ;;  %v9990_v15 = vld [vmem:[#allocation12 + $0xd14] sm:$0xf0]  ;;  %v10853_v28 = vld [vmem:[#allocation12 + $0xc38] sm:$0xf0] }
 0x42d   :  { %6805 = vmatpush.bf16.msra.mxu3 %v8765_v26  ;;  %6722 = vmatmul.bf16.vlgmr.msrb.gmra.mxu0 %v11533_v29  ;;  %v10814_v26 = vld [vmem:[#allocation12 + $0xb04] sm:$0xf]  ;;  %v9069_v51 = vor.u32 %v10646_v5, %v9066_v21  ;;  %v9661_v5 = vor.u32 %v10797_v52, %v9660_v0  ;;  %v10074_v21 = vld [vmem:[#allocation12 + $0xdbc] sm:$0xf0]  ;;  %v9520_v52 = vld [vmem:[#allocation12 + $0x948] sm:$0xf] }
 0x42e   :  { %6800 = vmatmul.bf16.vlgmr.msra.gmra.mxu2 %v11500_v4  ;;  %v11778_v4 = vpop.f32.mrf.mxu0 }
 0x42f   :  { %6844 = vmatpush.bf16.msrb.mxu2 %v9437_v13  ;;  %6728 = vmatpush.bf16.msrb.mxu1 %v9181_v1  ;;  %v9738_v13 = vld [vmem:[#allocation12 + $0xb1c] sm:$0xf0]  ;;  %v11780_v53 = vpop.f32.mrf.mxu3  ;;  %v6478_v1 = vpop.f32.mrf.mxu1  ;;  %v6516_v16 = vadd.f32 %v11778_v4, %v11769_v45  ;;  %v10601_v45 = vld [vmem:[#allocation12 + $0x458] sm:$0xf0] }
 0x430   :  { %6767 = vmatpush.bf16.msra.mxu0 %v9853_v6  ;;  %v10046_v1 = vld [vmem:[#allocation12 + $0xd84] sm:$0xf0] }
 0x431   :  { %6806 = vmatpush.bf16.msra.mxu3 %v8737_v24  ;;  %v11782_v57 = vpop.f32.mrf.mxu2  ;;  %v10958_v20 = vpop.eup %10957  ;;  %v9741_v24 = vor.u32 %v10814_v26, %v9738_v13  ;;  %v9632_v26 = vld [vmem:[#allocation12 + $0xa28] sm:$0xf]  ;;  %v10790_v13 = vld [vmem:[#allocation12 + $0xa40] sm:$0xf0] }
 0x432   :  { %6905 = vst [vmem:[%s11845_s8 + $0x10] sm:$0xff] %v10958_v20  ;;  %v9633_v32 = vor.u32 %v10790_v13, %v9632_v26  ;;  %v10615_v20 = vld [vmem:[#allocation12 + $0x4c8] sm:$0xf0]  ;;  %v9492_v26 = vld [vmem:[#allocation12 + $0x910] sm:$0xf] }
 0x433   :  { %6845 = vmatpush.bf16.msrb.mxu2 %v9409_v54  ;;  %6729 = vmatpush.bf16.msrb.mxu1 %v9153_v3  ;;  %v10639_v54 = vld [vmem:[#allocation12 + $0x58c] sm:$0xf]  ;;  %v9268_v3 = vld [vmem:[#allocation12 + $0x750] sm:$0xf] }
 0x434   :  { %6768 = vmatpush.bf16.msra.mxu0 %v9825_v2  ;;  %v10699_v2 = vld [vmem:[#allocation12 + $0x768] sm:$0xf0]  ;;  %v9041_v36 = vor.u32 %v10639_v54, %v9038_v27  ;;  %v10049_v54 = vor.u32 %v10891_v19, %v10046_v1  ;;  %v10856_v19 = vld [vmem:[#allocation12 + $0xc54] sm:$0xf] }
 0x435   :  { %6807 = vmatpush.bf16.msra.mxu3 %v8709_v25  ;;  %v10632_v25 = vld [vmem:[#allocation12 + $0x554] sm:$0xf]  ;;  %v9269_v46 = vor.u32 %v10699_v2, %v9268_v3  ;;  %v9576_v3 = vld [vmem:[#allocation12 + $0x9b8] sm:$0xf]  ;;  %v10755_v13 = vld [vmem:[#allocation12 + $0x928] sm:$0xf0] }
 0x436   :  { %v6517_v6 = vpop.f32.mrf.mxu0  ;;  %v10776_v2 = vld [vmem:[#allocation12 + $0x9d0] sm:$0xf0]  ;;  %v9493_v1 = vor.u32 %v10755_v13, %v9492_v26 }
 0x437   :  { %6846 = vmatpush.bf16.msrb.mxu2 %v9381_v12  ;;  %6730 = vmatpush.bf16.msrb.mxu1 %v9125_v62  ;;  %v9010_v12 = vld [vmem:[#allocation12 + $0x56c] sm:$0xf0]  ;;  %v6556_v10 = vpop.f32.mrf.mxu3  ;;  %v10692_v62 = vld [vmem:[#allocation12 + $0x730] sm:$0xf0] }
 0x438   :  { %6769 = vmatpush.bf16.msra.mxu0 %v9797_v63  ;;  %v10905_v63 = vld [vmem:[#allocation12 + $0xddc] sm:$0xf]  ;;  %v9241_v14 = vor.u32 %v10692_v62, %v9240_v60  ;;  %v8932_v6 = vld [vmem:[#allocation12 + $0x4b0] sm:$0xf]  ;;  %v8877_v60 = vor.u32 %v10601_v45, %v8876_v50  ;;  %v10870_v62 = vld [vmem:[#allocation12 + $0xcc4] sm:$0xf] }
 0x439   :  { %6808 = vmatpush.bf16.msra.mxu3 %v8681_v59  ;;  %v6595_v56 = vpop.f32.mrf.mxu2  ;;  %v10629_v59 = vld [vmem:[#allocation12 + $0x538] sm:$0xf0]  ;;  %v10105_v61 = vor.u32 %v10905_v63, %v10102_v40  ;;  %v8933_v27 = vor.u32 %v10615_v20, %v8932_v6  ;;  %v8792_v6 = vld [vmem:[#allocation12 + $0x398] sm:$0xf]  ;;  %v10580_v20 = vld [vmem:[#allocation12 + $0x3b0] sm:$0xf0] }
 0x43a   :  { %v10769_v10 = vld [vmem:[#allocation12 + $0x998] sm:$0xf0]  ;;  %v10671_v50 = vld [vmem:[#allocation12 + $0x688] sm:$0xf0]  ;;  %v9828_v45 = vld [vmem:[#allocation12 + $0xbb0] sm:$0xf] }
 0x43b   :  { %6847 = vmatpush.bf16.msrb.mxu2 %v9353_v49  ;;  %6731 = vmatpush.bf16.msrb.mxu1 %v9097_v37  ;;  %v9013_v49 = vor.u32 %v10632_v25, %v9010_v12  ;;  %v8989_v37 = vor.u32 %v10629_v59, %v8988_v33  ;;  %v9549_v40 = vor.u32 %v10769_v10, %v9548_v9  ;;  %v9962_v33 = vld [vmem:[#allocation12 + $0xcdc] sm:$0xf0]  ;;  %v8848_v59 = vld [vmem:[#allocation12 + $0x408] sm:$0xf]  ;;  %v10839_v9 = vld [vmem:[#allocation12 + $0xbc8] sm:$0xf0] }
 0x43c   :  { %6770 = vmatpush.bf16.msra.mxu0 %v9769_v38  ;;  %v10898_v38 = vld [vmem:[#allocation12 + $0xda4] sm:$0xf] }
 0x43d   :  { %6809 = vmatpush.bf16.msra.mxu3 %v8653_v11  ;;  %v8960_v11 = vld [vmem:[#allocation12 + $0x4e8] sm:$0xf]  ;;  %v10077_v42 = vor.u32 %v10898_v38, %v10074_v21 }
 0x43e   :  { %v9934_v21 = vld [vmem:[#allocation12 + $0xca4] sm:$0xf0] }
 0x43f   :  { %6848 = vmatpush.bf16.msrb.mxu2 %v9325_v8  ;;  %6732 = vmatpush.bf16.msrb.mxu1 %v9069_v51  ;;  %v10622_v8 = vld [vmem:[#allocation12 + $0x500] sm:$0xf0]  ;;  %v9604_v51 = vld [vmem:[#allocation12 + $0x9f0] sm:$0xf] }
 0x440   :  { %6771 = vmatpush.bf16.msra.mxu0 %v9741_v24  ;;  %v8961_v48 = vor.u32 %v10622_v8, %v8960_v11  ;;  %v10783_v24 = vld [vmem:[#allocation12 + $0xa08] sm:$0xf0]  ;;  %v8820_v11 = vld [vmem:[#allocation12 + $0x3d0] sm:$0xf] }
 0x441   :  { %6810 = vmatpush.bf16.msra.mxu3 %v8625_v23  ;;  %v9605_v23 = vor.u32 %v10783_v24, %v9604_v51  ;;  %v10587_v8 = vld [vmem:[#allocation12 + $0x3e8] sm:$0xf0]  ;;  %v9464_v51 = vld [vmem:[#allocation12 + $0x8d8] sm:$0xf] }
 0x443   :  { %6849 = vmatpush.bf16.msrb.mxu2 %v9297_v34  ;;  %6733 = vmatpush.bf16.msrb.mxu1 %v9041_v36  ;;  %v10018_v34 = vld [vmem:[#allocation12 + $0xd4c] sm:$0xf0] }
 0x444   :  { %6772 = vmatpush.bf16.msra.mxu0 %v9713_v30  ;;  %v11795_v30 = vld [vmem:[#allocation13 + $0x1c] sm:$0xff]  ;;  %v10021_v12 = vor.u32 %v10884_v7, %v10018_v34 }
 0x445   :  { %6811 = vmatpush.bf16.msra.mxu3 %v8597_v44  ;;  %v10877_v44 = vld [vmem:[#allocation12 + $0xcfc] sm:$0xf]  ;;  %v9212_v7 = vld [vmem:[#allocation12 + $0x6e0] sm:$0xf] }
 0x446   :  { %v9993_v56 = vor.u32 %v10877_v44, %v9990_v15  ;;  %v9884_v34 = vld [vmem:[#allocation12 + $0xc20] sm:$0xf]  ;;  %v9156_v15 = vld [vmem:[#allocation12 + $0x670] sm:$0xf] }
 0x447   :  { %6850 = vmatpush.bf16.msrb.mxu2 %v9269_v46  ;;  %6734 = vmatpush.bf16.msrb.mxu1 %v9013_v49  ;;  %v9577_v46 = vor.u32 %v10776_v2, %v9576_v3  ;;  %v10594_v49 = vld [vmem:[#allocation12 + $0x420] sm:$0xf0] }
 0x448   :  { %6773 = vmatpush.bf16.msra.mxu0 %v9685_v58  ;;  %v8849_v38 = vor.u32 %v10594_v49, %v8848_v59 }
 0x449   :  { %6812 = vmatpush.bf16.msra.mxu3 %v8569_v39 }
 0x44a   :  { %6735 = vmatmul.bf16.vlgmr.msrb.gmra.mxu1 %v11556_v18  ;;  %v11793_v36 = vpop.f32.mrf.mxu0 }
 0x44b   :  { %6851 = vmatpush.bf16.msrb.mxu2 %v9241_v14  ;;  %6779 = vmatpush.bf16.msra.mxu1 %v10105_v61 }
 0x44c   :  { %6818 = vmatpush.bf16.msrb.mxu0 %v8989_v37  ;;  %6813 = vmatmul.bf16.vlgmr.msra.gmra.mxu3 %v11514_v47  ;;  %v6528_v47 = vpop.f32.mrf.mxu1  ;;  %v9965_v37 = vor.u32 %v10870_v62, %v9962_v33  ;;  %v9128_v62 = vld [vmem:[#allocation12 + $0x638] sm:$0xf]  ;;  %v10832_v33 = vld [vmem:[#allocation12 + $0xb90] sm:$0xf0] }
 0x44d   :  { %6857 = vmatpush.bf16.msrb.mxu3 %v9661_v5  ;;  %6774 = vmatmul.bf16.vlgmr.msra.gmra.mxu0 %v11658_v17  ;;  %v6529_v25 = vadd.f32 %v6528_v47, %v6516_v16  ;;  %v10863_v5 = vld [vmem:[#allocation12 + $0xc8c] sm:$0xf]  ;;  %v8793_v16 = vor.u32 %v10580_v20, %v8792_v6  ;;  %v9885_v47 = vor.u32 %v10853_v28, %v9884_v34  ;;  %v10909_v34 = vld [vmem:[#allocation12 + $0xdf8] sm:$0xf0] }
 0x44e   :  { %6852 = vmatmul.bf16.vlgmr.msrb.gmra.mxu2 %v11578_v41  ;;  %v3854_v41 = vperm.slane %v11795_v30, 4  ;;  %v10811_v6 = vld [vmem:[#allocation12 + $0xae8] sm:$0xf0] }
 0x44f   :  { %6780 = vmatpush.bf16.msra.mxu1 %v10077_v42  ;;  %v11799_v4 = vadd.f32 %v11767_v35, %v6529_v25  ;;  %v6606_v58 = vpop.f32.mrf.mxu3  ;;  %v10762_v35 = vld [vmem:[#allocation12 + $0x960] sm:$0xf0]  ;;  %v9937_v42 = vor.u32 %v10863_v5, %v9934_v21 }
 0x450   :  { %6819 = vmatpush.bf16.msrb.mxu0 %v8961_v48  ;;  %v6594_v63 = vadd.f32 %v11782_v57, %v3854_v41  ;;  %v9521_v57 = vor.u32 %v10762_v35, %v9520_v52  ;;  %v8821_v48 = vor.u32 %v10587_v8, %v8820_v11  ;;  %v9184_v41 = vld [vmem:[#allocation12 + $0x6a8] sm:$0xf]  ;;  %v10678_v25 = vld [vmem:[#allocation12 + $0x6c0] sm:$0xf0]  ;;  %v9772_v35 = vld [vmem:[#allocation12 + $0xb40] sm:$0xf] }
 0x451   :  { %6858 = vmatpush.bf16.msrb.mxu3 %v9633_v32  ;;  %v11802_v0 = vpop.f32.mrf.mxu2  ;;  %v9906_v32 = vld [vmem:[#allocation12 + $0xc6c] sm:$0xf0]  ;;  %v9185_v44 = vor.u32 %v10678_v25, %v9184_v41  ;;  %v6555_v10 = vadd.f32 %v11780_v53, %v11799_v4  ;;  %v9100_v4 = vld [vmem:[#allocation12 + $0x600] sm:$0xf]  ;;  %v10650_v5 = vld [vmem:[#allocation12 + $0x5e0] sm:$0xf0] }
 0x452   :  { %v11804_v39 = vadd.f32 %v6606_v58, %v6594_v63  ;;  %v6569_v61 = vpop.f32.mrf.mxu0  ;;  %v9909_v43 = vor.u32 %v10856_v19, %v9906_v32  ;;  %v10664_v63 = vld [vmem:[#allocation12 + $0x650] sm:$0xf0]  ;;  %v9044_v19 = vld [vmem:[#allocation12 + $0x590] sm:$0xf]  ;;  %v10643_v32 = vld [vmem:[#allocation12 + $0x5a8] sm:$0xf0] }
 0x453   :  { %6781 = vmatpush.bf16.msra.mxu1 %v10049_v54  ;;  %v6568_v59 = vadd.f32 %v11793_v36, %v6555_v10  ;;  %v9129_v58 = vor.u32 %v10664_v63, %v9128_v62  ;;  %v9744_v36 = vld [vmem:[#allocation12 + $0xb08] sm:$0xf]  ;;  %v9045_v20 = vor.u32 %v10643_v32, %v9044_v19  ;;  %v10902_v41 = vld [vmem:[#allocation12 + $0xdc0] sm:$0xf0]  ;;  %v3855_v63 = vperm.slane %v11795_v30, 5 }
 0x454   :  { %6820 = vmatpush.bf16.msrb.mxu0 %v8933_v27  ;;  %v6530_v14 = vpop.f32.mrf.mxu1  ;;  %v10748_v27 = vld [vmem:[#allocation12 + $0x8f0] sm:$0xf0] }
 0x455   :  { %6859 = vmatpush.bf16.msrb.mxu3 %v9605_v23  ;;  %v10685_v23 = vld [vmem:[#allocation12 + $0x6f8] sm:$0xf0]  ;;  %v9465_v3 = vor.u32 %v10748_v27, %v9464_v51  ;;  %v9688_v27 = vld [vmem:[#allocation12 + $0xa98] sm:$0xf] }
 0x456   :  { %v9213_v2 = vor.u32 %v10685_v23, %v9212_v7  ;;  %v10825_v14 = vld [vmem:[#allocation12 + $0xb58] sm:$0xf0]  ;;  %v10804_v7 = vld [vmem:[#allocation12 + $0xab0] sm:$0xf0]  ;;  %v10108_v23 = vld [vmem:[#allocation12 + $0xde0] sm:$0xf] }
 0x457   :  { %6782 = vmatpush.bf16.msra.mxu1 %v10021_v12  ;;  %v6608_v24 = vpop.f32.mrf.mxu3  ;;  %v9856_v12 = vld [vmem:[#allocation12 + $0xbe8] sm:$0xf] }
 0x458   :  { %6821 = vmatpush.bf16.msrb.mxu0 %v8905_v31  ;;  %v10846_v31 = vld [vmem:[#allocation12 + $0xc00] sm:$0xf0]  ;;  %v9016_v24 = vld [vmem:[#allocation12 + $0x558] sm:$0xf] }
 0x459   :  { %6860 = vmatpush.bf16.msrb.mxu3 %v9577_v46  ;;  %v6647_v54 = vpop.f32.mrf.mxu2  ;;  %v9857_v46 = vor.u32 %v10846_v31, %v9856_v12  ;;  %v10052_v12 = vld [vmem:[#allocation12 + $0xd70] sm:$0xf]  ;;  %v10895_v31 = vld [vmem:[#allocation12 + $0xd88] sm:$0xf0] }
 0x45a   :  { %v10636_v54 = vld [vmem:[#allocation12 + $0x570] sm:$0xf0] }
 0x45b   :  { %6783 = vmatpush.bf16.msra.mxu1 %v9993_v56  ;;  %v9157_v56 = vor.u32 %v10671_v50, %v9156_v15  ;;  %v10888_v15 = vld [vmem:[#allocation12 + $0xd50] sm:$0xf0] }
 0x45c   :  { %6822 = vmatpush.bf16.msrb.mxu0 %v8877_v60  ;;  %v9829_v60 = vor.u32 %v10839_v9, %v9828_v45 }
 0x45d   :  { %6861 = vmatpush.bf16.msrb.mxu3 %v9549_v40  ;;  %v9800_v40 = vld [vmem:[#allocation12 + $0xb78] sm:$0xf] }
 0x45e   :  { %v9801_v53 = vor.u32 %v10832_v33, %v9800_v40  ;;  %v9968_v40 = vld [vmem:[#allocation12 + $0xcc8] sm:$0xf]  ;;  %v10874_v33 = vld [vmem:[#allocation12 + $0xce0] sm:$0xf0] }
 0x45f   :  { %6784 = vmatpush.bf16.msra.mxu1 %v9965_v37  ;;  %v9773_v37 = vor.u32 %v10825_v14, %v9772_v35  ;;  %v9912_v14 = vld [vmem:[#allocation12 + $0xc58] sm:$0xf] }
 0x460   :  { %6823 = vmatpush.bf16.msrb.mxu0 %v8849_v38  ;;  %v9072_v38 = vld [vmem:[#allocation12 + $0x5c8] sm:$0xf] }
 0x461   :  { %6862 = vmatpush.bf16.msrb.mxu3 %v9521_v57  ;;  %v10818_v57 = vld [vmem:[#allocation12 + $0xb20] sm:$0xf0]  ;;  %v9073_v13 = vor.u32 %v10650_v5, %v9072_v38 }
 0x463   :  { %6785 = vmatpush.bf16.msra.mxu1 %v9937_v42 }
 0x464   :  { %6824 = vmatpush.bf16.msrb.mxu0 %v8821_v48  ;;  %v9745_v48 = vor.u32 %v10818_v57, %v9744_v36 }
 0x465   :  { %6863 = vmatpush.bf16.msrb.mxu3 %v9493_v1  ;;  %v9716_v1 = vld [vmem:[#allocation12 + $0xad0] sm:$0xf] }
 0x466   :  { %v9717_v51 = vor.u32 %v10811_v6, %v9716_v1 }
 0x467   :  { %6786 = vmatpush.bf16.msra.mxu1 %v9909_v43  ;;  %v6580_v49 = vpop.f32.mrf.mxu1 }
 0x468   :  { %6825 = vmatpush.bf16.msrb.mxu0 %v8793_v16  ;;  %v6581_v52 = vadd.f32 %v6580_v49, %v6568_v59  ;;  %v9017_v16 = vor.u32 %v10636_v54, %v9016_v24 }
 0x469   :  { %6864 = vmatpush.bf16.msrb.mxu3 %v9465_v3  ;;  %v9689_v3 = vor.u32 %v10804_v7, %v9688_v27 }
 0x46a   :  { %6787 = vmatmul.bf16.vlgmr.msra.gmra.mxu1 %v11673_v22  ;;  %10959 = vtanh.f32 %v6581_v52 }
 0x46b   :  { %6831 = vmatpush.bf16.msrb.mxu1 %v9213_v2  ;;  %6826 = vmatmul.bf16.vlgmr.msrb.gmra.mxu0 %v11533_v29  ;;  %v11812_v29 = vpop.f32.mrf.mxu0  ;;  %v10109_v2 = vor.u32 %v10909_v34, %v10108_v23 }
 0x46c   :  { %6870 = vmatpush.bf16.msra.mxu0 %v9885_v47  ;;  %6865 = vmatmul.bf16.vlgmr.msrb.gmra.mxu3 %v11622_v55  ;;  %v10657_v55 = vld [vmem:[#allocation12 + $0x618] sm:$0xf0]  ;;  %v10080_v47 = vld [vmem:[#allocation12 + $0xda8] sm:$0xf]  ;;  %v6620_v50 = vadd.f32 %v11812_v29, %v11804_v39  ;;  %v9969_v39 = vor.u32 %v10874_v33, %v9968_v40 }
 0x46d   :  { %v9101_v61 = vor.u32 %v10657_v55, %v9100_v4  ;;  %v10081_v25 = vor.u32 %v10902_v41, %v10080_v47  ;;  %v9940_v4 = vld [vmem:[#allocation12 + $0xc90] sm:$0xf]  ;;  %v10867_v55 = vld [vmem:[#allocation12 + $0xca8] sm:$0xf0] }
 0x46e   :  { %v9941_v35 = vor.u32 %v10867_v55, %v9940_v4 }
 0x46f   :  { %6832 = vmatpush.bf16.msrb.mxu1 %v9185_v44  ;;  %v11814_v21 = vpop.f32.mrf.mxu3  ;;  %v6582_v8 = vpop.f32.mrf.mxu1  ;;  %v10053_v44 = vor.u32 %v10895_v31, %v10052_v12 }
 0x470   :  { %6871 = vmatpush.bf16.msra.mxu0 %v9857_v46  ;;  %v10960_v42 = vpop.eup %10959  ;;  %v10024_v46 = vld [vmem:[#allocation12 + $0xd38] sm:$0xf] }
 0x471   :  { %v6697_v11 = vpop.f32.mrf.mxu2  ;;  %6906 = vst [vmem:[%s11845_s8 + $0x18] sm:$0xff] %v10960_v42  ;;  %v10025_v45 = vor.u32 %v10888_v15, %v10024_v46 }
 0x472   :  { %v6698_v59 = vadd.f32 %v6697_v11, %v3855_v63 }
 0x473   :  { %6833 = vmatpush.bf16.msrb.mxu1 %v9157_v56  ;;  %v6621_v26 = vpop.f32.mrf.mxu0  ;;  %v9996_v56 = vld [vmem:[#allocation12 + $0xd00] sm:$0xf] }
 0x474   :  { %6872 = vmatpush.bf16.msra.mxu0 %v9829_v60  ;;  %v10881_v60 = vld [vmem:[#allocation12 + $0xd18] sm:$0xf0] }
 0x477   :  { %6834 = vmatpush.bf16.msrb.mxu1 %v9129_v58  ;;  %v6660_v28 = vpop.f32.mrf.mxu3 }
 0x478   :  { %6873 = vmatpush.bf16.msra.mxu0 %v9801_v53 }
 0x479   :  { %v6699_v43 = vpop.f32.mrf.mxu2 }
 0x47b   :  { %6835 = vmatpush.bf16.msrb.mxu1 %v9101_v61  ;;  %v10860_v61 = vld [vmem:[#allocation12 + $0xc70] sm:$0xf0] }
 0x47c   :  { %6874 = vmatpush.bf16.msra.mxu0 %v9773_v37  ;;  %v9913_v38 = vor.u32 %v10860_v61, %v9912_v14 }
 0x47f   :  { %6836 = vmatpush.bf16.msrb.mxu1 %v9073_v13 }
 0x480   :  { %6875 = vmatpush.bf16.msra.mxu0 %v9745_v48 }
 0x483   :  { %6837 = vmatpush.bf16.msrb.mxu1 %v9045_v20 }
 0x484   :  { %6876 = vmatpush.bf16.msra.mxu0 %v9717_v51  ;;  %v3856_v51 = vperm.slane %v11795_v30, 6 }
 0x487   :  { %6838 = vmatpush.bf16.msrb.mxu1 %v9017_v16  ;;  %v6632_v9 = vpop.f32.mrf.mxu1 }
 0x488   :  { %6877 = vmatpush.bf16.msra.mxu0 %v9689_v3  ;;  %v6633_v62 = vadd.f32 %v6632_v9, %v6620_v50 }
 0x48a   :  { %6839 = vmatmul.bf16.vlgmr.msrb.gmra.mxu1 %v11556_v18  ;;  %v6671_v10 = vpop.f32.mrf.mxu0  ;;  %v6646_v18 = vadd.f32 %v11802_v0, %v6633_v62 }
 0x48b   :  { %6883 = vmatpush.bf16.msra.mxu1 %v10109_v2  ;;  %6878 = vmatmul.bf16.vlgmr.msra.gmra.mxu0 %v11658_v17  ;;  %v9997_v17 = vor.u32 %v10881_v60, %v9996_v56 }
 0x48c   :  { %v6659_v5 = vadd.f32 %v11814_v21, %v6646_v18 }
 0x48e   :  { %v6672_v36 = vadd.f32 %v6671_v10, %v6659_v5 }
 0x48f   :  { %6884 = vmatpush.bf16.msra.mxu1 %v10081_v25  ;;  %v6710_v49 = vpop.f32.mrf.mxu3  ;;  %v6634_v52 = vpop.f32.mrf.mxu1 }
 0x490   :  { %v6711_v29 = vadd.f32 %v6710_v49, %v6698_v59 }
 0x491   :  { %v6749_v58 = vpop.f32.mrf.mxu2 }
 0x492   :  { %v6673_v53 = vpop.f32.mrf.mxu0 }
 0x493   :  { %6885 = vmatpush.bf16.msra.mxu1 %v10053_v44 }
 0x497   :  { %6886 = vmatpush.bf16.msra.mxu1 %v10025_v45  ;;  %v6712_v0 = vpop.f32.mrf.mxu3 }
 0x499   :  { %v6751_v37 = vpop.f32.mrf.mxu2 }
 0x49b   :  { %6887 = vmatpush.bf16.msra.mxu1 %v9997_v17 }
 0x49f   :  { %6888 = vmatpush.bf16.msra.mxu1 %v9969_v39 }
 0x4a3   :  { %6889 = vmatpush.bf16.msra.mxu1 %v9941_v35 }
 0x4a7   :  { %6890 = vmatpush.bf16.msra.mxu1 %v9913_v38  ;;  %v6684_v57 = vpop.f32.mrf.mxu1 }
 0x4a8   :  { %v6685_v8 = vadd.f32 %v6684_v57, %v6672_v36 }
 0x4aa   :  { %6891 = vmatmul.bf16.vlgmr.msra.gmra.mxu1 %v11673_v22  ;;  %v6723_v11 = vpop.f32.mrf.mxu0  ;;  %10961 = vtanh.f32 %v6685_v8 }
 0x4ab   :  { %v6724_v6 = vadd.f32 %v6723_v11, %v6711_v29 }
 0x4af   :  { %v6762_v26 = vpop.f32.mrf.mxu3  ;;  %v6686_v42 = vpop.f32.mrf.mxu1 }
 0x4b0   :  { %v10962_v19 = vpop.eup %10961 }
 0x4b1   :  { %v6801_v13 = vpop.f32.mrf.mxu2  ;;  %6907 = vst [vmem:[%s11845_s8 + $0x20] sm:$0xff] %v10962_v19 }
 0x4b2   :  { %v6725_v48 = vpop.f32.mrf.mxu0  ;;  %v6802_v54 = vadd.f32 %v6801_v13, %v3856_v51 }
 0x4b7   :  { %v6764_v32 = vpop.f32.mrf.mxu3 }
 0x4b9   :  { %v6803_v1 = vpop.f32.mrf.mxu2 }
 0x4c7   :  { %v6736_v22 = vpop.f32.mrf.mxu1 }
 0x4c8   :  { %v6737_v20 = vadd.f32 %v6736_v22, %v6724_v6 }
 0x4ca   :  { %v6775_v21 = vpop.f32.mrf.mxu0  ;;  %v6750_v24 = vadd.f32 %v6749_v58, %v6737_v20 }
 0x4cc   :  { %v6763_v3 = vadd.f32 %v6762_v26, %v6750_v24 }
 0x4ce   :  { %v6776_v2 = vadd.f32 %v6775_v21, %v6763_v3 }
 0x4cf   :  { %v6814_v27 = vpop.f32.mrf.mxu3  ;;  %v6738_v34 = vpop.f32.mrf.mxu1 }
 0x4d0   :  { %v6815_v7 = vadd.f32 %v6814_v27, %v6802_v54 }
 0x4d1   :  { %v6853_v23 = vpop.f32.mrf.mxu2 }
 0x4d2   :  { %v6777_v28 = vpop.f32.mrf.mxu0 }
 0x4d7   :  { %v6816_v43 = vpop.f32.mrf.mxu3 }
 0x4d9   :  { %v6855_v16 = vpop.f32.mrf.mxu2 }
 0x4e7   :  { %v6788_v47 = vpop.f32.mrf.mxu1 }
 0x4e8   :  { %v6827_v41 = vpop.f32.mrf.mxu0  ;;  %v6789_v25 = vadd.f32 %v6788_v47, %v6776_v2 }
 0x4e9   :  { %v6828_v15 = vadd.f32 %v6827_v41, %v6815_v7 }
 0x4ea   :  { %10963 = vtanh.f32 %v6789_v25 }
 0x4ef   :  { %v6866_v12 = vpop.f32.mrf.mxu3  ;;  %v6790_v31 = vpop.f32.mrf.mxu1 }
 0x4f0   :  { %v6829_v44 = vpop.f32.mrf.mxu0  ;;  %v10964_v46 = vpop.eup %10963 }
 0x4f1   :  { %6908 = vst [vmem:[%s11845_s8 + $0x28] sm:$0xff] %v10964_v46 }
 0x4f7   :  { %v6868_v30 = vpop.f32.mrf.mxu3 }
 0x507   :  { %v6840_v50 = vpop.f32.mrf.mxu1 }
 0x508   :  { %v6841_v45 = vadd.f32 %v6840_v50, %v6828_v15  ;;  %v6879_v9 = vpop.f32.mrf.mxu0 }
 0x50a   :  { %v6854_v10 = vadd.f32 %v6853_v23, %v6841_v45 }
 0x50c   :  { %v6867_v62 = vadd.f32 %v6866_v12, %v6854_v10 }
 0x50e   :  { %v6880_v63 = vadd.f32 %v6879_v9, %v6867_v62 }
 0x50f   :  { %v6842_v56 = vpop.f32.mrf.mxu1 }
 0x510   :  { %v6881_v60 = vpop.f32.mrf.mxu0 }
 0x527   :  { %v6892_v18 = vpop.f32.mrf.mxu1 }
 0x528   :  { %v6893_v17 = vadd.f32 %v6892_v18, %v6880_v63 }
 0x52a   :  { %10965 = vtanh.f32 %v6893_v17 }
 0x52f   :  { %v6894_v40 = vpop.f32.mrf.mxu1 }
 0x530   :  { %v10966_v33 = vpop.eup %10965 }
 0x531   :  { %6909 = vst [vmem:[%s11845_s8 + $0x30] sm:$0xff] %v10966_v33 }
 0x532   :  { %6914 = vsyncpa [#allocation4], 1 }
 0x533   :  { %6915 = vsyncpa [#allocation8], 1 }
 0x534   :  { %6916 = vsyncpa [#allocation11], 1 }
 0x535   :  { %6917 = vsyncpa [#allocation14], 1 }
 0x536   :  { %6918 = vsyncpa [#allocation5], 1 }

</bundles_post_ra>
